<compile_context>
chip_gen: v7x
topology: tpu7x:2x2x1
jax: 0.10.0
libtpu: 0.0.40
codegen_flags: <defaults>
</compile_context>

<pallas_src>
import numpy as np
import jax
import jax.numpy as jnp
from jax import lax
from jax.experimental import pallas as pl
from jax.experimental.pallas import tpu as pltpu

LANE = 128  # TPU lane width; every GEMM output dim is padded to a multiple.


def _round_up(x, m):
    return -(-x // m) * m


# ---------------------------------------------------------------------------
# Pallas kernels
# ---------------------------------------------------------------------------
def _conv1_relu_pool_kernel(p_ref, w_ref, b_ref, o_ref):
    """Fused conv1-GEMM + bias + ReLU + 2x2 max-pool for one row tile.

    p_ref: (4, bm, K) bf16  corner-grouped im2col patches (batch-collapsed M)
    w_ref: (K, 128)   bf16  conv1 weights, out-channels zero-padded to 128
    b_ref: (1, 128)   f32   bias (zero-padded)
    o_ref: (bm, 128)  bf16  pooled activations, lane-dense
    """
    p = p_ref[...]
    bm, k = p.shape[1], p.shape[2]
    # One long MXU stream over all 4 pool corners (leading-dim collapse only).
    acc = jnp.dot(p.reshape(4 * bm, k), w_ref[...],
                  preferred_element_type=jnp.float32)            # (4*bm, 128)
    z = jnp.maximum(jnp.maximum(acc[0:bm], acc[bm:2 * bm]),
                    jnp.maximum(acc[2 * bm:3 * bm], acc[3 * bm:4 * bm]))
    o_ref[...] = jnp.maximum(z + b_ref[...], 0.0).astype(o_ref.dtype)


def _conv2_fc_kernel(x_ref, w2_ref, b2_ref, w1_ref, b1_ref,
                     wf2_ref, bf2_ref, wf3_ref, bf3_ref, o_ref):
    """conv2(as Toeplitz GEMM)+ReLU+pool -> fc1+ReLU -> fc2+ReLU -> fc3.

    x_ref : (bn, 1280) bf16  compact pooled-conv1 features (h,w,c order)
    w2_ref: (1280, 2048) bf16 corner-major unrolled conv2 weights
    b2_ref: (1, 512)  f32    conv2 bias broadcast over the 25 positions
    w1_ref: (512, 128) bf16  fc1 (compact feature order), padded lanes
    others: fc2/fc3 weights (128,128) bf16, biases (1,128) f32
    o_ref : (bn, 128) f32    logits (lane-padded)
    """
    x = x_ref[...]
    cw = b2_ref.shape[-1]                       # 512 (lane-aligned corner block)

    def corner(c):                              # each dot is (bn,1280)x(1280,512)
        return jnp.dot(x, w2_ref[:, c * cw:(c + 1) * cw],
                       preferred_element_type=jnp.float32)

    z = jnp.maximum(jnp.maximum(corner(0), corner(1)),
                    jnp.maximum(corner(2), corner(3)))           # 2x2 max-pool
    z = jnp.maximum(z + b2_ref[...], 0.0)                        # (bn, 512) f32

    h = jnp.dot(z.astype(jnp.bfloat16), w1_ref[...],
                preferred_element_type=jnp.float32)
    h = jnp.maximum(h + b1_ref[...], 0.0)
    h = jnp.dot(h.astype(jnp.bfloat16), wf2_ref[...],
                preferred_element_type=jnp.float32)
    h = jnp.maximum(h + bf2_ref[...], 0.0)
    h = jnp.dot(h.astype(jnp.bfloat16), wf3_ref[...],
                preferred_element_type=jnp.float32)
    o_ref[...] = (h + bf3_ref[...]).astype(o_ref.dtype)


# ---------------------------------------------------------------------------
# Wrappers
# ---------------------------------------------------------------------------
def _corner_patches(x_nhwc, ksize):
    """Pure data-movement im2col grouped by 2x2 pool corner.

    (N,H,W,C) -> (4, N*Po*Qo, C*k*k-ordered-(kh,kw,ci)) -- no conv, no MXU.
    """
    n, hh, ww, c = x_nhwc.shape
    ho, wo = hh - ksize + 1, ww - ksize + 1
    po, qo = ho // 2, wo // 2
    taps = []
    for kh in range(ksize):
        for kw in range(ksize):
            taps.append(x_nhwc[:, kh:kh + 2 * po, kw:kw + 2 * qo, :])
    pat = jnp.stack(taps, axis=3)                     # (n, 2po, 2qo, k*k, c)
    pat = pat.reshape(n, po, 2, qo, 2, ksize * ksize * c)
    pat = pat.transpose(2, 4, 0, 1, 3, 5)             # (dh, dw, n, po, qo, K)
    return pat.reshape(4, n * po * qo, ksize * ksize * c)


def conv1_relu_pool(x_nhwc, w_pad, b_pad, ksize):
    """Fused conv1 + ReLU + maxpool(2,2); grid over batch-collapsed rows."""
    pat = _corner_patches(x_nhwc, ksize)              # (4, M1, K) bf16
    m1, k = pat.shape[1], pat.shape[2]
    bm = 512 if m1 >= 4096 else 256                   # >=2 steps already at N=2
    m1p = _round_up(max(m1, bm), bm)
    if m1p != m1:
        pat = jnp.pad(pat, ((0, 0), (0, m1p - m1), (0, 0)))
    return pl.pallas_call(
        _conv1_relu_pool_kernel,
        out_shape=jax.ShapeDtypeStruct((m1p, LANE), jnp.bfloat16),
        grid=(m1p // bm,),
        in_specs=[pl.BlockSpec((4, bm, k), lambda i: (0, i, 0)),
                  pl.BlockSpec((k, LANE), lambda i: (0, 0)),
                  pl.BlockSpec((1, LANE), lambda i: (0, 0))],
        out_specs=pl.BlockSpec((bm, LANE), lambda i: (i, 0)),
        compiler_params=pltpu.CompilerParams(
            dimension_semantics=("parallel",)),
    )(pat, w_pad, b_pad)


def conv2_fc_stack(x1, w2_big, b2_big, w1, b1, wf2, bf2, wf3, bf3):
    """Fused conv2+pool+fc1+fc2+fc3; grid over batch tiles."""
    n, kin = x1.shape
    if n <= 8:
        bn = n
    else:
        # ~half the (8-aligned) batch per step so v7x's 2 cores both get work,
        # capped at 64 rows to keep the 2048-wide conv2 accumulator small.
        bn = min(64, max(8, _round_up((n + 1) // 2, 8)))
    npad = _round_up(n, bn)
    if npad != n:
        x1 = jnp.pad(x1, ((0, npad - n), (0, 0)))

    def full(a):
        nd = a.ndim
        return pl.BlockSpec(a.shape, lambda i: (0,) * nd)

    out = pl.pallas_call(
        _conv2_fc_kernel,
        out_shape=jax.ShapeDtypeStruct((npad, LANE), jnp.float32),
        grid=(npad // bn,),
        in_specs=[pl.BlockSpec((bn, kin), lambda i: (i, 0)),
                  full(w2_big), full(b2_big), full(w1), full(b1),
                  full(wf2), full(bf2), full(wf3), full(bf3)],
        out_specs=pl.BlockSpec((bn, LANE), lambda i: (i, 0)),
        compiler_params=pltpu.CompilerParams(
            dimension_semantics=("parallel",),
            vmem_limit_bytes=40 * 1024 * 1024),  # ~11 MB used; safe on v5e/v7x
    )(x1, w2_big, b2_big, w1, b1, wf2, bf2, wf3, bf3)
    return out[:n]


# ---------------------------------------------------------------------------
# Model: Net(num_classes=10, in_channels=3, input_size=32)
# ---------------------------------------------------------------------------
def init_params(key, *, in_channels=3, input_size=32, num_classes=10):
    """Raw (PyTorch-layout) parameters; linear weights stored as (in, out)."""
    s = input_size
    s = (s - 5 + 1) // 2
    s = (s - 5 + 1) // 2
    feature_size = 16 * s * s

    ks = jax.random.split(key, 10)

    def u(k, shape, fan_in):
        bound = 1.0 / jnp.sqrt(jnp.float32(fan_in))
        return jax.random.uniform(k, shape, jnp.float32, -bound, bound)

    return {
        "conv1_w": u(ks[0], (6, in_channels, 5, 5), in_channels * 25),
        "conv1_b": u(ks[1], (6,), in_channels * 25),
        "conv2_w": u(ks[2], (16, 6, 5, 5), 6 * 25),
        "conv2_b": u(ks[3], (16,), 6 * 25),
        "fc1_w": u(ks[4], (feature_size, 120), feature_size),
        "fc1_b": u(ks[5], (120,), feature_size),
        "fc2_w": u(ks[6], (120, 84), 120),
        "fc2_b": u(ks[7], (84,), 120),
        "fc3_w": u(ks[8], (84, num_classes), 84),
        "fc3_b": u(ks[9], (num_classes,), 84),
    }


def pack_params(params, *, in_channels=3, input_size=32, num_classes=10):
    """Pad / permute parameters into the lane-dense bf16 layouts used above."""
    c1 = params["conv1_w"].shape[0]              # 6
    c2 = params["conv2_w"].shape[0]              # 16
    k = params["conv1_w"].shape[-1]              # 5
    p1 = (input_size - k + 1) // 2               # 14  (pooled conv1 spatial)
    p2 = (p1 - k + 1) // 2                       # 5   (pooled conv2 spatial)
    h1 = params["fc1_w"].shape[1]                # 120
    h2 = params["fc2_w"].shape[1]                # 84

    kin1 = in_channels * k * k                   # 75
    feat1 = p1 * p1 * c1                         # 1176
    kin2 = _round_up(feat1, LANE)                # 1280
    corner_w = _round_up(c2 * p2 * p2, LANE)     # 512

    f32 = lambda a: np.asarray(a, dtype=np.float32)

    # conv1 weights: rows ordered (kh, kw, ci) to match _corner_patches.
    w1c = f32(params["conv1_w"]).transpose(2, 3, 1, 0).reshape(kin1, c1)
    conv1_w = np.zeros((kin1, LANE), np.float32)
    conv1_w[:, :c1] = w1c
    conv1_b = np.zeros((1, LANE), np.float32)
    conv1_b[0, :c1] = f32(params["conv1_b"])

    # conv2 as a corner-major dense Toeplitz GEMM: rows = pooled conv1 feature
    # index f=(h*p1+w)*c1+ci, cols = corner*512 + (po*p2+qo)*c2 + co.
    w2 = f32(params["conv2_w"])                  # (16, 6, 5, 5)
    w2_big = np.zeros((kin2, 4 * corner_w), np.float32)
    for dh in range(2):
        for dw in range(2):
            d = dh * 2 + dw
            for po in range(p2):
                for qo in range(p2):
                    col0 = d * corner_w + (po * p2 + qo) * c2
                    for kh in range(k):
                        for kw in range(k):
                            hh = 2 * po + dh + kh
                            ww = 2 * qo + dw + kw
                            for ci in range(c1):
                                f = (hh * p1 + ww) * c1 + ci
                                w2_big[f, col0:col0 + c2] = w2[:, ci, kh, kw]
    conv2_b = np.zeros((1, corner_w), np.float32)
    for p in range(p2 * p2):
        conv2_b[0, p * c2:(p + 1) * c2] = f32(params["conv2_b"])

    # fc1: torch flatten order (c, h, w) -> compact order ((h*p2+w)*c2 + c).
    f1 = f32(params["fc1_w"]).reshape(c2, p2 * p2, h1)
    f1 = f1.transpose(1, 0, 2).reshape(c2 * p2 * p2, h1)
    fc1_w = np.zeros((corner_w, LANE), np.float32)
    fc1_w[:c2 * p2 * p2, :h1] = f1
    fc1_b = np.zeros((1, LANE), np.float32); fc1_b[0, :h1] = f32(params["fc1_b"])

    fc2_w = np.zeros((LANE, LANE), np.float32); fc2_w[:h1, :h2] = f32(params["fc2_w"])
    fc2_b = np.zeros((1, LANE), np.float32); fc2_b[0, :h2] = f32(params["fc2_b"])
    fc3_w = np.zeros((LANE, LANE), np.float32)
    fc3_w[:h2, :num_classes] = f32(params["fc3_w"])
    fc3_b = np.zeros((1, LANE), np.float32)
    fc3_b[0, :num_classes] = f32(params["fc3_b"])

    bf = jnp.bfloat16
    packed = {
        "conv1_w": jnp.asarray(conv1_w, bf), "conv1_b": jnp.asarray(conv1_b),
        "conv2_w": jnp.asarray(w2_big, bf), "conv2_b": jnp.asarray(conv2_b),
        "fc1_w": jnp.asarray(fc1_w, bf), "fc1_b": jnp.asarray(fc1_b),
        "fc2_w": jnp.asarray(fc2_w, bf), "fc2_b": jnp.asarray(fc2_b),
        "fc3_w": jnp.asarray(fc3_w, bf), "fc3_b": jnp.asarray(fc3_b),
    }
    dims = {"c1": int(c1), "p1": int(p1), "feat1": int(feat1),
            "kin2": int(kin2), "num_classes": int(num_classes), "ksize": int(k)}
    return packed, dims


def make_forward(dims):
    c1, p1, feat1 = dims["c1"], dims["p1"], dims["feat1"]
    kin2, nc, ksize = dims["kin2"], dims["num_classes"], dims["ksize"]

    @jax.jit
    def forward(x_nchw, p):
        n = x_nchw.shape[0]
        x = jnp.transpose(x_nchw, (0, 2, 3, 1)).astype(jnp.bfloat16)   # NHWC
        a1 = conv1_relu_pool(x, p["conv1_w"], p["conv1_b"], ksize)     # (M1p,128)
        # Compact pooled conv1 features to (N, 1176) -> pad lanes to 1280.
        # TODO(synk): this small XLA lane-compaction is the only remaining
        # padded handoff; a conv1->conv2 fused kernel would remove it.
        x1 = a1[: n * p1 * p1, :c1].reshape(n, feat1)
        x1 = jnp.pad(x1, ((0, 0), (0, kin2 - feat1)))
        logits = conv2_fc_stack(x1, p["conv2_w"], p["conv2_b"],
                                p["fc1_w"], p["fc1_b"],
                                p["fc2_w"], p["fc2_b"],
                                p["fc3_w"], p["fc3_b"])
        return logits[:, :nc]

    return forward


# ---------------------------------------------------------------------------
# Pure-JAX reference (mirrors the PyTorch module) for a correctness check.
# ---------------------------------------------------------------------------
def reference_forward(x, params):
    hp = lax.Precision.HIGHEST

    def conv(z, w, b):
        y = lax.conv_general_dilated(z, w, (1, 1), "VALID",
                                     dimension_numbers=("NCHW", "OIHW", "NCHW"),
                                     precision=hp)
        return jnp.maximum(y + b[None, :, None, None], 0.0)

    def pool(z):
        n, c, h, w = z.shape
        z = z[:, :, :2 * (h // 2), :2 * (w // 2)]
        return z.reshape(n, c, h // 2, 2, w // 2, 2).max(axis=(3, 5))

    h = pool(conv(x, params["conv1_w"], params["conv1_b"]))
    h = pool(conv(h, params["conv2_w"], params["conv2_b"]))
    h = h.reshape(h.shape[0], -1)
    h = jnp.maximum(jnp.dot(h, params["fc1_w"], precision=hp) + params["fc1_b"], 0.0)
    h = jnp.maximum(jnp.dot(h, params["fc2_w"], precision=hp) + params["fc2_b"], 0.0)
    return jnp.dot(h, params["fc3_w"], precision=hp) + params["fc3_b"]


if __name__ == "__main__":
    key = jax.random.PRNGKey(0)
    k_params, k_input = jax.random.split(key)

    num_classes, in_channels, input_size = 10, 3, 32
    params = init_params(k_params, in_channels=in_channels,
                         input_size=input_size, num_classes=num_classes)
    packed, dims = pack_params(params, in_channels=in_channels,
                               input_size=input_size, num_classes=num_classes)
    forward = make_forward(dims)

    x = jax.random.normal(
        k_input, (2, in_channels, input_size, input_size), dtype=jnp.float32)

    logits = jax.block_until_ready(forward(x, packed))

    assert logits.shape == (2, num_classes), logits.shape
    assert bool(jnp.all(jnp.isfinite(logits)))

    # Cross-check against the f32 HIGHEST-precision reference; GEMM operands
    # are bf16 in the kernels, so use a correspondingly loose tolerance.
    ref = jax.block_until_ready(reference_forward(x, params))
    err = float(jnp.max(jnp.abs(logits - ref)))
    assert err < 1e-1, f"mismatch vs reference: max abs err = {err}"

    print("KERNEL_OK")
</pallas_src>

<mosaic_0001>
module attributes {stable_mosaic.version = 11 : i64} {
  func.func @_conv1_relu_pool_kernel(%arg0: i32, %arg1: memref<4x256x75xbf16, #tpu.memory_space<vmem>>, %arg2: memref<75x128xbf16, #tpu.memory_space<vmem>>, %arg3: memref<1x128xf32, #tpu.memory_space<vmem>>, %arg4: memref<256x128xbf16, #tpu.memory_space<vmem>>) attributes {dimension_semantics = [#tpu.dimension_semantics<parallel>], iteration_bounds = array<i64: 2>, scalar_prefetch = 0 : i64, scratch_operands = 0 : i64, tpu.core_type = #tpu.core_type<tc>, window_params = [{transform_indices = @transform_0, window_bounds = array<i64: 4, 256, 75>}, {pipeline_mode = #tpu.pipeline_mode<synchronous>, transform_indices = @transform_1, window_bounds = array<i64: 75, 128>}, {pipeline_mode = #tpu.pipeline_mode<synchronous>, transform_indices = @transform_2, window_bounds = array<i64: 1, 128>}, {transform_indices = @transform_3, window_bounds = array<i64: 256, 128>}]} {
    %c0 = arith.constant 0 : index
    %c0_0 = arith.constant 0 : index
    %c0_1 = arith.constant 0 : index
    %0 = vector.load %arg1[%c0, %c0_0, %c0_1] : memref<4x256x75xbf16, #tpu.memory_space<vmem>>, vector<4x256x75xbf16>
    %1 = vector.shape_cast %0 : vector<4x256x75xbf16> to vector<1024x75xbf16>
    %c0_2 = arith.constant 0 : index
    %c0_3 = arith.constant 0 : index
    %2 = vector.load %arg2[%c0_2, %c0_3] : memref<75x128xbf16, #tpu.memory_space<vmem>>, vector<75x128xbf16>
    %cst = arith.constant dense<0.000000e+00> : vector<1024x128xf32>
    %3 = tpu.matmul %1, %2, %cst {dimension_numbers = #tpu.dot_dimension_numbers<[1], [0], [0], [1], [0, 0, 1, 1], [], []>} : vector<1024x75xbf16>, vector<75x128xbf16>, vector<1024x128xf32> -> vector<1024x128xf32>
    %4 = vector.extract_strided_slice %3 {offsets = [0, 0], sizes = [256, 128], strides = [1, 1]} : vector<1024x128xf32> to vector<256x128xf32>
    %5 = vector.extract_strided_slice %3 {offsets = [256, 0], sizes = [256, 128], strides = [1, 1]} : vector<1024x128xf32> to vector<256x128xf32>
    %6 = arith.maximumf %4, %5 : vector<256x128xf32>
    %7 = vector.extract_strided_slice %3 {offsets = [512, 0], sizes = [256, 128], strides = [1, 1]} : vector<1024x128xf32> to vector<256x128xf32>
    %8 = vector.extract_strided_slice %3 {offsets = [768, 0], sizes = [256, 128], strides = [1, 1]} : vector<1024x128xf32> to vector<256x128xf32>
    %9 = arith.maximumf %7, %8 : vector<256x128xf32>
    %10 = arith.maximumf %6, %9 : vector<256x128xf32>
    %c0_4 = arith.constant 0 : index
    %c0_5 = arith.constant 0 : index
    %11 = vector.load %arg3[%c0_4, %c0_5] : memref<1x128xf32, #tpu.memory_space<vmem>>, vector<1x128xf32>
    %12 = vector.broadcast %11 : vector<1x128xf32> to vector<256x128xf32>
    %13 = arith.addf %10, %12 : vector<256x128xf32>
    %cst_6 = arith.constant 0.000000e+00 : f32
    %14 = vector.broadcast %cst_6 : f32 to vector<256x128xf32>
    %15 = arith.maximumf %13, %14 : vector<256x128xf32>
    %16 = arith.truncf %15 : vector<256x128xf32> to vector<256x128xbf16>
    %c0_7 = arith.constant 0 : index
    %c0_8 = arith.constant 0 : index
    %17 = vector.load %arg4[%c0_7, %c0_8] : memref<256x128xbf16, #tpu.memory_space<vmem>>, vector<256x128xbf16>
    tpu.vector_store %arg4[%c0_7, %c0_8], %16 {strides = array<i32>} : memref<256x128xbf16, #tpu.memory_space<vmem>>, vector<256x128xbf16>,
    return
  }
  func.func @transform_0(%arg0: i32) -> (i32, i32, i32) {
    %c0_i32 = arith.constant 0 : i32
    %c0_i32_0 = arith.constant 0 : i32
    %c0_i32_1 = arith.constant 0 : i32
    return %c0_i32, %arg0, %c0_i32_0 : i32, i32, i32
  }
  func.func @transform_1(%arg0: i32) -> (i32, i32) {
    %c0_i32 = arith.constant 0 : i32
    %c0_i32_0 = arith.constant 0 : i32
    %c0_i32_1 = arith.constant 0 : i32
    return %c0_i32, %c0_i32_0 : i32, i32
  }
  func.func @transform_2(%arg0: i32) -> (i32, i32) {
    %c0_i32 = arith.constant 0 : i32
    %c0_i32_0 = arith.constant 0 : i32
    %c0_i32_1 = arith.constant 0 : i32
    return %c0_i32, %c0_i32_0 : i32, i32
  }
  func.func @transform_3(%arg0: i32) -> (i32, i32) {
    %c0_i32 = arith.constant 0 : i32
    %c0_i32_0 = arith.constant 0 : i32
    return %arg0, %c0_i32 : i32, i32
  }
}

module attributes {stable_mosaic.version = 11 : i64} {
  func.func @_conv2_fc_kernel(%arg0: i32, %arg1: memref<2x1280xbf16, #tpu.memory_space<vmem>>, %arg2: memref<1280x2048xbf16, #tpu.memory_space<vmem>>, %arg3: memref<1x512xf32, #tpu.memory_space<vmem>>, %arg4: memref<512x128xbf16, #tpu.memory_space<vmem>>, %arg5: memref<1x128xf32, #tpu.memory_space<vmem>>, %arg6: memref<128x128xbf16, #tpu.memory_space<vmem>>, %arg7: memref<1x128xf32, #tpu.memory_space<vmem>>, %arg8: memref<128x128xbf16, #tpu.memory_space<vmem>>, %arg9: memref<1x128xf32, #tpu.memory_space<vmem>>, %arg10: memref<2x128xf32, #tpu.memory_space<vmem>>) attributes {dimension_semantics = [#tpu.dimension_semantics<parallel>], iteration_bounds = array<i64: 1>, scalar_prefetch = 0 : i64, scratch_operands = 0 : i64, tpu.core_type = #tpu.core_type<tc>, window_params = [{transform_indices = @transform_0, window_bounds = array<i64: 2, 1280>}, {pipeline_mode = #tpu.pipeline_mode<synchronous>, transform_indices = @transform_1, window_bounds = array<i64: 1280, 2048>}, {pipeline_mode = #tpu.pipeline_mode<synchronous>, transform_indices = @transform_2, window_bounds = array<i64: 1, 512>}, {pipeline_mode = #tpu.pipeline_mode<synchronous>, transform_indices = @transform_3, window_bounds = array<i64: 512, 128>}, {pipeline_mode = #tpu.pipeline_mode<synchronous>, transform_indices = @transform_4, window_bounds = array<i64: 1, 128>}, {pipeline_mode = #tpu.pipeline_mode<synchronous>, transform_indices = @transform_5, window_bounds = array<i64: 128, 128>}, {pipeline_mode = #tpu.pipeline_mode<synchronous>, transform_indices = @transform_6, window_bounds = array<i64: 1, 128>}, {pipeline_mode = #tpu.pipeline_mode<synchronous>, transform_indices = @transform_7, window_bounds = array<i64: 128, 128>}, {pipeline_mode = #tpu.pipeline_mode<synchronous>, transform_indices = @transform_8, window_bounds = array<i64: 1, 128>}, {transform_indices = @transform_9, window_bounds = array<i64: 2, 128>}]} {
    %c0 = arith.constant 0 : index
    %c0_0 = arith.constant 0 : index
    %0 = vector.load %arg1[%c0, %c0_0] : memref<2x1280xbf16, #tpu.memory_space<vmem>>, vector<2x1280xbf16>
    %c0_1 = arith.constant 0 : index
    %c0_2 = arith.constant 0 : index
    %1 = vector.load %arg2[%c0_1, %c0_2] : memref<1280x2048xbf16, #tpu.memory_space<vmem>>, vector<1280x512xbf16>
    %cst = arith.constant dense<0.000000e+00> : vector<2x512xf32>
    %2 = tpu.matmul %0, %1, %cst {dimension_numbers = #tpu.dot_dimension_numbers<[1], [0], [0], [1], [0, 0, 1, 1], [], []>} : vector<2x1280xbf16>, vector<1280x512xbf16>, vector<2x512xf32> -> vector<2x512xf32>
    %c0_3 = arith.constant 0 : index
    %c512 = arith.constant 512 : index
    %3 = vector.load %arg2[%c0_3, %c512] : memref<1280x2048xbf16, #tpu.memory_space<vmem>>, vector<1280x512xbf16>
    %cst_4 = arith.constant dense<0.000000e+00> : vector<2x512xf32>
    %4 = tpu.matmul %0, %3, %cst_4 {dimension_numbers = #tpu.dot_dimension_numbers<[1], [0], [0], [1], [0, 0, 1, 1], [], []>} : vector<2x1280xbf16>, vector<1280x512xbf16>, vector<2x512xf32> -> vector<2x512xf32>
    %5 = arith.maximumf %2, %4 : vector<2x512xf32>
    %c0_5 = arith.constant 0 : index
    %c1024 = arith.constant 1024 : index
    %6 = vector.load %arg2[%c0_5, %c1024] : memref<1280x2048xbf16, #tpu.memory_space<vmem>>, vector<1280x512xbf16>
    %cst_6 = arith.constant dense<0.000000e+00> : vector<2x512xf32>
    %7 = tpu.matmul %0, %6, %cst_6 {dimension_numbers = #tpu.dot_dimension_numbers<[1], [0], [0], [1], [0, 0, 1, 1], [], []>} : vector<2x1280xbf16>, vector<1280x512xbf16>, vector<2x512xf32> -> vector<2x512xf32>
    %c0_7 = arith.constant 0 : index
    %c1536 = arith.constant 1536 : index
    %8 = vector.load %arg2[%c0_7, %c1536] : memref<1280x2048xbf16, #tpu.memory_space<vmem>>, vector<1280x512xbf16>
    %cst_8 = arith.constant dense<0.000000e+00> : vector<2x512xf32>
    %9 = tpu.matmul %0, %8, %cst_8 {dimension_numbers = #tpu.dot_dimension_numbers<[1], [0], [0], [1], [0, 0, 1, 1], [], []>} : vector<2x1280xbf16>, vector<1280x512xbf16>, vector<2x512xf32> -> vector<2x512xf32>
    %10 = arith.maximumf %7, %9 : vector<2x512xf32>
    %11 = arith.maximumf %5, %10 : vector<2x512xf32>
    %c0_9 = arith.constant 0 : index
    %c0_10 = arith.constant 0 : index
    %12 = vector.load %arg3[%c0_9, %c0_10] : memref<1x512xf32, #tpu.memory_space<vmem>>, vector<1x512xf32>
    %13 = vector.broadcast %12 : vector<1x512xf32> to vector<2x512xf32>
    %14 = arith.addf %11, %13 : vector<2x512xf32>
    %cst_11 = arith.constant 0.000000e+00 : f32
    %15 = vector.broadcast %cst_11 : f32 to vector<2x512xf32>
    %16 = arith.maximumf %14, %15 : vector<2x512xf32>
    %17 = arith.truncf %16 : vector<2x512xf32> to vector<2x512xbf16>
    %c0_12 = arith.constant 0 : index
    %c0_13 = arith.constant 0 : index
    %18 = vector.load %arg4[%c0_12, %c0_13] : memref<512x128xbf16, #tpu.memory_space<vmem>>, vector<512x128xbf16>
    %cst_14 = arith.constant dense<0.000000e+00> : vector<2x128xf32>
    %19 = tpu.matmul %17, %18, %cst_14 {dimension_numbers = #tpu.dot_dimension_numbers<[1], [0], [0], [1], [0, 0, 1, 1], [], []>} : vector<2x512xbf16>, vector<512x128xbf16>, vector<2x128xf32> -> vector<2x128xf32>
    %c0_15 = arith.constant 0 : index
    %c0_16 = arith.constant 0 : index
    %20 = vector.load %arg5[%c0_15, %c0_16] : memref<1x128xf32, #tpu.memory_space<vmem>>, vector<1x128xf32>
    %21 = vector.broadcast %20 : vector<1x128xf32> to vector<2x128xf32>
    %22 = arith.addf %19, %21 : vector<2x128xf32>
    %cst_17 = arith.constant 0.000000e+00 : f32
    %23 = vector.broadcast %cst_17 : f32 to vector<2x128xf32>
    %24 = arith.maximumf %22, %23 : vector<2x128xf32>
    %25 = arith.truncf %24 : vector<2x128xf32> to vector<2x128xbf16>
    %c0_18 = arith.constant 0 : index
    %c0_19 = arith.constant 0 : index
    %26 = vector.load %arg6[%c0_18, %c0_19] : memref<128x128xbf16, #tpu.memory_space<vmem>>, vector<128x128xbf16>
    %cst_20 = arith.constant dense<0.000000e+00> : vector<2x128xf32>
    %27 = tpu.matmul %25, %26, %cst_20 {dimension_numbers = #tpu.dot_dimension_numbers<[1], [0], [0], [1], [0, 0, 1, 1], [], []>} : vector<2x128xbf16>, vector<128x128xbf16>, vector<2x128xf32> -> vector<2x128xf32>
    %c0_21 = arith.constant 0 : index
    %c0_22 = arith.constant 0 : index
    %28 = vector.load %arg7[%c0_21, %c0_22] : memref<1x128xf32, #tpu.memory_space<vmem>>, vector<1x128xf32>
    %29 = vector.broadcast %28 : vector<1x128xf32> to vector<2x128xf32>
    %30 = arith.addf %27, %29 : vector<2x128xf32>
    %cst_23 = arith.constant 0.000000e+00 : f32
    %31 = vector.broadcast %cst_23 : f32 to vector<2x128xf32>
    %32 = arith.maximumf %30, %31 : vector<2x128xf32>
    %33 = arith.truncf %32 : vector<2x128xf32> to vector<2x128xbf16>
    %c0_24 = arith.constant 0 : index
    %c0_25 = arith.constant 0 : index
    %34 = vector.load %arg8[%c0_24, %c0_25] : memref<128x128xbf16, #tpu.memory_space<vmem>>, vector<128x128xbf16>
    %cst_26 = arith.constant dense<0.000000e+00> : vector<2x128xf32>
    %35 = tpu.matmul %33, %34, %cst_26 {dimension_numbers = #tpu.dot_dimension_numbers<[1], [0], [0], [1], [0, 0, 1, 1], [], []>} : vector<2x128xbf16>, vector<128x128xbf16>, vector<2x128xf32> -> vector<2x128xf32>
    %c0_27 = arith.constant 0 : index
    %c0_28 = arith.constant 0 : index
    %36 = vector.load %arg9[%c0_27, %c0_28] : memref<1x128xf32, #tpu.memory_space<vmem>>, vector<1x128xf32>
    %37 = vector.broadcast %36 : vector<1x128xf32> to vector<2x128xf32>
    %38 = arith.addf %35, %37 : vector<2x128xf32>
    %c0_29 = arith.constant 0 : index
    %c0_30 = arith.constant 0 : index
    %39 = vector.load %arg10[%c0_29, %c0_30] : memref<2x128xf32, #tpu.memory_space<vmem>>, vector<2x128xf32>
    tpu.vector_store %arg10[%c0_29, %c0_30], %38 {strides = array<i32>} : memref<2x128xf32, #tpu.memory_space<vmem>>, vector<2x128xf32>,
    return
  }
  func.func @transform_0(%arg0: i32) -> (i32, i32) {
    %c0_i32 = arith.constant 0 : i32
    %c0_i32_0 = arith.constant 0 : i32
    return %arg0, %c0_i32 : i32, i32
  }
  func.func @transform_1(%arg0: i32) -> (i32, i32) {
    %c0_i32 = arith.constant 0 : i32
    %c0_i32_0 = arith.constant 0 : i32
    %c0_i32_1 = arith.constant 0 : i32
    return %c0_i32, %c0_i32_0 : i32, i32
  }
  func.func @transform_2(%arg0: i32) -> (i32, i32) {
    %c0_i32 = arith.constant 0 : i32
    %c0_i32_0 = arith.constant 0 : i32
    %c0_i32_1 = arith.constant 0 : i32
    return %c0_i32, %c0_i32_0 : i32, i32
  }
  func.func @transform_3(%arg0: i32) -> (i32, i32) {
    %c0_i32 = arith.constant 0 : i32
    %c0_i32_0 = arith.constant 0 : i32
    %c0_i32_1 = arith.constant 0 : i32
    return %c0_i32, %c0_i32_0 : i32, i32
  }
  func.func @transform_4(%arg0: i32) -> (i32, i32) {
    %c0_i32 = arith.constant 0 : i32
    %c0_i32_0 = arith.constant 0 : i32
    %c0_i32_1 = arith.constant 0 : i32
    return %c0_i32, %c0_i32_0 : i32, i32
  }
  func.func @transform_5(%arg0: i32) -> (i32, i32) {
    %c0_i32 = arith.constant 0 : i32
    %c0_i32_0 = arith.constant 0 : i32
    %c0_i32_1 = arith.constant 0 : i32
    return %c0_i32, %c0_i32_0 : i32, i32
  }
  func.func @transform_6(%arg0: i32) -> (i32, i32) {
    %c0_i32 = arith.constant 0 : i32
    %c0_i32_0 = arith.constant 0 : i32
    %c0_i32_1 = arith.constant 0 : i32
    return %c0_i32, %c0_i32_0 : i32, i32
  }
  func.func @transform_7(%arg0: i32) -> (i32, i32) {
    %c0_i32 = arith.constant 0 : i32
    %c0_i32_0 = arith.constant 0 : i32
    %c0_i32_1 = arith.constant 0 : i32
    return %c0_i32, %c0_i32_0 : i32, i32
  }
  func.func @transform_8(%arg0: i32) -> (i32, i32) {
    %c0_i32 = arith.constant 0 : i32
    %c0_i32_0 = arith.constant 0 : i32
    %c0_i32_1 = arith.constant 0 : i32
    return %c0_i32, %c0_i32_0 : i32, i32
  }
  func.func @transform_9(%arg0: i32) -> (i32, i32) {
    %c0_i32 = arith.constant 0 : i32
    %c0_i32_0 = arith.constant 0 : i32
    return %arg0, %c0_i32 : i32, i32
  }
}

</mosaic_0001>

<bundles_post_ra>
// kernel: forward.2
= control target key start
LH: loop header
LB: loop body
LE: loop exit
PB: predicated region body
PF: predicated region fallthrough
CT: control target
= control target key end

     0   :  { %s3008_s12 = smov 0   ;;  %s3010_s13 = smov 0   ;;  %s3585_s0 = inlined_call_operand.vmem [shape: bf16[4,512,75], index: 0, kind: input, shape index: {}]   ;;  %s3586_s1 = inlined_call_operand.vmem [shape: bf16[75,128], index: 1, kind: input, shape index: {}]   ;;  %s3587_s2 = inlined_call_operand.vmem [shape: f32[1,128], index: 2, kind: input, shape index: {}]   ;;  %s3588_s3 = inlined_call_operand.vmem [shape: bf16[512,128], index: 3, kind: output, shape index: {}]  }
   0x1   :  { %s3012_s14 = smov 0  }
   0x2 LB: > { %s2345_s15 = sadd.s32 4294967295, %s2985_s14   ;;  %s3025_s16 = sadd.s32 1, %s2985_s14   ;;  %s2985_s14 = sphi %s3012_s14, %s3621_s14   ;;  %s2981_s13 = sphi %s3010_s13, %s3620_s13   ;;  %s2977_s12 = sphi %s3008_s12, %s3619_s12  }
   0x3   : > { %s17_s17 = ssub.s32 %s2985_s14, %s3025_s16  ;;  %s20_s18 = sadd.s32 1, %s2981_s13 }
   0x4   : > { %p18_p0 = scmp.eq.s32.totalorder %s17_s17, 0  ;;  %p27_p1 = scmp.ne.s32.totalorder %s2981_s13, %s2977_s12 }
   0x5   : > { %p28_p2 = scmp.eq.s32.totalorder %s2985_s14, 0  ;;  %p2348_p4 = scmp.ge.s32.totalorder %s2985_s14, 2 }
   0x6   : > { %s3034_s19 = scalar_select %p18_p0, %s2981_s13, %s20_s18  }
   0x7   : > { %p29_p3 = por %p28_p2, %p27_p1  ;;  %127 = sbr.rel (%p2348_p4) target bundleno = 50 (0x32), region = 24 }
   0xe   : > { %130 = sbr.rel (!%p29_p3) target bundleno = 50 (0x32), region = 28  ;;  %s132_s20 = sand.u32 (%p29_p3), 1, %s2981_s13  }
   0xf   : > { %s2524_s21 = sshll.u32 (%p29_p3), %s2985_s14, 7  ;;  %s2349_s22 = sshll.u32 (%p29_p3), %s132_s20, 9 }
  0x10   : > { %s3042_s25 = scalar_lea.vmem (%p29_p3), %s3585_s0, %s2524_s21  ;;  %s3047_s26 = scalar_lea.vmem (%p29_p3), [#allocation2], %s2349_s22 }
  0x11   : > { %v153_v0 = vld [vmem:[%s3042_s25] sm:$0xff] (%p29_p3)   ;;  %v157_v1 = vld [vmem:[%s3042_s25 + $0x8] sm:$0xff] (%p29_p3)   ;;  %v161_v2 = vld [vmem:[%s3042_s25 + $0x10] sm:$0xff] (%p29_p3)  }
  0x12   : > { %154 = vst [vmem:[%s3047_s26] sm:$0xff] (%p29_p3), %v153_v0   ;;  %158 = vst [vmem:[%s3047_s26 + $0x8] sm:$0xff] (%p29_p3), %v157_v1   ;;  %v165_v3 = vld [vmem:[%s3042_s25 + $0x18] sm:$0xff] (%p29_p3)   ;;  %v169_v4 = vld [vmem:[%s3042_s25 + $0x20] sm:$0xff] (%p29_p3)  }
  0x13   : > { %162 = vst [vmem:[%s3047_s26 + $0x10] sm:$0xff] (%p29_p3), %v161_v2   ;;  %v173_v5 = vld [vmem:[%s3042_s25 + $0x28] sm:$0xff] (%p29_p3)   ;;  %166 = vst [vmem:[%s3047_s26 + $0x18] sm:$0xff] (%p29_p3), %v165_v3   ;;  %v177_v6 = vld [vmem:[%s3042_s25 + $0x30] sm:$0xff] (%p29_p3)  }
  0x14   : > { %170 = vst [vmem:[%s3047_s26 + $0x20] sm:$0xff] (%p29_p3), %v169_v4   ;;  %174 = vst [vmem:[%s3047_s26 + $0x28] sm:$0xff] (%p29_p3), %v173_v5   ;;  %v181_v7 = vld [vmem:[%s3042_s25 + $0x38] sm:$0xff] (%p29_p3)   ;;  %v185_v8 = vld [vmem:[%s3042_s25 + $0x40] sm:$0xff] (%p29_p3)  }
  0x15   : > { %178 = vst [vmem:[%s3047_s26 + $0x30] sm:$0xff] %v177_v6   ;;  %182 = vst [vmem:[%s3047_s26 + $0x38] sm:$0xff] %v181_v7   ;;  %v189_v9 = vld [vmem:[%s3042_s25 + $0x48] sm:$0xff]   ;;  %v193_v10 = vld [vmem:[%s3042_s25 + $0x50] sm:$0xff]  }
  0x16   : > { %186 = vst [vmem:[%s3047_s26 + $0x40] sm:$0xff] %v185_v8   ;;  %v197_v11 = vld [vmem:[%s3042_s25 + $0x58] sm:$0xff]   ;;  %190 = vst [vmem:[%s3047_s26 + $0x48] sm:$0xff] %v189_v9   ;;  %v201_v12 = vld [vmem:[%s3042_s25 + $0x60] sm:$0xff]  }
  0x17   : > { %194 = vst [vmem:[%s3047_s26 + $0x50] sm:$0xff] %v193_v10   ;;  %198 = vst [vmem:[%s3047_s26 + $0x58] sm:$0xff] %v197_v11   ;;  %v205_v13 = vld [vmem:[%s3042_s25 + $0x68] sm:$0xff]   ;;  %v209_v14 = vld [vmem:[%s3042_s25 + $0x70] sm:$0xff]  }
  0x18   : > { %202 = vst [vmem:[%s3047_s26 + $0x60] sm:$0xff] %v201_v12   ;;  %206 = vst [vmem:[%s3047_s26 + $0x68] sm:$0xff] %v205_v13   ;;  %v213_v15 = vld [vmem:[%s3042_s25 + $0x78] sm:$0xff]   ;;  %v217_v16 = vld [vmem:[%s3042_s25 + $0x100] sm:$0xff]  }
  0x19   : > { %210 = vst [vmem:[%s3047_s26 + $0x70] sm:$0xff] %v209_v14   ;;  %v221_v17 = vld [vmem:[%s3042_s25 + $0x108] sm:$0xff]   ;;  %214 = vst [vmem:[%s3047_s26 + $0x78] sm:$0xff] %v213_v15   ;;  %v225_v18 = vld [vmem:[%s3042_s25 + $0x110] sm:$0xff]  }
  0x1a   : > { %218 = vst [vmem:[%s3047_s26 + $0x80] sm:$0xff] %v217_v16   ;;  %222 = vst [vmem:[%s3047_s26 + $0x88] sm:$0xff] %v221_v17   ;;  %v229_v19 = vld [vmem:[%s3042_s25 + $0x118] sm:$0xff]   ;;  %v233_v20 = vld [vmem:[%s3042_s25 + $0x120] sm:$0xff]  }
  0x1b   : > { %226 = vst [vmem:[%s3047_s26 + $0x90] sm:$0xff] %v225_v18   ;;  %230 = vst [vmem:[%s3047_s26 + $0x98] sm:$0xff] %v229_v19   ;;  %v237_v21 = vld [vmem:[%s3042_s25 + $0x128] sm:$0xff]   ;;  %v241_v22 = vld [vmem:[%s3042_s25 + $0x130] sm:$0xff]  }
  0x1c   : > { %234 = vst [vmem:[%s3047_s26 + $0xa0] sm:$0xff] %v233_v20   ;;  %v245_v23 = vld [vmem:[%s3042_s25 + $0x138] sm:$0xff]   ;;  %238 = vst [vmem:[%s3047_s26 + $0xa8] sm:$0xff] %v237_v21   ;;  %v249_v24 = vld [vmem:[%s3042_s25 + $0x140] sm:$0xff]  }
  0x1d   : > { %242 = vst [vmem:[%s3047_s26 + $0xb0] sm:$0xff] %v241_v22   ;;  %246 = vst [vmem:[%s3047_s26 + $0xb8] sm:$0xff] %v245_v23   ;;  %v253_v25 = vld [vmem:[%s3042_s25 + $0x148] sm:$0xff]   ;;  %v257_v26 = vld [vmem:[%s3042_s25 + $0x150] sm:$0xff]  }
  0x1e   : > { %250 = vst [vmem:[%s3047_s26 + $0xc0] sm:$0xff] %v249_v24   ;;  %254 = vst [vmem:[%s3047_s26 + $0xc8] sm:$0xff] %v253_v25   ;;  %v261_v27 = vld [vmem:[%s3042_s25 + $0x158] sm:$0xff]   ;;  %v265_v28 = vld [vmem:[%s3042_s25 + $0x160] sm:$0xff]  }
  0x1f   : > { %258 = vst [vmem:[%s3047_s26 + $0xd0] sm:$0xff] %v257_v26   ;;  %v269_v29 = vld [vmem:[%s3042_s25 + $0x168] sm:$0xff]   ;;  %262 = vst [vmem:[%s3047_s26 + $0xd8] sm:$0xff] %v261_v27   ;;  %v273_v30 = vld [vmem:[%s3042_s25 + $0x170] sm:$0xff]  }
  0x20   : > { %266 = vst [vmem:[%s3047_s26 + $0xe0] sm:$0xff] %v265_v28   ;;  %270 = vst [vmem:[%s3047_s26 + $0xe8] sm:$0xff] %v269_v29   ;;  %v277_v31 = vld [vmem:[%s3042_s25 + $0x178] sm:$0xff]   ;;  %v281_v32 = vld [vmem:[%s3042_s25 + $0x200] sm:$0xff]  }
  0x21   : > { %274 = vst [vmem:[%s3047_s26 + $0xf0] sm:$0xff] %v273_v30   ;;  %278 = vst [vmem:[%s3047_s26 + $0xf8] sm:$0xff] %v277_v31   ;;  %v285_v33 = vld [vmem:[%s3042_s25 + $0x208] sm:$0xff]   ;;  %v289_v34 = vld [vmem:[%s3042_s25 + $0x210] sm:$0xff]  }
  0x22   : > { %282 = vst [vmem:[%s3047_s26 + $0x100] sm:$0xff] %v281_v32   ;;  %v293_v35 = vld [vmem:[%s3042_s25 + $0x218] sm:$0xff]   ;;  %286 = vst [vmem:[%s3047_s26 + $0x108] sm:$0xff] %v285_v33   ;;  %v297_v36 = vld [vmem:[%s3042_s25 + $0x220] sm:$0xff]  }
  0x23   : > { %290 = vst [vmem:[%s3047_s26 + $0x110] sm:$0xff] %v289_v34   ;;  %294 = vst [vmem:[%s3047_s26 + $0x118] sm:$0xff] %v293_v35   ;;  %v301_v37 = vld [vmem:[%s3042_s25 + $0x228] sm:$0xff]   ;;  %v305_v38 = vld [vmem:[%s3042_s25 + $0x230] sm:$0xff]  }
  0x24   : > { %298 = vst [vmem:[%s3047_s26 + $0x120] sm:$0xff] %v297_v36   ;;  %302 = vst [vmem:[%s3047_s26 + $0x128] sm:$0xff] %v301_v37   ;;  %v309_v39 = vld [vmem:[%s3042_s25 + $0x238] sm:$0xff]   ;;  %v313_v40 = vld [vmem:[%s3042_s25 + $0x240] sm:$0xff]  }
  0x25   : > { %306 = vst [vmem:[%s3047_s26 + $0x130] sm:$0xff] %v305_v38   ;;  %v317_v41 = vld [vmem:[%s3042_s25 + $0x248] sm:$0xff]   ;;  %310 = vst [vmem:[%s3047_s26 + $0x138] sm:$0xff] %v309_v39   ;;  %v321_v42 = vld [vmem:[%s3042_s25 + $0x250] sm:$0xff]  }
  0x26   : > { %314 = vst [vmem:[%s3047_s26 + $0x140] sm:$0xff] %v313_v40   ;;  %318 = vst [vmem:[%s3047_s26 + $0x148] sm:$0xff] %v317_v41   ;;  %v325_v43 = vld [vmem:[%s3042_s25 + $0x258] sm:$0xff]   ;;  %v329_v44 = vld [vmem:[%s3042_s25 + $0x260] sm:$0xff]  }
  0x27   : > { %322 = vst [vmem:[%s3047_s26 + $0x150] sm:$0xff] %v321_v42   ;;  %326 = vst [vmem:[%s3047_s26 + $0x158] sm:$0xff] %v325_v43   ;;  %v333_v45 = vld [vmem:[%s3042_s25 + $0x268] sm:$0xff]   ;;  %v337_v46 = vld [vmem:[%s3042_s25 + $0x270] sm:$0xff]  }
  0x28   : > { %330 = vst [vmem:[%s3047_s26 + $0x160] sm:$0xff] %v329_v44   ;;  %v341_v47 = vld [vmem:[%s3042_s25 + $0x278] sm:$0xff]   ;;  %334 = vst [vmem:[%s3047_s26 + $0x168] sm:$0xff] %v333_v45   ;;  %v345_v48 = vld [vmem:[%s3042_s25 + $0x300] sm:$0xff]  }
  0x29   : > { %338 = vst [vmem:[%s3047_s26 + $0x170] sm:$0xff] %v337_v46   ;;  %342 = vst [vmem:[%s3047_s26 + $0x178] sm:$0xff] %v341_v47   ;;  %v349_v49 = vld [vmem:[%s3042_s25 + $0x308] sm:$0xff]   ;;  %v353_v50 = vld [vmem:[%s3042_s25 + $0x310] sm:$0xff]  }
  0x2a   : > { %346 = vst [vmem:[%s3047_s26 + $0x180] sm:$0xff] %v345_v48   ;;  %350 = vst [vmem:[%s3047_s26 + $0x188] sm:$0xff] %v349_v49   ;;  %v357_v51 = vld [vmem:[%s3042_s25 + $0x318] sm:$0xff]   ;;  %v361_v52 = vld [vmem:[%s3042_s25 + $0x320] sm:$0xff]  }
  0x2b   : > { %354 = vst [vmem:[%s3047_s26 + $0x190] sm:$0xff] %v353_v50   ;;  %v365_v53 = vld [vmem:[%s3042_s25 + $0x328] sm:$0xff]   ;;  %358 = vst [vmem:[%s3047_s26 + $0x198] sm:$0xff] %v357_v51   ;;  %v369_v54 = vld [vmem:[%s3042_s25 + $0x330] sm:$0xff]  }
  0x2c   : > { %362 = vst [vmem:[%s3047_s26 + $0x1a0] sm:$0xff] %v361_v52   ;;  %366 = vst [vmem:[%s3047_s26 + $0x1a8] sm:$0xff] %v365_v53   ;;  %v373_v55 = vld [vmem:[%s3042_s25 + $0x338] sm:$0xff]   ;;  %v377_v56 = vld [vmem:[%s3042_s25 + $0x340] sm:$0xff]  }
  0x2d   : > { %370 = vst [vmem:[%s3047_s26 + $0x1b0] sm:$0xff] %v369_v54   ;;  %374 = vst [vmem:[%s3047_s26 + $0x1b8] sm:$0xff] %v373_v55   ;;  %v381_v57 = vld [vmem:[%s3042_s25 + $0x348] sm:$0xff]   ;;  %v385_v58 = vld [vmem:[%s3042_s25 + $0x350] sm:$0xff]  }
  0x2e   : > { %378 = vst [vmem:[%s3047_s26 + $0x1c0] sm:$0xff] %v377_v56   ;;  %v389_v59 = vld [vmem:[%s3042_s25 + $0x358] sm:$0xff]   ;;  %382 = vst [vmem:[%s3047_s26 + $0x1c8] sm:$0xff] %v381_v57   ;;  %v393_v60 = vld [vmem:[%s3042_s25 + $0x360] sm:$0xff]  }
  0x2f   : > { %386 = vst [vmem:[%s3047_s26 + $0x1d0] sm:$0xff] %v385_v58   ;;  %390 = vst [vmem:[%s3047_s26 + $0x1d8] sm:$0xff] %v389_v59   ;;  %v397_v61 = vld [vmem:[%s3042_s25 + $0x368] sm:$0xff]   ;;  %v401_v62 = vld [vmem:[%s3042_s25 + $0x370] sm:$0xff]  }
  0x30   : > { %394 = vst [vmem:[%s3047_s26 + $0x1e0] sm:$0xff] %v393_v60   ;;  %398 = vst [vmem:[%s3047_s26 + $0x1e8] sm:$0xff] %v397_v61   ;;  %v405_v63 = vld [vmem:[%s3042_s25 + $0x378] sm:$0xff]  }
  0x31   : > { %402 = vst [vmem:[%s3047_s26 + $0x1f0] sm:$0xff] %v401_v62   ;;  %406 = vst [vmem:[%s3047_s26 + $0x1f8] sm:$0xff] %v405_v63  }
  0x32 PF: > { %p2352_p5 = scmp.ge.s32.totalorder %s2985_s14, 1  ;;  %p686_p6 = scmp.lt.s32.totalorder %s2985_s14, 3 }
  0x34   : > { %p687_p7 = pnand %p2352_p5, %p686_p6 }
  0x36   : > { %690 = sbr.rel (%p687_p7) target bundleno = 428 (0x1ac), region = 69 }
  0x3d   : > { %v2894_v0 = vld [vmem:[%s3586_s1] sm:$0xff]   ;;  %v2895_v1 = vld [vmem:[%s3586_s1 + $0x8] sm:$0xff]   ;;  %vm1404_vm0 = vcmask 1044480   ;;  %v2896_v2 = vld [vmem:[%s3586_s1 + $0x10] sm:$0xff]   ;;  %s693_s6 = sand.u32 1, %s2977_s12   ;;  %vm1405_vm1 = vcmask 1045504  }
  0x3e   : > { %2721 = vmatprep.subr.bf16.mxu0 %v2894_v0  ;;  %2859 = vmatprep.subr.bf16.mxu1 %v2894_v0  ;;  %v2987_v3 = vmov 65535   ;;  %s2353_s7 = sshll.u32 %s693_s6, 9  ;;  %v2897_v5 = vld [vmem:[%s3586_s1 + $0x18] sm:$0xff]   ;;  %v2898_v6 = vld [vmem:[%s3586_s1 + $0x20] sm:$0x3f]   ;;  %vm1211_vm2 = vcmask 613376  }
  0x3f   : > { %2722 = vmatpush3.bf16.msra.mxu0 %v2894_v0  ;;  %2864 = vmatpush3.bf16.msra.mxu1 %v2894_v0  ;;  %v1406_v4 = vsel %vm1404_vm0, 4294967295, %v2987_v3  ;;  %s3192_s17 = scalar_lea.vmem [#allocation2], %s2353_s7  ;;  %s2354_s12 = sshll.u32 %s2345_s15, 5 }
  0x40   : > { %2723 = vmatprep.subr.bf16.mxu0 %v2895_v1  ;;  %2860 = vmatprep.subr.bf16.mxu1 %v2895_v1  ;;  %v2899_v7 = vld [vmem:[%s3192_s17] sm:$0xff]   ;;  %v1407_v8 = vsel %vm1405_vm1, %v1406_v4, 0  ;;  %v2901_v11 = vld [vmem:[%s3192_s17 + $0x8] sm:$0xff]   ;;  %v2903_v13 = vld [vmem:[%s3192_s17 + $0x10] sm:$0xff]   ;;  %p718_p8 = scmp.lt.s32.totalorder %s2354_s12, 63 }
  0x41   : > { %v2900_v9 = vld [vmem:[%s3192_s17 + $0x100] sm:$0xff]   ;;  %2731 = vmatprep.mubr.msk.bf16.mxu0 %vm1211_vm2, %v2899_v7  ;;  %v1409_v10 = vand.u32 %v2898_v6, %v1407_v8  ;;  %v2902_v12 = vld [vmem:[%s3192_s17 + $0x108] sm:$0xff]   ;;  %v2904_v14 = vld [vmem:[%s3192_s17 + $0x110] sm:$0xff]  }
  0x42   : > { %2795 = vmatprep.mubr.msk.bf16.mxu1 %vm1211_vm2, %v2900_v9  ;;  %v2905_v15 = vld [vmem:[%s3192_s17 + $0x18] sm:$0xff]   ;;  %v2907_v17 = vld [vmem:[%s3192_s17 + $0x20] sm:$0xff]   ;;  %v2909_v19 = vld [vmem:[%s3192_s17 + $0x28] sm:$0xff]   ;;  %s3623_s12 = smov (!%p718_p8, %s2354_s12), 63 }
  0x43   : > { %2724 = vmatpush3.bf16.msra.mxu0 %v2895_v1  ;;  %2865 = vmatpush3.bf16.msra.mxu1 %v2895_v1  ;;  %v2906_v16 = vld [vmem:[%s3192_s17 + $0x118] sm:$0xff]   ;;  %v2908_v18 = vld [vmem:[%s3192_s17 + $0x120] sm:$0xff]   ;;  %v2910_v20 = vld [vmem:[%s3192_s17 + $0x128] sm:$0xff]   ;;  %s2355_s14 = sshll.u32 %s3623_s12, 2 }
  0x44   : > { %2725 = vmatprep.subr.bf16.mxu0 %v2896_v2  ;;  %2861 = vmatprep.subr.bf16.mxu1 %v2896_v2  ;;  %v2911_v21 = vld [vmem:[%s3192_s17 + $0x30] sm:$0xff]   ;;  %v2913_v23 = vld [vmem:[%s3192_s17 + $0x38] sm:$0xff]   ;;  %v2915_v25 = vld [vmem:[%s3192_s17 + $0x40] sm:$0xff]   ;;  %s3475_s22 = scalar_lea.vmem %s3588_s3, %s2355_s14 }
  0x45   : > { %v2912_v22 = vld [vmem:[%s3192_s17 + $0x130] sm:$0xff]   ;;  %v2914_v24 = vld [vmem:[%s3192_s17 + $0x138] sm:$0xff]   ;;  %v2916_v26 = vld [vmem:[%s3192_s17 + $0x140] sm:$0xff]  }
  0x46   : > { %v2917_v27 = vld [vmem:[%s3192_s17 + $0x48] sm:$0xff]   ;;  %v2919_v29 = vld [vmem:[%s3192_s17 + $0x50] sm:$0xff]   ;;  %v2921_v31 = vld [vmem:[%s3192_s17 + $0x58] sm:$0xff]  }
  0x47   : > { %2726 = vmatpush3.bf16.msra.mxu0 %v2896_v2  ;;  %2866 = vmatpush3.bf16.msra.mxu1 %v2896_v2  ;;  %v2918_v28 = vld [vmem:[%s3192_s17 + $0x148] sm:$0xff]   ;;  %v2920_v30 = vld [vmem:[%s3192_s17 + $0x150] sm:$0xff]   ;;  %v2922_v32 = vld [vmem:[%s3192_s17 + $0x158] sm:$0xff]  }
  0x48   : > { %2727 = vmatprep.subr.bf16.mxu0 %v2897_v5  ;;  %2862 = vmatprep.subr.bf16.mxu1 %v2897_v5  ;;  %v2923_v33 = vld [vmem:[%s3192_s17 + $0x60] sm:$0xff]   ;;  %v2925_v35 = vld [vmem:[%s3192_s17 + $0x68] sm:$0xff]   ;;  %v2927_v37 = vld [vmem:[%s3192_s17 + $0x70] sm:$0xff]  }
  0x49   : > { %v2924_v34 = vld [vmem:[%s3192_s17 + $0x160] sm:$0xff]   ;;  %v2926_v36 = vld [vmem:[%s3192_s17 + $0x168] sm:$0xff]   ;;  %v2928_v38 = vld [vmem:[%s3192_s17 + $0x170] sm:$0xff]  }
  0x4a   : > { %v2929_v39 = vld [vmem:[%s3192_s17 + $0x78] sm:$0xff]   ;;  %v2931_v41 = vld [vmem:[%s3192_s17 + $0x80] sm:$0xff]   ;;  %v2933_v43 = vld [vmem:[%s3192_s17 + $0x88] sm:$0xff]  }
  0x4b   : > { %2728 = vmatpush3.bf16.msra.mxu0 %v2897_v5  ;;  %2867 = vmatpush3.bf16.msra.mxu1 %v2897_v5  ;;  %v2930_v40 = vld [vmem:[%s3192_s17 + $0x178] sm:$0xff]   ;;  %v2932_v42 = vld [vmem:[%s3192_s17 + $0x180] sm:$0xff]   ;;  %v2934_v44 = vld [vmem:[%s3192_s17 + $0x188] sm:$0xff]  }
  0x4c   : > { %2729 = vmatprep.subr.bf16.mxu0 %v1409_v10  ;;  %2863 = vmatprep.subr.bf16.mxu1 %v1409_v10  ;;  %v2935_v45 = vld [vmem:[%s3192_s17 + $0x90] sm:$0xff]   ;;  %v2937_v47 = vld [vmem:[%s3192_s17 + $0x98] sm:$0xff]   ;;  %v2939_v49 = vld [vmem:[%s3192_s17 + $0xa0] sm:$0xff]  }
  0x4d   : > { %v2936_v46 = vld [vmem:[%s3192_s17 + $0x190] sm:$0xff]   ;;  %v2938_v48 = vld [vmem:[%s3192_s17 + $0x198] sm:$0xff]   ;;  %v2940_v50 = vld [vmem:[%s3192_s17 + $0x1a0] sm:$0xff]  }
  0x4e   : > { %v2941_v51 = vld [vmem:[%s3192_s17 + $0xa8] sm:$0xff]   ;;  %v2943_v53 = vld [vmem:[%s3192_s17 + $0xb0] sm:$0xff]   ;;  %v2945_v55 = vld [vmem:[%s3192_s17 + $0xb8] sm:$0xff]  }
  0x4f   : > { %2730 = vmatpush3.bf16.msra.mxu0 %v1409_v10  ;;  %2868 = vmatpush3.bf16.msra.mxu1 %v1409_v10  ;;  %v2942_v52 = vld [vmem:[%s3192_s17 + $0x1a8] sm:$0xff]   ;;  %v2944_v54 = vld [vmem:[%s3192_s17 + $0x1b0] sm:$0xff]   ;;  %v2946_v56 = vld [vmem:[%s3192_s17 + $0x1b8] sm:$0xff]  }
  0x50   : > { %v2947_v57 = vld [vmem:[%s3192_s17 + $0xc0] sm:$0xff]   ;;  %v2949_v59 = vld [vmem:[%s3192_s17 + $0xc8] sm:$0xff]   ;;  %v2951_v61 = vld [vmem:[%s3192_s17 + $0xd0] sm:$0xff]  }
  0x51   : > { %v2948_v58 = vld [vmem:[%s3192_s17 + $0x1c0] sm:$0xff]   ;;  %v2950_v60 = vld [vmem:[%s3192_s17 + $0x1c8] sm:$0xff]   ;;  %v2952_v62 = vld [vmem:[%s3192_s17 + $0x1d0] sm:$0xff]  }
  0x52   : > { %2732 = vmatmul.mubr.msk.bf16.vlgmr.msra.gmra.mrb[0].mxu0 %vm1211_vm2, %v2901_v11  ;;  %2796 = vmatmul.mubr.msk.bf16.vlgmr.msra.gmra.mrb[0].mxu1 %vm1211_vm2, %v2902_v12  ;;  %v2953_v63 = vld [vmem:[%s3192_s17 + $0xd8] sm:$0xff]   ;;  %v2955_v1 = vld [vmem:[%s3192_s17 + $0xe0] sm:$0xff]   ;;  %v2957_v3 = vld [vmem:[%s3192_s17 + $0xe8] sm:$0xff]  }
  0x53   : > { %2735 = vmatprep.mubr.msk.bf16.mxu0 %vm1211_vm2, %v2903_v13  ;;  %2799 = vmatprep.mubr.msk.bf16.mxu1 %vm1211_vm2, %v2904_v14  ;;  %v2954_v0 = vld [vmem:[%s3192_s17 + $0x1d8] sm:$0xff]   ;;  %v2956_v2 = vld [vmem:[%s3192_s17 + $0x1e0] sm:$0xff]   ;;  %v2958_v4 = vld [vmem:[%s3192_s17 + $0x1e8] sm:$0xff]  }
  0x54   : > { %v2959_v5 = vld [vmem:[%s3192_s17 + $0xf0] sm:$0xff]   ;;  %v2961_v7 = vld [vmem:[%s3192_s17 + $0xf8] sm:$0xff]  }
  0x55   : > { %v2960_v6 = vld [vmem:[%s3192_s17 + $0x1f0] sm:$0xff]   ;;  %v2962_v8 = vld [vmem:[%s3192_s17 + $0x1f8] sm:$0xff]  }
  0x5a   : > { %2736 = vmatmul.mubr.msk.bf16.gmra.mrb[4].mxu0 %vm1211_vm2, %v2905_v15  ;;  %2800 = vmatmul.mubr.msk.bf16.gmra.mrb[4].mxu1 %vm1211_vm2, %v2906_v16 }
  0x5b   : > { %2739 = vmatprep.mubr.msk.bf16.mxu0 %vm1211_vm2, %v2907_v17  ;;  %2803 = vmatprep.mubr.msk.bf16.mxu1 %vm1211_vm2, %v2908_v18 }
  0x62   : > { %2740 = vmatmul.mubr.msk.bf16.gmra.mrb[8].mxu0 %vm1211_vm2, %v2909_v19  ;;  %2804 = vmatmul.mubr.msk.bf16.gmra.mrb[8].mxu1 %vm1211_vm2, %v2910_v20 }
  0x63   : > { %2743 = vmatprep.mubr.msk.bf16.mxu0 %vm1211_vm2, %v2911_v21  ;;  %2807 = vmatprep.mubr.msk.bf16.mxu1 %vm1211_vm2, %v2912_v22 }
  0x6a   : > { %2744 = vmatmul.mubr.msk.bf16.gmra.mrb[12].mxu0 %vm1211_vm2, %v2913_v23  ;;  %2808 = vmatmul.mubr.msk.bf16.gmra.mrb[12].mxu1 %vm1211_vm2, %v2914_v24 }
  0x6b   : > { %2747 = vmatprep.mubr.msk.bf16.mxu0 %vm1211_vm2, %v2915_v25  ;;  %2811 = vmatprep.mubr.msk.bf16.mxu1 %vm1211_vm2, %v2916_v26 }
  0x72   : > { %2748 = vmatmul.mubr.msk.bf16.gmra.mrb[16].mxu0 %vm1211_vm2, %v2917_v27  ;;  %2812 = vmatmul.mubr.msk.bf16.gmra.mrb[16].mxu1 %vm1211_vm2, %v2918_v28 }
  0x73   : > { %2751 = vmatprep.mubr.msk.bf16.mxu0 %vm1211_vm2, %v2919_v29  ;;  %2815 = vmatprep.mubr.msk.bf16.mxu1 %vm1211_vm2, %v2920_v30 }
  0x7a   : > { %2752 = vmatmul.mubr.msk.bf16.gmra.mrb[20].mxu0 %vm1211_vm2, %v2921_v31  ;;  %2816 = vmatmul.mubr.msk.bf16.gmra.mrb[20].mxu1 %vm1211_vm2, %v2922_v32 }
  0x7b   : > { %2755 = vmatprep.mubr.msk.bf16.mxu0 %vm1211_vm2, %v2923_v33  ;;  %2819 = vmatprep.mubr.msk.bf16.mxu1 %vm1211_vm2, %v2924_v34 }
  0x82   : > { %2756 = vmatmul.mubr.msk.bf16.gmra.mrb[24].mxu0 %vm1211_vm2, %v2925_v35  ;;  %2820 = vmatmul.mubr.msk.bf16.gmra.mrb[24].mxu1 %vm1211_vm2, %v2926_v36 }
  0x83   : > { %2759 = vmatprep.mubr.msk.bf16.mxu0 %vm1211_vm2, %v2927_v37  ;;  %2823 = vmatprep.mubr.msk.bf16.mxu1 %vm1211_vm2, %v2928_v38 }
  0x8a   : > { %2760 = vmatmul.mubr.msk.bf16.gmra.mrb[28].mxu0 %vm1211_vm2, %v2929_v39  ;;  %2824 = vmatmul.mubr.msk.bf16.gmra.mrb[28].mxu1 %vm1211_vm2, %v2930_v40 }
  0x8b   : > { %2763 = vmatprep.mubr.msk.bf16.mxu0 %vm1211_vm2, %v2931_v41  ;;  %2827 = vmatprep.mubr.msk.bf16.mxu1 %vm1211_vm2, %v2932_v42 }
  0x92   : > { %2764 = vmatmul.mubr.msk.bf16.gmra.mrb[32].mxu0 %vm1211_vm2, %v2933_v43  ;;  %2828 = vmatmul.mubr.msk.bf16.gmra.mrb[32].mxu1 %vm1211_vm2, %v2934_v44 }
  0x93   : > { %2767 = vmatprep.mubr.msk.bf16.mxu0 %vm1211_vm2, %v2935_v45  ;;  %2831 = vmatprep.mubr.msk.bf16.mxu1 %vm1211_vm2, %v2936_v46 }
  0x9a   : > { %2768 = vmatmul.mubr.msk.bf16.gmra.mrb[36].mxu0 %vm1211_vm2, %v2937_v47  ;;  %2832 = vmatmul.mubr.msk.bf16.gmra.mrb[36].mxu1 %vm1211_vm2, %v2938_v48 }
  0x9b   : > { %2771 = vmatprep.mubr.msk.bf16.mxu0 %vm1211_vm2, %v2939_v49  ;;  %2835 = vmatprep.mubr.msk.bf16.mxu1 %vm1211_vm2, %v2940_v50 }
  0xa2   : > { %2772 = vmatmul.mubr.msk.bf16.gmra.mrb[40].mxu0 %vm1211_vm2, %v2941_v51  ;;  %2836 = vmatmul.mubr.msk.bf16.gmra.mrb[40].mxu1 %vm1211_vm2, %v2942_v52 }
  0xa3   : > { %2775 = vmatprep.mubr.msk.bf16.mxu0 %vm1211_vm2, %v2943_v53  ;;  %2839 = vmatprep.mubr.msk.bf16.mxu1 %vm1211_vm2, %v2944_v54 }
  0xaa   : > { %2776 = vmatmul.mubr.msk.bf16.gmra.mrb[44].mxu0 %vm1211_vm2, %v2945_v55  ;;  %2840 = vmatmul.mubr.msk.bf16.gmra.mrb[44].mxu1 %vm1211_vm2, %v2946_v56 }
  0xab   : > { %2779 = vmatprep.mubr.msk.bf16.mxu0 %vm1211_vm2, %v2947_v57  ;;  %2843 = vmatprep.mubr.msk.bf16.mxu1 %vm1211_vm2, %v2948_v58 }
  0xb2   : > { %2780 = vmatmul.mubr.msk.bf16.gmra.mrb[48].mxu0 %vm1211_vm2, %v2949_v59  ;;  %2844 = vmatmul.mubr.msk.bf16.gmra.mrb[48].mxu1 %vm1211_vm2, %v2950_v60 }
  0xb3   : > { %2783 = vmatprep.mubr.msk.bf16.mxu0 %vm1211_vm2, %v2951_v61  ;;  %2847 = vmatprep.mubr.msk.bf16.mxu1 %vm1211_vm2, %v2952_v62 }
  0xba   : > { %2784 = vmatmul.mubr.msk.bf16.gmra.mrb[52].mxu0 %vm1211_vm2, %v2953_v63  ;;  %2848 = vmatmul.mubr.msk.bf16.gmra.mrb[52].mxu1 %vm1211_vm2, %v2954_v0 }
  0xbb   : > { %2787 = vmatprep.mubr.msk.bf16.mxu0 %vm1211_vm2, %v2955_v1  ;;  %2851 = vmatprep.mubr.msk.bf16.mxu1 %vm1211_vm2, %v2956_v2 }
  0xc2   : > { %2788 = vmatmul.mubr.msk.bf16.gmra.mrb[56].mxu0 %vm1211_vm2, %v2957_v3  ;;  %2852 = vmatmul.mubr.msk.bf16.gmra.mrb[56].mxu1 %vm1211_vm2, %v2958_v4 }
  0xc3   : > { %2791 = vmatprep.mubr.msk.bf16.mxu0 %vm1211_vm2, %v2959_v5  ;;  %2855 = vmatprep.mubr.msk.bf16.mxu1 %vm1211_vm2, %v2960_v6 }
  0xca   : > { %2792 = vmatmul.mubr.msk.bf16.gmra.mrb[60].mxu0 %vm1211_vm2, %v2961_v7  ;;  %2856 = vmatmul.mubr.msk.bf16.gmra.mrb[60].mxu1 %vm1211_vm2, %v2962_v8 }
 0x125   : > { %v3322_v9 = vpop.f32.mrb[0].mxu0  ;;  %v3324_v10 = vpop.f32.mrb[0].mxu1 }
 0x126   : > { %v3326_v11 = vpop.f32.mrb[1].mxu0  ;;  %v3328_v12 = vpop.f32.mrb[1].mxu1 }
 0x127   : > { %v3330_v13 = vpop.f32.mrb[2].mxu0  ;;  %v3332_v14 = vpop.f32.mrb[2].mxu1 }
 0x128   : > { %v3334_v15 = vpop.f32.mrb[3].mxu0  ;;  %v3336_v16 = vpop.f32.mrb[3].mxu1 }
 0x12d   : > { %v3338_v17 = vpop.f32.mrb[4].mxu0  ;;  %v3340_v18 = vpop.f32.mrb[4].mxu1 }
 0x12e   : > { %v3342_v19 = vpop.f32.mrb[5].mxu0  ;;  %v3344_v20 = vpop.f32.mrb[5].mxu1 }
 0x12f   : > { %v3346_v21 = vpop.f32.mrb[6].mxu0  ;;  %v3348_v22 = vpop.f32.mrb[6].mxu1 }
 0x130   : > { %v3350_v23 = vpop.f32.mrb[7].mxu0  ;;  %v3352_v24 = vpop.f32.mrb[7].mxu1 }
 0x135   : > { %v3354_v25 = vpop.f32.mrb[8].mxu0  ;;  %v3356_v26 = vpop.f32.mrb[8].mxu1 }
 0x136   : > { %v3358_v27 = vpop.f32.mrb[9].mxu0  ;;  %v3360_v28 = vpop.f32.mrb[9].mxu1 }
 0x137   : > { %v3362_v29 = vpop.f32.mrb[10].mxu0  ;;  %v3364_v30 = vpop.f32.mrb[10].mxu1 }
 0x138   : > { %v3366_v31 = vpop.f32.mrb[11].mxu0  ;;  %v3368_v32 = vpop.f32.mrb[11].mxu1 }
 0x13d   : > { %v3370_v33 = vpop.f32.mrb[12].mxu0  ;;  %v3372_v34 = vpop.f32.mrb[12].mxu1 }
 0x13e   : > { %v3374_v35 = vpop.f32.mrb[13].mxu0  ;;  %v3376_v36 = vpop.f32.mrb[13].mxu1 }
 0x13f   : > { %v3378_v37 = vpop.f32.mrb[14].mxu0  ;;  %v3380_v38 = vpop.f32.mrb[14].mxu1 }
 0x140   : > { %v3382_v39 = vpop.f32.mrb[15].mxu0  ;;  %v3384_v40 = vpop.f32.mrb[15].mxu1 }
 0x145   : > { %v3386_v41 = vpop.f32.mrb[16].mxu0  ;;  %v3388_v42 = vpop.f32.mrb[16].mxu1 }
 0x146   : > { %v3390_v43 = vpop.f32.mrb[17].mxu0  ;;  %v3392_v44 = vpop.f32.mrb[17].mxu1 }
 0x147   : > { %v3394_v45 = vpop.f32.mrb[18].mxu0  ;;  %v3396_v46 = vpop.f32.mrb[18].mxu1 }
 0x148   : > { %v3398_v47 = vpop.f32.mrb[19].mxu0  ;;  %v3400_v48 = vpop.f32.mrb[19].mxu1 }
 0x14d   : > { %v3402_v49 = vpop.f32.mrb[20].mxu0  ;;  %v3404_v50 = vpop.f32.mrb[20].mxu1 }
 0x14e   : > { %v3406_v51 = vpop.f32.mrb[21].mxu0  ;;  %v3408_v52 = vpop.f32.mrb[21].mxu1 }
 0x14f   : > { %v3410_v53 = vpop.f32.mrb[22].mxu0  ;;  %v3412_v54 = vpop.f32.mrb[22].mxu1 }
 0x150   : > { %v3414_v55 = vpop.f32.mrb[23].mxu0  ;;  %v3416_v56 = vpop.f32.mrb[23].mxu1 }
 0x155   : > { %v3418_v57 = vpop.f32.mrb[24].mxu0  ;;  %v3420_v58 = vpop.f32.mrb[24].mxu1 }
 0x156   : > { %3589 = vst [vmem:[#allocation3_spill] sm:$0xff] %v3420_v58  ;;  %v3422_v59 = vpop.f32.mrb[25].mxu0  ;;  %v3424_v60 = vpop.f32.mrb[25].mxu1 }
 0x157   : > { %3590 = vst [vmem:[#allocation4_spill] sm:$0xff] %v3422_v59  ;;  %3591 = vst [vmem:[#allocation5_spill] sm:$0xff] %v3424_v60  ;;  %v3426_v61 = vpop.f32.mrb[26].mxu0  ;;  %v3428_v62 = vpop.f32.mrb[26].mxu1 }
 0x158   : > { %3592 = vst [vmem:[#allocation6_spill] sm:$0xff] %v3426_v61  ;;  %3593 = vst [vmem:[#allocation7_spill] sm:$0xff] %v3428_v62  ;;  %v3430_v63 = vpop.f32.mrb[27].mxu0  ;;  %v3432_v0 = vpop.f32.mrb[27].mxu1 }
 0x159   : > { %3594 = vst [vmem:[#allocation8_spill] sm:$0xff] %v3430_v63  ;;  %3595 = vst [vmem:[#allocation9_spill] sm:$0xff] %v3432_v0 }
 0x15d   : > { %v3434_v1 = vpop.f32.mrb[28].mxu0  ;;  %v3436_v2 = vpop.f32.mrb[28].mxu1 }
 0x15e   : > { %3596 = vst [vmem:[#allocation10_spill] sm:$0xff] %v3434_v1  ;;  %3597 = vst [vmem:[#allocation11_spill] sm:$0xff] %v3436_v2  ;;  %v3438_v3 = vpop.f32.mrb[29].mxu0  ;;  %v3440_v4 = vpop.f32.mrb[29].mxu1 }
 0x15f   : > { %3598 = vst [vmem:[#allocation12_spill] sm:$0xff] %v3438_v3  ;;  %3599 = vst [vmem:[#allocation13_spill] sm:$0xff] %v3440_v4  ;;  %v3442_v5 = vpop.f32.mrb[30].mxu0  ;;  %v3444_v6 = vpop.f32.mrb[30].mxu1 }
 0x160   : > { %3600 = vst [vmem:[#allocation14_spill] sm:$0xff] %v3442_v5  ;;  %3601 = vst [vmem:[#allocation15_spill] sm:$0xff] %v3444_v6  ;;  %v3446_v7 = vpop.f32.mrb[31].mxu0  ;;  %v3448_v8 = vpop.f32.mrb[31].mxu1  ;;  %v3457_v5 = vld [vmem:[%s3587_s2] ss:$0 sm:$0xff] }
 0x161   : > { %3602 = vst [vmem:[#allocation16_spill] sm:$0xff] %v3446_v7  ;;  %3603 = vst [vmem:[#allocation17_spill] sm:$0xff] %v3448_v8 }
 0x165   : > { %v2765_v0 = vpop.f32.mrb[32].mxu0  ;;  %v2829_v63 = vpop.f32.mrb[32].mxu1 }
 0x166   : > { %v1958_v1 = vmax.f32 %v3322_v9, %v2765_v0  ;;  %v1990_v2 = vmax.f32 %v3324_v10, %v2829_v63  ;;  %v1573_v3 = vpop.f32.mrb[33].mxu0  ;;  %v1829_v62 = vpop.f32.mrb[33].mxu1 }
 0x167   : > { %v1956_v7 = vmax.f32 %v3326_v11, %v1573_v3  ;;  %v1988_v8 = vmax.f32 %v3328_v12, %v1829_v62  ;;  %v2766_v6 = vpop.f32.mrb[34].mxu0  ;;  %v2830_v4 = vpop.f32.mrb[34].mxu1 }
 0x168   : > { %v2022_v61 = vmax.f32 %v1958_v1, %v1990_v2  ;;  %v1959_v60 = vmax.f32 %v3330_v13, %v2766_v6  ;;  %v1991_v9 = vmax.f32 %v3332_v14, %v2830_v4  ;;  %v1576_v10 = vpop.f32.mrb[35].mxu0  ;;  %v1832_v63 = vpop.f32.mrb[35].mxu1 }
 0x169   : > { %v2020_v0 = vmax.f32 %v1956_v7, %v1988_v8  ;;  %v1957_v59 = vmax.f32 %v3334_v15, %v1576_v10  ;;  %v1989_v58 = vmax.f32 %v3336_v16, %v1832_v63 }
 0x16a   : > { %v2061_v11 = vadd.f32 %v3457_v5, %v2022_v61  ;;  %v2023_v3 = vmax.f32 %v1959_v60, %v1991_v9 }
 0x16b   : > { %v2059_v12 = vadd.f32 %v3457_v5, %v2020_v0  ;;  %v2021_v62 = vmax.f32 %v1957_v59, %v1989_v58 }
 0x16c   : > { %v2062_v13 = vadd.f32 %v3457_v5, %v2023_v3  ;;  %v2093_v4 = vmax.f32 %v2061_v11, 0.0 }
 0x16d   : > { %v2060_v1 = vadd.f32 %v3457_v5, %v2021_v62  ;;  %v2769_v2 = vpop.f32.mrb[36].mxu0  ;;  %v2833_v14 = vpop.f32.mrb[36].mxu1  ;;  %v2091_v61 = vmax.f32 %v2059_v12, 0.0 }
 0x16e   : > { %v2094_v6 = vmax.f32 %v2062_v13, 0.0  ;;  %v1962_v7 = vmax.f32 %v3338_v17, %v2769_v2  ;;  %v1994_v15 = vmax.f32 %v3340_v18, %v2833_v14  ;;  %v1589_v16 = vpop.f32.mrb[37].mxu0  ;;  %v1845_v8 = vpop.f32.mrb[37].mxu1 }
 0x16f   : > { %v2092_v58 = vmax.f32 %v2060_v1, 0.0  ;;  %v1960_v59 = vmax.f32 %v3342_v19, %v1589_v16  ;;  %v1992_v60 = vmax.f32 %v3344_v20, %v1845_v8  ;;  %v2770_v9 = vpop.f32.mrb[38].mxu0  ;;  %v2834_v10 = vpop.f32.mrb[38].mxu1 }
 0x170   : > { %v2565_v17 = vpack.c.bf16 %v2094_v6, %v2093_v4  ;;  %v2026_v63 = vmax.f32 %v1962_v7, %v1994_v15  ;;  %v1963_v18 = vmax.f32 %v3346_v21, %v2770_v9  ;;  %v1995_v0 = vmax.f32 %v3348_v22, %v2834_v10  ;;  %v1592_v11 = vpop.f32.mrb[39].mxu0  ;;  %v1848_v3 = vpop.f32.mrb[39].mxu1 }
 0x171   : > { %v2560_v12 = vpack.c.bf16 %v2092_v58, %v2091_v61  ;;  %v2024_v62 = vmax.f32 %v1960_v59, %v1992_v60  ;;  %v1961_v13 = vmax.f32 %v3350_v23, %v1592_v11  ;;  %v1993_v1 = vmax.f32 %v3352_v24, %v1848_v3 }
 0x172   : > { %2637 = vst [vmem:[%s3475_s22 + $0x8] sm:$0xff] %v2565_v17   ;;  %v2065_v19 = vadd.f32 %v3457_v5, %v2026_v63  ;;  %v2027_v20 = vmax.f32 %v1963_v18, %v1995_v0 }
 0x173   : > { %2561 = vst [vmem:[%s3475_s22] sm:$0xff] %v2560_v12   ;;  %v2063_v2 = vadd.f32 %v3457_v5, %v2024_v62  ;;  %v2025_v14 = vmax.f32 %v1961_v13, %v1993_v1 }
 0x174   : > { %v2066_v21 = vadd.f32 %v3457_v5, %v2027_v20  ;;  %v2097_v7 = vmax.f32 %v2065_v19, 0.0 }
 0x175   : > { %v2064_v22 = vadd.f32 %v3457_v5, %v2025_v14  ;;  %v2773_v4 = vpop.f32.mrb[40].mxu0  ;;  %v2837_v6 = vpop.f32.mrb[40].mxu1  ;;  %v2095_v61 = vmax.f32 %v2063_v2, 0.0 }
 0x176   : > { %v2098_v15 = vmax.f32 %v2066_v21, 0.0  ;;  %v1966_v23 = vmax.f32 %v3354_v25, %v2773_v4  ;;  %v1998_v24 = vmax.f32 %v3356_v26, %v2837_v6  ;;  %v1605_v16 = vpop.f32.mrb[41].mxu0  ;;  %v1861_v8 = vpop.f32.mrb[41].mxu1 }
 0x177   : > { %v2096_v58 = vmax.f32 %v2064_v22, 0.0  ;;  %v1964_v59 = vmax.f32 %v3358_v27, %v1605_v16  ;;  %v1996_v60 = vmax.f32 %v3360_v28, %v1861_v8  ;;  %v2774_v9 = vpop.f32.mrb[42].mxu0  ;;  %v2838_v10 = vpop.f32.mrb[42].mxu1 }
 0x178   : > { %v2575_v17 = vpack.c.bf16 %v2098_v15, %v2097_v7  ;;  %v2030_v63 = vmax.f32 %v1966_v23, %v1998_v24  ;;  %v1967_v18 = vmax.f32 %v3362_v29, %v2774_v9  ;;  %v1999_v25 = vmax.f32 %v3364_v30, %v2838_v10  ;;  %v1608_v0 = vpop.f32.mrb[43].mxu0  ;;  %v1864_v26 = vpop.f32.mrb[43].mxu1 }
 0x179   : > { %v2570_v11 = vpack.c.bf16 %v2096_v58, %v2095_v61  ;;  %v2028_v3 = vmax.f32 %v1964_v59, %v1996_v60  ;;  %v1965_v12 = vmax.f32 %v3366_v31, %v1608_v0  ;;  %v1997_v62 = vmax.f32 %v3368_v32, %v1864_v26 }
 0x17a   : > { %2639 = vst [vmem:[%s3475_s22 + $0x18] sm:$0xff] %v2575_v17   ;;  %v2069_v27 = vadd.f32 %v3457_v5, %v2030_v63  ;;  %v2031_v28 = vmax.f32 %v1967_v18, %v1999_v25 }
 0x17b   : > { %2638 = vst [vmem:[%s3475_s22 + $0x10] sm:$0xff] %v2570_v11   ;;  %v2067_v13 = vadd.f32 %v3457_v5, %v2028_v3  ;;  %v2029_v1 = vmax.f32 %v1965_v12, %v1997_v62 }
 0x17c   : > { %v2070_v29 = vadd.f32 %v3457_v5, %v2031_v28  ;;  %v2101_v2 = vmax.f32 %v2069_v27, 0.0 }
 0x17d   : > { %v2068_v30 = vadd.f32 %v3457_v5, %v2029_v1  ;;  %v2777_v19 = vpop.f32.mrb[44].mxu0  ;;  %v2841_v20 = vpop.f32.mrb[44].mxu1  ;;  %v2099_v4 = vmax.f32 %v2067_v13, 0.0 }
 0x17e   : > { %v2102_v14 = vmax.f32 %v2070_v29, 0.0  ;;  %v1970_v31 = vmax.f32 %v3370_v33, %v2777_v19  ;;  %v2002_v32 = vmax.f32 %v3372_v34, %v2841_v20  ;;  %v1621_v21 = vpop.f32.mrb[45].mxu0  ;;  %v1877_v22 = vpop.f32.mrb[45].mxu1 }
 0x17f   : > { %v2100_v6 = vmax.f32 %v2068_v30, 0.0  ;;  %v1968_v7 = vmax.f32 %v3374_v35, %v1621_v21  ;;  %v2000_v15 = vmax.f32 %v3376_v36, %v1877_v22  ;;  %v2778_v23 = vpop.f32.mrb[46].mxu0  ;;  %v2842_v24 = vpop.f32.mrb[46].mxu1 }
 0x180   : > { %v2585_v16 = vpack.c.bf16 %v2102_v14, %v2101_v2  ;;  %v2034_v8 = vmax.f32 %v1970_v31, %v2002_v32  ;;  %v1971_v61 = vmax.f32 %v3378_v37, %v2778_v23  ;;  %v2003_v33 = vmax.f32 %v3380_v38, %v2842_v24  ;;  %v1624_v58 = vpop.f32.mrb[47].mxu0  ;;  %v1880_v34 = vpop.f32.mrb[47].mxu1 }
 0x181   : > { %v2580_v59 = vpack.c.bf16 %v2100_v6, %v2099_v4  ;;  %v2032_v60 = vmax.f32 %v1968_v7, %v2000_v15  ;;  %v1969_v9 = vmax.f32 %v3382_v39, %v1624_v58  ;;  %v2001_v10 = vmax.f32 %v3384_v40, %v1880_v34 }
 0x182   : > { %2641 = vst [vmem:[%s3475_s22 + $0x28] sm:$0xff] %v2585_v16   ;;  %v2073_v35 = vadd.f32 %v3457_v5, %v2034_v8  ;;  %v2035_v36 = vmax.f32 %v1971_v61, %v2003_v33 }
 0x183   : > { %2640 = vst [vmem:[%s3475_s22 + $0x20] sm:$0xff] %v2580_v59   ;;  %v2071_v17 = vadd.f32 %v3457_v5, %v2032_v60  ;;  %v2033_v63 = vmax.f32 %v1969_v9, %v2001_v10 }
 0x184   : > { %v2074_v37 = vadd.f32 %v3457_v5, %v2035_v36  ;;  %v2105_v0 = vmax.f32 %v2073_v35, 0.0 }
 0x185   : > { %v2072_v38 = vadd.f32 %v3457_v5, %v2033_v63  ;;  %v2781_v18 = vpop.f32.mrb[48].mxu0  ;;  %v2845_v25 = vpop.f32.mrb[48].mxu1  ;;  %v2103_v12 = vmax.f32 %v2071_v17, 0.0 }
 0x186   : > { %v2106_v26 = vmax.f32 %v2074_v37, 0.0  ;;  %v1974_v39 = vmax.f32 %v3386_v41, %v2781_v18  ;;  %v2006_v40 = vmax.f32 %v3388_v42, %v2845_v25  ;;  %v1637_v11 = vpop.f32.mrb[49].mxu0  ;;  %v1893_v3 = vpop.f32.mrb[49].mxu1 }
 0x187   : > { %v2104_v62 = vmax.f32 %v2072_v38, 0.0  ;;  %v1972_v27 = vmax.f32 %v3390_v43, %v1637_v11  ;;  %v2004_v28 = vmax.f32 %v3392_v44, %v1893_v3  ;;  %v2782_v13 = vpop.f32.mrb[50].mxu0  ;;  %v2846_v1 = vpop.f32.mrb[50].mxu1 }
 0x188   : > { %v2595_v29 = vpack.c.bf16 %v2106_v26, %v2105_v0  ;;  %v2038_v30 = vmax.f32 %v1974_v39, %v2006_v40  ;;  %v1975_v19 = vmax.f32 %v3394_v45, %v2782_v13  ;;  %v2007_v41 = vmax.f32 %v3396_v46, %v2846_v1  ;;  %v1640_v20 = vpop.f32.mrb[51].mxu0  ;;  %v1896_v42 = vpop.f32.mrb[51].mxu1  ;;  %v3604_v39 = vld [vmem:[#allocation3_spill] sm:$0xff] }
 0x189   : > { %v2590_v2 = vpack.c.bf16 %v2104_v62, %v2103_v12  ;;  %v2036_v14 = vmax.f32 %v1972_v27, %v2004_v28  ;;  %v1973_v31 = vmax.f32 %v3398_v47, %v1640_v20  ;;  %v2005_v32 = vmax.f32 %v3400_v48, %v1896_v42  ;;  %v3605_v62 = vld [vmem:[#allocation4_spill] sm:$0xff]  ;;  %v3606_v28 = vld [vmem:[#allocation5_spill] sm:$0xff]  ;;  %v3608_v42 = vld [vmem:[#allocation7_spill] sm:$0xff] }
 0x18a   : > { %2643 = vst [vmem:[%s3475_s22 + $0x38] sm:$0xff] %v2595_v29   ;;  %v2077_v43 = vadd.f32 %v3457_v5, %v2038_v30  ;;  %v2039_v44 = vmax.f32 %v1975_v19, %v2007_v41  ;;  %v3607_v41 = vld [vmem:[#allocation6_spill] sm:$0xff] }
 0x18b   : > { %2642 = vst [vmem:[%s3475_s22 + $0x30] sm:$0xff] %v2590_v2   ;;  %v2075_v21 = vadd.f32 %v3457_v5, %v2036_v14  ;;  %v2037_v22 = vmax.f32 %v1973_v31, %v2005_v32 }
 0x18c   : > { %v2078_v45 = vadd.f32 %v3457_v5, %v2039_v44  ;;  %v2109_v7 = vmax.f32 %v2077_v43, 0.0  ;;  %v3609_v43 = vld [vmem:[#allocation8_spill] sm:$0xff] }
 0x18d   : > { %v2076_v46 = vadd.f32 %v3457_v5, %v2037_v22  ;;  %v2785_v4 = vpop.f32.mrb[52].mxu0  ;;  %v2849_v6 = vpop.f32.mrb[52].mxu1  ;;  %v2107_v16 = vmax.f32 %v2075_v21, 0.0  ;;  %v3610_v21 = vld [vmem:[#allocation9_spill] sm:$0xff] }
 0x18e   : > { %v2110_v15 = vmax.f32 %v2078_v45, 0.0  ;;  %v1978_v47 = vmax.f32 %v3402_v49, %v2785_v4  ;;  %v2010_v48 = vmax.f32 %v3404_v50, %v2849_v6  ;;  %v1653_v23 = vpop.f32.mrb[53].mxu0  ;;  %v1909_v24 = vpop.f32.mrb[53].mxu1 }
 0x18f   : > { %v2108_v8 = vmax.f32 %v2076_v46, 0.0  ;;  %v1976_v61 = vmax.f32 %v3406_v51, %v1653_v23  ;;  %v2008_v33 = vmax.f32 %v3408_v52, %v1909_v24  ;;  %v2786_v58 = vpop.f32.mrb[54].mxu0  ;;  %v2850_v34 = vpop.f32.mrb[54].mxu1 }
 0x190   : > { %v2605_v59 = vpack.c.bf16 %v2110_v15, %v2109_v7  ;;  %v2042_v60 = vmax.f32 %v1978_v47, %v2010_v48  ;;  %v1979_v9 = vmax.f32 %v3410_v53, %v2786_v58  ;;  %v2011_v49 = vmax.f32 %v3412_v54, %v2850_v34  ;;  %v1656_v10 = vpop.f32.mrb[55].mxu0  ;;  %v1912_v50 = vpop.f32.mrb[55].mxu1 }
 0x191   : > { %v2600_v35 = vpack.c.bf16 %v2108_v8, %v2107_v16  ;;  %v2040_v36 = vmax.f32 %v1976_v61, %v2008_v33  ;;  %v1977_v17 = vmax.f32 %v3414_v55, %v1656_v10  ;;  %v2009_v63 = vmax.f32 %v3416_v56, %v1912_v50  ;;  %v3611_v16 = vld [vmem:[#allocation10_spill] sm:$0xff]  ;;  %v3612_v61 = vld [vmem:[#allocation11_spill] sm:$0xff]  ;;  %v3614_v10 = vld [vmem:[#allocation13_spill] sm:$0xff] }
 0x192   : > { %2645 = vst [vmem:[%s3475_s22 + $0x48] sm:$0xff] %v2605_v59   ;;  %v2081_v51 = vadd.f32 %v3457_v5, %v2042_v60  ;;  %v2043_v52 = vmax.f32 %v1979_v9, %v2011_v49  ;;  %v3613_v9 = vld [vmem:[#allocation12_spill] sm:$0xff] }
 0x193   : > { %2644 = vst [vmem:[%s3475_s22 + $0x40] sm:$0xff] %v2600_v35   ;;  %v2079_v37 = vadd.f32 %v3457_v5, %v2040_v36  ;;  %v2041_v38 = vmax.f32 %v1977_v17, %v2009_v63 }
 0x194   : > { %v2082_v53 = vadd.f32 %v3457_v5, %v2043_v52  ;;  %v2113_v0 = vmax.f32 %v2081_v51, 0.0  ;;  %v3615_v51 = vld [vmem:[#allocation14_spill] sm:$0xff] }
 0x195   : > { %v2080_v54 = vadd.f32 %v3457_v5, %v2041_v38  ;;  %v2789_v18 = vpop.f32.mrb[56].mxu0  ;;  %v2853_v25 = vpop.f32.mrb[56].mxu1  ;;  %v2111_v3 = vmax.f32 %v2079_v37, 0.0  ;;  %v3616_v37 = vld [vmem:[#allocation15_spill] sm:$0xff] }
 0x196   : > { %v2114_v26 = vmax.f32 %v2082_v53, 0.0  ;;  %v1982_v55 = vmax.f32 %v3418_v57, %v2789_v18  ;;  %v2014_v56 = vmax.f32 %v3604_v39, %v2853_v25  ;;  %v1669_v40 = vpop.f32.mrb[57].mxu0  ;;  %v1925_v11 = vpop.f32.mrb[57].mxu1 }
 0x197   : > { %v2112_v12 = vmax.f32 %v2080_v54, 0.0  ;;  %v1980_v27 = vmax.f32 %v3605_v62, %v1669_v40  ;;  %v2012_v13 = vmax.f32 %v3606_v28, %v1925_v11  ;;  %v2790_v1 = vpop.f32.mrb[58].mxu0  ;;  %v2854_v29 = vpop.f32.mrb[58].mxu1 }
 0x198   : > { %v2615_v30 = vpack.c.bf16 %v2114_v26, %v2113_v0  ;;  %v2046_v19 = vmax.f32 %v1982_v55, %v2014_v56  ;;  %v1983_v20 = vmax.f32 %v3607_v41, %v2790_v1  ;;  %v2015_v57 = vmax.f32 %v3608_v42, %v2854_v29  ;;  %v1672_v2 = vpop.f32.mrb[59].mxu0  ;;  %v1928_v14 = vpop.f32.mrb[59].mxu1  ;;  %v3617_v0 = vld [vmem:[#allocation16_spill] sm:$0xff]  ;;  %v3618_v55 = vld [vmem:[#allocation17_spill] sm:$0xff] }
 0x199   : > { %v2610_v31 = vpack.c.bf16 %v2112_v12, %v2111_v3  ;;  %v2044_v32 = vmax.f32 %v1980_v27, %v2012_v13  ;;  %v1981_v44 = vmax.f32 %v3609_v43, %v1672_v2  ;;  %v2013_v22 = vmax.f32 %v3610_v21, %v1928_v14 }
 0x19a   : > { %2647 = vst [vmem:[%s3475_s22 + $0x58] sm:$0xff] %v2615_v30   ;;  %v2085_v45 = vadd.f32 %v3457_v5, %v2046_v19  ;;  %v2047_v46 = vmax.f32 %v1983_v20, %v2015_v57 }
 0x19b   : > { %2646 = vst [vmem:[%s3475_s22 + $0x50] sm:$0xff] %v2610_v31   ;;  %v2083_v4 = vadd.f32 %v3457_v5, %v2044_v32  ;;  %v2045_v6 = vmax.f32 %v1981_v44, %v2013_v22 }
 0x19c   : > { %v2086_v7 = vadd.f32 %v3457_v5, %v2047_v46  ;;  %v2117_v23 = vmax.f32 %v2085_v45, 0.0 }
 0x19d   : > { %v2084_v15 = vadd.f32 %v3457_v5, %v2045_v6  ;;  %v2793_v47 = vpop.f32.mrb[60].mxu0  ;;  %v2857_v48 = vpop.f32.mrb[60].mxu1  ;;  %v2115_v59 = vmax.f32 %v2083_v4, 0.0 }
 0x19e   : > { %v2118_v24 = vmax.f32 %v2086_v7, 0.0  ;;  %v1986_v8 = vmax.f32 %v3611_v16, %v2793_v47  ;;  %v2018_v33 = vmax.f32 %v3612_v61, %v2857_v48  ;;  %v1685_v58 = vpop.f32.mrb[61].mxu0  ;;  %v1941_v34 = vpop.f32.mrb[61].mxu1 }
 0x19f   : > { %v2116_v60 = vmax.f32 %v2084_v15, 0.0  ;;  %v1984_v49 = vmax.f32 %v3613_v9, %v1685_v58  ;;  %v2016_v50 = vmax.f32 %v3614_v10, %v1941_v34  ;;  %v2794_v35 = vpop.f32.mrb[62].mxu0  ;;  %v2858_v36 = vpop.f32.mrb[62].mxu1 }
 0x1a0   : > { %v2625_v17 = vpack.c.bf16 %v2118_v24, %v2117_v23  ;;  %v2050_v63 = vmax.f32 %v1986_v8, %v2018_v33  ;;  %v1987_v52 = vmax.f32 %v3615_v51, %v2794_v35  ;;  %v2019_v38 = vmax.f32 %v3616_v37, %v2858_v36  ;;  %v1688_v53 = vpop.f32.mrb[63].mxu0  ;;  %v1944_v54 = vpop.f32.mrb[63].mxu1 }
 0x1a1   : > { %v2620_v18 = vpack.c.bf16 %v2116_v60, %v2115_v59  ;;  %v2048_v25 = vmax.f32 %v1984_v49, %v2016_v50  ;;  %v1985_v26 = vmax.f32 %v3617_v0, %v1688_v53  ;;  %v2017_v39 = vmax.f32 %v3618_v55, %v1944_v54 }
 0x1a2   : > { %2649 = vst [vmem:[%s3475_s22 + $0x68] sm:$0xff] %v2625_v17   ;;  %v2089_v56 = vadd.f32 %v3457_v5, %v2050_v63  ;;  %v2051_v40 = vmax.f32 %v1987_v52, %v2019_v38 }
 0x1a3   : > { %2648 = vst [vmem:[%s3475_s22 + $0x60] sm:$0xff] %v2620_v18   ;;  %v2087_v11 = vadd.f32 %v3457_v5, %v2048_v25  ;;  %v2049_v3 = vmax.f32 %v1985_v26, %v2017_v39 }
 0x1a4   : > { %v2090_v12 = vadd.f32 %v3457_v5, %v2051_v40  ;;  %v2121_v27 = vmax.f32 %v2089_v56, 0.0 }
 0x1a5   : > { %v2088_v62 = vadd.f32 %v3457_v5, %v2049_v3  ;;  %v2119_v13 = vmax.f32 %v2087_v11, 0.0 }
 0x1a6   : > { %v2122_v28 = vmax.f32 %v2090_v12, 0.0 }
 0x1a7   : > { %v2120_v1 = vmax.f32 %v2088_v62, 0.0 }
 0x1a8   : > { %v2635_v29 = vpack.c.bf16 %v2122_v28, %v2121_v27 }
 0x1a9   : > { %v2630_v30 = vpack.c.bf16 %v2120_v1, %v2119_v13 }
 0x1aa   : > { %2651 = vst [vmem:[%s3475_s22 + $0x78] sm:$0xff] %v2635_v29  }
 0x1ab   : > { %2650 = vst [vmem:[%s3475_s22 + $0x70] sm:$0xff] %v2630_v30  }
 0x1ac PF: > { %p10_p9 = scmp.ge.s32.totalorder %s3025_s16, 4   ;;  %s3619_s12 = smov %s2981_s13 }
 0x1ad   : > { %s3620_s13 = smov %s3034_s19  ;;  %s3621_s14 = smov %s3025_s16 }
 0x1ae   :  { %12 = sbr.rel (!%p10_p9) target bundleno = 2 (0x2), region = 108 }

// kernel: forward.3
= control target key start
LH: loop header
LB: loop body
LE: loop exit
PB: predicated region body
PF: predicated region fallthrough
CT: control target
= control target key end

     0   :  { %v11708_v32 = vmov 1966171168   ;;  %v362_v34 = vlaneseq  ;;  %s15987_s0 = inlined_call_operand.vmem [shape: bf16[2,1280], index: 0, kind: input, shape index: {}]   ;;  %s15988_s1 = inlined_call_operand.vmem [shape: bf16[1280,2048], index: 1, kind: input, shape index: {}]   ;;  %s15989_s2 = inlined_call_operand.vmem [shape: f32[1,512], index: 2, kind: input, shape index: {}]   ;;  %s15990_s3 = inlined_call_operand.vmem [shape: bf16[512,128], index: 3, kind: input, shape index: {}]   ;;  %s15991_s4 = inlined_call_operand.vmem [shape: f32[1,128], index: 4, kind: input, shape index: {}]   ;;  %s15992_s5 = inlined_call_operand.vmem [shape: bf16[128,128], index: 5, kind: input, shape index: {}]   ;;  %s15993_s6 = inlined_call_operand.vmem [shape: f32[1,128], index: 6, kind: input, shape index: {}]   ;;  %s15994_s7 = inlined_call_operand.vmem [shape: bf16[128,128], index: 7, kind: input, shape index: {}]   ;;  %s15995_s8 = inlined_call_operand.vmem [shape: f32[1,128], index: 8, kind: input, shape index: {}]   ;;  %s15996_s9 = inlined_call_operand.hbm [shape: f32[2,128], index: 9, kind: output, shape index: {}]  }
   0x1   :  { %v36_v0 = vld [vmem:[%s15988_s1] sm:$0xff]  ;;  %v37_v2 = vld [vmem:[%s15988_s1 + $0x8] sm:$0xff]  ;;  %v360_v33 = vunpack.c.l.s4 %v11708_v32 }
   0x2   :  { %v38_v1 = vld [vmem:[%s15988_s1 + $0x40] sm:$0xff]  ;;  %v39_v4 = vld [vmem:[%s15988_s1 + $0x48] sm:$0xff]  ;;  %v11828_v44 = vshrl.u32 %v362_v34, 7 }
   0x3   :  { %v10071_v3 = vcombine.high %v36_v0, %v38_v1  ;;  %v10070_v5 = vcombine.low %v36_v0, %v38_v1  ;;  %v40_v6 = vld [vmem:[%s15988_s1 + $0x80] sm:$0xff]  ;;  %v10073_v8 = vcombine.high %v37_v2, %v39_v4  ;;  %v10072_v9 = vcombine.low %v37_v2, %v39_v4  ;;  %v41_v11 = vld [vmem:[%s15988_s1 + $0x88] sm:$0xff] }
   0x4   :  { %v42_v7 = vld [vmem:[%s15988_s1 + $0xc0] sm:$0xff]  ;;  %v43_v12 = vld [vmem:[%s15988_s1 + $0xc8] sm:$0xff]  ;;  %v361_v43 = vunpack.c.0.s8 %v360_v33 }
   0x5   :  { %v10075_v10 = vcombine.high %v40_v6, %v42_v7  ;;  %v44_v13 = vld [vmem:[%s15988_s1 + $0x100] sm:$0xff]  ;;  %2039 = vmatprep.subr.bf16.mxu0 %v10071_v3  ;;  %v10077_v14 = vcombine.high %v41_v11, %v43_v12  ;;  %v45_v16 = vld [vmem:[%s15988_s1 + $0x108] sm:$0xff]  ;;  %2244 = vmatprep.subr.bf16.mxu1 %v10073_v8  ;;  %v10074_v18 = vcombine.low %v40_v6, %v42_v7 }
   0x6   :  { %v46_v15 = vld [vmem:[%s15988_s1 + $0x140] sm:$0xff]  ;;  %v47_v17 = vld [vmem:[%s15988_s1 + $0x148] sm:$0xff]  ;;  %2040 = vmatpush1.bf16.msra.mxu0 %v10070_v5  ;;  %2245 = vmatpush1.bf16.msra.mxu1 %v10072_v9  ;;  %v10076_v19 = vcombine.low %v41_v11, %v43_v12  ;;  %v11843_v53 = vsub.s32 %v361_v43, %v11828_v44 }
   0x7   :  { %2041 = vmatprep.subr.bf16.mxu0 %v10075_v10  ;;  %v10079_v20 = vcombine.high %v44_v13, %v46_v15  ;;  %2246 = vmatprep.subr.bf16.mxu1 %v10077_v14  ;;  %v10081_v21 = vcombine.high %v45_v16, %v47_v17  ;;  %v48_v22 = vld [vmem:[%s15988_s1 + $0x180] sm:$0xff]  ;;  %v49_v24 = vld [vmem:[%s15988_s1 + $0x188] sm:$0xff]  ;;  %v10078_v26 = vcombine.low %v44_v13, %v46_v15 }
   0x8   :  { %v50_v23 = vld [vmem:[%s15988_s1 + $0x1c0] sm:$0xff]  ;;  %v51_v25 = vld [vmem:[%s15988_s1 + $0x1c8] sm:$0xff]  ;;  %v10080_v27 = vcombine.low %v45_v16, %v47_v17 }
   0x9   :  { %v10083_v28 = vcombine.high %v48_v22, %v50_v23  ;;  %v10085_v29 = vcombine.high %v49_v24, %v51_v25  ;;  %v52_v30 = vld [vmem:[%s15988_s1 + $0x200] sm:$0xff]  ;;  %v53_v35 = vld [vmem:[%s15988_s1 + $0x208] sm:$0xff]  ;;  %v10082_v37 = vcombine.low %v48_v22, %v50_v23  ;;  %v10084_v38 = vcombine.low %v49_v24, %v51_v25 }
   0xa   :  { %2042 = vmatpush1.bf16.msra.mxu0 %v10074_v18  ;;  %2247 = vmatpush1.bf16.msra.mxu1 %v10076_v19  ;;  %v54_v31 = vld [vmem:[%s15988_s1 + $0x240] sm:$0xff]  ;;  %v55_v36 = vld [vmem:[%s15988_s1 + $0x248] sm:$0xff] }
   0xb   :  { %2043 = vmatprep.subr.bf16.mxu0 %v10079_v20  ;;  %2248 = vmatprep.subr.bf16.mxu1 %v10081_v21  ;;  %v10087_v39 = vcombine.high %v52_v30, %v54_v31  ;;  %v10089_v40 = vcombine.high %v53_v35, %v55_v36  ;;  %v56_v41 = vld [vmem:[%s15988_s1 + $0x280] sm:$0xff]  ;;  %v57_v45 = vld [vmem:[%s15988_s1 + $0x288] sm:$0xff]  ;;  %v10086_v47 = vcombine.low %v52_v30, %v54_v31 }
   0xc   :  { %v58_v42 = vld [vmem:[%s15988_s1 + $0x2c0] sm:$0xff]  ;;  %v59_v46 = vld [vmem:[%s15988_s1 + $0x2c8] sm:$0xff]  ;;  %v10088_v48 = vcombine.low %v53_v35, %v55_v36 }
   0xd   :  { %v10091_v49 = vcombine.high %v56_v41, %v58_v42  ;;  %v10093_v50 = vcombine.high %v57_v45, %v59_v46  ;;  %v60_v51 = vld [vmem:[%s15988_s1 + $0x300] sm:$0xff]  ;;  %v61_v54 = vld [vmem:[%s15988_s1 + $0x308] sm:$0xff]  ;;  %v10090_v56 = vcombine.low %v56_v41, %v58_v42  ;;  %v10092_v57 = vcombine.low %v57_v45, %v59_v46 }
   0xe   :  { %2044 = vmatpush1.bf16.msra.mxu0 %v10078_v26  ;;  %2249 = vmatpush1.bf16.msra.mxu1 %v10080_v27  ;;  %v62_v52 = vld [vmem:[%s15988_s1 + $0x340] sm:$0xff]  ;;  %v63_v55 = vld [vmem:[%s15988_s1 + $0x348] sm:$0xff] }
   0xf   :  { %2045 = vmatprep.subr.bf16.mxu0 %v10083_v28  ;;  %2250 = vmatprep.subr.bf16.mxu1 %v10085_v29  ;;  %v10095_v58 = vcombine.high %v60_v51, %v62_v52  ;;  %v11854_v59 = vld [vmem:[%s15987_s0] sm:$0xff]  ;;  %v10097_v60 = vcombine.high %v61_v54, %v63_v55  ;;  %v65_v0 = vld [vmem:[%s15988_s1 + $0x388] sm:$0xff]  ;;  %v10094_v2 = vcombine.low %v60_v51, %v62_v52 }
  0x10   :  { %v64_v61 = vld [vmem:[%s15988_s1 + $0x380] sm:$0xff]  ;;  %v11864_v63 = vrot.slane %v11854_v59, %v11843_v53  ;;  %v67_v1 = vld [vmem:[%s15988_s1 + $0x3c8] sm:$0xff]  ;;  %v10096_v4 = vcombine.low %v61_v54, %v63_v55 }
  0x11   :  { %v66_v62 = vld [vmem:[%s15988_s1 + $0x3c0] sm:$0xff]  ;;  %v10101_v6 = vcombine.high %v65_v0, %v67_v1  ;;  %v69_v10 = vld [vmem:[%s15988_s1 + $0x408] sm:$0xff]  ;;  %v10100_v13 = vcombine.low %v65_v0, %v67_v1 }
  0x12   :  { %2046 = vmatpush1.bf16.msra.mxu0 %v10082_v37  ;;  %2251 = vmatpush1.bf16.msra.mxu1 %v10084_v38  ;;  %v373_v3 = vcombine.high %v11864_v63, %v11864_v63  ;;  %v10099_v5 = vcombine.high %v64_v61, %v66_v62  ;;  %v68_v7 = vld [vmem:[%s15988_s1 + $0x400] sm:$0xff]  ;;  %v71_v11 = vld [vmem:[%s15988_s1 + $0x448] sm:$0xff]  ;;  %v10098_v12 = vcombine.low %v64_v61, %v66_v62 }
  0x13   :  { %2047 = vmatprep.subr.bf16.mxu0 %v10087_v39  ;;  %2252 = vmatprep.subr.bf16.mxu1 %v10089_v40  ;;  %v70_v8 = vld [vmem:[%s15988_s1 + $0x440] sm:$0xff]  ;;  %v10105_v15 = vcombine.high %v69_v10, %v71_v11  ;;  %v73_v18 = vld [vmem:[%s15988_s1 + $0x488] sm:$0xff]  ;;  %v10104_v21 = vcombine.low %v69_v10, %v71_v11 }
  0x14   :  { %v11881_v9 = vrot.slane %v373_v3, %v11843_v53  ;;  %v10103_v14 = vcombine.high %v68_v7, %v70_v8  ;;  %v72_v16 = vld [vmem:[%s15988_s1 + $0x480] sm:$0xff]  ;;  %v75_v19 = vld [vmem:[%s15988_s1 + $0x4c8] sm:$0xff]  ;;  %v10102_v20 = vcombine.low %v68_v7, %v70_v8 }
  0x15   :  { %v74_v17 = vld [vmem:[%s15988_s1 + $0x4c0] sm:$0xff]  ;;  %v10109_v23 = vcombine.high %v73_v18, %v75_v19  ;;  %v77_v26 = vld [vmem:[%s15988_s1 + $0x508] sm:$0xff]  ;;  %v10108_v29 = vcombine.low %v73_v18, %v75_v19 }
  0x16   :  { %2048 = vmatpush1.bf16.msra.mxu0 %v10086_v47  ;;  %2253 = vmatpush1.bf16.msra.mxu1 %v10088_v48  ;;  %v10107_v22 = vcombine.high %v72_v16, %v74_v17  ;;  %v76_v24 = vld [vmem:[%s15988_s1 + $0x500] sm:$0xff]  ;;  %v79_v27 = vld [vmem:[%s15988_s1 + $0x548] sm:$0xff]  ;;  %v10106_v28 = vcombine.low %v72_v16, %v74_v17 }
  0x17   :  { %2049 = vmatprep.subr.bf16.mxu0 %v10091_v49  ;;  %2254 = vmatprep.subr.bf16.mxu1 %v10093_v50  ;;  %v78_v25 = vld [vmem:[%s15988_s1 + $0x540] sm:$0xff]  ;;  %v10113_v31 = vcombine.high %v77_v26, %v79_v27  ;;  %v81_v34 = vld [vmem:[%s15988_s1 + $0x588] sm:$0xff]  ;;  %v10112_v37 = vcombine.low %v77_v26, %v79_v27 }
  0x18   :  { %2071 = vmatprep.mubr.bf16.mxu0 %v11881_v9  ;;  %2276 = vmatprep.mubr.bf16.mxu1 %v11881_v9  ;;  %v10111_v30 = vcombine.high %v76_v24, %v78_v25  ;;  %v80_v32 = vld [vmem:[%s15988_s1 + $0x580] sm:$0xff]  ;;  %v83_v35 = vld [vmem:[%s15988_s1 + $0x5c8] sm:$0xff]  ;;  %v10110_v36 = vcombine.low %v76_v24, %v78_v25 }
  0x19   :  { %v82_v33 = vld [vmem:[%s15988_s1 + $0x5c0] sm:$0xff]  ;;  %v10117_v39 = vcombine.high %v81_v34, %v83_v35  ;;  %v85_v42 = vld [vmem:[%s15988_s1 + $0x608] sm:$0xff]  ;;  %v10116_v46 = vcombine.low %v81_v34, %v83_v35 }
  0x1a   :  { %2050 = vmatpush1.bf16.msra.mxu0 %v10090_v56  ;;  %2255 = vmatpush1.bf16.msra.mxu1 %v10092_v57  ;;  %v10115_v38 = vcombine.high %v80_v32, %v82_v33  ;;  %v84_v40 = vld [vmem:[%s15988_s1 + $0x600] sm:$0xff]  ;;  %v87_v43 = vld [vmem:[%s15988_s1 + $0x648] sm:$0xff]  ;;  %v10114_v45 = vcombine.low %v80_v32, %v82_v33  ;;  %v12017_v33 = vcombine.high %v11881_v9, %v11881_v9 }
  0x1b   :  { %2051 = vmatprep.subr.bf16.mxu0 %v10095_v58  ;;  %2256 = vmatprep.subr.bf16.mxu1 %v10097_v60  ;;  %v86_v41 = vld [vmem:[%s15988_s1 + $0x640] sm:$0xff]  ;;  %v10121_v48 = vcombine.high %v85_v42, %v87_v43  ;;  %v89_v51 = vld [vmem:[%s15988_s1 + $0x688] sm:$0xff]  ;;  %v10120_v55 = vcombine.low %v85_v42, %v87_v43 }
  0x1c   :  { %v10119_v47 = vcombine.high %v84_v40, %v86_v41  ;;  %v88_v49 = vld [vmem:[%s15988_s1 + $0x680] sm:$0xff]  ;;  %v91_v52 = vld [vmem:[%s15988_s1 + $0x6c8] sm:$0xff]  ;;  %v10118_v54 = vcombine.low %v84_v40, %v86_v41 }
  0x1d   :  { %v90_v50 = vld [vmem:[%s15988_s1 + $0x6c0] sm:$0xff]  ;;  %v10125_v57 = vcombine.high %v89_v51, %v91_v52  ;;  %v93_v61 = vld [vmem:[%s15988_s1 + $0x708] sm:$0xff]  ;;  %v10124_v1 = vcombine.low %v89_v51, %v91_v52 }
  0x1e   :  { %2052 = vmatpush1.bf16.msra.mxu0 %v10094_v2  ;;  %2257 = vmatpush1.bf16.msra.mxu1 %v10096_v4  ;;  %v10123_v56 = vcombine.high %v88_v49, %v90_v50  ;;  %v92_v58 = vld [vmem:[%s15988_s1 + $0x700] sm:$0xff]  ;;  %v95_v62 = vld [vmem:[%s15988_s1 + $0x748] sm:$0xff]  ;;  %v10122_v0 = vcombine.low %v88_v49, %v90_v50 }
  0x1f   :  { %2053 = vmatprep.subr.bf16.mxu0 %v10099_v5  ;;  %2258 = vmatprep.subr.bf16.mxu1 %v10101_v6  ;;  %v94_v60 = vld [vmem:[%s15988_s1 + $0x740] sm:$0xff]  ;;  %v10129_v3 = vcombine.high %v93_v61, %v95_v62  ;;  %v97_v6 = vld [vmem:[%s15988_s1 + $0x788] sm:$0xff]  ;;  %v10128_v10 = vcombine.low %v93_v61, %v95_v62 }
  0x20   :  { %v10127_v2 = vcombine.high %v92_v58, %v94_v60  ;;  %v96_v4 = vld [vmem:[%s15988_s1 + $0x780] sm:$0xff]  ;;  %v99_v7 = vld [vmem:[%s15988_s1 + $0x7c8] sm:$0xff]  ;;  %v10126_v8 = vcombine.low %v92_v58, %v94_v60 }
  0x21   :  { %v98_v5 = vld [vmem:[%s15988_s1 + $0x7c0] sm:$0xff]  ;;  %v103_v16 = vld [vmem:[%s15988_s1 + $0x848] sm:$0xff]  ;;  %v10132_v18 = vcombine.low %v97_v6, %v99_v7 }
  0x22   :  { %2054 = vmatpush1.bf16.msra.mxu0 %v10098_v12  ;;  %2259 = vmatpush1.bf16.msra.mxu1 %v10100_v13  ;;  %v10131_v11 = vcombine.high %v96_v4, %v98_v5  ;;  %v10133_v12 = vcombine.high %v97_v6, %v99_v7  ;;  %v100_v13 = vld [vmem:[%s15988_s1 + $0x800] sm:$0xff]  ;;  %v10130_v17 = vcombine.low %v96_v4, %v98_v5  ;;  %v105_v24 = vld [vmem:[%s15988_s1 + $0x888] sm:$0xff] }
  0x23   :  { %2055 = vmatprep.subr.bf16.mxu0 %v10103_v14  ;;  %2260 = vmatprep.subr.bf16.mxu1 %v10105_v15  ;;  %v102_v14 = vld [vmem:[%s15988_s1 + $0x840] sm:$0xff]  ;;  %v101_v15 = vld [vmem:[%s15988_s1 + $0x808] sm:$0xff] }
  0x24   :  { %v10135_v19 = vcombine.high %v100_v13, %v102_v14  ;;  %v107_v25 = vld [vmem:[%s15988_s1 + $0x8c8] sm:$0xff]  ;;  %v10134_v26 = vcombine.low %v100_v13, %v102_v14  ;;  %v10136_v27 = vcombine.low %v101_v15, %v103_v16 }
  0x25   :  { %v111_v32 = vld [vmem:[%s15988_s1 + $0x948] sm:$0xff]  ;;  %v10140_v35 = vcombine.low %v105_v24, %v107_v25 }
  0x26   :  { %2056 = vmatpush1.bf16.msra.mxu0 %v10102_v20  ;;  %2261 = vmatpush1.bf16.msra.mxu1 %v10104_v21  ;;  %v10137_v20 = vcombine.high %v101_v15, %v103_v16  ;;  %v104_v21 = vld [vmem:[%s15988_s1 + $0x880] sm:$0xff]  ;;  %v115_v41 = vld [vmem:[%s15988_s1 + $0x9c8] sm:$0xff] }
  0x27   :  { %2057 = vmatprep.subr.bf16.mxu0 %v10107_v22  ;;  %2262 = vmatprep.subr.bf16.mxu1 %v10109_v23  ;;  %v106_v22 = vld [vmem:[%s15988_s1 + $0x8c0] sm:$0xff]  ;;  %v11995_v23 = vrot.slane %v11864_v63, %v11843_v53  ;;  %v119_v50 = vld [vmem:[%s15988_s1 + $0xa48] sm:$0xff] }
  0x28   :  { %v110_v63 = vld [vmem:[%s15988_s1 + $0x940] sm:$0xff]  ;;  %v10138_v34 = vcombine.low %v104_v21, %v106_v22  ;;  %v123_v60 = vld [vmem:[%s15988_s1 + $0xac8] sm:$0xff] }
  0x29   :  { %v127_v5 = vld [vmem:[%s15988_s1 + $0xb48] sm:$0xff] }
  0x2a   :  { %2058 = vmatpush1.bf16.msra.mxu0 %v10106_v28  ;;  %2263 = vmatpush1.bf16.msra.mxu1 %v10108_v29  ;;  %v10139_v28 = vcombine.high %v104_v21, %v106_v22  ;;  %v108_v29 = vld [vmem:[%s15988_s1 + $0x900] sm:$0xff]  ;;  %v131_v14 = vld [vmem:[%s15988_s1 + $0xbc8] sm:$0xff] }
  0x2b   :  { %2059 = vmatprep.subr.bf16.mxu0 %v10111_v30  ;;  %2264 = vmatprep.subr.bf16.mxu1 %v10113_v31  ;;  %v109_v30 = vld [vmem:[%s15988_s1 + $0x908] sm:$0xff]  ;;  %v10141_v31 = vcombine.high %v105_v24, %v107_v25  ;;  %v10142_v42 = vcombine.low %v108_v29, %v110_v63 }
  0x2c   :  { %v10145_v40 = vcombine.high %v109_v30, %v111_v32  ;;  %v10144_v43 = vcombine.low %v109_v30, %v111_v32  ;;  %v135_v22 = vld [vmem:[%s15988_s1 + $0xc48] sm:$0xff] }
  0x2d   :  { %v139_v30 = vld [vmem:[%s15988_s1 + $0xcc8] sm:$0xff] }
  0x2e   :  { %2060 = vmatpush1.bf16.msra.mxu0 %v10110_v36  ;;  %2265 = vmatpush1.bf16.msra.mxu1 %v10112_v37  ;;  %v10143_v36 = vcombine.high %v108_v29, %v110_v63  ;;  %v112_v37 = vld [vmem:[%s15988_s1 + $0x980] sm:$0xff]  ;;  %v137_v29 = vld [vmem:[%s15988_s1 + $0xc88] sm:$0xff] }
  0x2f   :  { %2061 = vmatprep.subr.bf16.mxu0 %v10115_v38  ;;  %2266 = vmatprep.subr.bf16.mxu1 %v10117_v39  ;;  %v114_v38 = vld [vmem:[%s15988_s1 + $0x9c0] sm:$0xff]  ;;  %v113_v39 = vld [vmem:[%s15988_s1 + $0x988] sm:$0xff] }
  0x30   :  { %v10149_v49 = vcombine.high %v113_v39, %v115_v41  ;;  %v10146_v51 = vcombine.low %v112_v37, %v114_v38  ;;  %v10148_v52 = vcombine.low %v113_v39, %v115_v41  ;;  %v143_v39 = vld [vmem:[%s15988_s1 + $0xd48] sm:$0xff]  ;;  %v10172_v41 = vcombine.low %v137_v29, %v139_v30 }
  0x32   :  { %2062 = vmatpush1.bf16.msra.mxu0 %v10114_v45  ;;  %2267 = vmatpush1.bf16.msra.mxu1 %v10116_v46  ;;  %v10147_v45 = vcombine.high %v112_v37, %v114_v38  ;;  %v116_v46 = vld [vmem:[%s15988_s1 + $0xa00] sm:$0xff]  ;;  %v141_v37 = vld [vmem:[%s15988_s1 + $0xd08] sm:$0xff]  ;;  %v10173_v38 = vcombine.high %v137_v29, %v139_v30 }
  0x33   :  { %2063 = vmatprep.subr.bf16.mxu0 %v10119_v47  ;;  %2268 = vmatprep.subr.bf16.mxu1 %v10121_v48  ;;  %v118_v47 = vld [vmem:[%s15988_s1 + $0xa40] sm:$0xff]  ;;  %v117_v48 = vld [vmem:[%s15988_s1 + $0xa08] sm:$0xff] }
  0x34   :  { %v10153_v58 = vcombine.high %v117_v48, %v119_v50  ;;  %v10150_v61 = vcombine.low %v116_v46, %v118_v47  ;;  %v10152_v62 = vcombine.low %v117_v48, %v119_v50  ;;  %v147_v48 = vld [vmem:[%s15988_s1 + $0xdc8] sm:$0xff]  ;;  %v10176_v50 = vcombine.low %v141_v37, %v143_v39 }
  0x36   :  { %2064 = vmatpush1.bf16.msra.mxu0 %v10118_v54  ;;  %2269 = vmatpush1.bf16.msra.mxu1 %v10120_v55  ;;  %v10151_v54 = vcombine.high %v116_v46, %v118_v47  ;;  %v120_v55 = vld [vmem:[%s15988_s1 + $0xa80] sm:$0xff]  ;;  %v145_v46 = vld [vmem:[%s15988_s1 + $0xd88] sm:$0xff]  ;;  %v10177_v47 = vcombine.high %v141_v37, %v143_v39 }
  0x37   :  { %2065 = vmatprep.subr.bf16.mxu0 %v10123_v56  ;;  %2270 = vmatprep.subr.bf16.mxu1 %v10125_v57  ;;  %v122_v56 = vld [vmem:[%s15988_s1 + $0xac0] sm:$0xff]  ;;  %v121_v57 = vld [vmem:[%s15988_s1 + $0xa88] sm:$0xff] }
  0x38   :  { %v10157_v4 = vcombine.high %v121_v57, %v123_v60  ;;  %v10154_v6 = vcombine.low %v120_v55, %v122_v56  ;;  %v10156_v7 = vcombine.low %v121_v57, %v123_v60  ;;  %v151_v57 = vld [vmem:[%s15988_s1 + $0xe48] sm:$0xff]  ;;  %v10180_v60 = vcombine.low %v145_v46, %v147_v48 }
  0x3a   :  { %2066 = vmatpush1.bf16.msra.mxu0 %v10122_v0  ;;  %2271 = vmatpush1.bf16.msra.mxu1 %v10124_v1  ;;  %v10155_v0 = vcombine.high %v120_v55, %v122_v56  ;;  %v124_v1 = vld [vmem:[%s15988_s1 + $0xb00] sm:$0xff]  ;;  %v149_v55 = vld [vmem:[%s15988_s1 + $0xe08] sm:$0xff]  ;;  %v10181_v56 = vcombine.high %v145_v46, %v147_v48 }
  0x3b   :  { %2067 = vmatprep.subr.bf16.mxu0 %v10127_v2  ;;  %2272 = vmatprep.subr.bf16.mxu1 %v10129_v3  ;;  %v126_v2 = vld [vmem:[%s15988_s1 + $0xb40] sm:$0xff]  ;;  %v125_v3 = vld [vmem:[%s15988_s1 + $0xb08] sm:$0xff] }
  0x3c   :  { %v10161_v13 = vcombine.high %v125_v3, %v127_v5  ;;  %v10158_v15 = vcombine.low %v124_v1, %v126_v2  ;;  %v10160_v16 = vcombine.low %v125_v3, %v127_v5  ;;  %v155_v3 = vld [vmem:[%s15988_s1 + $0xec8] sm:$0xff] }
  0x3e   :  { %2068 = vmatpush1.bf16.msra.mxu0 %v10126_v8  ;;  %2273 = vmatpush1.bf16.msra.mxu1 %v10128_v10  ;;  %v10159_v8 = vcombine.high %v124_v1, %v126_v2  ;;  %v128_v10 = vld [vmem:[%s15988_s1 + $0xb80] sm:$0xff]  ;;  %v153_v1 = vld [vmem:[%s15988_s1 + $0xe88] sm:$0xff]  ;;  %v10185_v2 = vcombine.high %v149_v55, %v151_v57 }
  0x3f   :  { %2069 = vmatprep.subr.bf16.mxu0 %v10131_v11  ;;  %2274 = vmatprep.subr.bf16.mxu1 %v10133_v12  ;;  %v130_v11 = vld [vmem:[%s15988_s1 + $0xbc0] sm:$0xff]  ;;  %v129_v12 = vld [vmem:[%s15988_s1 + $0xb88] sm:$0xff] }
  0x40   :  { %v10165_v21 = vcombine.high %v129_v12, %v131_v14  ;;  %v10162_v24 = vcombine.low %v128_v10, %v130_v11  ;;  %v10164_v25 = vcombine.low %v129_v12, %v131_v14 }
  0x42   :  { %2070 = vmatpush1.bf16.msra.mxu0 %v10130_v17  ;;  %2275 = vmatpush1.bf16.msra.mxu1 %v10132_v18  ;;  %v10163_v17 = vcombine.high %v128_v10, %v130_v11  ;;  %v132_v18 = vld [vmem:[%s15988_s1 + $0xc00] sm:$0xff] }
  0x43   :  { %2080 = vmatprep.subr.bf16.mxu0 %v10135_v19  ;;  %2285 = vmatprep.subr.bf16.mxu1 %v10137_v20  ;;  %v134_v19 = vld [vmem:[%s15988_s1 + $0xc40] sm:$0xff]  ;;  %v133_v20 = vld [vmem:[%s15988_s1 + $0xc08] sm:$0xff] }
  0x44   :  { %v10169_v63 = vcombine.high %v133_v20, %v135_v22  ;;  %v10168_v32 = vcombine.low %v133_v20, %v135_v22 }
  0x45   :  { %2072 = vmatmul.mubr.bf16.vlgmr.msra.gmra.mrb[0].mxu0 %v11995_v23  ;;  %2277 = vmatmul.mubr.bf16.vlgmr.msra.gmra.mrb[0].mxu1 %v11995_v23 }
  0x46   :  { %2081 = vmatpush1.bf16.msra.mxu0 %v10134_v26  ;;  %2286 = vmatpush1.bf16.msra.mxu1 %v10136_v27  ;;  %v10167_v26 = vcombine.high %v132_v18, %v134_v19  ;;  %v136_v27 = vld [vmem:[%s15988_s1 + $0xc80] sm:$0xff] }
  0x47   :  { %2082 = vmatprep.subr.bf16.mxu0 %v10139_v28  ;;  %2287 = vmatprep.subr.bf16.mxu1 %v10141_v31  ;;  %v138_v28 = vld [vmem:[%s15988_s1 + $0xcc0] sm:$0xff]  ;;  %v10166_v31 = vcombine.low %v132_v18, %v134_v19 }
  0x48   :  { %2112 = vmatprep.mubr.bf16.mxu0 %v12017_v33  ;;  %2317 = vmatprep.mubr.bf16.mxu1 %v12017_v33 }
  0x4a   :  { %2083 = vmatpush1.bf16.msra.mxu0 %v10138_v34  ;;  %2288 = vmatpush1.bf16.msra.mxu1 %v10140_v35  ;;  %v10171_v34 = vcombine.high %v136_v27, %v138_v28  ;;  %v140_v35 = vld [vmem:[%s15988_s1 + $0xd00] sm:$0xff] }
  0x4b   :  { %2084 = vmatprep.subr.bf16.mxu0 %v10143_v36  ;;  %2289 = vmatprep.subr.bf16.mxu1 %v10145_v40  ;;  %v142_v36 = vld [vmem:[%s15988_s1 + $0xd40] sm:$0xff]  ;;  %v10170_v40 = vcombine.low %v136_v27, %v138_v28 }
  0x4e   :  { %2085 = vmatpush1.bf16.msra.mxu0 %v10142_v42  ;;  %2290 = vmatpush1.bf16.msra.mxu1 %v10144_v43  ;;  %v10175_v42 = vcombine.high %v140_v35, %v142_v36  ;;  %v144_v43 = vld [vmem:[%s15988_s1 + $0xd80] sm:$0xff] }
  0x4f   :  { %2086 = vmatprep.subr.bf16.mxu0 %v10147_v45  ;;  %2291 = vmatprep.subr.bf16.mxu1 %v10149_v49  ;;  %v146_v45 = vld [vmem:[%s15988_s1 + $0xdc0] sm:$0xff]  ;;  %v10174_v49 = vcombine.low %v140_v35, %v142_v36 }
  0x52   :  { %2087 = vmatpush1.bf16.msra.mxu0 %v10146_v51  ;;  %2292 = vmatpush1.bf16.msra.mxu1 %v10148_v52  ;;  %v10179_v51 = vcombine.high %v144_v43, %v146_v45  ;;  %v148_v52 = vld [vmem:[%s15988_s1 + $0xe00] sm:$0xff] }
  0x53   :  { %2088 = vmatprep.subr.bf16.mxu0 %v10151_v54  ;;  %2293 = vmatprep.subr.bf16.mxu1 %v10153_v58  ;;  %v150_v54 = vld [vmem:[%s15988_s1 + $0xe40] sm:$0xff]  ;;  %v10178_v58 = vcombine.low %v144_v43, %v146_v45 }
  0x56   :  { %2089 = vmatpush1.bf16.msra.mxu0 %v10150_v61  ;;  %2294 = vmatpush1.bf16.msra.mxu1 %v10152_v62  ;;  %v10183_v61 = vcombine.high %v148_v52, %v150_v54  ;;  %v152_v62 = vld [vmem:[%s15988_s1 + $0xe80] sm:$0xff] }
  0x57   :  { %2090 = vmatprep.subr.bf16.mxu0 %v10155_v0  ;;  %2295 = vmatprep.subr.bf16.mxu1 %v10157_v4  ;;  %v154_v0 = vld [vmem:[%s15988_s1 + $0xec0] sm:$0xff]  ;;  %v10182_v4 = vcombine.low %v148_v52, %v150_v54 }
  0x5a   :  { %2091 = vmatpush1.bf16.msra.mxu0 %v10154_v6  ;;  %2296 = vmatpush1.bf16.msra.mxu1 %v10156_v7 }
  0x5b   :  { %2092 = vmatprep.subr.bf16.mxu0 %v10159_v8  ;;  %2297 = vmatprep.subr.bf16.mxu1 %v10161_v13 }
  0x5e   :  { %2093 = vmatpush1.bf16.msra.mxu0 %v10158_v15  ;;  %2298 = vmatpush1.bf16.msra.mxu1 %v10160_v16 }
  0x5f   :  { %2094 = vmatprep.subr.bf16.mxu0 %v10163_v17  ;;  %2299 = vmatprep.subr.bf16.mxu1 %v10165_v21 }
  0x62   :  { %2095 = vmatpush1.bf16.msra.mxu0 %v10162_v24  ;;  %2300 = vmatpush1.bf16.msra.mxu1 %v10164_v25 }
  0x63   :  { %2096 = vmatprep.subr.bf16.mxu0 %v10167_v26  ;;  %2301 = vmatprep.subr.bf16.mxu1 %v10169_v63 }
  0x66   :  { %2097 = vmatpush1.bf16.msra.mxu0 %v10166_v31  ;;  %2302 = vmatpush1.bf16.msra.mxu1 %v10168_v32 }
  0x67   :  { %2098 = vmatprep.subr.bf16.mxu0 %v10171_v34  ;;  %2303 = vmatprep.subr.bf16.mxu1 %v10173_v38 }
  0x6a   :  { %2099 = vmatpush1.bf16.msra.mxu0 %v10170_v40  ;;  %2304 = vmatpush1.bf16.msra.mxu1 %v10172_v41 }
  0x6b   :  { %2100 = vmatprep.subr.bf16.mxu0 %v10175_v42  ;;  %2305 = vmatprep.subr.bf16.mxu1 %v10177_v47 }
  0x6e   :  { %2101 = vmatpush1.bf16.msra.mxu0 %v10174_v49  ;;  %2306 = vmatpush1.bf16.msra.mxu1 %v10176_v50 }
  0x6f   :  { %2102 = vmatprep.subr.bf16.mxu0 %v10179_v51  ;;  %2307 = vmatprep.subr.bf16.mxu1 %v10181_v56 }
  0x72   :  { %2103 = vmatpush1.bf16.msra.mxu0 %v10178_v58 }
  0x73   :  { %14 = vsyncpa [#allocation3], 0  ;;  %2308 = vmatpush1.bf16.msra.mxu1 %v10180_v60  ;;  %2104 = vmatprep.subr.bf16.mxu0 %v10183_v61  ;;  %v10184_v5 = vcombine.low %v149_v55, %v151_v57  ;;  %v10187_v6 = vcombine.high %v152_v62, %v154_v0  ;;  %v10189_v7 = vcombine.high %v153_v1, %v155_v3  ;;  %v156_v8 = vld [vmem:[%s15988_s1 + $0xf00] sm:$0xff]  ;;  %v157_v11 = vld [vmem:[%s15988_s1 + $0xf08] sm:$0xff]  ;;  %vm11710_vm0 = vmmov 0   ;;  %s11711_s28 = smov [#allocation2]  }
  0x74   :  { %2309 = vmatprep.subr.bf16.mxu1 %v10185_v2  ;;  %v158_v10 = vld [vmem:[%s15988_s1 + $0xf40] sm:$0xff]  ;;  %v159_v12 = vld [vmem:[%s15988_s1 + $0xf48] sm:$0xff]  ;;  %v10186_v13 = vcombine.low %v152_v62, %v154_v0  ;;  %v10188_v14 = vcombine.low %v153_v1, %v155_v3  ;;  %v358_v19 = vcombine.high %v11854_v59, %v11854_v59  ;;  %v12206_v38 = vcombine.high %v11995_v23, %v11995_v23  ;;  %s10061_s29 = sshll.u32 %s11711_s28, 4  ;;  %s10062_s29 = int_to_ptr.vmem [resolvable:$true] %s10061_s29 }
  0x75   :  { %v10191_v15 = vcombine.high %v156_v8, %v158_v10  ;;  %v10193_v16 = vcombine.high %v157_v11, %v159_v12  ;;  %v160_v17 = vld [vmem:[%s15988_s1 + $0xf80] sm:$0xff]  ;;  %v161_v20 = vld [vmem:[%s15988_s1 + $0xf88] sm:$0xff]  ;;  %v10190_v22 = vcombine.low %v156_v8, %v158_v10  ;;  %v10192_v24 = vcombine.low %v157_v11, %v159_v12  ;;  %p11689_p1 = scmp.lt.s32.totalorder %s10062_s29, %s10062_s29 }
  0x76   :  { %2105 = vmatpush1.bf16.msra.mxu0 %v10182_v4  ;;  %v162_v18 = vld [vmem:[%s15988_s1 + $0xfc0] sm:$0xff]  ;;  %v163_v21 = vld [vmem:[%s15988_s1 + $0xfc8] sm:$0xff]  ;;  %v12188_v28 = vrot.slane %v358_v19, %v11843_v53 }
  0x77   :  { %2310 = vmatpush1.bf16.msra.mxu1 %v10184_v5  ;;  %2106 = vmatprep.subr.bf16.mxu0 %v10187_v6  ;;  %v10195_v25 = vcombine.high %v160_v17, %v162_v18  ;;  %v10197_v26 = vcombine.high %v161_v20, %v163_v21  ;;  %v164_v59 = vld [vmem:[%s15988_s1 + $0x1000] sm:$0xff]  ;;  %v165_v29 = vld [vmem:[%s15988_s1 + $0x1008] sm:$0xff]  ;;  %v10194_v30 = vcombine.low %v160_v17, %v162_v18 }
  0x78   :  { %2311 = vmatprep.subr.bf16.mxu1 %v10189_v7  ;;  %v166_v27 = vld [vmem:[%s15988_s1 + $0x1040] sm:$0xff]  ;;  %v167_v63 = vld [vmem:[%s15988_s1 + $0x1048] sm:$0xff]  ;;  %v10196_v31 = vcombine.low %v161_v20, %v163_v21  ;;  %v374_v37 = vcombine.high %v12188_v28, %v12188_v28 }
  0x79   :  { %v10199_v32 = vcombine.high %v164_v59, %v166_v27  ;;  %v10201_v34 = vcombine.high %v165_v29, %v167_v63  ;;  %v168_v35 = vld [vmem:[%s15988_s1 + $0x1080] sm:$0xff]  ;;  %v169_v39 = vld [vmem:[%s15988_s1 + $0x1088] sm:$0xff]  ;;  %v10198_v41 = vcombine.low %v164_v59, %v166_v27  ;;  %v10200_v42 = vcombine.low %v165_v29, %v167_v63 }
  0x7a   :  { %2107 = vmatpush1.bf16.msra.mxu0 %v10186_v13  ;;  %v170_v36 = vld [vmem:[%s15988_s1 + $0x10c0] sm:$0xff]  ;;  %v171_v40 = vld [vmem:[%s15988_s1 + $0x10c8] sm:$0xff]  ;;  %v12221_v48 = vrot.slane %v374_v37, %v11843_v53 }
  0x7b   :  { %2312 = vmatpush1.bf16.msra.mxu1 %v10188_v14  ;;  %2108 = vmatprep.subr.bf16.mxu0 %v10191_v15  ;;  %v10203_v43 = vcombine.high %v168_v35, %v170_v36  ;;  %v10205_v45 = vcombine.high %v169_v39, %v171_v40  ;;  %v172_v46 = vld [vmem:[%s15988_s1 + $0x1100] sm:$0xff]  ;;  %v173_v49 = vld [vmem:[%s15988_s1 + $0x1108] sm:$0xff]  ;;  %v10202_v51 = vcombine.low %v168_v35, %v170_v36 }
  0x7c   :  { %2313 = vmatprep.subr.bf16.mxu1 %v10193_v16  ;;  %v174_v47 = vld [vmem:[%s15988_s1 + $0x1140] sm:$0xff]  ;;  %v175_v50 = vld [vmem:[%s15988_s1 + $0x1148] sm:$0xff]  ;;  %v10204_v52 = vcombine.low %v169_v39, %v171_v40 }
  0x7d   :  { %v10207_v54 = vcombine.high %v172_v46, %v174_v47  ;;  %v10209_v55 = vcombine.high %v173_v49, %v175_v50  ;;  %v176_v56 = vld [vmem:[%s15988_s1 + $0x1180] sm:$0xff]  ;;  %v177_v58 = vld [vmem:[%s15988_s1 + $0x1188] sm:$0xff]  ;;  %v10206_v61 = vcombine.low %v172_v46, %v174_v47  ;;  %v10208_v62 = vcombine.low %v173_v49, %v175_v50 }
  0x7e   :  { %2109 = vmatpush1.bf16.msra.mxu0 %v10190_v22  ;;  %v178_v57 = vld [vmem:[%s15988_s1 + $0x11c0] sm:$0xff]  ;;  %v179_v60 = vld [vmem:[%s15988_s1 + $0x11c8] sm:$0xff] }
  0x7f   :  { %2314 = vmatpush1.bf16.msra.mxu1 %v10192_v24  ;;  %2110 = vmatprep.subr.bf16.mxu0 %v10195_v25  ;;  %v10211_v0 = vcombine.high %v176_v56, %v178_v57  ;;  %v10213_v1 = vcombine.high %v177_v58, %v179_v60  ;;  %v180_v2 = vld [vmem:[%s15988_s1 + $0x1200] sm:$0xff]  ;;  %v181_v4 = vld [vmem:[%s15988_s1 + $0x1208] sm:$0xff]  ;;  %v10210_v6 = vcombine.low %v176_v56, %v178_v57 }
  0x80   :  { %2315 = vmatprep.subr.bf16.mxu1 %v10197_v26  ;;  %v182_v3 = vld [vmem:[%s15988_s1 + $0x1240] sm:$0xff]  ;;  %v183_v5 = vld [vmem:[%s15988_s1 + $0x1248] sm:$0xff]  ;;  %v10212_v7 = vcombine.low %v177_v58, %v179_v60 }
  0x81   :  { %v10215_v8 = vcombine.high %v180_v2, %v182_v3  ;;  %v10217_v10 = vcombine.high %v181_v4, %v183_v5  ;;  %v184_v11 = vld [vmem:[%s15988_s1 + $0x1280] sm:$0xff]  ;;  %v185_v13 = vld [vmem:[%s15988_s1 + $0x1288] sm:$0xff]  ;;  %v10214_v15 = vcombine.low %v180_v2, %v182_v3  ;;  %v10216_v16 = vcombine.low %v181_v4, %v183_v5 }
  0x82   :  { %2111 = vmatpush1.bf16.msra.mxu0 %v10194_v30  ;;  %v186_v12 = vld [vmem:[%s15988_s1 + $0x12c0] sm:$0xff]  ;;  %v187_v14 = vld [vmem:[%s15988_s1 + $0x12c8] sm:$0xff] }
  0x83   :  { %2316 = vmatpush1.bf16.msra.mxu1 %v10196_v31  ;;  %2121 = vmatprep.subr.bf16.mxu0 %v10199_v32  ;;  %v10219_v17 = vcombine.high %v184_v11, %v186_v12  ;;  %v10221_v18 = vcombine.high %v185_v13, %v187_v14  ;;  %v188_v19 = vld [vmem:[%s15988_s1 + $0x1300] sm:$0xff]  ;;  %v189_v21 = vld [vmem:[%s15988_s1 + $0x1308] sm:$0xff]  ;;  %v10218_v24 = vcombine.low %v184_v11, %v186_v12 }
  0x84   :  { %2326 = vmatprep.subr.bf16.mxu1 %v10201_v34  ;;  %v190_v20 = vld [vmem:[%s15988_s1 + $0x1340] sm:$0xff]  ;;  %v191_v22 = vld [vmem:[%s15988_s1 + $0x1348] sm:$0xff]  ;;  %v10220_v25 = vcombine.low %v185_v13, %v187_v14 }
  0x85   :  { %2113 = vmatmul.mubr.bf16.vlgmr.msra.gmra.mrb[0].mxu0 %v12206_v38  ;;  %v10223_v26 = vcombine.high %v188_v19, %v190_v20  ;;  %v10225_v59 = vcombine.high %v189_v21, %v191_v22  ;;  %v192_v27 = vld [vmem:[%s15988_s1 + $0x1380] sm:$0xff]  ;;  %v193_v63 = vld [vmem:[%s15988_s1 + $0x1388] sm:$0xff]  ;;  %v10222_v31 = vcombine.low %v188_v19, %v190_v20  ;;  %v10224_v32 = vcombine.low %v189_v21, %v191_v22 }
  0x86   :  { %2122 = vmatpush1.bf16.msra.mxu0 %v10198_v41  ;;  %2318 = vmatmul.mubr.bf16.vlgmr.msra.gmra.mrb[0].mxu1 %v12206_v38  ;;  %v194_v29 = vld [vmem:[%s15988_s1 + $0x13c0] sm:$0xff]  ;;  %v195_v30 = vld [vmem:[%s15988_s1 + $0x13c8] sm:$0xff] }
  0x87   :  { %2327 = vmatpush1.bf16.msra.mxu1 %v10200_v42  ;;  %2123 = vmatprep.subr.bf16.mxu0 %v10203_v43  ;;  %v10227_v34 = vcombine.high %v192_v27, %v194_v29  ;;  %v10229_v35 = vcombine.high %v193_v63, %v195_v30  ;;  %v196_v36 = vld [vmem:[%s15988_s1 + $0x1400] sm:$0xff]  ;;  %v197_v39 = vld [vmem:[%s15988_s1 + $0x1408] sm:$0xff]  ;;  %v10226_v41 = vcombine.low %v192_v27, %v194_v29 }
  0x88   :  { %2328 = vmatprep.subr.bf16.mxu1 %v10205_v45  ;;  %2153 = vmatprep.mubr.bf16.mxu0 %v12221_v48  ;;  %v198_v37 = vld [vmem:[%s15988_s1 + $0x1440] sm:$0xff]  ;;  %v199_v40 = vld [vmem:[%s15988_s1 + $0x1448] sm:$0xff]  ;;  %v10228_v42 = vcombine.low %v193_v63, %v195_v30 }
  0x89   :  { %2358 = vmatprep.mubr.bf16.mxu1 %v12221_v48  ;;  %v10231_v43 = vcombine.high %v196_v36, %v198_v37  ;;  %v10233_v45 = vcombine.high %v197_v39, %v199_v40  ;;  %v200_v46 = vld [vmem:[%s15988_s1 + $0x1480] sm:$0xff]  ;;  %v201_v49 = vld [vmem:[%s15988_s1 + $0x1488] sm:$0xff] }
  0x8a   :  { %2124 = vmatpush1.bf16.msra.mxu0 %v10202_v51  ;;  %v202_v47 = vld [vmem:[%s15988_s1 + $0x14c0] sm:$0xff]  ;;  %v203_v50 = vld [vmem:[%s15988_s1 + $0x14c8] sm:$0xff]  ;;  %v10230_v51 = vcombine.low %v196_v36, %v198_v37 }
  0x8b   :  { %2329 = vmatpush1.bf16.msra.mxu1 %v10204_v52  ;;  %2125 = vmatprep.subr.bf16.mxu0 %v10207_v54  ;;  %v10232_v52 = vcombine.low %v197_v39, %v199_v40  ;;  %v10235_v54 = vcombine.high %v200_v46, %v202_v47  ;;  %v204_v56 = vld [vmem:[%s15988_s1 + $0x1500] sm:$0xff]  ;;  %v205_v58 = vld [vmem:[%s15988_s1 + $0x1508] sm:$0xff] }
  0x8c   :  { %2330 = vmatprep.subr.bf16.mxu1 %v10209_v55  ;;  %v10237_v55 = vcombine.high %v201_v49, %v203_v50  ;;  %v206_v57 = vld [vmem:[%s15988_s1 + $0x1540] sm:$0xff]  ;;  %v207_v60 = vld [vmem:[%s15988_s1 + $0x1548] sm:$0xff] }
  0x8d   :  { %v208_v2 = vld [vmem:[%s15988_s1 + $0x1580] sm:$0xff]  ;;  %v209_v4 = vld [vmem:[%s15988_s1 + $0x1588] sm:$0xff] }
  0x8e   :  { %2126 = vmatpush1.bf16.msra.mxu0 %v10206_v61  ;;  %v10234_v61 = vcombine.low %v200_v46, %v202_v47  ;;  %v210_v3 = vld [vmem:[%s15988_s1 + $0x15c0] sm:$0xff]  ;;  %v211_v5 = vld [vmem:[%s15988_s1 + $0x15c8] sm:$0xff] }
  0x8f   :  { %2331 = vmatpush1.bf16.msra.mxu1 %v10208_v62  ;;  %2127 = vmatprep.subr.bf16.mxu0 %v10211_v0  ;;  %v10236_v62 = vcombine.low %v201_v49, %v203_v50  ;;  %v10239_v0 = vcombine.high %v204_v56, %v206_v57  ;;  %v212_v11 = vld [vmem:[%s15988_s1 + $0x1600] sm:$0xff]  ;;  %v213_v13 = vld [vmem:[%s15988_s1 + $0x1608] sm:$0xff] }
  0x90   :  { %2332 = vmatprep.subr.bf16.mxu1 %v10213_v1  ;;  %v10241_v1 = vcombine.high %v205_v58, %v207_v60  ;;  %v214_v12 = vld [vmem:[%s15988_s1 + $0x1640] sm:$0xff]  ;;  %v215_v14 = vld [vmem:[%s15988_s1 + $0x1648] sm:$0xff] }
  0x91   :  { %v216_v19 = vld [vmem:[%s15988_s1 + $0x1680] sm:$0xff]  ;;  %v217_v21 = vld [vmem:[%s15988_s1 + $0x1688] sm:$0xff] }
  0x92   :  { %2128 = vmatpush1.bf16.msra.mxu0 %v10210_v6  ;;  %v10238_v6 = vcombine.low %v204_v56, %v206_v57  ;;  %v218_v20 = vld [vmem:[%s15988_s1 + $0x16c0] sm:$0xff]  ;;  %v219_v22 = vld [vmem:[%s15988_s1 + $0x16c8] sm:$0xff] }
  0x93   :  { %2333 = vmatpush1.bf16.msra.mxu1 %v10212_v7  ;;  %2129 = vmatprep.subr.bf16.mxu0 %v10215_v8  ;;  %v10240_v7 = vcombine.low %v205_v58, %v207_v60  ;;  %v10243_v8 = vcombine.high %v208_v2, %v210_v3  ;;  %v220_v27 = vld [vmem:[%s15988_s1 + $0x1700] sm:$0xff]  ;;  %v221_v63 = vld [vmem:[%s15988_s1 + $0x1708] sm:$0xff]  ;;  %v12409_v58 = vrot.slane %v12188_v28, %v11843_v53 }
  0x94   :  { %2334 = vmatprep.subr.bf16.mxu1 %v10217_v10  ;;  %v10245_v10 = vcombine.high %v209_v4, %v211_v5  ;;  %v222_v29 = vld [vmem:[%s15988_s1 + $0x1740] sm:$0xff]  ;;  %v223_v30 = vld [vmem:[%s15988_s1 + $0x1748] sm:$0xff] }
  0x95   :  { %v224_v36 = vld [vmem:[%s15988_s1 + $0x1780] sm:$0xff]  ;;  %v225_v39 = vld [vmem:[%s15988_s1 + $0x1788] sm:$0xff] }
  0x96   :  { %2130 = vmatpush1.bf16.msra.mxu0 %v10214_v15  ;;  %v10242_v15 = vcombine.low %v208_v2, %v210_v3  ;;  %v226_v37 = vld [vmem:[%s15988_s1 + $0x17c0] sm:$0xff]  ;;  %v227_v40 = vld [vmem:[%s15988_s1 + $0x17c8] sm:$0xff] }
  0x97   :  { %2335 = vmatpush1.bf16.msra.mxu1 %v10216_v16  ;;  %2131 = vmatprep.subr.bf16.mxu0 %v10219_v17  ;;  %v10244_v16 = vcombine.low %v209_v4, %v211_v5  ;;  %v10247_v17 = vcombine.high %v212_v11, %v214_v12  ;;  %v228_v46 = vld [vmem:[%s15988_s1 + $0x1800] sm:$0xff]  ;;  %v229_v49 = vld [vmem:[%s15988_s1 + $0x1808] sm:$0xff]  ;;  %v12425_v4 = vcombine.high %v12221_v48, %v12221_v48 }
  0x98   :  { %2336 = vmatprep.subr.bf16.mxu1 %v10221_v18  ;;  %v10249_v18 = vcombine.high %v213_v13, %v215_v14  ;;  %v230_v47 = vld [vmem:[%s15988_s1 + $0x1840] sm:$0xff]  ;;  %v231_v50 = vld [vmem:[%s15988_s1 + $0x1848] sm:$0xff] }
  0x99   :  { %v232_v56 = vld [vmem:[%s15988_s1 + $0x1880] sm:$0xff]  ;;  %v233_v60 = vld [vmem:[%s15988_s1 + $0x1888] sm:$0xff] }
  0x9a   :  { %2132 = vmatpush1.bf16.msra.mxu0 %v10218_v24  ;;  %v10246_v24 = vcombine.low %v212_v11, %v214_v12  ;;  %v234_v57 = vld [vmem:[%s15988_s1 + $0x18c0] sm:$0xff]  ;;  %v237_v5 = vld [vmem:[%s15988_s1 + $0x1908] sm:$0xff] }
  0x9b   :  { %2337 = vmatpush1.bf16.msra.mxu1 %v10220_v25  ;;  %2133 = vmatprep.subr.bf16.mxu0 %v10223_v26  ;;  %v10248_v25 = vcombine.low %v213_v13, %v215_v14  ;;  %v10251_v26 = vcombine.high %v216_v19, %v218_v20  ;;  %v236_v28 = vld [vmem:[%s15988_s1 + $0x1900] sm:$0xff]  ;;  %v241_v14 = vld [vmem:[%s15988_s1 + $0x1988] sm:$0xff] }
  0x9c   :  { %2338 = vmatprep.subr.bf16.mxu1 %v10225_v59  ;;  %v10253_v59 = vcombine.high %v217_v21, %v219_v22  ;;  %v238_v3 = vld [vmem:[%s15988_s1 + $0x1940] sm:$0xff] }
  0x9d   :  { %v240_v12 = vld [vmem:[%s15988_s1 + $0x1980] sm:$0xff] }
  0x9e   :  { %2134 = vmatpush1.bf16.msra.mxu0 %v10222_v31  ;;  %v10250_v31 = vcombine.low %v216_v19, %v218_v20  ;;  %v242_v13 = vld [vmem:[%s15988_s1 + $0x19c0] sm:$0xff] }
  0x9f   :  { %2339 = vmatpush1.bf16.msra.mxu1 %v10224_v32  ;;  %2135 = vmatprep.subr.bf16.mxu0 %v10227_v34  ;;  %v10252_v32 = vcombine.low %v217_v21, %v219_v22  ;;  %v10255_v34 = vcombine.high %v220_v27, %v222_v29  ;;  %v244_v20 = vld [vmem:[%s15988_s1 + $0x1a00] sm:$0xff]  ;;  %v245_v22 = vld [vmem:[%s15988_s1 + $0x1a08] sm:$0xff] }
  0xa0   :  { %2340 = vmatprep.subr.bf16.mxu1 %v10229_v35  ;;  %v10257_v35 = vcombine.high %v221_v63, %v223_v30  ;;  %v246_v21 = vld [vmem:[%s15988_s1 + $0x1a40] sm:$0xff] }
  0xa2   :  { %2136 = vmatpush1.bf16.msra.mxu0 %v10226_v41  ;;  %v10254_v41 = vcombine.low %v220_v27, %v222_v29  ;;  %v248_v29 = vld [vmem:[%s15988_s1 + $0x1a80] sm:$0xff] }
  0xa3   :  { %2341 = vmatpush1.bf16.msra.mxu1 %v10228_v42  ;;  %2137 = vmatprep.subr.bf16.mxu0 %v10231_v43  ;;  %v10256_v42 = vcombine.low %v221_v63, %v223_v30  ;;  %v10259_v43 = vcombine.high %v224_v36, %v226_v37  ;;  %v250_v63 = vld [vmem:[%s15988_s1 + $0x1ac0] sm:$0xff]  ;;  %v249_v30 = vld [vmem:[%s15988_s1 + $0x1a88] sm:$0xff] }
  0xa4   :  { %2342 = vmatprep.subr.bf16.mxu1 %v10233_v45  ;;  %v10261_v45 = vcombine.high %v225_v39, %v227_v40 }
  0xa6   :  { %2138 = vmatpush1.bf16.msra.mxu0 %v10230_v51  ;;  %v10258_v51 = vcombine.low %v224_v36, %v226_v37  ;;  %v252_v37 = vld [vmem:[%s15988_s1 + $0x1b00] sm:$0xff] }
  0xa7   :  { %2343 = vmatpush1.bf16.msra.mxu1 %v10232_v52  ;;  %2139 = vmatprep.subr.bf16.mxu0 %v10235_v54  ;;  %v10260_v52 = vcombine.low %v225_v39, %v227_v40  ;;  %v10263_v54 = vcombine.high %v228_v46, %v230_v47  ;;  %v254_v39 = vld [vmem:[%s15988_s1 + $0x1b40] sm:$0xff]  ;;  %v253_v40 = vld [vmem:[%s15988_s1 + $0x1b08] sm:$0xff] }
  0xa8   :  { %2344 = vmatprep.subr.bf16.mxu1 %v10237_v55  ;;  %v10265_v55 = vcombine.high %v229_v49, %v231_v50 }
  0xaa   :  { %2140 = vmatpush1.bf16.msra.mxu0 %v10234_v61  ;;  %v235_v61 = vld [vmem:[%s15988_s1 + $0x18c8] sm:$0xff] }
  0xab   :  { %2345 = vmatpush1.bf16.msra.mxu1 %v10236_v62  ;;  %2141 = vmatprep.subr.bf16.mxu0 %v10239_v0  ;;  %v10262_v62 = vcombine.low %v228_v46, %v230_v47  ;;  %v10264_v0 = vcombine.low %v229_v49, %v231_v50  ;;  %v10269_v2 = vcombine.high %v233_v60, %v235_v61  ;;  %v256_v47 = vld [vmem:[%s15988_s1 + $0x1b80] sm:$0xff]  ;;  %v257_v50 = vld [vmem:[%s15988_s1 + $0x1b88] sm:$0xff] }
  0xac   :  { %2346 = vmatprep.subr.bf16.mxu1 %v10241_v1  ;;  %v10267_v1 = vcombine.high %v232_v56, %v234_v57  ;;  %v258_v49 = vld [vmem:[%s15988_s1 + $0x1bc0] sm:$0xff] }
  0xae   :  { %2142 = vmatpush1.bf16.msra.mxu0 %v10238_v6  ;;  %v239_v6 = vld [vmem:[%s15988_s1 + $0x1948] sm:$0xff] }
  0xaf   :  { %2347 = vmatpush1.bf16.msra.mxu1 %v10240_v7  ;;  %2143 = vmatprep.subr.bf16.mxu0 %v10243_v8  ;;  %v10266_v7 = vcombine.low %v232_v56, %v234_v57  ;;  %v10268_v8 = vcombine.low %v233_v60, %v235_v61  ;;  %v10273_v11 = vcombine.high %v237_v5, %v239_v6  ;;  %v260_v57 = vld [vmem:[%s15988_s1 + $0x1c00] sm:$0xff]  ;;  %v261_v61 = vld [vmem:[%s15988_s1 + $0x1c08] sm:$0xff] }
  0xb0   :  { %2348 = vmatprep.subr.bf16.mxu1 %v10245_v10  ;;  %v10271_v10 = vcombine.high %v236_v28, %v238_v3  ;;  %v262_v60 = vld [vmem:[%s15988_s1 + $0x1c40] sm:$0xff] }
  0xb2   :  { %2144 = vmatpush1.bf16.msra.mxu0 %v10242_v15  ;;  %v243_v15 = vld [vmem:[%s15988_s1 + $0x19c8] sm:$0xff] }
  0xb3   :  { %2349 = vmatpush1.bf16.msra.mxu1 %v10244_v16  ;;  %2145 = vmatprep.subr.bf16.mxu0 %v10247_v17  ;;  %v10270_v16 = vcombine.low %v236_v28, %v238_v3  ;;  %v10272_v17 = vcombine.low %v237_v5, %v239_v6  ;;  %v10277_v19 = vcombine.high %v241_v14, %v243_v15  ;;  %v264_v3 = vld [vmem:[%s15988_s1 + $0x1c80] sm:$0xff]  ;;  %v265_v6 = vld [vmem:[%s15988_s1 + $0x1c88] sm:$0xff] }
  0xb4   :  { %2350 = vmatprep.subr.bf16.mxu1 %v10249_v18  ;;  %v10275_v18 = vcombine.high %v240_v12, %v242_v13  ;;  %v266_v5 = vld [vmem:[%s15988_s1 + $0x1cc0] sm:$0xff] }
  0xb6   :  { %2146 = vmatpush1.bf16.msra.mxu0 %v10246_v24  ;;  %v247_v24 = vld [vmem:[%s15988_s1 + $0x1a48] sm:$0xff] }
  0xb7   :  { %2351 = vmatpush1.bf16.msra.mxu1 %v10248_v25  ;;  %2147 = vmatprep.subr.bf16.mxu0 %v10251_v26  ;;  %v10274_v25 = vcombine.low %v240_v12, %v242_v13  ;;  %v10276_v26 = vcombine.low %v241_v14, %v243_v15  ;;  %v10281_v27 = vcombine.high %v245_v22, %v247_v24  ;;  %v268_v13 = vld [vmem:[%s15988_s1 + $0x1d00] sm:$0xff]  ;;  %v269_v15 = vld [vmem:[%s15988_s1 + $0x1d08] sm:$0xff] }
  0xb8   :  { %2352 = vmatprep.subr.bf16.mxu1 %v10253_v59  ;;  %v10279_v59 = vcombine.high %v244_v20, %v246_v21  ;;  %v270_v14 = vld [vmem:[%s15988_s1 + $0x1d40] sm:$0xff] }
  0xba   :  { %2148 = vmatpush1.bf16.msra.mxu0 %v10250_v31  ;;  %v251_v31 = vld [vmem:[%s15988_s1 + $0x1ac8] sm:$0xff] }
  0xbb   :  { %2353 = vmatpush1.bf16.msra.mxu1 %v10252_v32  ;;  %2149 = vmatprep.subr.bf16.mxu0 %v10255_v34  ;;  %v10278_v32 = vcombine.low %v244_v20, %v246_v21  ;;  %v10280_v34 = vcombine.low %v245_v22, %v247_v24  ;;  %v10285_v36 = vcombine.high %v249_v30, %v251_v31  ;;  %v272_v21 = vld [vmem:[%s15988_s1 + $0x1d80] sm:$0xff]  ;;  %v273_v24 = vld [vmem:[%s15988_s1 + $0x1d88] sm:$0xff] }
  0xbc   :  { %2354 = vmatprep.subr.bf16.mxu1 %v10257_v35  ;;  %v10283_v35 = vcombine.high %v248_v29, %v250_v63  ;;  %v274_v22 = vld [vmem:[%s15988_s1 + $0x1dc0] sm:$0xff] }
  0xbe   :  { %2150 = vmatpush1.bf16.msra.mxu0 %v10254_v41  ;;  %v255_v41 = vld [vmem:[%s15988_s1 + $0x1b48] sm:$0xff] }
  0xbf   :  { %2355 = vmatpush1.bf16.msra.mxu1 %v10256_v42  ;;  %2151 = vmatprep.subr.bf16.mxu0 %v10259_v43  ;;  %v10282_v42 = vcombine.low %v248_v29, %v250_v63  ;;  %v10284_v43 = vcombine.low %v249_v30, %v251_v31  ;;  %v10289_v46 = vcombine.high %v253_v40, %v255_v41  ;;  %v276_v63 = vld [vmem:[%s15988_s1 + $0x1e00] sm:$0xff]  ;;  %v277_v31 = vld [vmem:[%s15988_s1 + $0x1e08] sm:$0xff] }
  0xc0   :  { %2356 = vmatprep.subr.bf16.mxu1 %v10261_v45  ;;  %v10287_v45 = vcombine.high %v252_v37, %v254_v39  ;;  %v278_v30 = vld [vmem:[%s15988_s1 + $0x1e40] sm:$0xff] }
  0xc2   :  { %2152 = vmatpush1.bf16.msra.mxu0 %v10258_v51  ;;  %v259_v51 = vld [vmem:[%s15988_s1 + $0x1bc8] sm:$0xff] }
  0xc3   :  { %2357 = vmatpush1.bf16.msra.mxu1 %v10260_v52  ;;  %2162 = vmatprep.subr.bf16.mxu0 %v10263_v54  ;;  %v10286_v52 = vcombine.low %v252_v37, %v254_v39  ;;  %v10288_v54 = vcombine.low %v253_v40, %v255_v41  ;;  %v10293_v56 = vcombine.high %v257_v50, %v259_v51  ;;  %v280_v39 = vld [vmem:[%s15988_s1 + $0x1e80] sm:$0xff]  ;;  %v281_v41 = vld [vmem:[%s15988_s1 + $0x1e88] sm:$0xff] }
  0xc4   :  { %2367 = vmatprep.subr.bf16.mxu1 %v10265_v55  ;;  %v10291_v55 = vcombine.high %v256_v47, %v258_v49  ;;  %v282_v40 = vld [vmem:[%s15988_s1 + $0x1ec0] sm:$0xff] }
  0xc5   :  { %2154 = vmatmul.mubr.bf16.vlgmr.msra.gmra.mrb[0].mxu0 %v12409_v58 }
  0xc6   :  { %2163 = vmatpush1.bf16.msra.mxu0 %v10262_v62  ;;  %2359 = vmatmul.mubr.bf16.vlgmr.msra.gmra.mrb[0].mxu1 %v12409_v58  ;;  %v263_v62 = vld [vmem:[%s15988_s1 + $0x1c48] sm:$0xff] }
  0xc7   :  { %2368 = vmatpush1.bf16.msra.mxu1 %v10264_v0  ;;  %2164 = vmatprep.subr.bf16.mxu0 %v10267_v1  ;;  %v10290_v0 = vcombine.low %v256_v47, %v258_v49  ;;  %v10292_v1 = vcombine.low %v257_v50, %v259_v51  ;;  %v10297_v28 = vcombine.high %v261_v61, %v263_v62  ;;  %v284_v49 = vld [vmem:[%s15988_s1 + $0x1f00] sm:$0xff]  ;;  %v285_v51 = vld [vmem:[%s15988_s1 + $0x1f08] sm:$0xff] }
  0xc8   :  { %2369 = vmatprep.subr.bf16.mxu1 %v10269_v2  ;;  %2194 = vmatprep.mubr.bf16.mxu0 %v12425_v4  ;;  %v10295_v2 = vcombine.high %v260_v57, %v262_v60  ;;  %v286_v50 = vld [vmem:[%s15988_s1 + $0x1f40] sm:$0xff] }
  0xc9   :  { %2399 = vmatprep.mubr.bf16.mxu1 %v12425_v4 }
  0xca   :  { %2165 = vmatpush1.bf16.msra.mxu0 %v10266_v7  ;;  %v267_v7 = vld [vmem:[%s15988_s1 + $0x1cc8] sm:$0xff] }
  0xcb   :  { %2370 = vmatpush1.bf16.msra.mxu1 %v10268_v8  ;;  %2166 = vmatprep.subr.bf16.mxu0 %v10271_v10  ;;  %v10294_v8 = vcombine.low %v260_v57, %v262_v60  ;;  %v10296_v10 = vcombine.low %v261_v61, %v263_v62  ;;  %v10301_v12 = vcombine.high %v265_v6, %v267_v7  ;;  %v288_v60 = vld [vmem:[%s15988_s1 + $0x1f80] sm:$0xff]  ;;  %v289_v62 = vld [vmem:[%s15988_s1 + $0x1f88] sm:$0xff] }
  0xcc   :  { %2371 = vmatprep.subr.bf16.mxu1 %v10273_v11  ;;  %v10299_v11 = vcombine.high %v264_v3, %v266_v5  ;;  %v290_v61 = vld [vmem:[%s15988_s1 + $0x1fc0] sm:$0xff] }
  0xce   :  { %2167 = vmatpush1.bf16.msra.mxu0 %v10270_v16  ;;  %v271_v16 = vld [vmem:[%s15988_s1 + $0x1d48] sm:$0xff] }
  0xcf   :  { %2372 = vmatpush1.bf16.msra.mxu1 %v10272_v17  ;;  %2168 = vmatprep.subr.bf16.mxu0 %v10275_v18  ;;  %v10298_v17 = vcombine.low %v264_v3, %v266_v5  ;;  %v10300_v18 = vcombine.low %v265_v6, %v267_v7  ;;  %v10305_v20 = vcombine.high %v269_v15, %v271_v16  ;;  %v292_v5 = vld [vmem:[%s15988_s1 + $0x2000] sm:$0xff]  ;;  %v293_v7 = vld [vmem:[%s15988_s1 + $0x2008] sm:$0xff] }
  0xd0   :  { %2373 = vmatprep.subr.bf16.mxu1 %v10277_v19  ;;  %v10303_v19 = vcombine.high %v268_v13, %v270_v14  ;;  %v294_v6 = vld [vmem:[%s15988_s1 + $0x2040] sm:$0xff] }
  0xd2   :  { %2169 = vmatpush1.bf16.msra.mxu0 %v10274_v25  ;;  %v275_v25 = vld [vmem:[%s15988_s1 + $0x1dc8] sm:$0xff] }
  0xd3   :  { %2374 = vmatpush1.bf16.msra.mxu1 %v10276_v26  ;;  %2170 = vmatprep.subr.bf16.mxu0 %v10279_v59  ;;  %v10302_v26 = vcombine.low %v268_v13, %v270_v14  ;;  %v10304_v59 = vcombine.low %v269_v15, %v271_v16  ;;  %v10309_v29 = vcombine.high %v273_v24, %v275_v25  ;;  %v296_v15 = vld [vmem:[%s15988_s1 + $0x2080] sm:$0xff] }
  0xd4   :  { %2375 = vmatprep.subr.bf16.mxu1 %v10281_v27  ;;  %v10307_v27 = vcombine.high %v272_v21, %v274_v22  ;;  %v10327_v13 = vcombine.high %v292_v5, %v294_v6  ;;  %v298_v16 = vld [vmem:[%s15988_s1 + $0x20c0] sm:$0xff] }
  0xd6   :  { %2171 = vmatpush1.bf16.msra.mxu0 %v10278_v32  ;;  %v279_v32 = vld [vmem:[%s15988_s1 + $0x1e48] sm:$0xff] }
  0xd7   :  { %2376 = vmatpush1.bf16.msra.mxu1 %v10280_v34  ;;  %2172 = vmatprep.subr.bf16.mxu0 %v10283_v35  ;;  %v10306_v34 = vcombine.low %v272_v21, %v274_v22  ;;  %v10308_v35 = vcombine.low %v273_v24, %v275_v25  ;;  %v10313_v37 = vcombine.high %v277_v31, %v279_v32 }
  0xd8   :  { %2377 = vmatprep.subr.bf16.mxu1 %v10285_v36  ;;  %v10311_v36 = vcombine.high %v276_v63, %v278_v30  ;;  %v10326_v21 = vcombine.low %v292_v5, %v294_v6  ;;  %v10331_v24 = vcombine.high %v296_v15, %v298_v16  ;;  %v319_v5 = vld [vmem:[%s15988_s1 + $0x2348] sm:$0xff] }
  0xda   :  { %2173 = vmatpush1.bf16.msra.mxu0 %v10282_v42  ;;  %v283_v42 = vld [vmem:[%s15988_s1 + $0x1ec8] sm:$0xff] }
  0xdb   :  { %2378 = vmatpush1.bf16.msra.mxu1 %v10284_v43  ;;  %2174 = vmatprep.subr.bf16.mxu0 %v10287_v45  ;;  %v10310_v43 = vcombine.low %v276_v63, %v278_v30  ;;  %v10312_v45 = vcombine.low %v277_v31, %v279_v32  ;;  %v10317_v47 = vcombine.high %v281_v41, %v283_v42  ;;  %v303_v63 = vld [vmem:[%s15988_s1 + $0x2148] sm:$0xff] }
  0xdc   :  { %2379 = vmatprep.subr.bf16.mxu1 %v10289_v46  ;;  %v10315_v46 = vcombine.high %v280_v39, %v282_v40  ;;  %v10330_v30 = vcombine.low %v296_v15, %v298_v16  ;;  %v323_v15 = vld [vmem:[%s15988_s1 + $0x23c8] sm:$0xff] }
  0xde   :  { %2175 = vmatpush1.bf16.msra.mxu0 %v10286_v52  ;;  %v287_v52 = vld [vmem:[%s15988_s1 + $0x1f48] sm:$0xff] }
  0xdf   :  { %2380 = vmatpush1.bf16.msra.mxu1 %v10288_v54  ;;  %2176 = vmatprep.subr.bf16.mxu0 %v10291_v55  ;;  %v10314_v54 = vcombine.low %v280_v39, %v282_v40  ;;  %v10316_v55 = vcombine.low %v281_v41, %v283_v42  ;;  %v10321_v57 = vcombine.high %v285_v51, %v287_v52  ;;  %v307_v39 = vld [vmem:[%s15988_s1 + $0x21c8] sm:$0xff] }
  0xe0   :  { %2381 = vmatprep.subr.bf16.mxu1 %v10293_v56  ;;  %v10319_v56 = vcombine.high %v284_v49, %v286_v50 }
  0xe2   :  { %2177 = vmatpush1.bf16.msra.mxu0 %v10290_v0  ;;  %v291_v0 = vld [vmem:[%s15988_s1 + $0x1fc8] sm:$0xff] }
  0xe3   :  { %2382 = vmatpush1.bf16.msra.mxu1 %v10292_v1  ;;  %2178 = vmatprep.subr.bf16.mxu0 %v10295_v2  ;;  %v10318_v1 = vcombine.low %v284_v49, %v286_v50  ;;  %v10320_v2 = vcombine.low %v285_v51, %v287_v52  ;;  %v10325_v3 = vcombine.high %v289_v62, %v291_v0  ;;  %v311_v49 = vld [vmem:[%s15988_s1 + $0x2248] sm:$0xff] }
  0xe4   :  { %2383 = vmatprep.subr.bf16.mxu1 %v10297_v28  ;;  %v10323_v28 = vcombine.high %v288_v60, %v290_v61 }
  0xe6   :  { %2179 = vmatpush1.bf16.msra.mxu0 %v10294_v8  ;;  %v295_v8 = vld [vmem:[%s15988_s1 + $0x2048] sm:$0xff] }
  0xe7   :  { %2384 = vmatpush1.bf16.msra.mxu1 %v10296_v10  ;;  %2180 = vmatprep.subr.bf16.mxu0 %v10299_v11  ;;  %v12608_v10 = vld.sshfl [vmem:[%s15987_s0 + $0x8] sm:$0x11 pattern:$0x75316420]  ;;  %v10322_v11 = vcombine.low %v288_v60, %v290_v61  ;;  %v10329_v14 = vcombine.high %v293_v7, %v295_v8  ;;  %v10328_v22 = vcombine.low %v293_v7, %v295_v8 }
  0xe8   :  { %2385 = vmatprep.subr.bf16.mxu1 %v10301_v12  ;;  %v10324_v12 = vcombine.low %v289_v62, %v291_v0  ;;  %v315_v60 = vld [vmem:[%s15988_s1 + $0x22c8] sm:$0xff] }
  0xea   :  { %2181 = vmatpush1.bf16.msra.mxu0 %v10298_v17  ;;  %v414_v17 = vcombine.high %v12608_v10, %v12608_v10 }
  0xeb   :  { %2386 = vmatpush1.bf16.msra.mxu1 %v10300_v18  ;;  %2182 = vmatprep.subr.bf16.mxu0 %v10303_v19  ;;  %v12620_v18 = vcombine.high %v12409_v58, %v12409_v58  ;;  %v297_v19 = vld [vmem:[%s15988_s1 + $0x2088] sm:$0xff] }
  0xec   :  { %2387 = vmatprep.subr.bf16.mxu1 %v10305_v20  ;;  %v299_v20 = vld [vmem:[%s15988_s1 + $0x20c8] sm:$0xff] }
  0xed   :  { %v10333_v25 = vcombine.high %v297_v19, %v299_v20  ;;  %v10332_v31 = vcombine.low %v297_v19, %v299_v20 }
  0xee   :  { %2183 = vmatpush1.bf16.msra.mxu0 %v10302_v26  ;;  %v300_v26 = vld [vmem:[%s15988_s1 + $0x2100] sm:$0xff] }
  0xef   :  { %2388 = vmatpush1.bf16.msra.mxu1 %v10304_v59  ;;  %2184 = vmatprep.subr.bf16.mxu0 %v10307_v27  ;;  %v302_v59 = vld [vmem:[%s15988_s1 + $0x2140] sm:$0xff]  ;;  %v12635_v27 = vrot.slane %v414_v17, %v11843_v53 }
  0xf0   :  { %2389 = vmatprep.subr.bf16.mxu1 %v10309_v29  ;;  %v301_v29 = vld [vmem:[%s15988_s1 + $0x2108] sm:$0xff]  ;;  %v10335_v32 = vcombine.high %v300_v26, %v302_v59  ;;  %v10334_v40 = vcombine.low %v300_v26, %v302_v59 }
  0xf1   :  { %v10336_v41 = vcombine.low %v301_v29, %v303_v63 }
  0xf2   :  { %2185 = vmatpush1.bf16.msra.mxu0 %v10306_v34  ;;  %v10337_v34 = vcombine.high %v301_v29, %v303_v63 }
  0xf3   :  { %2390 = vmatpush1.bf16.msra.mxu1 %v10308_v35  ;;  %2186 = vmatprep.subr.bf16.mxu0 %v10311_v36  ;;  %v304_v35 = vld [vmem:[%s15988_s1 + $0x2180] sm:$0xff] }
  0xf4   :  { %2391 = vmatprep.subr.bf16.mxu1 %v10313_v37  ;;  %v306_v36 = vld [vmem:[%s15988_s1 + $0x21c0] sm:$0xff]  ;;  %v305_v37 = vld [vmem:[%s15988_s1 + $0x2188] sm:$0xff] }
  0xf5   :  { %v10339_v42 = vcombine.high %v304_v35, %v306_v36  ;;  %v10338_v50 = vcombine.low %v304_v35, %v306_v36  ;;  %v10340_v51 = vcombine.low %v305_v37, %v307_v39 }
  0xf6   :  { %2187 = vmatpush1.bf16.msra.mxu0 %v10310_v43  ;;  %v10341_v43 = vcombine.high %v305_v37, %v307_v39 }
  0xf7   :  { %2392 = vmatpush1.bf16.msra.mxu1 %v10312_v45  ;;  %2188 = vmatprep.subr.bf16.mxu0 %v10315_v46  ;;  %v308_v45 = vld [vmem:[%s15988_s1 + $0x2200] sm:$0xff] }
  0xf8   :  { %2393 = vmatprep.subr.bf16.mxu1 %v10317_v47  ;;  %v310_v46 = vld [vmem:[%s15988_s1 + $0x2240] sm:$0xff]  ;;  %v309_v47 = vld [vmem:[%s15988_s1 + $0x2208] sm:$0xff] }
  0xf9   :  { %v10343_v52 = vcombine.high %v308_v45, %v310_v46  ;;  %v10342_v61 = vcombine.low %v308_v45, %v310_v46  ;;  %v10344_v62 = vcombine.low %v309_v47, %v311_v49 }
  0xfa   :  { %2189 = vmatpush1.bf16.msra.mxu0 %v10314_v54  ;;  %v10345_v54 = vcombine.high %v309_v47, %v311_v49 }
  0xfb   :  { %2394 = vmatpush1.bf16.msra.mxu1 %v10316_v55  ;;  %2190 = vmatprep.subr.bf16.mxu0 %v10319_v56  ;;  %v312_v55 = vld [vmem:[%s15988_s1 + $0x2280] sm:$0xff] }
  0xfc   :  { %2395 = vmatprep.subr.bf16.mxu1 %v10321_v57  ;;  %v314_v56 = vld [vmem:[%s15988_s1 + $0x22c0] sm:$0xff]  ;;  %v313_v57 = vld [vmem:[%s15988_s1 + $0x2288] sm:$0xff] }
  0xfd   :  { %v10347_v0 = vcombine.high %v312_v55, %v314_v56  ;;  %v10346_v6 = vcombine.low %v312_v55, %v314_v56  ;;  %v10348_v7 = vcombine.low %v313_v57, %v315_v60 }
  0xfe   :  { %2191 = vmatpush1.bf16.msra.mxu0 %v10318_v1  ;;  %v10349_v1 = vcombine.high %v313_v57, %v315_v60 }
  0xff   :  { %2396 = vmatpush1.bf16.msra.mxu1 %v10320_v2  ;;  %2192 = vmatprep.subr.bf16.mxu0 %v10323_v28  ;;  %v316_v2 = vld [vmem:[%s15988_s1 + $0x2300] sm:$0xff] }
 0x100   :  { %2397 = vmatprep.subr.bf16.mxu1 %v10325_v3  ;;  %v318_v28 = vld [vmem:[%s15988_s1 + $0x2340] sm:$0xff]  ;;  %v317_v3 = vld [vmem:[%s15988_s1 + $0x2308] sm:$0xff] }
 0x101   :  { %v10351_v8 = vcombine.high %v316_v2, %v318_v28  ;;  %v10350_v16 = vcombine.low %v316_v2, %v318_v28  ;;  %v10352_v17 = vcombine.low %v317_v3, %v319_v5 }
 0x102   :  { %2193 = vmatpush1.bf16.msra.mxu0 %v10322_v11  ;;  %v10353_v11 = vcombine.high %v317_v3, %v319_v5 }
 0x103   :  { %2398 = vmatpush1.bf16.msra.mxu1 %v10324_v12  ;;  %2203 = vmatprep.subr.bf16.mxu0 %v10327_v13  ;;  %v320_v12 = vld [vmem:[%s15988_s1 + $0x2380] sm:$0xff] }
 0x104   :  { %2408 = vmatprep.subr.bf16.mxu1 %v10329_v14  ;;  %v322_v13 = vld [vmem:[%s15988_s1 + $0x23c0] sm:$0xff]  ;;  %v321_v14 = vld [vmem:[%s15988_s1 + $0x2388] sm:$0xff] }
 0x105   :  { %2195 = vmatmul.mubr.bf16.vlgmr.msra.gmra.mrb[0].mxu0 %v12620_v18  ;;  %v10355_v19 = vcombine.high %v320_v12, %v322_v13  ;;  %v10357_v20 = vcombine.high %v321_v14, %v323_v15  ;;  %v10354_v26 = vcombine.low %v320_v12, %v322_v13  ;;  %v10356_v59 = vcombine.low %v321_v14, %v323_v15 }
 0x106   :  { %2204 = vmatpush1.bf16.msra.mxu0 %v10326_v21  ;;  %2400 = vmatmul.mubr.bf16.vlgmr.msra.gmra.mrb[0].mxu1 %v12620_v18  ;;  %v324_v21 = vld [vmem:[%s15988_s1 + $0x2400] sm:$0xff] }
 0x107   :  { %2409 = vmatpush1.bf16.msra.mxu1 %v10328_v22  ;;  %2205 = vmatprep.subr.bf16.mxu0 %v10331_v24  ;;  %v326_v22 = vld [vmem:[%s15988_s1 + $0x2440] sm:$0xff]  ;;  %v325_v24 = vld [vmem:[%s15988_s1 + $0x2408] sm:$0xff] }
 0x108   :  { %2410 = vmatprep.subr.bf16.mxu1 %v10333_v25  ;;  %2235 = vmatprep.mubr.bf16.mxu0 %v12635_v27  ;;  %v327_v25 = vld [vmem:[%s15988_s1 + $0x2448] sm:$0xff]  ;;  %v10359_v29 = vcombine.high %v324_v21, %v326_v22  ;;  %v10358_v35 = vcombine.low %v324_v21, %v326_v22 }
 0x109   :  { %2440 = vmatprep.mubr.bf16.mxu1 %v12635_v27  ;;  %v10361_v63 = vcombine.high %v325_v24, %v327_v25  ;;  %v10360_v36 = vcombine.low %v325_v24, %v327_v25 }
 0x10a   :  { %2206 = vmatpush1.bf16.msra.mxu0 %v10330_v30  ;;  %v328_v30 = vld [vmem:[%s15988_s1 + $0x2480] sm:$0xff] }
 0x10b   :  { %2411 = vmatpush1.bf16.msra.mxu1 %v10332_v31  ;;  %2207 = vmatprep.subr.bf16.mxu0 %v10335_v32  ;;  %v330_v31 = vld [vmem:[%s15988_s1 + $0x24c0] sm:$0xff]  ;;  %v329_v32 = vld [vmem:[%s15988_s1 + $0x2488] sm:$0xff] }
 0x10c   :  { %2412 = vmatprep.subr.bf16.mxu1 %v10337_v34  ;;  %v331_v34 = vld [vmem:[%s15988_s1 + $0x24c8] sm:$0xff]  ;;  %v10363_v37 = vcombine.high %v328_v30, %v330_v31  ;;  %v10362_v45 = vcombine.low %v328_v30, %v330_v31 }
 0x10d   :  { %v10365_v39 = vcombine.high %v329_v32, %v331_v34  ;;  %v10364_v46 = vcombine.low %v329_v32, %v331_v34 }
 0x10e   :  { %2208 = vmatpush1.bf16.msra.mxu0 %v10334_v40  ;;  %v332_v40 = vld [vmem:[%s15988_s1 + $0x2500] sm:$0xff] }
 0x10f   :  { %2413 = vmatpush1.bf16.msra.mxu1 %v10336_v41  ;;  %2209 = vmatprep.subr.bf16.mxu0 %v10339_v42  ;;  %v334_v41 = vld [vmem:[%s15988_s1 + $0x2540] sm:$0xff]  ;;  %v333_v42 = vld [vmem:[%s15988_s1 + $0x2508] sm:$0xff] }
 0x110   :  { %2414 = vmatprep.subr.bf16.mxu1 %v10341_v43  ;;  %v335_v43 = vld [vmem:[%s15988_s1 + $0x2548] sm:$0xff]  ;;  %v10367_v47 = vcombine.high %v332_v40, %v334_v41  ;;  %v10366_v55 = vcombine.low %v332_v40, %v334_v41 }
 0x111   :  { %v10369_v49 = vcombine.high %v333_v42, %v335_v43  ;;  %v10368_v56 = vcombine.low %v333_v42, %v335_v43 }
 0x112   :  { %2210 = vmatpush1.bf16.msra.mxu0 %v10338_v50  ;;  %v336_v50 = vld [vmem:[%s15988_s1 + $0x2580] sm:$0xff] }
 0x113   :  { %2415 = vmatpush1.bf16.msra.mxu1 %v10340_v51  ;;  %2211 = vmatprep.subr.bf16.mxu0 %v10343_v52  ;;  %v338_v51 = vld [vmem:[%s15988_s1 + $0x25c0] sm:$0xff]  ;;  %v337_v52 = vld [vmem:[%s15988_s1 + $0x2588] sm:$0xff] }
 0x114   :  { %2416 = vmatprep.subr.bf16.mxu1 %v10345_v54  ;;  %v339_v54 = vld [vmem:[%s15988_s1 + $0x25c8] sm:$0xff]  ;;  %v10371_v57 = vcombine.high %v336_v50, %v338_v51  ;;  %v10370_v2 = vcombine.low %v336_v50, %v338_v51  ;;  %v2456_v50 = vld [vmem:[%s15988_s1 + $0xd8] sm:$0xff] }
 0x115   :  { %v10373_v60 = vcombine.high %v337_v52, %v339_v54  ;;  %v10372_v28 = vcombine.low %v337_v52, %v339_v54 }
 0x116   :  { %2212 = vmatpush1.bf16.msra.mxu0 %v10342_v61  ;;  %v340_v61 = vld [vmem:[%s15988_s1 + $0x2600] sm:$0xff] }
 0x117   :  { %2417 = vmatpush1.bf16.msra.mxu1 %v10344_v62  ;;  %2213 = vmatprep.subr.bf16.mxu0 %v10347_v0  ;;  %v342_v62 = vld [vmem:[%s15988_s1 + $0x2640] sm:$0xff]  ;;  %v341_v0 = vld [vmem:[%s15988_s1 + $0x2608] sm:$0xff] }
 0x118   :  { %2418 = vmatprep.subr.bf16.mxu1 %v10349_v1  ;;  %v343_v1 = vld [vmem:[%s15988_s1 + $0x2648] sm:$0xff]  ;;  %v10375_v3 = vcombine.high %v340_v61, %v342_v62  ;;  %v10374_v12 = vcombine.low %v340_v61, %v342_v62 }
 0x119   :  { %v10377_v5 = vcombine.high %v341_v0, %v343_v1  ;;  %v10376_v13 = vcombine.low %v341_v0, %v343_v1  ;;  %v2461_v1 = vld [vmem:[%s15988_s1 + $0x190] sm:$0xff] }
 0x11a   :  { %2214 = vmatpush1.bf16.msra.mxu0 %v10346_v6  ;;  %v344_v6 = vld [vmem:[%s15988_s1 + $0x2680] sm:$0xff] }
 0x11b   :  { %2419 = vmatpush1.bf16.msra.mxu1 %v10348_v7  ;;  %2215 = vmatprep.subr.bf16.mxu0 %v10351_v8  ;;  %v346_v7 = vld [vmem:[%s15988_s1 + $0x26c0] sm:$0xff]  ;;  %v345_v8 = vld [vmem:[%s15988_s1 + $0x2688] sm:$0xff] }
 0x11c   :  { %2420 = vmatprep.subr.bf16.mxu1 %v10353_v11  ;;  %v347_v11 = vld [vmem:[%s15988_s1 + $0x26c8] sm:$0xff]  ;;  %v10379_v14 = vcombine.high %v344_v6, %v346_v7  ;;  %v10378_v21 = vcombine.low %v344_v6, %v346_v7 }
 0x11d   :  { %v10381_v15 = vcombine.high %v345_v8, %v347_v11  ;;  %v10380_v22 = vcombine.low %v345_v8, %v347_v11  ;;  %v2465_v11 = vld [vmem:[%s15988_s1 + $0x210] sm:$0xff] }
 0x11e   :  { %2216 = vmatpush1.bf16.msra.mxu0 %v10350_v16  ;;  %v348_v16 = vld [vmem:[%s15988_s1 + $0x2700] sm:$0xff] }
 0x11f   :  { %2421 = vmatpush1.bf16.msra.mxu1 %v10352_v17  ;;  %2217 = vmatprep.subr.bf16.mxu0 %v10355_v19  ;;  %v350_v17 = vld [vmem:[%s15988_s1 + $0x2740] sm:$0xff]  ;;  %v349_v19 = vld [vmem:[%s15988_s1 + $0x2708] sm:$0xff] }
 0x120   :  { %2422 = vmatprep.subr.bf16.mxu1 %v10357_v20  ;;  %v351_v20 = vld [vmem:[%s15988_s1 + $0x2748] sm:$0xff]  ;;  %v10383_v24 = vcombine.high %v348_v16, %v350_v17  ;;  %v10382_v30 = vcombine.low %v348_v16, %v350_v17 }
 0x121   :  { %v10385_v25 = vcombine.high %v349_v19, %v351_v20  ;;  %v10384_v31 = vcombine.low %v349_v19, %v351_v20  ;;  %v2469_v20 = vld [vmem:[%s15988_s1 + $0x290] sm:$0xff] }
 0x122   :  { %2218 = vmatpush1.bf16.msra.mxu0 %v10354_v26  ;;  %v352_v26 = vld [vmem:[%s15988_s1 + $0x2780] sm:$0xff] }
 0x123   :  { %2423 = vmatpush1.bf16.msra.mxu1 %v10356_v59  ;;  %2219 = vmatprep.subr.bf16.mxu0 %v10359_v29  ;;  %v354_v59 = vld [vmem:[%s15988_s1 + $0x27c0] sm:$0xff]  ;;  %v353_v29 = vld [vmem:[%s15988_s1 + $0x2788] sm:$0xff] }
 0x124   :  { %2424 = vmatprep.subr.bf16.mxu1 %v10361_v63  ;;  %v355_v63 = vld [vmem:[%s15988_s1 + $0x27c8] sm:$0xff]  ;;  %v10387_v32 = vcombine.high %v352_v26, %v354_v59  ;;  %v10386_v40 = vcombine.low %v352_v26, %v354_v59 }
 0x125   :  { %v10389_v34 = vcombine.high %v353_v29, %v355_v63  ;;  %v10388_v41 = vcombine.low %v353_v29, %v355_v63  ;;  %v2473_v63 = vld [vmem:[%s15988_s1 + $0x310] sm:$0xff] }
 0x126   :  { %2220 = vmatpush1.bf16.msra.mxu0 %v10358_v35  ;;  %v2449_v35 = vld [vmem:[%s15988_s1 + $0x10] sm:$0xff] }
 0x127   :  { %2425 = vmatpush1.bf16.msra.mxu1 %v10360_v36  ;;  %2221 = vmatprep.subr.bf16.mxu0 %v10363_v37  ;;  %v2451_v36 = vld [vmem:[%s15988_s1 + $0x50] sm:$0xff]  ;;  %v2450_v37 = vld [vmem:[%s15988_s1 + $0x18] sm:$0xff] }
 0x128   :  { %2426 = vmatprep.subr.bf16.mxu1 %v10365_v39  ;;  %v2452_v39 = vld [vmem:[%s15988_s1 + $0x58] sm:$0xff]  ;;  %v10391_v42 = vcombine.high %v2449_v35, %v2451_v36  ;;  %v10390_v51 = vcombine.low %v2449_v35, %v2451_v36 }
 0x129   :  { %v10393_v43 = vcombine.high %v2450_v37, %v2452_v39  ;;  %v10392_v52 = vcombine.low %v2450_v37, %v2452_v39  ;;  %v2477_v39 = vld [vmem:[%s15988_s1 + $0x390] sm:$0xff] }
 0x12a   :  { %2222 = vmatpush1.bf16.msra.mxu0 %v10362_v45  ;;  %v2453_v45 = vld [vmem:[%s15988_s1 + $0x90] sm:$0xff] }
 0x12b   :  { %2427 = vmatpush1.bf16.msra.mxu1 %v10364_v46  ;;  %2223 = vmatprep.subr.bf16.mxu0 %v10367_v47  ;;  %v2455_v46 = vld [vmem:[%s15988_s1 + $0xd0] sm:$0xff]  ;;  %v12823_v47 = vrot.slane %v12608_v10, %v11843_v53 }
 0x12c   :  { %2428 = vmatprep.subr.bf16.mxu1 %v10369_v49  ;;  %v2454_v49 = vld [vmem:[%s15988_s1 + $0x98] sm:$0xff]  ;;  %v10395_v54 = vcombine.high %v2453_v45, %v2455_v46  ;;  %v2457_v53 = vld [vmem:[%s15988_s1 + $0x110] sm:$0xff] }
 0x12d   :  { %v2459_v10 = vld [vmem:[%s15988_s1 + $0x150] sm:$0xff]  ;;  %v10396_v61 = vcombine.low %v2454_v49, %v2456_v50 }
 0x12e   :  { %2224 = vmatpush1.bf16.msra.mxu0 %v10366_v55  ;;  %v10397_v55 = vcombine.high %v2454_v49, %v2456_v50  ;;  %v10399_v62 = vcombine.high %v2457_v53, %v2459_v10  ;;  %v2481_v50 = vld [vmem:[%s15988_s1 + $0x410] sm:$0xff] }
 0x12f   :  { %2429 = vmatpush1.bf16.msra.mxu1 %v10368_v56  ;;  %2225 = vmatprep.subr.bf16.mxu0 %v10371_v57  ;;  %v2458_v56 = vld [vmem:[%s15988_s1 + $0x118] sm:$0xff] }
 0x130   :  { %2430 = vmatprep.subr.bf16.mxu1 %v10373_v60  ;;  %v2460_v57 = vld [vmem:[%s15988_s1 + $0x158] sm:$0xff]  ;;  %v10394_v60 = vcombine.low %v2453_v45, %v2455_v46 }
 0x131   :  { %v10401_v0 = vcombine.high %v2458_v56, %v2460_v57  ;;  %v10400_v6 = vcombine.low %v2458_v56, %v2460_v57  ;;  %v2485_v57 = vld [vmem:[%s15988_s1 + $0x490] sm:$0xff] }
 0x132   :  { %2226 = vmatpush1.bf16.msra.mxu0 %v10370_v2  ;;  %v2463_v2 = vld [vmem:[%s15988_s1 + $0x1d0] sm:$0xff] }
 0x133   :  { %2431 = vmatpush1.bf16.msra.mxu1 %v10372_v28  ;;  %2227 = vmatprep.subr.bf16.mxu0 %v10375_v3  ;;  %v2462_v28 = vld [vmem:[%s15988_s1 + $0x198] sm:$0xff]  ;;  %v10403_v7 = vcombine.high %v2461_v1, %v2463_v2 }
 0x134   :  { %2432 = vmatprep.subr.bf16.mxu1 %v10377_v5  ;;  %v2464_v3 = vld [vmem:[%s15988_s1 + $0x1d8] sm:$0xff]  ;;  %v10398_v5 = vcombine.low %v2457_v53, %v2459_v10 }
 0x135   :  { %v10405_v8 = vcombine.high %v2462_v28, %v2464_v3  ;;  %v10404_v16 = vcombine.low %v2462_v28, %v2464_v3  ;;  %v2489_v3 = vld [vmem:[%s15988_s1 + $0x510] sm:$0xff] }
 0x136   :  { %2228 = vmatpush1.bf16.msra.mxu0 %v10374_v12  ;;  %v2467_v12 = vld [vmem:[%s15988_s1 + $0x250] sm:$0xff] }
 0x137   :  { %2433 = vmatpush1.bf16.msra.mxu1 %v10376_v13  ;;  %2229 = vmatprep.subr.bf16.mxu0 %v10379_v14  ;;  %v2466_v13 = vld [vmem:[%s15988_s1 + $0x218] sm:$0xff]  ;;  %v10407_v17 = vcombine.high %v2465_v11, %v2467_v12 }
 0x138   :  { %2434 = vmatprep.subr.bf16.mxu1 %v10381_v15  ;;  %v2468_v14 = vld [vmem:[%s15988_s1 + $0x258] sm:$0xff]  ;;  %v10402_v15 = vcombine.low %v2461_v1, %v2463_v2 }
 0x139   :  { %v10409_v19 = vcombine.high %v2466_v13, %v2468_v14  ;;  %v10408_v26 = vcombine.low %v2466_v13, %v2468_v14  ;;  %v2493_v14 = vld [vmem:[%s15988_s1 + $0x590] sm:$0xff] }
 0x13a   :  { %2230 = vmatpush1.bf16.msra.mxu0 %v10378_v21  ;;  %v2471_v21 = vld [vmem:[%s15988_s1 + $0x2d0] sm:$0xff] }
 0x13b   :  { %2435 = vmatpush1.bf16.msra.mxu1 %v10380_v22  ;;  %2231 = vmatprep.subr.bf16.mxu0 %v10383_v24  ;;  %v2470_v22 = vld [vmem:[%s15988_s1 + $0x298] sm:$0xff]  ;;  %v10411_v59 = vcombine.high %v2469_v20, %v2471_v21 }
 0x13c   :  { %2436 = vmatprep.subr.bf16.mxu1 %v10385_v25  ;;  %v2472_v24 = vld [vmem:[%s15988_s1 + $0x2d8] sm:$0xff]  ;;  %v10406_v25 = vcombine.low %v2465_v11, %v2467_v12 }
 0x13d   :  { %v10413_v29 = vcombine.high %v2470_v22, %v2472_v24  ;;  %v10412_v35 = vcombine.low %v2470_v22, %v2472_v24  ;;  %v2497_v24 = vld [vmem:[%s15988_s1 + $0x610] sm:$0xff] }
 0x13e   :  { %2232 = vmatpush1.bf16.msra.mxu0 %v10382_v30  ;;  %v2475_v30 = vld [vmem:[%s15988_s1 + $0x350] sm:$0xff] }
 0x13f   :  { %2437 = vmatpush1.bf16.msra.mxu1 %v10384_v31  ;;  %2233 = vmatprep.subr.bf16.mxu0 %v10387_v32  ;;  %v2474_v31 = vld [vmem:[%s15988_s1 + $0x318] sm:$0xff]  ;;  %v10415_v36 = vcombine.high %v2473_v63, %v2475_v30 }
 0x140   :  { %2438 = vmatprep.subr.bf16.mxu1 %v10389_v34  ;;  %v2476_v32 = vld [vmem:[%s15988_s1 + $0x358] sm:$0xff]  ;;  %v10410_v34 = vcombine.low %v2469_v20, %v2471_v21 }
 0x141   :  { %v10417_v37 = vcombine.high %v2474_v31, %v2476_v32  ;;  %v10416_v45 = vcombine.low %v2474_v31, %v2476_v32  ;;  %v2501_v32 = vld [vmem:[%s15988_s1 + $0x690] sm:$0xff] }
 0x142   :  { %2234 = vmatpush1.bf16.msra.mxu0 %v10386_v40  ;;  %v2479_v40 = vld [vmem:[%s15988_s1 + $0x3d0] sm:$0xff] }
 0x143   :  { %2439 = vmatpush1.bf16.msra.mxu1 %v10388_v41  ;;  %4369 = vmatprep.subr.bf16.mxu0 %v10391_v42  ;;  %v2478_v41 = vld [vmem:[%s15988_s1 + $0x398] sm:$0xff]  ;;  %v10419_v46 = vcombine.high %v2477_v39, %v2479_v40 }
 0x144   :  { %4574 = vmatprep.subr.bf16.mxu1 %v10393_v43  ;;  %v2480_v42 = vld [vmem:[%s15988_s1 + $0x3d8] sm:$0xff]  ;;  %v10414_v43 = vcombine.low %v2473_v63, %v2475_v30 }
 0x145   :  { %2236 = vmatmul.mubr.bf16.vlgmr.msra.gmra.mrb[0].mxu0 %v12823_v47  ;;  %v10421_v49 = vcombine.high %v2478_v41, %v2480_v42  ;;  %v10420_v53 = vcombine.low %v2478_v41, %v2480_v42  ;;  %v2505_v42 = vld [vmem:[%s15988_s1 + $0x710] sm:$0xff] }
 0x146   :  { %2441 = vmatmul.mubr.bf16.vlgmr.msra.gmra.mrb[0].mxu1 %v12823_v47  ;;  %4370 = vmatpush1.bf16.msra.mxu0 %v10390_v51  ;;  %v2483_v51 = vld [vmem:[%s15988_s1 + $0x450] sm:$0xff] }
 0x147   :  { %4575 = vmatpush1.bf16.msra.mxu1 %v10392_v52  ;;  %4371 = vmatprep.subr.bf16.mxu0 %v10395_v54  ;;  %v2482_v52 = vld [vmem:[%s15988_s1 + $0x418] sm:$0xff]  ;;  %v10423_v10 = vcombine.high %v2481_v50, %v2483_v51 }
 0x148   :  { %4576 = vmatprep.subr.bf16.mxu1 %v10397_v55  ;;  %4401 = vmatprep.mubr.bf16.mxu0 %v11881_v9  ;;  %v2484_v54 = vld [vmem:[%s15988_s1 + $0x458] sm:$0xff]  ;;  %v10418_v55 = vcombine.low %v2477_v39, %v2479_v40 }
 0x149   :  { %4606 = vmatprep.mubr.bf16.mxu1 %v11881_v9  ;;  %v10425_v56 = vcombine.high %v2482_v52, %v2484_v54  ;;  %v10424_v1 = vcombine.low %v2482_v52, %v2484_v54  ;;  %v2509_v54 = vld [vmem:[%s15988_s1 + $0x790] sm:$0xff] }
 0x14a   :  { %4372 = vmatpush1.bf16.msra.mxu0 %v10394_v60  ;;  %v2487_v60 = vld [vmem:[%s15988_s1 + $0x4d0] sm:$0xff] }
 0x14b   :  { %4577 = vmatpush1.bf16.msra.mxu1 %v10396_v61  ;;  %4373 = vmatprep.subr.bf16.mxu0 %v10399_v62  ;;  %v2486_v61 = vld [vmem:[%s15988_s1 + $0x498] sm:$0xff]  ;;  %v10427_v2 = vcombine.high %v2485_v57, %v2487_v60 }
 0x14c   :  { %4578 = vmatprep.subr.bf16.mxu1 %v10401_v0  ;;  %v2488_v62 = vld [vmem:[%s15988_s1 + $0x4d8] sm:$0xff]  ;;  %v10422_v0 = vcombine.low %v2481_v50, %v2483_v51 }
 0x14d   :  { %v10429_v28 = vcombine.high %v2486_v61, %v2488_v62  ;;  %v10428_v11 = vcombine.low %v2486_v61, %v2488_v62  ;;  %v2513_v62 = vld [vmem:[%s15988_s1 + $0x810] sm:$0xff] }
 0x14e   :  { %4374 = vmatpush1.bf16.msra.mxu0 %v10398_v5  ;;  %v2491_v5 = vld [vmem:[%s15988_s1 + $0x550] sm:$0xff] }
 0x14f   :  { %4579 = vmatpush1.bf16.msra.mxu1 %v10400_v6  ;;  %4375 = vmatprep.subr.bf16.mxu0 %v10403_v7  ;;  %v2490_v6 = vld [vmem:[%s15988_s1 + $0x518] sm:$0xff]  ;;  %v10431_v12 = vcombine.high %v2489_v3, %v2491_v5 }
 0x150   :  { %4580 = vmatprep.subr.bf16.mxu1 %v10405_v8  ;;  %v2492_v7 = vld [vmem:[%s15988_s1 + $0x558] sm:$0xff]  ;;  %v10426_v8 = vcombine.low %v2485_v57, %v2487_v60 }
 0x151   :  { %v10433_v13 = vcombine.high %v2490_v6, %v2492_v7  ;;  %v10432_v20 = vcombine.low %v2490_v6, %v2492_v7  ;;  %v2517_v7 = vld [vmem:[%s15988_s1 + $0x890] sm:$0xff] }
 0x152   :  { %4376 = vmatpush1.bf16.msra.mxu0 %v10402_v15  ;;  %v2495_v15 = vld [vmem:[%s15988_s1 + $0x5d0] sm:$0xff] }
 0x153   :  { %4581 = vmatpush1.bf16.msra.mxu1 %v10404_v16  ;;  %4377 = vmatprep.subr.bf16.mxu0 %v10407_v17  ;;  %v2494_v16 = vld [vmem:[%s15988_s1 + $0x598] sm:$0xff]  ;;  %v10435_v21 = vcombine.high %v2493_v14, %v2495_v15 }
 0x154   :  { %4582 = vmatprep.subr.bf16.mxu1 %v10409_v19  ;;  %v2496_v17 = vld [vmem:[%s15988_s1 + $0x5d8] sm:$0xff]  ;;  %v10430_v19 = vcombine.low %v2489_v3, %v2491_v5 }
 0x155   :  { %v10437_v22 = vcombine.high %v2494_v16, %v2496_v17  ;;  %v10436_v63 = vcombine.low %v2494_v16, %v2496_v17  ;;  %v2521_v17 = vld [vmem:[%s15988_s1 + $0x910] sm:$0xff] }
 0x156   :  { %4378 = vmatpush1.bf16.msra.mxu0 %v10406_v25  ;;  %v2499_v25 = vld [vmem:[%s15988_s1 + $0x650] sm:$0xff] }
 0x157   :  { %4583 = vmatpush1.bf16.msra.mxu1 %v10408_v26  ;;  %4379 = vmatprep.subr.bf16.mxu0 %v10411_v59  ;;  %v2498_v26 = vld [vmem:[%s15988_s1 + $0x618] sm:$0xff]  ;;  %v10439_v30 = vcombine.high %v2497_v24, %v2499_v25 }
 0x158   :  { %4584 = vmatprep.subr.bf16.mxu1 %v10413_v29  ;;  %v2500_v59 = vld [vmem:[%s15988_s1 + $0x658] sm:$0xff]  ;;  %v10434_v29 = vcombine.low %v2493_v14, %v2495_v15 }
 0x159   :  { %v10441_v31 = vcombine.high %v2498_v26, %v2500_v59  ;;  %v10440_v39 = vcombine.low %v2498_v26, %v2500_v59  ;;  %v2525_v59 = vld [vmem:[%s15988_s1 + $0x990] sm:$0xff] }
 0x15a   :  { %4380 = vmatpush1.bf16.msra.mxu0 %v10410_v34  ;;  %v2503_v34 = vld [vmem:[%s15988_s1 + $0x6d0] sm:$0xff] }
 0x15b   :  { %4585 = vmatpush1.bf16.msra.mxu1 %v10412_v35  ;;  %4381 = vmatprep.subr.bf16.mxu0 %v10415_v36  ;;  %v2502_v35 = vld [vmem:[%s15988_s1 + $0x698] sm:$0xff]  ;;  %v10443_v40 = vcombine.high %v2501_v32, %v2503_v34 }
 0x15c   :  { %4586 = vmatprep.subr.bf16.mxu1 %v10417_v37  ;;  %v2504_v36 = vld [vmem:[%s15988_s1 + $0x6d8] sm:$0xff]  ;;  %v10438_v37 = vcombine.low %v2497_v24, %v2499_v25 }
 0x15d   :  { %v10445_v41 = vcombine.high %v2502_v35, %v2504_v36  ;;  %v10444_v50 = vcombine.low %v2502_v35, %v2504_v36  ;;  %v2529_v36 = vld [vmem:[%s15988_s1 + $0xa10] sm:$0xff] }
 0x15e   :  { %4382 = vmatpush1.bf16.msra.mxu0 %v10414_v43  ;;  %v2507_v43 = vld [vmem:[%s15988_s1 + $0x750] sm:$0xff] }
 0x15f   :  { %4587 = vmatpush1.bf16.msra.mxu1 %v10416_v45  ;;  %4383 = vmatprep.subr.bf16.mxu0 %v10419_v46  ;;  %v2506_v45 = vld [vmem:[%s15988_s1 + $0x718] sm:$0xff]  ;;  %v10447_v51 = vcombine.high %v2505_v42, %v2507_v43 }
 0x160   :  { %4588 = vmatprep.subr.bf16.mxu1 %v10421_v49  ;;  %v2508_v46 = vld [vmem:[%s15988_s1 + $0x758] sm:$0xff]  ;;  %v10442_v49 = vcombine.low %v2501_v32, %v2503_v34 }
 0x161   :  { %v10449_v52 = vcombine.high %v2506_v45, %v2508_v46  ;;  %v10448_v57 = vcombine.low %v2506_v45, %v2508_v46  ;;  %v2533_v46 = vld [vmem:[%s15988_s1 + $0xa90] sm:$0xff] }
 0x162   :  { %4384 = vmatpush1.bf16.msra.mxu0 %v10418_v55  ;;  %v2511_v55 = vld [vmem:[%s15988_s1 + $0x7d0] sm:$0xff] }
 0x163   :  { %4589 = vmatpush1.bf16.msra.mxu1 %v10420_v53  ;;  %4385 = vmatprep.subr.bf16.mxu0 %v10423_v10  ;;  %v2510_v53 = vld [vmem:[%s15988_s1 + $0x798] sm:$0xff]  ;;  %v10451_v60 = vcombine.high %v2509_v54, %v2511_v55 }
 0x164   :  { %4590 = vmatprep.subr.bf16.mxu1 %v10425_v56  ;;  %v2512_v10 = vld [vmem:[%s15988_s1 + $0x7d8] sm:$0xff]  ;;  %v10446_v56 = vcombine.low %v2505_v42, %v2507_v43 }
 0x165   :  { %v10453_v61 = vcombine.high %v2510_v53, %v2512_v10  ;;  %v10452_v3 = vcombine.low %v2510_v53, %v2512_v10  ;;  %v2537_v10 = vld [vmem:[%s15988_s1 + $0xb10] sm:$0xff] }
 0x166   :  { %4386 = vmatpush1.bf16.msra.mxu0 %v10422_v0  ;;  %v2515_v0 = vld [vmem:[%s15988_s1 + $0x850] sm:$0xff] }
 0x167   :  { %4591 = vmatpush1.bf16.msra.mxu1 %v10424_v1  ;;  %4387 = vmatprep.subr.bf16.mxu0 %v10427_v2  ;;  %v2514_v1 = vld [vmem:[%s15988_s1 + $0x818] sm:$0xff]  ;;  %v10455_v5 = vcombine.high %v2513_v62, %v2515_v0 }
 0x168   :  { %4592 = vmatprep.subr.bf16.mxu1 %v10429_v28  ;;  %v2516_v2 = vld [vmem:[%s15988_s1 + $0x858] sm:$0xff]  ;;  %v10450_v28 = vcombine.low %v2509_v54, %v2511_v55 }
 0x169   :  { %v10457_v6 = vcombine.high %v2514_v1, %v2516_v2  ;;  %v10456_v14 = vcombine.low %v2514_v1, %v2516_v2  ;;  %v2541_v2 = vld [vmem:[%s15988_s1 + $0xb90] sm:$0xff] }
 0x16a   :  { %4388 = vmatpush1.bf16.msra.mxu0 %v10426_v8  ;;  %v2519_v8 = vld [vmem:[%s15988_s1 + $0x8d0] sm:$0xff] }
 0x16b   :  { %4593 = vmatpush1.bf16.msra.mxu1 %v10428_v11  ;;  %4389 = vmatprep.subr.bf16.mxu0 %v10431_v12  ;;  %v2518_v11 = vld [vmem:[%s15988_s1 + $0x898] sm:$0xff]  ;;  %v10459_v15 = vcombine.high %v2517_v7, %v2519_v8 }
 0x16c   :  { %4594 = vmatprep.subr.bf16.mxu1 %v10433_v13  ;;  %v2520_v12 = vld [vmem:[%s15988_s1 + $0x8d8] sm:$0xff]  ;;  %v10454_v13 = vcombine.low %v2513_v62, %v2515_v0 }
 0x16d   :  { %v10461_v16 = vcombine.high %v2518_v11, %v2520_v12  ;;  %v10460_v24 = vcombine.low %v2518_v11, %v2520_v12  ;;  %v2545_v12 = vld [vmem:[%s15988_s1 + $0xc10] sm:$0xff] }
 0x16e   :  { %4390 = vmatpush1.bf16.msra.mxu0 %v10430_v19  ;;  %v2523_v19 = vld [vmem:[%s15988_s1 + $0x950] sm:$0xff] }
 0x16f   :  { %4595 = vmatpush1.bf16.msra.mxu1 %v10432_v20  ;;  %4391 = vmatprep.subr.bf16.mxu0 %v10435_v21  ;;  %v2522_v20 = vld [vmem:[%s15988_s1 + $0x918] sm:$0xff]  ;;  %v10463_v25 = vcombine.high %v2521_v17, %v2523_v19 }
 0x170   :  { %4596 = vmatprep.subr.bf16.mxu1 %v10437_v22  ;;  %v2524_v21 = vld [vmem:[%s15988_s1 + $0x958] sm:$0xff]  ;;  %v10458_v22 = vcombine.low %v2517_v7, %v2519_v8 }
 0x171   :  { %v10465_v26 = vcombine.high %v2522_v20, %v2524_v21  ;;  %v10464_v32 = vcombine.low %v2522_v20, %v2524_v21  ;;  %v2549_v21 = vld [vmem:[%s15988_s1 + $0xc90] sm:$0xff] }
 0x172   :  { %4392 = vmatpush1.bf16.msra.mxu0 %v10434_v29  ;;  %v2527_v29 = vld [vmem:[%s15988_s1 + $0x9d0] sm:$0xff] }
 0x173   :  { %4597 = vmatpush1.bf16.msra.mxu1 %v10436_v63  ;;  %4393 = vmatprep.subr.bf16.mxu0 %v10439_v30  ;;  %v2526_v63 = vld [vmem:[%s15988_s1 + $0x998] sm:$0xff]  ;;  %v10467_v34 = vcombine.high %v2525_v59, %v2527_v29 }
 0x174   :  { %4598 = vmatprep.subr.bf16.mxu1 %v10441_v31  ;;  %v2528_v30 = vld [vmem:[%s15988_s1 + $0x9d8] sm:$0xff]  ;;  %v10462_v31 = vcombine.low %v2521_v17, %v2523_v19 }
 0x175   :  { %v10469_v35 = vcombine.high %v2526_v63, %v2528_v30  ;;  %v10468_v42 = vcombine.low %v2526_v63, %v2528_v30  ;;  %v2553_v30 = vld [vmem:[%s15988_s1 + $0xd10] sm:$0xff] }
 0x176   :  { %4394 = vmatpush1.bf16.msra.mxu0 %v10438_v37  ;;  %v2531_v37 = vld [vmem:[%s15988_s1 + $0xa50] sm:$0xff] }
 0x177   :  { %4599 = vmatpush1.bf16.msra.mxu1 %v10440_v39  ;;  %4395 = vmatprep.subr.bf16.mxu0 %v10443_v40  ;;  %v2530_v39 = vld [vmem:[%s15988_s1 + $0xa18] sm:$0xff]  ;;  %v10471_v43 = vcombine.high %v2529_v36, %v2531_v37 }
 0x178   :  { %4600 = vmatprep.subr.bf16.mxu1 %v10445_v41  ;;  %v2532_v40 = vld [vmem:[%s15988_s1 + $0xa58] sm:$0xff]  ;;  %v10466_v41 = vcombine.low %v2525_v59, %v2527_v29 }
 0x179   :  { %v10473_v45 = vcombine.high %v2530_v39, %v2532_v40  ;;  %v10472_v54 = vcombine.low %v2530_v39, %v2532_v40  ;;  %v2557_v40 = vld [vmem:[%s15988_s1 + $0xd90] sm:$0xff] }
 0x17a   :  { %4396 = vmatpush1.bf16.msra.mxu0 %v10442_v49  ;;  %v2535_v49 = vld [vmem:[%s15988_s1 + $0xad0] sm:$0xff] }
 0x17b   :  { %4601 = vmatpush1.bf16.msra.mxu1 %v10444_v50  ;;  %4397 = vmatprep.subr.bf16.mxu0 %v10447_v51  ;;  %v2534_v50 = vld [vmem:[%s15988_s1 + $0xa98] sm:$0xff]  ;;  %v10475_v55 = vcombine.high %v2533_v46, %v2535_v49 }
 0x17c   :  { %4602 = vmatprep.subr.bf16.mxu1 %v10449_v52  ;;  %v2536_v51 = vld [vmem:[%s15988_s1 + $0xad8] sm:$0xff]  ;;  %v10470_v52 = vcombine.low %v2529_v36, %v2531_v37 }
 0x17d   :  { %v10477_v53 = vcombine.high %v2534_v50, %v2536_v51  ;;  %v10476_v62 = vcombine.low %v2534_v50, %v2536_v51  ;;  %v2561_v51 = vld [vmem:[%s15988_s1 + $0xe10] sm:$0xff] }
 0x17e   :  { %4398 = vmatpush1.bf16.msra.mxu0 %v10446_v56  ;;  %v2539_v56 = vld [vmem:[%s15988_s1 + $0xb50] sm:$0xff] }
 0x17f   :  { %4603 = vmatpush1.bf16.msra.mxu1 %v10448_v57  ;;  %4399 = vmatprep.subr.bf16.mxu0 %v10451_v60  ;;  %v2538_v57 = vld [vmem:[%s15988_s1 + $0xb18] sm:$0xff]  ;;  %v10479_v0 = vcombine.high %v2537_v10, %v2539_v56 }
 0x180   :  { %4604 = vmatprep.subr.bf16.mxu1 %v10453_v61  ;;  %v2540_v60 = vld [vmem:[%s15988_s1 + $0xb58] sm:$0xff]  ;;  %v10474_v61 = vcombine.low %v2533_v46, %v2535_v49 }
 0x181   :  { %v10481_v1 = vcombine.high %v2538_v57, %v2540_v60  ;;  %v10480_v7 = vcombine.low %v2538_v57, %v2540_v60  ;;  %v2565_v60 = vld [vmem:[%s15988_s1 + $0xe90] sm:$0xff] }
 0x182   :  { %4400 = vmatpush1.bf16.msra.mxu0 %v10450_v28  ;;  %v2543_v28 = vld [vmem:[%s15988_s1 + $0xbd0] sm:$0xff] }
 0x183   :  { %4605 = vmatpush1.bf16.msra.mxu1 %v10452_v3  ;;  %4410 = vmatprep.subr.bf16.mxu0 %v10455_v5  ;;  %v2542_v3 = vld [vmem:[%s15988_s1 + $0xb98] sm:$0xff]  ;;  %v10483_v8 = vcombine.high %v2541_v2, %v2543_v28 }
 0x184   :  { %4615 = vmatprep.subr.bf16.mxu1 %v10457_v6  ;;  %v2544_v5 = vld [vmem:[%s15988_s1 + $0xbd8] sm:$0xff]  ;;  %v10478_v6 = vcombine.low %v2537_v10, %v2539_v56 }
 0x185   :  { %4402 = vmatmul.mubr.bf16.vlgmr.msra.gmra.mrb[4].mxu0 %v11995_v23  ;;  %v10485_v11 = vcombine.high %v2542_v3, %v2544_v5  ;;  %v10484_v17 = vcombine.low %v2542_v3, %v2544_v5  ;;  %v2569_v5 = vld [vmem:[%s15988_s1 + $0xf10] sm:$0xff] }
 0x186   :  { %4411 = vmatpush1.bf16.msra.mxu0 %v10454_v13  ;;  %4607 = vmatmul.mubr.bf16.vlgmr.msra.gmra.mrb[4].mxu1 %v11995_v23  ;;  %v2547_v13 = vld [vmem:[%s15988_s1 + $0xc50] sm:$0xff] }
 0x187   :  { %4616 = vmatpush1.bf16.msra.mxu1 %v10456_v14  ;;  %4412 = vmatprep.subr.bf16.mxu0 %v10459_v15  ;;  %v2546_v14 = vld [vmem:[%s15988_s1 + $0xc18] sm:$0xff]  ;;  %v10487_v19 = vcombine.high %v2545_v12, %v2547_v13 }
 0x188   :  { %4617 = vmatprep.subr.bf16.mxu1 %v10461_v16  ;;  %4442 = vmatprep.mubr.bf16.mxu0 %v12017_v33  ;;  %v2548_v15 = vld [vmem:[%s15988_s1 + $0xc58] sm:$0xff]  ;;  %v10482_v16 = vcombine.low %v2541_v2, %v2543_v28 }
 0x189   :  { %4647 = vmatprep.mubr.bf16.mxu1 %v12017_v33  ;;  %v10489_v20 = vcombine.high %v2546_v14, %v2548_v15  ;;  %v10488_v59 = vcombine.low %v2546_v14, %v2548_v15  ;;  %v2573_v15 = vld [vmem:[%s15988_s1 + $0xf90] sm:$0xff] }
 0x18a   :  { %4413 = vmatpush1.bf16.msra.mxu0 %v10458_v22  ;;  %v2551_v22 = vld [vmem:[%s15988_s1 + $0xcd0] sm:$0xff] }
 0x18b   :  { %4618 = vmatpush1.bf16.msra.mxu1 %v10460_v24  ;;  %4414 = vmatprep.subr.bf16.mxu0 %v10463_v25  ;;  %v2550_v24 = vld [vmem:[%s15988_s1 + $0xc98] sm:$0xff]  ;;  %v10491_v29 = vcombine.high %v2549_v21, %v2551_v22 }
 0x18c   :  { %4619 = vmatprep.subr.bf16.mxu1 %v10465_v26  ;;  %v2552_v25 = vld [vmem:[%s15988_s1 + $0xcd8] sm:$0xff]  ;;  %v10486_v26 = vcombine.low %v2545_v12, %v2547_v13 }
 0x18d   :  { %v10493_v63 = vcombine.high %v2550_v24, %v2552_v25  ;;  %v10492_v36 = vcombine.low %v2550_v24, %v2552_v25  ;;  %v2577_v25 = vld [vmem:[%s15988_s1 + $0x1010] sm:$0xff] }
 0x18e   :  { %4415 = vmatpush1.bf16.msra.mxu0 %v10462_v31  ;;  %v2555_v31 = vld [vmem:[%s15988_s1 + $0xd50] sm:$0xff] }
 0x18f   :  { %4620 = vmatpush1.bf16.msra.mxu1 %v10464_v32  ;;  %4416 = vmatprep.subr.bf16.mxu0 %v10467_v34  ;;  %v2554_v32 = vld [vmem:[%s15988_s1 + $0xd18] sm:$0xff]  ;;  %v10495_v37 = vcombine.high %v2553_v30, %v2555_v31 }
 0x190   :  { %4621 = vmatprep.subr.bf16.mxu1 %v10469_v35  ;;  %v2556_v34 = vld [vmem:[%s15988_s1 + $0xd58] sm:$0xff]  ;;  %v10490_v35 = vcombine.low %v2549_v21, %v2551_v22 }
 0x191   :  { %v10497_v39 = vcombine.high %v2554_v32, %v2556_v34  ;;  %v10496_v46 = vcombine.low %v2554_v32, %v2556_v34  ;;  %v2581_v34 = vld [vmem:[%s15988_s1 + $0x1090] sm:$0xff] }
 0x192   :  { %4417 = vmatpush1.bf16.msra.mxu0 %v10466_v41  ;;  %v2559_v41 = vld [vmem:[%s15988_s1 + $0xdd0] sm:$0xff] }
 0x193   :  { %4622 = vmatpush1.bf16.msra.mxu1 %v10468_v42  ;;  %4418 = vmatprep.subr.bf16.mxu0 %v10471_v43  ;;  %v2558_v42 = vld [vmem:[%s15988_s1 + $0xd98] sm:$0xff]  ;;  %v10499_v49 = vcombine.high %v2557_v40, %v2559_v41 }
 0x194   :  { %4623 = vmatprep.subr.bf16.mxu1 %v10473_v45  ;;  %v2560_v43 = vld [vmem:[%s15988_s1 + $0xdd8] sm:$0xff]  ;;  %v10494_v45 = vcombine.low %v2553_v30, %v2555_v31 }
 0x195   :  { %v10501_v50 = vcombine.high %v2558_v42, %v2560_v43  ;;  %v10500_v10 = vcombine.low %v2558_v42, %v2560_v43  ;;  %v2585_v43 = vld [vmem:[%s15988_s1 + $0x1110] sm:$0xff] }
 0x196   :  { %4419 = vmatpush1.bf16.msra.mxu0 %v10470_v52  ;;  %v2563_v52 = vld [vmem:[%s15988_s1 + $0xe50] sm:$0xff] }
 0x197   :  { %4624 = vmatpush1.bf16.msra.mxu1 %v10472_v54  ;;  %4420 = vmatprep.subr.bf16.mxu0 %v10475_v55  ;;  %v2562_v54 = vld [vmem:[%s15988_s1 + $0xe18] sm:$0xff]  ;;  %v10503_v56 = vcombine.high %v2561_v51, %v2563_v52 }
 0x198   :  { %4625 = vmatprep.subr.bf16.mxu1 %v10477_v53  ;;  %v2564_v55 = vld [vmem:[%s15988_s1 + $0xe58] sm:$0xff]  ;;  %v10498_v53 = vcombine.low %v2557_v40, %v2559_v41 }
 0x199   :  { %v10505_v57 = vcombine.high %v2562_v54, %v2564_v55  ;;  %v10504_v2 = vcombine.low %v2562_v54, %v2564_v55  ;;  %v2589_v55 = vld [vmem:[%s15988_s1 + $0x1190] sm:$0xff] }
 0x19a   :  { %4421 = vmatpush1.bf16.msra.mxu0 %v10474_v61  ;;  %v2567_v61 = vld [vmem:[%s15988_s1 + $0xed0] sm:$0xff] }
 0x19b   :  { %4626 = vmatpush1.bf16.msra.mxu1 %v10476_v62  ;;  %4422 = vmatprep.subr.bf16.mxu0 %v10479_v0  ;;  %v2566_v62 = vld [vmem:[%s15988_s1 + $0xe98] sm:$0xff]  ;;  %v10507_v28 = vcombine.high %v2565_v60, %v2567_v61 }
 0x19c   :  { %4627 = vmatprep.subr.bf16.mxu1 %v10481_v1  ;;  %v2568_v0 = vld [vmem:[%s15988_s1 + $0xed8] sm:$0xff]  ;;  %v10502_v1 = vcombine.low %v2561_v51, %v2563_v52 }
 0x19d   :  { %v10509_v3 = vcombine.high %v2566_v62, %v2568_v0  ;;  %v10508_v12 = vcombine.low %v2566_v62, %v2568_v0  ;;  %v2593_v0 = vld [vmem:[%s15988_s1 + $0x1210] sm:$0xff] }
 0x19e   :  { %4423 = vmatpush1.bf16.msra.mxu0 %v10478_v6  ;;  %v2571_v6 = vld [vmem:[%s15988_s1 + $0xf50] sm:$0xff] }
 0x19f   :  { %4628 = vmatpush1.bf16.msra.mxu1 %v10480_v7  ;;  %4424 = vmatprep.subr.bf16.mxu0 %v10483_v8  ;;  %v2570_v7 = vld [vmem:[%s15988_s1 + $0xf18] sm:$0xff]  ;;  %v10511_v13 = vcombine.high %v2569_v5, %v2571_v6 }
 0x1a0   :  { %4629 = vmatprep.subr.bf16.mxu1 %v10485_v11  ;;  %v2572_v8 = vld [vmem:[%s15988_s1 + $0xf58] sm:$0xff]  ;;  %v10506_v11 = vcombine.low %v2565_v60, %v2567_v61 }
 0x1a1   :  { %v10513_v14 = vcombine.high %v2570_v7, %v2572_v8  ;;  %v10512_v21 = vcombine.low %v2570_v7, %v2572_v8  ;;  %v2597_v8 = vld [vmem:[%s15988_s1 + $0x1290] sm:$0xff] }
 0x1a2   :  { %4425 = vmatpush1.bf16.msra.mxu0 %v10482_v16  ;;  %v2575_v16 = vld [vmem:[%s15988_s1 + $0xfd0] sm:$0xff] }
 0x1a3   :  { %4630 = vmatpush1.bf16.msra.mxu1 %v10484_v17  ;;  %4426 = vmatprep.subr.bf16.mxu0 %v10487_v19  ;;  %v2574_v17 = vld [vmem:[%s15988_s1 + $0xf98] sm:$0xff]  ;;  %v10515_v22 = vcombine.high %v2573_v15, %v2575_v16 }
 0x1a4   :  { %4631 = vmatprep.subr.bf16.mxu1 %v10489_v20  ;;  %v2576_v19 = vld [vmem:[%s15988_s1 + $0xfd8] sm:$0xff]  ;;  %v10510_v20 = vcombine.low %v2569_v5, %v2571_v6 }
 0x1a5   :  { %v10517_v24 = vcombine.high %v2574_v17, %v2576_v19  ;;  %v10516_v30 = vcombine.low %v2574_v17, %v2576_v19  ;;  %v2601_v19 = vld [vmem:[%s15988_s1 + $0x1310] sm:$0xff] }
 0x1a6   :  { %4427 = vmatpush1.bf16.msra.mxu0 %v10486_v26  ;;  %v2579_v26 = vld [vmem:[%s15988_s1 + $0x1050] sm:$0xff] }
 0x1a7   :  { %4632 = vmatpush1.bf16.msra.mxu1 %v10488_v59  ;;  %4428 = vmatprep.subr.bf16.mxu0 %v10491_v29  ;;  %v2578_v59 = vld [vmem:[%s15988_s1 + $0x1018] sm:$0xff]  ;;  %v10519_v31 = vcombine.high %v2577_v25, %v2579_v26 }
 0x1a8   :  { %4633 = vmatprep.subr.bf16.mxu1 %v10493_v63  ;;  %v2580_v29 = vld [vmem:[%s15988_s1 + $0x1058] sm:$0xff]  ;;  %v10514_v63 = vcombine.low %v2573_v15, %v2575_v16 }
 0x1a9   :  { %v10521_v32 = vcombine.high %v2578_v59, %v2580_v29  ;;  %v10520_v40 = vcombine.low %v2578_v59, %v2580_v29  ;;  %v2605_v29 = vld [vmem:[%s15988_s1 + $0x1390] sm:$0xff] }
 0x1aa   :  { %4429 = vmatpush1.bf16.msra.mxu0 %v10490_v35  ;;  %v2583_v35 = vld [vmem:[%s15988_s1 + $0x10d0] sm:$0xff] }
 0x1ab   :  { %4634 = vmatpush1.bf16.msra.mxu1 %v10492_v36  ;;  %4430 = vmatprep.subr.bf16.mxu0 %v10495_v37  ;;  %v2582_v36 = vld [vmem:[%s15988_s1 + $0x1098] sm:$0xff]  ;;  %v10523_v41 = vcombine.high %v2581_v34, %v2583_v35 }
 0x1ac   :  { %4635 = vmatprep.subr.bf16.mxu1 %v10497_v39  ;;  %v2584_v37 = vld [vmem:[%s15988_s1 + $0x10d8] sm:$0xff]  ;;  %v10518_v39 = vcombine.low %v2577_v25, %v2579_v26 }
 0x1ad   :  { %v10525_v42 = vcombine.high %v2582_v36, %v2584_v37  ;;  %v10524_v51 = vcombine.low %v2582_v36, %v2584_v37  ;;  %v2609_v37 = vld [vmem:[%s15988_s1 + $0x1410] sm:$0xff] }
 0x1ae   :  { %4431 = vmatpush1.bf16.msra.mxu0 %v10494_v45  ;;  %v2587_v45 = vld [vmem:[%s15988_s1 + $0x1150] sm:$0xff] }
 0x1af   :  { %4636 = vmatpush1.bf16.msra.mxu1 %v10496_v46  ;;  %4432 = vmatprep.subr.bf16.mxu0 %v10499_v49  ;;  %v2586_v46 = vld [vmem:[%s15988_s1 + $0x1118] sm:$0xff]  ;;  %v10527_v52 = vcombine.high %v2585_v43, %v2587_v45 }
 0x1b0   :  { %4637 = vmatprep.subr.bf16.mxu1 %v10501_v50  ;;  %v2588_v49 = vld [vmem:[%s15988_s1 + $0x1158] sm:$0xff]  ;;  %v10522_v50 = vcombine.low %v2581_v34, %v2583_v35 }
 0x1b1   :  { %v10529_v54 = vcombine.high %v2586_v46, %v2588_v49  ;;  %v10528_v60 = vcombine.low %v2586_v46, %v2588_v49  ;;  %v2613_v49 = vld [vmem:[%s15988_s1 + $0x1490] sm:$0xff] }
 0x1b2   :  { %4433 = vmatpush1.bf16.msra.mxu0 %v10498_v53  ;;  %v2591_v53 = vld [vmem:[%s15988_s1 + $0x11d0] sm:$0xff] }
 0x1b3   :  { %4638 = vmatpush1.bf16.msra.mxu1 %v10500_v10  ;;  %4434 = vmatprep.subr.bf16.mxu0 %v10503_v56  ;;  %v2590_v10 = vld [vmem:[%s15988_s1 + $0x1198] sm:$0xff]  ;;  %v10531_v61 = vcombine.high %v2589_v55, %v2591_v53 }
 0x1b4   :  { %4639 = vmatprep.subr.bf16.mxu1 %v10505_v57  ;;  %v2592_v56 = vld [vmem:[%s15988_s1 + $0x11d8] sm:$0xff]  ;;  %v10526_v57 = vcombine.low %v2585_v43, %v2587_v45 }
 0x1b5   :  { %v10533_v62 = vcombine.high %v2590_v10, %v2592_v56  ;;  %v10532_v5 = vcombine.low %v2590_v10, %v2592_v56  ;;  %v2617_v56 = vld [vmem:[%s15988_s1 + $0x1510] sm:$0xff] }
 0x1b6   :  { %4435 = vmatpush1.bf16.msra.mxu0 %v10502_v1  ;;  %v2595_v1 = vld [vmem:[%s15988_s1 + $0x1250] sm:$0xff] }
 0x1b7   :  { %4640 = vmatpush1.bf16.msra.mxu1 %v10504_v2  ;;  %4436 = vmatprep.subr.bf16.mxu0 %v10507_v28  ;;  %v2594_v2 = vld [vmem:[%s15988_s1 + $0x1218] sm:$0xff]  ;;  %v10535_v6 = vcombine.high %v2593_v0, %v2595_v1 }
 0x1b8   :  { %4641 = vmatprep.subr.bf16.mxu1 %v10509_v3  ;;  %v2596_v28 = vld [vmem:[%s15988_s1 + $0x1258] sm:$0xff]  ;;  %v10530_v3 = vcombine.low %v2589_v55, %v2591_v53 }
 0x1b9   :  { %v10537_v7 = vcombine.high %v2594_v2, %v2596_v28  ;;  %v10536_v15 = vcombine.low %v2594_v2, %v2596_v28  ;;  %v2621_v28 = vld [vmem:[%s15988_s1 + $0x1590] sm:$0xff] }
 0x1ba   :  { %4437 = vmatpush1.bf16.msra.mxu0 %v10506_v11  ;;  %v2599_v11 = vld [vmem:[%s15988_s1 + $0x12d0] sm:$0xff] }
 0x1bb   :  { %4642 = vmatpush1.bf16.msra.mxu1 %v10508_v12  ;;  %4438 = vmatprep.subr.bf16.mxu0 %v10511_v13  ;;  %v2598_v12 = vld [vmem:[%s15988_s1 + $0x1298] sm:$0xff]  ;;  %v10539_v16 = vcombine.high %v2597_v8, %v2599_v11 }
 0x1bc   :  { %4643 = vmatprep.subr.bf16.mxu1 %v10513_v14  ;;  %v2600_v13 = vld [vmem:[%s15988_s1 + $0x12d8] sm:$0xff]  ;;  %v10534_v14 = vcombine.low %v2593_v0, %v2595_v1 }
 0x1bd   :  { %v10541_v17 = vcombine.high %v2598_v12, %v2600_v13  ;;  %v10540_v25 = vcombine.low %v2598_v12, %v2600_v13  ;;  %v2625_v13 = vld [vmem:[%s15988_s1 + $0x1610] sm:$0xff] }
 0x1be   :  { %4439 = vmatpush1.bf16.msra.mxu0 %v10510_v20  ;;  %v2603_v20 = vld [vmem:[%s15988_s1 + $0x1350] sm:$0xff] }
 0x1bf   :  { %4644 = vmatpush1.bf16.msra.mxu1 %v10512_v21  ;;  %4440 = vmatprep.subr.bf16.mxu0 %v10515_v22  ;;  %v2602_v21 = vld [vmem:[%s15988_s1 + $0x1318] sm:$0xff]  ;;  %v10543_v26 = vcombine.high %v2601_v19, %v2603_v20 }
 0x1c0   :  { %4645 = vmatprep.subr.bf16.mxu1 %v10517_v24  ;;  %v2604_v22 = vld [vmem:[%s15988_s1 + $0x1358] sm:$0xff]  ;;  %v10538_v24 = vcombine.low %v2597_v8, %v2599_v11 }
 0x1c1   :  { %v10545_v59 = vcombine.high %v2602_v21, %v2604_v22  ;;  %v10544_v34 = vcombine.low %v2602_v21, %v2604_v22  ;;  %v2629_v22 = vld [vmem:[%s15988_s1 + $0x1690] sm:$0xff] }
 0x1c2   :  { %4441 = vmatpush1.bf16.msra.mxu0 %v10514_v63  ;;  %v2607_v63 = vld [vmem:[%s15988_s1 + $0x13d0] sm:$0xff] }
 0x1c3   :  { %4646 = vmatpush1.bf16.msra.mxu1 %v10516_v30  ;;  %4451 = vmatprep.subr.bf16.mxu0 %v10519_v31  ;;  %v2606_v30 = vld [vmem:[%s15988_s1 + $0x1398] sm:$0xff]  ;;  %v10547_v35 = vcombine.high %v2605_v29, %v2607_v63 }
 0x1c4   :  { %4656 = vmatprep.subr.bf16.mxu1 %v10521_v32  ;;  %v2608_v31 = vld [vmem:[%s15988_s1 + $0x13d8] sm:$0xff]  ;;  %v10542_v32 = vcombine.low %v2601_v19, %v2603_v20 }
 0x1c5   :  { %4443 = vmatmul.mubr.bf16.vlgmr.msra.gmra.mrb[4].mxu0 %v12206_v38  ;;  %v10549_v36 = vcombine.high %v2606_v30, %v2608_v31  ;;  %v10548_v43 = vcombine.low %v2606_v30, %v2608_v31  ;;  %v2633_v31 = vld [vmem:[%s15988_s1 + $0x1710] sm:$0xff] }
 0x1c6   :  { %4452 = vmatpush1.bf16.msra.mxu0 %v10518_v39  ;;  %4648 = vmatmul.mubr.bf16.vlgmr.msra.gmra.mrb[4].mxu1 %v12206_v38  ;;  %v2611_v39 = vld [vmem:[%s15988_s1 + $0x1450] sm:$0xff] }
 0x1c7   :  { %4657 = vmatpush1.bf16.msra.mxu1 %v10520_v40  ;;  %4453 = vmatprep.subr.bf16.mxu0 %v10523_v41  ;;  %v2610_v40 = vld [vmem:[%s15988_s1 + $0x1418] sm:$0xff]  ;;  %v10551_v45 = vcombine.high %v2609_v37, %v2611_v39 }
 0x1c8   :  { %4658 = vmatprep.subr.bf16.mxu1 %v10525_v42  ;;  %4483 = vmatprep.mubr.bf16.mxu0 %v12221_v48  ;;  %v2612_v41 = vld [vmem:[%s15988_s1 + $0x1458] sm:$0xff]  ;;  %v10546_v42 = vcombine.low %v2605_v29, %v2607_v63 }
 0x1c9   :  { %4688 = vmatprep.mubr.bf16.mxu1 %v12221_v48  ;;  %v10553_v46 = vcombine.high %v2610_v40, %v2612_v41  ;;  %v10552_v55 = vcombine.low %v2610_v40, %v2612_v41  ;;  %v2637_v41 = vld [vmem:[%s15988_s1 + $0x1790] sm:$0xff] }
 0x1ca   :  { %4454 = vmatpush1.bf16.msra.mxu0 %v10522_v50  ;;  %v2615_v50 = vld [vmem:[%s15988_s1 + $0x14d0] sm:$0xff] }
 0x1cb   :  { %4659 = vmatpush1.bf16.msra.mxu1 %v10524_v51  ;;  %4455 = vmatprep.subr.bf16.mxu0 %v10527_v52  ;;  %v2614_v51 = vld [vmem:[%s15988_s1 + $0x1498] sm:$0xff]  ;;  %v10555_v53 = vcombine.high %v2613_v49, %v2615_v50 }
 0x1cc   :  { %4660 = vmatprep.subr.bf16.mxu1 %v10529_v54  ;;  %v2616_v52 = vld [vmem:[%s15988_s1 + $0x14d8] sm:$0xff]  ;;  %v10550_v54 = vcombine.low %v2609_v37, %v2611_v39 }
 0x1cd   :  { %v10557_v10 = vcombine.high %v2614_v51, %v2616_v52  ;;  %v10556_v0 = vcombine.low %v2614_v51, %v2616_v52  ;;  %v2641_v52 = vld [vmem:[%s15988_s1 + $0x1810] sm:$0xff] }
 0x1ce   :  { %4456 = vmatpush1.bf16.msra.mxu0 %v10526_v57  ;;  %v2619_v57 = vld [vmem:[%s15988_s1 + $0x1550] sm:$0xff] }
 0x1cf   :  { %4661 = vmatpush1.bf16.msra.mxu1 %v10528_v60  ;;  %4457 = vmatprep.subr.bf16.mxu0 %v10531_v61  ;;  %v2618_v60 = vld [vmem:[%s15988_s1 + $0x1518] sm:$0xff]  ;;  %v10559_v1 = vcombine.high %v2617_v56, %v2619_v57 }
 0x1d0   :  { %4662 = vmatprep.subr.bf16.mxu1 %v10533_v62  ;;  %v2620_v61 = vld [vmem:[%s15988_s1 + $0x1558] sm:$0xff]  ;;  %v10554_v62 = vcombine.low %v2613_v49, %v2615_v50 }
 0x1d1   :  { %v10561_v2 = vcombine.high %v2618_v60, %v2620_v61  ;;  %v10560_v8 = vcombine.low %v2618_v60, %v2620_v61  ;;  %v2645_v61 = vld [vmem:[%s15988_s1 + $0x1890] sm:$0xff] }
 0x1d2   :  { %4458 = vmatpush1.bf16.msra.mxu0 %v10530_v3  ;;  %v2623_v3 = vld [vmem:[%s15988_s1 + $0x15d0] sm:$0xff] }
 0x1d3   :  { %4663 = vmatpush1.bf16.msra.mxu1 %v10532_v5  ;;  %4459 = vmatprep.subr.bf16.mxu0 %v10535_v6  ;;  %v2622_v5 = vld [vmem:[%s15988_s1 + $0x1598] sm:$0xff]  ;;  %v10563_v11 = vcombine.high %v2621_v28, %v2623_v3 }
 0x1d4   :  { %4664 = vmatprep.subr.bf16.mxu1 %v10537_v7  ;;  %v2624_v6 = vld [vmem:[%s15988_s1 + $0x15d8] sm:$0xff]  ;;  %v10558_v7 = vcombine.low %v2617_v56, %v2619_v57 }
 0x1d5   :  { %v10565_v12 = vcombine.high %v2622_v5, %v2624_v6  ;;  %v10564_v19 = vcombine.low %v2622_v5, %v2624_v6  ;;  %v2649_v6 = vld [vmem:[%s15988_s1 + $0x1910] sm:$0xff] }
 0x1d6   :  { %4460 = vmatpush1.bf16.msra.mxu0 %v10534_v14  ;;  %v2627_v14 = vld [vmem:[%s15988_s1 + $0x1650] sm:$0xff] }
 0x1d7   :  { %4665 = vmatpush1.bf16.msra.mxu1 %v10536_v15  ;;  %4461 = vmatprep.subr.bf16.mxu0 %v10539_v16  ;;  %v2626_v15 = vld [vmem:[%s15988_s1 + $0x1618] sm:$0xff]  ;;  %v10567_v20 = vcombine.high %v2625_v13, %v2627_v14 }
 0x1d8   :  { %4666 = vmatprep.subr.bf16.mxu1 %v10541_v17  ;;  %v2628_v16 = vld [vmem:[%s15988_s1 + $0x1658] sm:$0xff]  ;;  %v10562_v17 = vcombine.low %v2621_v28, %v2623_v3 }
 0x1d9   :  { %v10569_v21 = vcombine.high %v2626_v15, %v2628_v16  ;;  %v10568_v29 = vcombine.low %v2626_v15, %v2628_v16  ;;  %v2653_v16 = vld [vmem:[%s15988_s1 + $0x1990] sm:$0xff] }
 0x1da   :  { %4462 = vmatpush1.bf16.msra.mxu0 %v10538_v24  ;;  %v2631_v24 = vld [vmem:[%s15988_s1 + $0x16d0] sm:$0xff] }
 0x1db   :  { %4667 = vmatpush1.bf16.msra.mxu1 %v10540_v25  ;;  %4463 = vmatprep.subr.bf16.mxu0 %v10543_v26  ;;  %v2630_v25 = vld [vmem:[%s15988_s1 + $0x1698] sm:$0xff]  ;;  %v10571_v63 = vcombine.high %v2629_v22, %v2631_v24 }
 0x1dc   :  { %4668 = vmatprep.subr.bf16.mxu1 %v10545_v59  ;;  %v2632_v26 = vld [vmem:[%s15988_s1 + $0x16d8] sm:$0xff]  ;;  %v10566_v59 = vcombine.low %v2625_v13, %v2627_v14 }
 0x1dd   :  { %v10573_v30 = vcombine.high %v2630_v25, %v2632_v26  ;;  %v10572_v37 = vcombine.low %v2630_v25, %v2632_v26  ;;  %v2657_v26 = vld [vmem:[%s15988_s1 + $0x1a10] sm:$0xff] }
 0x1de   :  { %4464 = vmatpush1.bf16.msra.mxu0 %v10542_v32  ;;  %v2635_v32 = vld [vmem:[%s15988_s1 + $0x1750] sm:$0xff] }
 0x1df   :  { %4669 = vmatpush1.bf16.msra.mxu1 %v10544_v34  ;;  %4465 = vmatprep.subr.bf16.mxu0 %v10547_v35  ;;  %v2634_v34 = vld [vmem:[%s15988_s1 + $0x1718] sm:$0xff]  ;;  %v10575_v39 = vcombine.high %v2633_v31, %v2635_v32 }
 0x1e0   :  { %4670 = vmatprep.subr.bf16.mxu1 %v10549_v36  ;;  %v2636_v35 = vld [vmem:[%s15988_s1 + $0x1758] sm:$0xff]  ;;  %v10570_v36 = vcombine.low %v2629_v22, %v2631_v24 }
 0x1e1   :  { %v10577_v40 = vcombine.high %v2634_v34, %v2636_v35  ;;  %v10576_v49 = vcombine.low %v2634_v34, %v2636_v35  ;;  %v2661_v35 = vld [vmem:[%s15988_s1 + $0x1a90] sm:$0xff] }
 0x1e2   :  { %4466 = vmatpush1.bf16.msra.mxu0 %v10546_v42  ;;  %v2639_v42 = vld [vmem:[%s15988_s1 + $0x17d0] sm:$0xff] }
 0x1e3   :  { %4671 = vmatpush1.bf16.msra.mxu1 %v10548_v43  ;;  %4467 = vmatprep.subr.bf16.mxu0 %v10551_v45  ;;  %v2638_v43 = vld [vmem:[%s15988_s1 + $0x1798] sm:$0xff]  ;;  %v10579_v50 = vcombine.high %v2637_v41, %v2639_v42 }
 0x1e4   :  { %4672 = vmatprep.subr.bf16.mxu1 %v10553_v46  ;;  %v2640_v45 = vld [vmem:[%s15988_s1 + $0x17d8] sm:$0xff]  ;;  %v10574_v46 = vcombine.low %v2633_v31, %v2635_v32 }
 0x1e5   :  { %v10581_v51 = vcombine.high %v2638_v43, %v2640_v45  ;;  %v10580_v56 = vcombine.low %v2638_v43, %v2640_v45  ;;  %v2665_v45 = vld [vmem:[%s15988_s1 + $0x1b10] sm:$0xff] }
 0x1e6   :  { %4468 = vmatpush1.bf16.msra.mxu0 %v10550_v54  ;;  %v2643_v54 = vld [vmem:[%s15988_s1 + $0x1850] sm:$0xff] }
 0x1e7   :  { %4673 = vmatpush1.bf16.msra.mxu1 %v10552_v55  ;;  %4469 = vmatprep.subr.bf16.mxu0 %v10555_v53  ;;  %v2642_v55 = vld [vmem:[%s15988_s1 + $0x1818] sm:$0xff]  ;;  %v10583_v57 = vcombine.high %v2641_v52, %v2643_v54 }
 0x1e8   :  { %4674 = vmatprep.subr.bf16.mxu1 %v10557_v10  ;;  %v2644_v53 = vld [vmem:[%s15988_s1 + $0x1858] sm:$0xff]  ;;  %v10578_v10 = vcombine.low %v2637_v41, %v2639_v42 }
 0x1e9   :  { %v10585_v60 = vcombine.high %v2642_v55, %v2644_v53  ;;  %v10584_v28 = vcombine.low %v2642_v55, %v2644_v53 }
 0x1ea   :  { %4470 = vmatpush1.bf16.msra.mxu0 %v10554_v62  ;;  %v2647_v62 = vld [vmem:[%s15988_s1 + $0x18d0] sm:$0xff] }
 0x1eb   :  { %4675 = vmatpush1.bf16.msra.mxu1 %v10556_v0  ;;  %4471 = vmatprep.subr.bf16.mxu0 %v10559_v1  ;;  %v2646_v0 = vld [vmem:[%s15988_s1 + $0x1898] sm:$0xff]  ;;  %v10587_v3 = vcombine.high %v2645_v61, %v2647_v62 }
 0x1ec   :  { %4676 = vmatprep.subr.bf16.mxu1 %v10561_v2  ;;  %v2648_v1 = vld [vmem:[%s15988_s1 + $0x18d8] sm:$0xff]  ;;  %v10582_v2 = vcombine.low %v2641_v52, %v2643_v54 }
 0x1ed   :  { %v10589_v5 = vcombine.high %v2646_v0, %v2648_v1  ;;  %v10588_v13 = vcombine.low %v2646_v0, %v2648_v1 }
 0x1ee   :  { %4472 = vmatpush1.bf16.msra.mxu0 %v10558_v7  ;;  %v2651_v7 = vld [vmem:[%s15988_s1 + $0x1950] sm:$0xff] }
 0x1ef   :  { %4677 = vmatpush1.bf16.msra.mxu1 %v10560_v8  ;;  %4473 = vmatprep.subr.bf16.mxu0 %v10563_v11  ;;  %v2650_v8 = vld [vmem:[%s15988_s1 + $0x1918] sm:$0xff]  ;;  %v10591_v14 = vcombine.high %v2649_v6, %v2651_v7 }
 0x1f0   :  { %4678 = vmatprep.subr.bf16.mxu1 %v10565_v12  ;;  %v2652_v11 = vld [vmem:[%s15988_s1 + $0x1958] sm:$0xff]  ;;  %v10586_v12 = vcombine.low %v2645_v61, %v2647_v62 }
 0x1f1   :  { %v10593_v15 = vcombine.high %v2650_v8, %v2652_v11  ;;  %v10592_v22 = vcombine.low %v2650_v8, %v2652_v11  ;;  %v2670_v61 = vld [vmem:[%s15988_s1 + $0x1b98] sm:$0xff]  ;;  %v2673_v11 = vld [vmem:[%s15988_s1 + $0x1c10] sm:$0xff] }
 0x1f2   :  { %4474 = vmatpush1.bf16.msra.mxu0 %v10562_v17  ;;  %v2655_v17 = vld [vmem:[%s15988_s1 + $0x19d0] sm:$0xff]  ;;  %v2672_v62 = vld [vmem:[%s15988_s1 + $0x1bd8] sm:$0xff] }
 0x1f3   :  { %4679 = vmatpush1.bf16.msra.mxu1 %v10564_v19  ;;  %4475 = vmatprep.subr.bf16.mxu0 %v10567_v20  ;;  %v2654_v19 = vld [vmem:[%s15988_s1 + $0x1998] sm:$0xff]  ;;  %v10595_v24 = vcombine.high %v2653_v16, %v2655_v17  ;;  %v10613_v8 = vcombine.high %v2670_v61, %v2672_v62 }
 0x1f4   :  { %4680 = vmatprep.subr.bf16.mxu1 %v10569_v21  ;;  %v2656_v20 = vld [vmem:[%s15988_s1 + $0x19d8] sm:$0xff]  ;;  %v10590_v21 = vcombine.low %v2649_v6, %v2651_v7 }
 0x1f5   :  { %v10597_v25 = vcombine.high %v2654_v19, %v2656_v20  ;;  %v10596_v31 = vcombine.low %v2654_v19, %v2656_v20  ;;  %v2677_v20 = vld [vmem:[%s15988_s1 + $0x1c90] sm:$0xff] }
 0x1f6   :  { %4476 = vmatpush1.bf16.msra.mxu0 %v10566_v59  ;;  %v2659_v59 = vld [vmem:[%s15988_s1 + $0x1a50] sm:$0xff] }
 0x1f7   :  { %4681 = vmatpush1.bf16.msra.mxu1 %v10568_v29  ;;  %4477 = vmatprep.subr.bf16.mxu0 %v10571_v63  ;;  %v2658_v29 = vld [vmem:[%s15988_s1 + $0x1a18] sm:$0xff]  ;;  %v10599_v32 = vcombine.high %v2657_v26, %v2659_v59 }
 0x1f8   :  { %4682 = vmatprep.subr.bf16.mxu1 %v10573_v30  ;;  %v2660_v63 = vld [vmem:[%s15988_s1 + $0x1a58] sm:$0xff]  ;;  %v10594_v30 = vcombine.low %v2653_v16, %v2655_v17  ;;  %v10612_v16 = vcombine.low %v2670_v61, %v2672_v62  ;;  %v2693_v62 = vld [vmem:[%s15988_s1 + $0x1e90] sm:$0xff] }
 0x1f9   :  { %v10601_v34 = vcombine.high %v2658_v29, %v2660_v63  ;;  %v10600_v41 = vcombine.low %v2658_v29, %v2660_v63  ;;  %v2681_v63 = vld [vmem:[%s15988_s1 + $0x1d10] sm:$0xff] }
 0x1fa   :  { %4478 = vmatpush1.bf16.msra.mxu0 %v10570_v36  ;;  %v2663_v36 = vld [vmem:[%s15988_s1 + $0x1ad0] sm:$0xff] }
 0x1fb   :  { %4683 = vmatpush1.bf16.msra.mxu1 %v10572_v37  ;;  %4479 = vmatprep.subr.bf16.mxu0 %v10575_v39  ;;  %v2662_v37 = vld [vmem:[%s15988_s1 + $0x1a98] sm:$0xff]  ;;  %v10603_v42 = vcombine.high %v2661_v35, %v2663_v36 }
 0x1fc   :  { %4684 = vmatprep.subr.bf16.mxu1 %v10577_v40  ;;  %v2664_v39 = vld [vmem:[%s15988_s1 + $0x1ad8] sm:$0xff]  ;;  %v10598_v40 = vcombine.low %v2657_v26, %v2659_v59 }
 0x1fd   :  { %v10605_v43 = vcombine.high %v2662_v37, %v2664_v39  ;;  %v10604_v52 = vcombine.low %v2662_v37, %v2664_v39  ;;  %v2685_v39 = vld [vmem:[%s15988_s1 + $0x1d90] sm:$0xff] }
 0x1fe   :  { %4480 = vmatpush1.bf16.msra.mxu0 %v10574_v46  ;;  %v2667_v46 = vld [vmem:[%s15988_s1 + $0x1b50] sm:$0xff] }
 0x1ff   :  { %4685 = vmatpush1.bf16.msra.mxu1 %v10576_v49  ;;  %4481 = vmatprep.subr.bf16.mxu0 %v10579_v50  ;;  %v2666_v49 = vld [vmem:[%s15988_s1 + $0x1b18] sm:$0xff]  ;;  %v10607_v54 = vcombine.high %v2665_v45, %v2667_v46 }
 0x200   :  { %4686 = vmatprep.subr.bf16.mxu1 %v10581_v51  ;;  %v2668_v50 = vld [vmem:[%s15988_s1 + $0x1b58] sm:$0xff]  ;;  %v10602_v51 = vcombine.low %v2661_v35, %v2663_v36 }
 0x201   :  { %v10609_v53 = vcombine.high %v2666_v49, %v2668_v50 }
 0x202   :  { %4482 = vmatpush1.bf16.msra.mxu0 %v10578_v10  ;;  %v2669_v10 = vld [vmem:[%s15988_s1 + $0x1b90] sm:$0xff] }
 0x203   :  { %4687 = vmatpush1.bf16.msra.mxu1 %v10580_v56  ;;  %4492 = vmatprep.subr.bf16.mxu0 %v10583_v57  ;;  %v2671_v56 = vld [vmem:[%s15988_s1 + $0x1bd0] sm:$0xff] }
 0x204   :  { %4697 = vmatprep.subr.bf16.mxu1 %v10585_v60  ;;  %v10611_v6 = vcombine.high %v2669_v10, %v2671_v56 }
 0x205   :  { %4484 = vmatmul.mubr.bf16.vlgmr.msra.gmra.mrb[4].mxu0 %v12409_v58 }
 0x206   :  { %4493 = vmatpush1.bf16.msra.mxu0 %v10582_v2  ;;  %4689 = vmatmul.mubr.bf16.vlgmr.msra.gmra.mrb[4].mxu1 %v12409_v58  ;;  %v10606_v2 = vcombine.low %v2665_v45, %v2667_v46 }
 0x207   :  { %4698 = vmatpush1.bf16.msra.mxu1 %v10584_v28  ;;  %4494 = vmatprep.subr.bf16.mxu0 %v10587_v3 }
 0x208   :  { %4699 = vmatprep.subr.bf16.mxu1 %v10589_v5  ;;  %4524 = vmatprep.mubr.bf16.mxu0 %v12425_v4  ;;  %v10608_v5 = vcombine.low %v2666_v49, %v2668_v50  ;;  %v2689_v50 = vld [vmem:[%s15988_s1 + $0x1e10] sm:$0xff] }
 0x209   :  { %4729 = vmatprep.mubr.bf16.mxu1 %v12425_v4 }
 0x20a   :  { %4495 = vmatpush1.bf16.msra.mxu0 %v10586_v12  ;;  %v2675_v12 = vld [vmem:[%s15988_s1 + $0x1c50] sm:$0xff] }
 0x20b   :  { %4700 = vmatpush1.bf16.msra.mxu1 %v10588_v13  ;;  %4496 = vmatprep.subr.bf16.mxu0 %v10591_v14  ;;  %v2674_v13 = vld [vmem:[%s15988_s1 + $0x1c18] sm:$0xff]  ;;  %v10615_v17 = vcombine.high %v2673_v11, %v2675_v12 }
 0x20c   :  { %4701 = vmatprep.subr.bf16.mxu1 %v10593_v15  ;;  %v2676_v14 = vld [vmem:[%s15988_s1 + $0x1c58] sm:$0xff]  ;;  %v10610_v15 = vcombine.low %v2669_v10, %v2671_v56 }
 0x20d   :  { %v10617_v19 = vcombine.high %v2674_v13, %v2676_v14  ;;  %v10616_v26 = vcombine.low %v2674_v13, %v2676_v14  ;;  %v2700_v13 = vld [vmem:[%s15988_s1 + $0x1f58] sm:$0xff] }
 0x20e   :  { %4497 = vmatpush1.bf16.msra.mxu0 %v10590_v21  ;;  %v2679_v21 = vld [vmem:[%s15988_s1 + $0x1cd0] sm:$0xff] }
 0x20f   :  { %4702 = vmatpush1.bf16.msra.mxu1 %v10592_v22  ;;  %4498 = vmatprep.subr.bf16.mxu0 %v10595_v24  ;;  %v2678_v22 = vld [vmem:[%s15988_s1 + $0x1c98] sm:$0xff]  ;;  %v10619_v59 = vcombine.high %v2677_v20, %v2679_v21 }
 0x210   :  { %4703 = vmatprep.subr.bf16.mxu1 %v10597_v25  ;;  %v2680_v24 = vld [vmem:[%s15988_s1 + $0x1cd8] sm:$0xff]  ;;  %v10614_v25 = vcombine.low %v2673_v11, %v2675_v12  ;;  %v2699_v11 = vld [vmem:[%s15988_s1 + $0x1f50] sm:$0xff] }
 0x211   :  { %v10621_v29 = vcombine.high %v2678_v22, %v2680_v24  ;;  %v10620_v35 = vcombine.low %v2678_v22, %v2680_v24  ;;  %v2698_v12 = vld [vmem:[%s15988_s1 + $0x1f18] sm:$0xff] }
 0x212   :  { %4499 = vmatpush1.bf16.msra.mxu0 %v10594_v30  ;;  %v2683_v30 = vld [vmem:[%s15988_s1 + $0x1d50] sm:$0xff]  ;;  %v2704_v22 = vld [vmem:[%s15988_s1 + $0x1fd8] sm:$0xff] }
 0x213   :  { %4704 = vmatpush1.bf16.msra.mxu1 %v10596_v31  ;;  %4500 = vmatprep.subr.bf16.mxu0 %v10599_v32  ;;  %v2682_v31 = vld [vmem:[%s15988_s1 + $0x1d18] sm:$0xff]  ;;  %v10623_v36 = vcombine.high %v2681_v63, %v2683_v30 }
 0x214   :  { %4705 = vmatprep.subr.bf16.mxu1 %v10601_v34  ;;  %v2684_v32 = vld [vmem:[%s15988_s1 + $0x1d58] sm:$0xff]  ;;  %v10618_v34 = vcombine.low %v2677_v20, %v2679_v21  ;;  %v2703_v20 = vld [vmem:[%s15988_s1 + $0x1fd0] sm:$0xff] }
 0x215   :  { %v10625_v37 = vcombine.high %v2682_v31, %v2684_v32  ;;  %v10624_v45 = vcombine.low %v2682_v31, %v2684_v32  ;;  %v2702_v21 = vld [vmem:[%s15988_s1 + $0x1f98] sm:$0xff] }
 0x216   :  { %4501 = vmatpush1.bf16.msra.mxu0 %v10598_v40  ;;  %v2687_v40 = vld [vmem:[%s15988_s1 + $0x1dd0] sm:$0xff]  ;;  %v2708_v31 = vld [vmem:[%s15988_s1 + $0x2058] sm:$0xff] }
 0x217   :  { %4706 = vmatpush1.bf16.msra.mxu1 %v10600_v41  ;;  %4502 = vmatprep.subr.bf16.mxu0 %v10603_v42  ;;  %v2686_v41 = vld [vmem:[%s15988_s1 + $0x1d98] sm:$0xff]  ;;  %v10627_v46 = vcombine.high %v2685_v39, %v2687_v40 }
 0x218   :  { %v13483_v55 = vpop.f32.mrb[0].mxu0  ;;  %4707 = vmatprep.subr.bf16.mxu1 %v10605_v43  ;;  %v2688_v42 = vld [vmem:[%s15988_s1 + $0x1dd8] sm:$0xff]  ;;  %v10622_v43 = vcombine.low %v2681_v63, %v2683_v30  ;;  %v2707_v63 = vld [vmem:[%s15988_s1 + $0x2050] sm:$0xff] }
 0x219   :  { %v13491_v57 = vpop.f32.mrb[0].mxu1  ;;  %v13493_v60 = vpop.f32.mrb[1].mxu0  ;;  %v10629_v49 = vcombine.high %v2686_v41, %v2688_v42  ;;  %v10628_v10 = vcombine.low %v2686_v41, %v2688_v42  ;;  %v2706_v30 = vld [vmem:[%s15988_s1 + $0x2018] sm:$0xff] }
 0x21a   :  { %v13501_v0 = vpop.f32.mrb[1].mxu1  ;;  %v2241_v1 = vpop.f32.mrb[2].mxu0  ;;  %4503 = vmatpush1.bf16.msra.mxu0 %v10602_v51  ;;  %v2691_v51 = vld [vmem:[%s15988_s1 + $0x1e50] sm:$0xff]  ;;  %v2712_v41 = vld [vmem:[%s15988_s1 + $0x20d8] sm:$0xff] }
 0x21b   :  { %v2446_v28 = vpop.f32.mrb[2].mxu1  ;;  %4708 = vmatpush1.bf16.msra.mxu1 %v10604_v52  ;;  %v2242_v3 = vpop.f32.mrb[3].mxu0  ;;  %4504 = vmatprep.subr.bf16.mxu0 %v10607_v54  ;;  %v2690_v52 = vld [vmem:[%s15988_s1 + $0x1e18] sm:$0xff]  ;;  %v10631_v56 = vcombine.high %v2689_v50, %v2691_v51  ;;  %v2695_v1 = vld [vmem:[%s15988_s1 + $0x1ed0] sm:$0xff] }
 0x21c   :  { %v2447_v7 = vpop.f32.mrb[3].mxu1  ;;  %4709 = vmatprep.subr.bf16.mxu1 %v10609_v53  ;;  %v2692_v54 = vld [vmem:[%s15988_s1 + $0x1e58] sm:$0xff]  ;;  %v10626_v53 = vcombine.low %v2685_v39, %v2687_v40  ;;  %v10630_v3 = vcombine.low %v2689_v50, %v2691_v51  ;;  %v10634_v14 = vcombine.low %v2693_v62, %v2695_v1  ;;  %v2711_v39 = vld [vmem:[%s15988_s1 + $0x20d0] sm:$0xff] }
 0x21d   :  { %v10633_v61 = vcombine.high %v2690_v52, %v2692_v54  ;;  %v2696_v28 = vld [vmem:[%s15988_s1 + $0x1ed8] sm:$0xff]  ;;  %v2715_v50 = vld [vmem:[%s15988_s1 + $0x2150] sm:$0xff] }
 0x21e   :  { %4505 = vmatpush1.bf16.msra.mxu0 %v10606_v2  ;;  %v2694_v2 = vld [vmem:[%s15988_s1 + $0x1e98] sm:$0xff] }
 0x21f   :  { %4710 = vmatpush1.bf16.msra.mxu1 %v10608_v5  ;;  %4506 = vmatprep.subr.bf16.mxu0 %v10611_v6  ;;  %v10632_v5 = vcombine.low %v2690_v52, %v2692_v54  ;;  %v10635_v6 = vcombine.high %v2693_v62, %v2695_v1  ;;  %v10637_v7 = vcombine.high %v2694_v2, %v2696_v28  ;;  %v2710_v40 = vld [vmem:[%s15988_s1 + $0x2098] sm:$0xff]  ;;  %v2719_v62 = vld [vmem:[%s15988_s1 + $0x21d0] sm:$0xff] }
 0x220   :  { %4711 = vmatprep.subr.bf16.mxu1 %v10613_v8  ;;  %v2697_v8 = vld [vmem:[%s15988_s1 + $0x1f10] sm:$0xff]  ;;  %v2714_v51 = vld [vmem:[%s15988_s1 + $0x2118] sm:$0xff] }
 0x221   :  { %v10638_v24 = vcombine.low %v2697_v8, %v2699_v11  ;;  %v2716_v52 = vld [vmem:[%s15988_s1 + $0x2158] sm:$0xff] }
 0x222   :  { %4507 = vmatpush1.bf16.msra.mxu0 %v10610_v15  ;;  %v10636_v15 = vcombine.low %v2694_v2, %v2696_v28  ;;  %v2718_v1 = vld [vmem:[%s15988_s1 + $0x2198] sm:$0xff] }
 0x223   :  { %4712 = vmatpush1.bf16.msra.mxu1 %v10612_v16  ;;  %4508 = vmatprep.subr.bf16.mxu0 %v10615_v17  ;;  %v10639_v16 = vcombine.high %v2697_v8, %v2699_v11  ;;  %v10641_v17 = vcombine.high %v2698_v12, %v2700_v13  ;;  %v2720_v2 = vld [vmem:[%s15988_s1 + $0x21d8] sm:$0xff]  ;;  %v2723_v8 = vld [vmem:[%s15988_s1 + $0x2250] sm:$0xff] }
 0x224   :  { %4713 = vmatprep.subr.bf16.mxu1 %v10617_v19  ;;  %v2701_v19 = vld [vmem:[%s15988_s1 + $0x1f90] sm:$0xff]  ;;  %v2722_v11 = vld [vmem:[%s15988_s1 + $0x2218] sm:$0xff] }
 0x225   :  { %v10642_v32 = vcombine.low %v2701_v19, %v2703_v20 }
 0x226   :  { %4509 = vmatpush1.bf16.msra.mxu0 %v10614_v25  ;;  %v10640_v25 = vcombine.low %v2698_v12, %v2700_v13  ;;  %v2724_v12 = vld [vmem:[%s15988_s1 + $0x2258] sm:$0xff] }
 0x227   :  { %4714 = vmatpush1.bf16.msra.mxu1 %v10616_v26  ;;  %4510 = vmatprep.subr.bf16.mxu0 %v10619_v59  ;;  %v10643_v26 = vcombine.high %v2701_v19, %v2703_v20  ;;  %v10645_v59 = vcombine.high %v2702_v21, %v2704_v22  ;;  %v2727_v19 = vld [vmem:[%s15988_s1 + $0x22d0] sm:$0xff]  ;;  %v2726_v20 = vld [vmem:[%s15988_s1 + $0x2298] sm:$0xff] }
 0x228   :  { %4715 = vmatprep.subr.bf16.mxu1 %v10621_v29  ;;  %v2705_v29 = vld [vmem:[%s15988_s1 + $0x2010] sm:$0xff] }
 0x229   :  { %v10646_v42 = vcombine.low %v2705_v29, %v2707_v63 }
 0x22a   :  { %4511 = vmatpush1.bf16.msra.mxu0 %v10618_v34  ;;  %v10644_v34 = vcombine.low %v2702_v21, %v2704_v22  ;;  %v2728_v21 = vld [vmem:[%s15988_s1 + $0x22d8] sm:$0xff] }
 0x22b   :  { %4716 = vmatpush1.bf16.msra.mxu1 %v10620_v35  ;;  %4512 = vmatprep.subr.bf16.mxu0 %v10623_v36  ;;  %v10647_v35 = vcombine.high %v2705_v29, %v2707_v63  ;;  %v10649_v36 = vcombine.high %v2706_v30, %v2708_v31  ;;  %v2731_v29 = vld [vmem:[%s15988_s1 + $0x2350] sm:$0xff]  ;;  %v2730_v63 = vld [vmem:[%s15988_s1 + $0x2318] sm:$0xff] }
 0x22c   :  { %4717 = vmatprep.subr.bf16.mxu1 %v10625_v37  ;;  %v2709_v37 = vld [vmem:[%s15988_s1 + $0x2090] sm:$0xff] }
 0x22d   :  { %v10650_v54 = vcombine.low %v2709_v37, %v2711_v39 }
 0x22e   :  { %4513 = vmatpush1.bf16.msra.mxu0 %v10622_v43  ;;  %v10648_v43 = vcombine.low %v2706_v30, %v2708_v31  ;;  %v2732_v30 = vld [vmem:[%s15988_s1 + $0x2358] sm:$0xff] }
 0x22f   :  { %4718 = vmatpush1.bf16.msra.mxu1 %v10624_v45  ;;  %4514 = vmatprep.subr.bf16.mxu0 %v10627_v46  ;;  %v10651_v45 = vcombine.high %v2709_v37, %v2711_v39  ;;  %v10653_v46 = vcombine.high %v2710_v40, %v2712_v41  ;;  %v2735_v37 = vld [vmem:[%s15988_s1 + $0x23d0] sm:$0xff]  ;;  %v2734_v39 = vld [vmem:[%s15988_s1 + $0x2398] sm:$0xff] }
 0x230   :  { %4719 = vmatprep.subr.bf16.mxu1 %v10629_v49  ;;  %v2713_v49 = vld [vmem:[%s15988_s1 + $0x2110] sm:$0xff] }
 0x231   :  { %v10654_v28 = vcombine.low %v2713_v49, %v2715_v50 }
 0x232   :  { %4515 = vmatpush1.bf16.msra.mxu0 %v10626_v53  ;;  %v10652_v53 = vcombine.low %v2710_v40, %v2712_v41  ;;  %v2736_v40 = vld [vmem:[%s15988_s1 + $0x23d8] sm:$0xff] }
 0x233   :  { %4720 = vmatpush1.bf16.msra.mxu1 %v10628_v10  ;;  %4516 = vmatprep.subr.bf16.mxu0 %v10631_v56  ;;  %v10655_v10 = vcombine.high %v2713_v49, %v2715_v50  ;;  %v10657_v56 = vcombine.high %v2714_v51, %v2716_v52  ;;  %v2739_v49 = vld [vmem:[%s15988_s1 + $0x2450] sm:$0xff]  ;;  %v2738_v50 = vld [vmem:[%s15988_s1 + $0x2418] sm:$0xff] }
 0x234   :  { %4721 = vmatprep.subr.bf16.mxu1 %v10633_v61  ;;  %v2717_v61 = vld [vmem:[%s15988_s1 + $0x2190] sm:$0xff] }
 0x235   :  { %v10658_v13 = vcombine.low %v2717_v61, %v2719_v62 }
 0x236   :  { %4517 = vmatpush1.bf16.msra.mxu0 %v10630_v3  ;;  %v10656_v3 = vcombine.low %v2714_v51, %v2716_v52  ;;  %v2740_v51 = vld [vmem:[%s15988_s1 + $0x2458] sm:$0xff] }
 0x237   :  { %4722 = vmatpush1.bf16.msra.mxu1 %v10632_v5  ;;  %4518 = vmatprep.subr.bf16.mxu0 %v10635_v6  ;;  %v10659_v5 = vcombine.high %v2717_v61, %v2719_v62  ;;  %v10661_v6 = vcombine.high %v2718_v1, %v2720_v2  ;;  %v2743_v61 = vld [vmem:[%s15988_s1 + $0x24d0] sm:$0xff]  ;;  %v2742_v62 = vld [vmem:[%s15988_s1 + $0x2498] sm:$0xff] }
 0x238   :  { %4723 = vmatprep.subr.bf16.mxu1 %v10637_v7  ;;  %v2721_v7 = vld [vmem:[%s15988_s1 + $0x2210] sm:$0xff] }
 0x239   :  { %v10662_v22 = vcombine.low %v2721_v7, %v2723_v8 }
 0x23a   :  { %4519 = vmatpush1.bf16.msra.mxu0 %v10634_v14  ;;  %v10660_v14 = vcombine.low %v2718_v1, %v2720_v2  ;;  %v2744_v1 = vld [vmem:[%s15988_s1 + $0x24d8] sm:$0xff] }
 0x23b   :  { %4724 = vmatpush1.bf16.msra.mxu1 %v10636_v15  ;;  %4520 = vmatprep.subr.bf16.mxu0 %v10639_v16  ;;  %v10663_v15 = vcombine.high %v2721_v7, %v2723_v8  ;;  %v10665_v16 = vcombine.high %v2722_v11, %v2724_v12  ;;  %v2747_v7 = vld [vmem:[%s15988_s1 + $0x2550] sm:$0xff]  ;;  %v2746_v8 = vld [vmem:[%s15988_s1 + $0x2518] sm:$0xff] }
 0x23c   :  { %4725 = vmatprep.subr.bf16.mxu1 %v10641_v17  ;;  %v2725_v17 = vld [vmem:[%s15988_s1 + $0x2290] sm:$0xff] }
 0x23d   :  { %v10666_v31 = vcombine.low %v2725_v17, %v2727_v19 }
 0x23e   :  { %4521 = vmatpush1.bf16.msra.mxu0 %v10638_v24  ;;  %v10664_v24 = vcombine.low %v2722_v11, %v2724_v12  ;;  %v2748_v11 = vld [vmem:[%s15988_s1 + $0x2558] sm:$0xff] }
 0x23f   :  { %4726 = vmatpush1.bf16.msra.mxu1 %v10640_v25  ;;  %4522 = vmatprep.subr.bf16.mxu0 %v10643_v26  ;;  %v10667_v25 = vcombine.high %v2725_v17, %v2727_v19  ;;  %v10669_v26 = vcombine.high %v2726_v20, %v2728_v21  ;;  %v2751_v17 = vld [vmem:[%s15988_s1 + $0x25d0] sm:$0xff]  ;;  %v2750_v19 = vld [vmem:[%s15988_s1 + $0x2598] sm:$0xff] }
 0x240   :  { %4727 = vmatprep.subr.bf16.mxu1 %v10645_v59  ;;  %v2729_v59 = vld [vmem:[%s15988_s1 + $0x2310] sm:$0xff] }
 0x241   :  { %v10670_v41 = vcombine.low %v2729_v59, %v2731_v29 }
 0x242   :  { %4523 = vmatpush1.bf16.msra.mxu0 %v10642_v32  ;;  %v10668_v32 = vcombine.low %v2726_v20, %v2728_v21  ;;  %v2752_v20 = vld [vmem:[%s15988_s1 + $0x25d8] sm:$0xff] }
 0x243   :  { %4728 = vmatpush1.bf16.msra.mxu1 %v10644_v34  ;;  %4533 = vmatprep.subr.bf16.mxu0 %v10647_v35  ;;  %v10671_v34 = vcombine.high %v2729_v59, %v2731_v29  ;;  %v10673_v35 = vcombine.high %v2730_v63, %v2732_v30  ;;  %v2755_v59 = vld [vmem:[%s15988_s1 + $0x2650] sm:$0xff]  ;;  %v2754_v29 = vld [vmem:[%s15988_s1 + $0x2618] sm:$0xff] }
 0x244   :  { %4738 = vmatprep.subr.bf16.mxu1 %v10649_v36  ;;  %v2733_v36 = vld [vmem:[%s15988_s1 + $0x2390] sm:$0xff] }
 0x245   :  { %4525 = vmatmul.mubr.bf16.vlgmr.msra.gmra.mrb[4].mxu0 %v12620_v18  ;;  %v10674_v52 = vcombine.low %v2733_v36, %v2735_v37 }
 0x246   :  { %4534 = vmatpush1.bf16.msra.mxu0 %v10646_v42  ;;  %4730 = vmatmul.mubr.bf16.vlgmr.msra.gmra.mrb[4].mxu1 %v12620_v18  ;;  %v10672_v42 = vcombine.low %v2730_v63, %v2732_v30  ;;  %v2756_v63 = vld [vmem:[%s15988_s1 + $0x2658] sm:$0xff] }
 0x247   :  { %4739 = vmatpush1.bf16.msra.mxu1 %v10648_v43  ;;  %4535 = vmatprep.subr.bf16.mxu0 %v10651_v45  ;;  %v10675_v43 = vcombine.high %v2733_v36, %v2735_v37  ;;  %v10677_v45 = vcombine.high %v2734_v39, %v2736_v40  ;;  %v2759_v36 = vld [vmem:[%s15988_s1 + $0x26d0] sm:$0xff]  ;;  %v2758_v37 = vld [vmem:[%s15988_s1 + $0x2698] sm:$0xff] }
 0x248   :  { %4740 = vmatprep.subr.bf16.mxu1 %v10653_v46  ;;  %4565 = vmatprep.mubr.bf16.mxu0 %v12635_v27  ;;  %v2737_v46 = vld [vmem:[%s15988_s1 + $0x2410] sm:$0xff] }
 0x249   :  { %4770 = vmatprep.mubr.bf16.mxu1 %v12635_v27  ;;  %v10678_v2 = vcombine.low %v2737_v46, %v2739_v49 }
 0x24a   :  { %4536 = vmatpush1.bf16.msra.mxu0 %v10650_v54  ;;  %v10676_v54 = vcombine.low %v2734_v39, %v2736_v40  ;;  %v2760_v39 = vld [vmem:[%s15988_s1 + $0x26d8] sm:$0xff] }
 0x24b   :  { %4741 = vmatpush1.bf16.msra.mxu1 %v10652_v53  ;;  %4537 = vmatprep.subr.bf16.mxu0 %v10655_v10  ;;  %v10679_v53 = vcombine.high %v2737_v46, %v2739_v49  ;;  %v10681_v10 = vcombine.high %v2738_v50, %v2740_v51  ;;  %v2763_v46 = vld [vmem:[%s15988_s1 + $0x2750] sm:$0xff]  ;;  %v2762_v49 = vld [vmem:[%s15988_s1 + $0x2718] sm:$0xff] }
 0x24c   :  { %4742 = vmatprep.subr.bf16.mxu1 %v10657_v56  ;;  %v2741_v56 = vld [vmem:[%s15988_s1 + $0x2490] sm:$0xff] }
 0x24d   :  { %v10682_v12 = vcombine.low %v2741_v56, %v2743_v61 }
 0x24e   :  { %4538 = vmatpush1.bf16.msra.mxu0 %v10654_v28  ;;  %v10680_v28 = vcombine.low %v2738_v50, %v2740_v51  ;;  %v2764_v50 = vld [vmem:[%s15988_s1 + $0x2758] sm:$0xff] }
 0x24f   :  { %4743 = vmatpush1.bf16.msra.mxu1 %v10656_v3  ;;  %4539 = vmatprep.subr.bf16.mxu0 %v10659_v5  ;;  %v10683_v3 = vcombine.high %v2741_v56, %v2743_v61  ;;  %v10685_v5 = vcombine.high %v2742_v62, %v2744_v1  ;;  %v2767_v56 = vld [vmem:[%s15988_s1 + $0x27d0] sm:$0xff]  ;;  %v2766_v61 = vld [vmem:[%s15988_s1 + $0x2798] sm:$0xff] }
 0x250   :  { %4744 = vmatprep.subr.bf16.mxu1 %v10661_v6  ;;  %v2745_v6 = vld [vmem:[%s15988_s1 + $0x2510] sm:$0xff] }
 0x251   :  { %v10686_v21 = vcombine.low %v2745_v6, %v2747_v7 }
 0x252   :  { %4540 = vmatpush1.bf16.msra.mxu0 %v10658_v13  ;;  %v10684_v13 = vcombine.low %v2742_v62, %v2744_v1  ;;  %v2768_v62 = vld [vmem:[%s15988_s1 + $0x27d8] sm:$0xff] }
 0x253   :  { %4745 = vmatpush1.bf16.msra.mxu1 %v10660_v14  ;;  %4541 = vmatprep.subr.bf16.mxu0 %v10663_v15  ;;  %v10687_v14 = vcombine.high %v2745_v6, %v2747_v7  ;;  %v10689_v15 = vcombine.high %v2746_v8, %v2748_v11  ;;  %v4785_v6 = vld [vmem:[%s15988_s1 + $0x60] sm:$0xff]  ;;  %v4784_v7 = vld [vmem:[%s15988_s1 + $0x28] sm:$0xff] }
 0x254   :  { %4746 = vmatprep.subr.bf16.mxu1 %v10665_v16  ;;  %v2749_v16 = vld [vmem:[%s15988_s1 + $0x2590] sm:$0xff] }
 0x255   :  { %v10690_v30 = vcombine.low %v2749_v16, %v2751_v17 }
 0x256   :  { %4542 = vmatpush1.bf16.msra.mxu0 %v10662_v22  ;;  %v10688_v22 = vcombine.low %v2746_v8, %v2748_v11  ;;  %v4786_v8 = vld [vmem:[%s15988_s1 + $0x68] sm:$0xff] }
 0x257   :  { %4747 = vmatpush1.bf16.msra.mxu1 %v10664_v24  ;;  %4543 = vmatprep.subr.bf16.mxu0 %v10667_v25  ;;  %v10691_v24 = vcombine.high %v2749_v16, %v2751_v17  ;;  %v10693_v25 = vcombine.high %v2750_v19, %v2752_v20  ;;  %v4789_v16 = vld [vmem:[%s15988_s1 + $0xe0] sm:$0xff]  ;;  %v4788_v17 = vld [vmem:[%s15988_s1 + $0xa8] sm:$0xff] }
 0x258   :  { %4748 = vmatprep.subr.bf16.mxu1 %v10669_v26  ;;  %v2753_v26 = vld [vmem:[%s15988_s1 + $0x2610] sm:$0xff] }
 0x259   :  { %v10694_v40 = vcombine.low %v2753_v26, %v2755_v59 }
 0x25a   :  { %4544 = vmatpush1.bf16.msra.mxu0 %v10666_v31  ;;  %v10692_v31 = vcombine.low %v2750_v19, %v2752_v20  ;;  %v4790_v19 = vld [vmem:[%s15988_s1 + $0xe8] sm:$0xff] }
 0x25b   :  { %4749 = vmatpush1.bf16.msra.mxu1 %v10668_v32  ;;  %4545 = vmatprep.subr.bf16.mxu0 %v10671_v34  ;;  %v10695_v32 = vcombine.high %v2753_v26, %v2755_v59  ;;  %v10697_v34 = vcombine.high %v2754_v29, %v2756_v63  ;;  %v4793_v26 = vld [vmem:[%s15988_s1 + $0x160] sm:$0xff]  ;;  %v4792_v59 = vld [vmem:[%s15988_s1 + $0x128] sm:$0xff] }
 0x25c   :  { %4750 = vmatprep.subr.bf16.mxu1 %v10673_v35  ;;  %v2757_v35 = vld [vmem:[%s15988_s1 + $0x2690] sm:$0xff] }
 0x25d   :  { %v10698_v51 = vcombine.low %v2757_v35, %v2759_v36 }
 0x25e   :  { %4546 = vmatpush1.bf16.msra.mxu0 %v10670_v41  ;;  %v10696_v41 = vcombine.low %v2754_v29, %v2756_v63  ;;  %v4794_v29 = vld [vmem:[%s15988_s1 + $0x168] sm:$0xff] }
 0x25f   :  { %4751 = vmatpush1.bf16.msra.mxu1 %v10672_v42  ;;  %4547 = vmatprep.subr.bf16.mxu0 %v10675_v43  ;;  %v10699_v42 = vcombine.high %v2757_v35, %v2759_v36  ;;  %v10701_v43 = vcombine.high %v2758_v37, %v2760_v39  ;;  %v4797_v35 = vld [vmem:[%s15988_s1 + $0x1e0] sm:$0xff]  ;;  %v4796_v36 = vld [vmem:[%s15988_s1 + $0x1a8] sm:$0xff] }
 0x260   :  { %4752 = vmatprep.subr.bf16.mxu1 %v10677_v45  ;;  %v2761_v45 = vld [vmem:[%s15988_s1 + $0x2710] sm:$0xff] }
 0x261   :  { %v10702_v1 = vcombine.low %v2761_v45, %v2763_v46 }
 0x262   :  { %4548 = vmatpush1.bf16.msra.mxu0 %v10674_v52  ;;  %v10700_v52 = vcombine.low %v2758_v37, %v2760_v39  ;;  %v4798_v37 = vld [vmem:[%s15988_s1 + $0x1e8] sm:$0xff] }
 0x263   :  { %4753 = vmatpush1.bf16.msra.mxu1 %v10676_v54  ;;  %4549 = vmatprep.subr.bf16.mxu0 %v10679_v53  ;;  %v10703_v54 = vcombine.high %v2761_v45, %v2763_v46  ;;  %v10705_v53 = vcombine.high %v2762_v49, %v2764_v50  ;;  %v4801_v45 = vld [vmem:[%s15988_s1 + $0x260] sm:$0xff]  ;;  %v4800_v46 = vld [vmem:[%s15988_s1 + $0x228] sm:$0xff] }
 0x264   :  { %4754 = vmatprep.subr.bf16.mxu1 %v10681_v10  ;;  %v2765_v10 = vld [vmem:[%s15988_s1 + $0x2790] sm:$0xff] }
 0x265   :  { %v10706_v11 = vcombine.low %v2765_v10, %v2767_v56 }
 0x266   :  { %4550 = vmatpush1.bf16.msra.mxu0 %v10678_v2  ;;  %v10704_v2 = vcombine.low %v2762_v49, %v2764_v50  ;;  %v4802_v49 = vld [vmem:[%s15988_s1 + $0x268] sm:$0xff] }
 0x267   :  { %4755 = vmatpush1.bf16.msra.mxu1 %v10680_v28  ;;  %4551 = vmatprep.subr.bf16.mxu0 %v10683_v3  ;;  %v10707_v28 = vcombine.high %v2765_v10, %v2767_v56  ;;  %v10709_v3 = vcombine.high %v2766_v61, %v2768_v62  ;;  %v4805_v10 = vld [vmem:[%s15988_s1 + $0x2e0] sm:$0xff]  ;;  %v4804_v56 = vld [vmem:[%s15988_s1 + $0x2a8] sm:$0xff] }
 0x268   :  { %4756 = vmatprep.subr.bf16.mxu1 %v10685_v5  ;;  %v4783_v5 = vld [vmem:[%s15988_s1 + $0x20] sm:$0xff] }
 0x269   :  { %v10710_v20 = vcombine.low %v4783_v5, %v4785_v6 }
 0x26a   :  { %4552 = vmatpush1.bf16.msra.mxu0 %v10682_v12  ;;  %v10708_v12 = vcombine.low %v2766_v61, %v2768_v62  ;;  %v4806_v61 = vld [vmem:[%s15988_s1 + $0x2e8] sm:$0xff] }
 0x26b   :  { %4757 = vmatpush1.bf16.msra.mxu1 %v10684_v13  ;;  %4553 = vmatprep.subr.bf16.mxu0 %v10687_v14  ;;  %v10711_v13 = vcombine.high %v4783_v5, %v4785_v6  ;;  %v10713_v14 = vcombine.high %v4784_v7, %v4786_v8  ;;  %v4809_v5 = vld [vmem:[%s15988_s1 + $0x360] sm:$0xff]  ;;  %v4808_v6 = vld [vmem:[%s15988_s1 + $0x328] sm:$0xff] }
 0x26c   :  { %4758 = vmatprep.subr.bf16.mxu1 %v10689_v15  ;;  %v4787_v15 = vld [vmem:[%s15988_s1 + $0xa0] sm:$0xff] }
 0x26d   :  { %v10714_v63 = vcombine.low %v4787_v15, %v4789_v16 }
 0x26e   :  { %4554 = vmatpush1.bf16.msra.mxu0 %v10686_v21  ;;  %v10712_v21 = vcombine.low %v4784_v7, %v4786_v8  ;;  %v4810_v7 = vld [vmem:[%s15988_s1 + $0x368] sm:$0xff] }
 0x26f   :  { %4759 = vmatpush1.bf16.msra.mxu1 %v10688_v22  ;;  %4555 = vmatprep.subr.bf16.mxu0 %v10691_v24  ;;  %v10715_v22 = vcombine.high %v4787_v15, %v4789_v16  ;;  %v10717_v24 = vcombine.high %v4788_v17, %v4790_v19  ;;  %v4813_v15 = vld [vmem:[%s15988_s1 + $0x3e0] sm:$0xff]  ;;  %v4812_v16 = vld [vmem:[%s15988_s1 + $0x3a8] sm:$0xff] }
 0x270   :  { %4760 = vmatprep.subr.bf16.mxu1 %v10693_v25  ;;  %v4791_v25 = vld [vmem:[%s15988_s1 + $0x120] sm:$0xff] }
 0x271   :  { %v10718_v39 = vcombine.low %v4791_v25, %v4793_v26 }
 0x272   :  { %4556 = vmatpush1.bf16.msra.mxu0 %v10690_v30  ;;  %v10716_v30 = vcombine.low %v4788_v17, %v4790_v19  ;;  %v4814_v17 = vld [vmem:[%s15988_s1 + $0x3e8] sm:$0xff] }
 0x273   :  { %4761 = vmatpush1.bf16.msra.mxu1 %v10692_v31  ;;  %4557 = vmatprep.subr.bf16.mxu0 %v10695_v32  ;;  %v10719_v31 = vcombine.high %v4791_v25, %v4793_v26  ;;  %v10721_v32 = vcombine.high %v4792_v59, %v4794_v29  ;;  %v4817_v25 = vld [vmem:[%s15988_s1 + $0x460] sm:$0xff]  ;;  %v4816_v26 = vld [vmem:[%s15988_s1 + $0x428] sm:$0xff] }
 0x274   :  { %4762 = vmatprep.subr.bf16.mxu1 %v10697_v34  ;;  %v4795_v34 = vld [vmem:[%s15988_s1 + $0x1a0] sm:$0xff] }
 0x275   :  { %v10722_v50 = vcombine.low %v4795_v34, %v4797_v35 }
 0x276   :  { %4558 = vmatpush1.bf16.msra.mxu0 %v10694_v40  ;;  %v10720_v40 = vcombine.low %v4792_v59, %v4794_v29  ;;  %v4818_v59 = vld [vmem:[%s15988_s1 + $0x468] sm:$0xff] }
 0x277   :  { %4763 = vmatpush1.bf16.msra.mxu1 %v10696_v41  ;;  %4559 = vmatprep.subr.bf16.mxu0 %v10699_v42  ;;  %v10723_v41 = vcombine.high %v4795_v34, %v4797_v35  ;;  %v10725_v42 = vcombine.high %v4796_v36, %v4798_v37  ;;  %v4821_v34 = vld [vmem:[%s15988_s1 + $0x4e0] sm:$0xff]  ;;  %v4820_v35 = vld [vmem:[%s15988_s1 + $0x4a8] sm:$0xff] }
 0x278   :  { %4764 = vmatprep.subr.bf16.mxu1 %v10701_v43  ;;  %v4799_v43 = vld [vmem:[%s15988_s1 + $0x220] sm:$0xff] }
 0x279   :  { %v10726_v62 = vcombine.low %v4799_v43, %v4801_v45 }
 0x27a   :  { %4560 = vmatpush1.bf16.msra.mxu0 %v10698_v51  ;;  %v10724_v51 = vcombine.low %v4796_v36, %v4798_v37  ;;  %v4822_v36 = vld [vmem:[%s15988_s1 + $0x4e8] sm:$0xff] }
 0x27b   :  { %4765 = vmatpush1.bf16.msra.mxu1 %v10700_v52  ;;  %4561 = vmatprep.subr.bf16.mxu0 %v10703_v54  ;;  %v10727_v52 = vcombine.high %v4799_v43, %v4801_v45  ;;  %v10729_v54 = vcombine.high %v4800_v46, %v4802_v49  ;;  %v4825_v43 = vld [vmem:[%s15988_s1 + $0x560] sm:$0xff]  ;;  %v4824_v45 = vld [vmem:[%s15988_s1 + $0x528] sm:$0xff] }
 0x27c   :  { %4766 = vmatprep.subr.bf16.mxu1 %v10705_v53  ;;  %v4803_v53 = vld [vmem:[%s15988_s1 + $0x2a0] sm:$0xff] }
 0x27d   :  { %v10730_v8 = vcombine.low %v4803_v53, %v4805_v10 }
 0x27e   :  { %4562 = vmatpush1.bf16.msra.mxu0 %v10702_v1  ;;  %v10728_v1 = vcombine.low %v4800_v46, %v4802_v49  ;;  %v4826_v46 = vld [vmem:[%s15988_s1 + $0x568] sm:$0xff] }
 0x27f   :  { %4767 = vmatpush1.bf16.msra.mxu1 %v10704_v2  ;;  %4563 = vmatprep.subr.bf16.mxu0 %v10707_v28  ;;  %v10731_v2 = vcombine.high %v4803_v53, %v4805_v10  ;;  %v10733_v28 = vcombine.high %v4804_v56, %v4806_v61  ;;  %v4829_v53 = vld [vmem:[%s15988_s1 + $0x5e0] sm:$0xff]  ;;  %v4828_v10 = vld [vmem:[%s15988_s1 + $0x5a8] sm:$0xff] }
 0x280   :  { %4768 = vmatprep.subr.bf16.mxu1 %v10709_v3  ;;  %v4807_v3 = vld [vmem:[%s15988_s1 + $0x320] sm:$0xff] }
 0x281   :  { %v10734_v19 = vcombine.low %v4807_v3, %v4809_v5 }
 0x282   :  { %4564 = vmatpush1.bf16.msra.mxu0 %v10706_v11  ;;  %v10732_v11 = vcombine.low %v4804_v56, %v4806_v61  ;;  %v4830_v56 = vld [vmem:[%s15988_s1 + $0x5e8] sm:$0xff] }
 0x283   :  { %4769 = vmatpush1.bf16.msra.mxu1 %v10708_v12  ;;  %6703 = vmatprep.subr.bf16.mxu0 %v10711_v13  ;;  %v10735_v12 = vcombine.high %v4807_v3, %v4809_v5  ;;  %v10737_v13 = vcombine.high %v4808_v6, %v4810_v7  ;;  %v4833_v3 = vld [vmem:[%s15988_s1 + $0x660] sm:$0xff]  ;;  %v4832_v5 = vld [vmem:[%s15988_s1 + $0x628] sm:$0xff] }
 0x284   :  { %6908 = vmatprep.subr.bf16.mxu1 %v10713_v14  ;;  %v4811_v14 = vld [vmem:[%s15988_s1 + $0x3a0] sm:$0xff] }
 0x285   :  { %4566 = vmatmul.mubr.bf16.vlgmr.msra.gmra.mrb[4].mxu0 %v12823_v47  ;;  %v10738_v29 = vcombine.low %v4811_v14, %v4813_v15 }
 0x286   :  { %4771 = vmatmul.mubr.bf16.vlgmr.msra.gmra.mrb[4].mxu1 %v12823_v47  ;;  %6704 = vmatpush1.bf16.msra.mxu0 %v10710_v20  ;;  %v10736_v20 = vcombine.low %v4808_v6, %v4810_v7  ;;  %v4834_v6 = vld [vmem:[%s15988_s1 + $0x668] sm:$0xff] }
 0x287   :  { %6909 = vmatpush1.bf16.msra.mxu1 %v10712_v21  ;;  %6705 = vmatprep.subr.bf16.mxu0 %v10715_v22  ;;  %v10739_v21 = vcombine.high %v4811_v14, %v4813_v15  ;;  %v10741_v22 = vcombine.high %v4812_v16, %v4814_v17  ;;  %v4837_v14 = vld [vmem:[%s15988_s1 + $0x6e0] sm:$0xff]  ;;  %v4836_v15 = vld [vmem:[%s15988_s1 + $0x6a8] sm:$0xff] }
 0x288   :  { %6910 = vmatprep.subr.bf16.mxu1 %v10717_v24  ;;  %6735 = vmatprep.mubr.bf16.mxu0 %v11881_v9  ;;  %v4815_v24 = vld [vmem:[%s15988_s1 + $0x420] sm:$0xff] }
 0x289   :  { %6940 = vmatprep.mubr.bf16.mxu1 %v11881_v9  ;;  %v10742_v37 = vcombine.low %v4815_v24, %v4817_v25 }
 0x28a   :  { %6706 = vmatpush1.bf16.msra.mxu0 %v10714_v63  ;;  %v10740_v63 = vcombine.low %v4812_v16, %v4814_v17  ;;  %v4838_v16 = vld [vmem:[%s15988_s1 + $0x6e8] sm:$0xff] }
 0x28b   :  { %6911 = vmatpush1.bf16.msra.mxu1 %v10716_v30  ;;  %6707 = vmatprep.subr.bf16.mxu0 %v10719_v31  ;;  %v10743_v30 = vcombine.high %v4815_v24, %v4817_v25  ;;  %v10745_v31 = vcombine.high %v4816_v26, %v4818_v59  ;;  %v4841_v24 = vld [vmem:[%s15988_s1 + $0x760] sm:$0xff]  ;;  %v4840_v25 = vld [vmem:[%s15988_s1 + $0x728] sm:$0xff] }
 0x28c   :  { %6912 = vmatprep.subr.bf16.mxu1 %v10721_v32  ;;  %v4819_v32 = vld [vmem:[%s15988_s1 + $0x4a0] sm:$0xff] }
 0x28d   :  { %v10746_v49 = vcombine.low %v4819_v32, %v4821_v34 }
 0x28e   :  { %6708 = vmatpush1.bf16.msra.mxu0 %v10718_v39  ;;  %v10744_v39 = vcombine.low %v4816_v26, %v4818_v59  ;;  %v4842_v26 = vld [vmem:[%s15988_s1 + $0x768] sm:$0xff] }
 0x28f   :  { %6913 = vmatpush1.bf16.msra.mxu1 %v10720_v40  ;;  %6709 = vmatprep.subr.bf16.mxu0 %v10723_v41  ;;  %v10747_v40 = vcombine.high %v4819_v32, %v4821_v34  ;;  %v10749_v41 = vcombine.high %v4820_v35, %v4822_v36  ;;  %v4845_v32 = vld [vmem:[%s15988_s1 + $0x7e0] sm:$0xff]  ;;  %v4844_v34 = vld [vmem:[%s15988_s1 + $0x7a8] sm:$0xff] }
 0x290   :  { %6914 = vmatprep.subr.bf16.mxu1 %v10725_v42  ;;  %v4823_v42 = vld [vmem:[%s15988_s1 + $0x520] sm:$0xff] }
 0x291   :  { %v10750_v61 = vcombine.low %v4823_v42, %v4825_v43 }
 0x292   :  { %6710 = vmatpush1.bf16.msra.mxu0 %v10722_v50  ;;  %v10748_v50 = vcombine.low %v4820_v35, %v4822_v36  ;;  %v4846_v35 = vld [vmem:[%s15988_s1 + $0x7e8] sm:$0xff] }
 0x293   :  { %6915 = vmatpush1.bf16.msra.mxu1 %v10724_v51  ;;  %6711 = vmatprep.subr.bf16.mxu0 %v10727_v52  ;;  %v10751_v51 = vcombine.high %v4823_v42, %v4825_v43  ;;  %v10753_v52 = vcombine.high %v4824_v45, %v4826_v46  ;;  %v4849_v42 = vld [vmem:[%s15988_s1 + $0x860] sm:$0xff]  ;;  %v4848_v43 = vld [vmem:[%s15988_s1 + $0x828] sm:$0xff] }
 0x294   :  { %6916 = vmatprep.subr.bf16.mxu1 %v10729_v54  ;;  %v4827_v54 = vld [vmem:[%s15988_s1 + $0x5a0] sm:$0xff] }
 0x295   :  { %v10754_v7 = vcombine.low %v4827_v54, %v4829_v53 }
 0x296   :  { %6712 = vmatpush1.bf16.msra.mxu0 %v10726_v62  ;;  %v10752_v62 = vcombine.low %v4824_v45, %v4826_v46  ;;  %v4850_v45 = vld [vmem:[%s15988_s1 + $0x868] sm:$0xff] }
 0x297   :  { %6917 = vmatpush1.bf16.msra.mxu1 %v10728_v1  ;;  %6713 = vmatprep.subr.bf16.mxu0 %v10731_v2  ;;  %v10755_v1 = vcombine.high %v4827_v54, %v4829_v53  ;;  %v10757_v2 = vcombine.high %v4828_v10, %v4830_v56  ;;  %v4853_v54 = vld [vmem:[%s15988_s1 + $0x8e0] sm:$0xff]  ;;  %v4852_v53 = vld [vmem:[%s15988_s1 + $0x8a8] sm:$0xff] }
 0x298   :  { %6918 = vmatprep.subr.bf16.mxu1 %v10733_v28  ;;  %v4831_v28 = vld [vmem:[%s15988_s1 + $0x620] sm:$0xff] }
 0x299   :  { %v10758_v17 = vcombine.low %v4831_v28, %v4833_v3 }
 0x29a   :  { %6714 = vmatpush1.bf16.msra.mxu0 %v10730_v8  ;;  %v10756_v8 = vcombine.low %v4828_v10, %v4830_v56  ;;  %v4854_v10 = vld [vmem:[%s15988_s1 + $0x8e8] sm:$0xff] }
 0x29b   :  { %6919 = vmatpush1.bf16.msra.mxu1 %v10732_v11  ;;  %6715 = vmatprep.subr.bf16.mxu0 %v10735_v12  ;;  %v10759_v11 = vcombine.high %v4831_v28, %v4833_v3  ;;  %v10761_v12 = vcombine.high %v4832_v5, %v4834_v6  ;;  %v4857_v28 = vld [vmem:[%s15988_s1 + $0x960] sm:$0xff]  ;;  %v4856_v3 = vld [vmem:[%s15988_s1 + $0x928] sm:$0xff] }
 0x29c   :  { %6920 = vmatprep.subr.bf16.mxu1 %v10737_v13  ;;  %v4835_v13 = vld [vmem:[%s15988_s1 + $0x6a0] sm:$0xff] }
 0x29d   :  { %v10762_v59 = vcombine.low %v4835_v13, %v4837_v14 }
 0x29e   :  { %6716 = vmatpush1.bf16.msra.mxu0 %v10734_v19  ;;  %v10760_v19 = vcombine.low %v4832_v5, %v4834_v6  ;;  %v4858_v5 = vld [vmem:[%s15988_s1 + $0x968] sm:$0xff] }
 0x29f   :  { %6921 = vmatpush1.bf16.msra.mxu1 %v10736_v20  ;;  %6717 = vmatprep.subr.bf16.mxu0 %v10739_v21  ;;  %v10763_v20 = vcombine.high %v4835_v13, %v4837_v14  ;;  %v10765_v21 = vcombine.high %v4836_v15, %v4838_v16  ;;  %v4861_v13 = vld [vmem:[%s15988_s1 + $0x9e0] sm:$0xff]  ;;  %v4860_v14 = vld [vmem:[%s15988_s1 + $0x9a8] sm:$0xff] }
 0x2a0   :  { %6922 = vmatprep.subr.bf16.mxu1 %v10741_v22  ;;  %v4839_v22 = vld [vmem:[%s15988_s1 + $0x720] sm:$0xff] }
 0x2a1   :  { %v10766_v36 = vcombine.low %v4839_v22, %v4841_v24 }
 0x2a2   :  { %6718 = vmatpush1.bf16.msra.mxu0 %v10738_v29  ;;  %v10764_v29 = vcombine.low %v4836_v15, %v4838_v16  ;;  %v4862_v15 = vld [vmem:[%s15988_s1 + $0x9e8] sm:$0xff] }
 0x2a3   :  { %6923 = vmatpush1.bf16.msra.mxu1 %v10740_v63  ;;  %6719 = vmatprep.subr.bf16.mxu0 %v10743_v30  ;;  %v10767_v63 = vcombine.high %v4839_v22, %v4841_v24  ;;  %v10769_v30 = vcombine.high %v4840_v25, %v4842_v26  ;;  %v4865_v22 = vld [vmem:[%s15988_s1 + $0xa60] sm:$0xff]  ;;  %v4864_v24 = vld [vmem:[%s15988_s1 + $0xa28] sm:$0xff] }
 0x2a4   :  { %6924 = vmatprep.subr.bf16.mxu1 %v10745_v31  ;;  %v4843_v31 = vld [vmem:[%s15988_s1 + $0x7a0] sm:$0xff] }
 0x2a5   :  { %v10770_v46 = vcombine.low %v4843_v31, %v4845_v32 }
 0x2a6   :  { %6720 = vmatpush1.bf16.msra.mxu0 %v10742_v37  ;;  %v10768_v37 = vcombine.low %v4840_v25, %v4842_v26  ;;  %v4866_v25 = vld [vmem:[%s15988_s1 + $0xa68] sm:$0xff] }
 0x2a7   :  { %6925 = vmatpush1.bf16.msra.mxu1 %v10744_v39  ;;  %6721 = vmatprep.subr.bf16.mxu0 %v10747_v40  ;;  %v10771_v39 = vcombine.high %v4843_v31, %v4845_v32  ;;  %v10773_v40 = vcombine.high %v4844_v34, %v4846_v35  ;;  %v4869_v31 = vld [vmem:[%s15988_s1 + $0xae0] sm:$0xff]  ;;  %v4868_v32 = vld [vmem:[%s15988_s1 + $0xaa8] sm:$0xff] }
 0x2a8   :  { %6926 = vmatprep.subr.bf16.mxu1 %v10749_v41  ;;  %v4847_v41 = vld [vmem:[%s15988_s1 + $0x820] sm:$0xff] }
 0x2a9   :  { %v10774_v56 = vcombine.low %v4847_v41, %v4849_v42 }
 0x2aa   :  { %6722 = vmatpush1.bf16.msra.mxu0 %v10746_v49  ;;  %v10772_v49 = vcombine.low %v4844_v34, %v4846_v35  ;;  %v4870_v34 = vld [vmem:[%s15988_s1 + $0xae8] sm:$0xff] }
 0x2ab   :  { %6927 = vmatpush1.bf16.msra.mxu1 %v10748_v50  ;;  %6723 = vmatprep.subr.bf16.mxu0 %v10751_v51  ;;  %v10775_v50 = vcombine.high %v4847_v41, %v4849_v42  ;;  %v10777_v51 = vcombine.high %v4848_v43, %v4850_v45  ;;  %v4873_v41 = vld [vmem:[%s15988_s1 + $0xb60] sm:$0xff]  ;;  %v4872_v42 = vld [vmem:[%s15988_s1 + $0xb28] sm:$0xff] }
 0x2ac   :  { %6928 = vmatprep.subr.bf16.mxu1 %v10753_v52  ;;  %v4851_v52 = vld [vmem:[%s15988_s1 + $0x8a0] sm:$0xff] }
 0x2ad   :  { %v10778_v6 = vcombine.low %v4851_v52, %v4853_v54 }
 0x2ae   :  { %6724 = vmatpush1.bf16.msra.mxu0 %v10750_v61  ;;  %v10776_v61 = vcombine.low %v4848_v43, %v4850_v45  ;;  %v4874_v43 = vld [vmem:[%s15988_s1 + $0xb68] sm:$0xff] }
 0x2af   :  { %6929 = vmatpush1.bf16.msra.mxu1 %v10752_v62  ;;  %6725 = vmatprep.subr.bf16.mxu0 %v10755_v1  ;;  %v10779_v62 = vcombine.high %v4851_v52, %v4853_v54  ;;  %v10781_v1 = vcombine.high %v4852_v53, %v4854_v10  ;;  %v4877_v52 = vld [vmem:[%s15988_s1 + $0xbe0] sm:$0xff]  ;;  %v4876_v54 = vld [vmem:[%s15988_s1 + $0xba8] sm:$0xff] }
 0x2b0   :  { %6930 = vmatprep.subr.bf16.mxu1 %v10757_v2  ;;  %v4855_v2 = vld [vmem:[%s15988_s1 + $0x920] sm:$0xff] }
 0x2b1   :  { %v10782_v16 = vcombine.low %v4855_v2, %v4857_v28 }
 0x2b2   :  { %6726 = vmatpush1.bf16.msra.mxu0 %v10754_v7  ;;  %v10780_v7 = vcombine.low %v4852_v53, %v4854_v10  ;;  %v4878_v53 = vld [vmem:[%s15988_s1 + $0xbe8] sm:$0xff] }
 0x2b3   :  { %6931 = vmatpush1.bf16.msra.mxu1 %v10756_v8  ;;  %6727 = vmatprep.subr.bf16.mxu0 %v10759_v11  ;;  %v10783_v8 = vcombine.high %v4855_v2, %v4857_v28  ;;  %v10785_v11 = vcombine.high %v4856_v3, %v4858_v5  ;;  %v4881_v2 = vld [vmem:[%s15988_s1 + $0xc60] sm:$0xff]  ;;  %v4880_v28 = vld [vmem:[%s15988_s1 + $0xc28] sm:$0xff] }
 0x2b4   :  { %6932 = vmatprep.subr.bf16.mxu1 %v10761_v12  ;;  %v4859_v12 = vld [vmem:[%s15988_s1 + $0x9a0] sm:$0xff] }
 0x2b5   :  { %v10786_v26 = vcombine.low %v4859_v12, %v4861_v13 }
 0x2b6   :  { %6728 = vmatpush1.bf16.msra.mxu0 %v10758_v17  ;;  %v10784_v17 = vcombine.low %v4856_v3, %v4858_v5  ;;  %v4882_v3 = vld [vmem:[%s15988_s1 + $0xc68] sm:$0xff] }
 0x2b7   :  { %6933 = vmatpush1.bf16.msra.mxu1 %v10760_v19  ;;  %6729 = vmatprep.subr.bf16.mxu0 %v10763_v20  ;;  %v10787_v19 = vcombine.high %v4859_v12, %v4861_v13  ;;  %v10789_v20 = vcombine.high %v4860_v14, %v4862_v15  ;;  %v4885_v12 = vld [vmem:[%s15988_s1 + $0xce0] sm:$0xff]  ;;  %v4884_v13 = vld [vmem:[%s15988_s1 + $0xca8] sm:$0xff] }
 0x2b8   :  { %6934 = vmatprep.subr.bf16.mxu1 %v10765_v21  ;;  %v4863_v21 = vld [vmem:[%s15988_s1 + $0xa20] sm:$0xff] }
 0x2b9   :  { %v10790_v35 = vcombine.low %v4863_v21, %v4865_v22 }
 0x2ba   :  { %6730 = vmatpush1.bf16.msra.mxu0 %v10762_v59  ;;  %v10788_v59 = vcombine.low %v4860_v14, %v4862_v15  ;;  %v4886_v14 = vld [vmem:[%s15988_s1 + $0xce8] sm:$0xff] }
 0x2bb   :  { %6935 = vmatpush1.bf16.msra.mxu1 %v10764_v29  ;;  %6731 = vmatprep.subr.bf16.mxu0 %v10767_v63  ;;  %v10791_v29 = vcombine.high %v4863_v21, %v4865_v22  ;;  %v10793_v63 = vcombine.high %v4864_v24, %v4866_v25  ;;  %v4889_v21 = vld [vmem:[%s15988_s1 + $0xd60] sm:$0xff]  ;;  %v4888_v22 = vld [vmem:[%s15988_s1 + $0xd28] sm:$0xff] }
 0x2bc   :  { %6936 = vmatprep.subr.bf16.mxu1 %v10769_v30  ;;  %v4867_v30 = vld [vmem:[%s15988_s1 + $0xaa0] sm:$0xff] }
 0x2bd   :  { %v10794_v45 = vcombine.low %v4867_v30, %v4869_v31 }
 0x2be   :  { %6732 = vmatpush1.bf16.msra.mxu0 %v10766_v36  ;;  %v10792_v36 = vcombine.low %v4864_v24, %v4866_v25  ;;  %v4890_v24 = vld [vmem:[%s15988_s1 + $0xd68] sm:$0xff] }
 0x2bf   :  { %6937 = vmatpush1.bf16.msra.mxu1 %v10768_v37  ;;  %6733 = vmatprep.subr.bf16.mxu0 %v10771_v39  ;;  %v10795_v37 = vcombine.high %v4867_v30, %v4869_v31  ;;  %v10797_v39 = vcombine.high %v4868_v32, %v4870_v34  ;;  %v4893_v30 = vld [vmem:[%s15988_s1 + $0xde0] sm:$0xff]  ;;  %v4892_v31 = vld [vmem:[%s15988_s1 + $0xda8] sm:$0xff] }
 0x2c0   :  { %6938 = vmatprep.subr.bf16.mxu1 %v10773_v40  ;;  %v4871_v40 = vld [vmem:[%s15988_s1 + $0xb20] sm:$0xff] }
 0x2c1   :  { %v10798_v10 = vcombine.low %v4871_v40, %v4873_v41 }
 0x2c2   :  { %6734 = vmatpush1.bf16.msra.mxu0 %v10770_v46  ;;  %v10796_v46 = vcombine.low %v4868_v32, %v4870_v34  ;;  %v4894_v32 = vld [vmem:[%s15988_s1 + $0xde8] sm:$0xff] }
 0x2c3   :  { %6939 = vmatpush1.bf16.msra.mxu1 %v10772_v49  ;;  %6744 = vmatprep.subr.bf16.mxu0 %v10775_v50  ;;  %v10799_v49 = vcombine.high %v4871_v40, %v4873_v41  ;;  %v10801_v50 = vcombine.high %v4872_v42, %v4874_v43  ;;  %v4897_v40 = vld [vmem:[%s15988_s1 + $0xe60] sm:$0xff]  ;;  %v4896_v41 = vld [vmem:[%s15988_s1 + $0xe28] sm:$0xff] }
 0x2c4   :  { %6949 = vmatprep.subr.bf16.mxu1 %v10777_v51  ;;  %v4875_v51 = vld [vmem:[%s15988_s1 + $0xba0] sm:$0xff] }
 0x2c5   :  { %6736 = vmatmul.mubr.bf16.vlgmr.msra.gmra.mrb[8].mxu0 %v11995_v23  ;;  %v10802_v5 = vcombine.low %v4875_v51, %v4877_v52 }
 0x2c6   :  { %6745 = vmatpush1.bf16.msra.mxu0 %v10774_v56  ;;  %6941 = vmatmul.mubr.bf16.vlgmr.msra.gmra.mrb[8].mxu1 %v11995_v23  ;;  %v10800_v56 = vcombine.low %v4872_v42, %v4874_v43  ;;  %v4898_v42 = vld [vmem:[%s15988_s1 + $0xe68] sm:$0xff] }
 0x2c7   :  { %6950 = vmatpush1.bf16.msra.mxu1 %v10776_v61  ;;  %6746 = vmatprep.subr.bf16.mxu0 %v10779_v62  ;;  %v10803_v61 = vcombine.high %v4875_v51, %v4877_v52  ;;  %v10805_v62 = vcombine.high %v4876_v54, %v4878_v53  ;;  %v4901_v51 = vld [vmem:[%s15988_s1 + $0xee0] sm:$0xff]  ;;  %v4900_v52 = vld [vmem:[%s15988_s1 + $0xea8] sm:$0xff] }
 0x2c8   :  { %6951 = vmatprep.subr.bf16.mxu1 %v10781_v1  ;;  %6776 = vmatprep.mubr.bf16.mxu0 %v12017_v33  ;;  %v4879_v1 = vld [vmem:[%s15988_s1 + $0xc20] sm:$0xff] }
 0x2c9   :  { %6981 = vmatprep.mubr.bf16.mxu1 %v12017_v33  ;;  %v10806_v15 = vcombine.low %v4879_v1, %v4881_v2 }
 0x2ca   :  { %6747 = vmatpush1.bf16.msra.mxu0 %v10778_v6  ;;  %v10804_v6 = vcombine.low %v4876_v54, %v4878_v53  ;;  %v4902_v54 = vld [vmem:[%s15988_s1 + $0xee8] sm:$0xff] }
 0x2cb   :  { %6952 = vmatpush1.bf16.msra.mxu1 %v10780_v7  ;;  %6748 = vmatprep.subr.bf16.mxu0 %v10783_v8  ;;  %v10807_v7 = vcombine.high %v4879_v1, %v4881_v2  ;;  %v10809_v8 = vcombine.high %v4880_v28, %v4882_v3  ;;  %v4905_v1 = vld [vmem:[%s15988_s1 + $0xf60] sm:$0xff]  ;;  %v4904_v2 = vld [vmem:[%s15988_s1 + $0xf28] sm:$0xff] }
 0x2cc   :  { %6953 = vmatprep.subr.bf16.mxu1 %v10785_v11  ;;  %v4883_v11 = vld [vmem:[%s15988_s1 + $0xca0] sm:$0xff] }
 0x2cd   :  { %v10810_v25 = vcombine.low %v4883_v11, %v4885_v12 }
 0x2ce   :  { %6749 = vmatpush1.bf16.msra.mxu0 %v10782_v16  ;;  %v10808_v16 = vcombine.low %v4880_v28, %v4882_v3  ;;  %v4906_v28 = vld [vmem:[%s15988_s1 + $0xf68] sm:$0xff] }
 0x2cf   :  { %6954 = vmatpush1.bf16.msra.mxu1 %v10784_v17  ;;  %6750 = vmatprep.subr.bf16.mxu0 %v10787_v19  ;;  %v10811_v17 = vcombine.high %v4883_v11, %v4885_v12  ;;  %v10813_v19 = vcombine.high %v4884_v13, %v4886_v14  ;;  %v4909_v11 = vld [vmem:[%s15988_s1 + $0xfe0] sm:$0xff]  ;;  %v4908_v12 = vld [vmem:[%s15988_s1 + $0xfa8] sm:$0xff] }
 0x2d0   :  { %6955 = vmatprep.subr.bf16.mxu1 %v10789_v20  ;;  %v4887_v20 = vld [vmem:[%s15988_s1 + $0xd20] sm:$0xff] }
 0x2d1   :  { %v10814_v34 = vcombine.low %v4887_v20, %v4889_v21 }
 0x2d2   :  { %6751 = vmatpush1.bf16.msra.mxu0 %v10786_v26  ;;  %v10812_v26 = vcombine.low %v4884_v13, %v4886_v14  ;;  %v4910_v13 = vld [vmem:[%s15988_s1 + $0xfe8] sm:$0xff] }
 0x2d3   :  { %6956 = vmatpush1.bf16.msra.mxu1 %v10788_v59  ;;  %6752 = vmatprep.subr.bf16.mxu0 %v10791_v29  ;;  %v10815_v59 = vcombine.high %v4887_v20, %v4889_v21  ;;  %v10817_v29 = vcombine.high %v4888_v22, %v4890_v24  ;;  %v4913_v20 = vld [vmem:[%s15988_s1 + $0x1060] sm:$0xff]  ;;  %v4912_v21 = vld [vmem:[%s15988_s1 + $0x1028] sm:$0xff] }
 0x2d4   :  { %6957 = vmatprep.subr.bf16.mxu1 %v10793_v63  ;;  %v4891_v63 = vld [vmem:[%s15988_s1 + $0xda0] sm:$0xff] }
 0x2d5   :  { %v10818_v43 = vcombine.low %v4891_v63, %v4893_v30 }
 0x2d6   :  { %6753 = vmatpush1.bf16.msra.mxu0 %v10790_v35  ;;  %v10816_v35 = vcombine.low %v4888_v22, %v4890_v24  ;;  %v4914_v22 = vld [vmem:[%s15988_s1 + $0x1068] sm:$0xff] }
 0x2d7   :  { %6958 = vmatpush1.bf16.msra.mxu1 %v10792_v36  ;;  %6754 = vmatprep.subr.bf16.mxu0 %v10795_v37  ;;  %v10819_v36 = vcombine.high %v4891_v63, %v4893_v30  ;;  %v10821_v37 = vcombine.high %v4892_v31, %v4894_v32  ;;  %v4917_v63 = vld [vmem:[%s15988_s1 + $0x10e0] sm:$0xff]  ;;  %v4916_v30 = vld [vmem:[%s15988_s1 + $0x10a8] sm:$0xff] }
 0x2d8   :  { %6959 = vmatprep.subr.bf16.mxu1 %v10797_v39  ;;  %v4895_v39 = vld [vmem:[%s15988_s1 + $0xe20] sm:$0xff] }
 0x2d9   :  { %v10822_v53 = vcombine.low %v4895_v39, %v4897_v40 }
 0x2da   :  { %6755 = vmatpush1.bf16.msra.mxu0 %v10794_v45  ;;  %v10820_v45 = vcombine.low %v4892_v31, %v4894_v32  ;;  %v4918_v31 = vld [vmem:[%s15988_s1 + $0x10e8] sm:$0xff] }
 0x2db   :  { %6960 = vmatpush1.bf16.msra.mxu1 %v10796_v46  ;;  %6756 = vmatprep.subr.bf16.mxu0 %v10799_v49  ;;  %v10823_v46 = vcombine.high %v4895_v39, %v4897_v40  ;;  %v10825_v49 = vcombine.high %v4896_v41, %v4898_v42  ;;  %v4921_v39 = vld [vmem:[%s15988_s1 + $0x1160] sm:$0xff]  ;;  %v4920_v40 = vld [vmem:[%s15988_s1 + $0x1128] sm:$0xff] }
 0x2dc   :  { %6961 = vmatprep.subr.bf16.mxu1 %v10801_v50  ;;  %v4899_v50 = vld [vmem:[%s15988_s1 + $0xea0] sm:$0xff] }
 0x2dd   :  { %v10826_v3 = vcombine.low %v4899_v50, %v4901_v51 }
 0x2de   :  { %6757 = vmatpush1.bf16.msra.mxu0 %v10798_v10  ;;  %v10824_v10 = vcombine.low %v4896_v41, %v4898_v42  ;;  %v4922_v41 = vld [vmem:[%s15988_s1 + $0x1168] sm:$0xff] }
 0x2df   :  { %6962 = vmatpush1.bf16.msra.mxu1 %v10800_v56  ;;  %6758 = vmatprep.subr.bf16.mxu0 %v10803_v61  ;;  %v10827_v56 = vcombine.high %v4899_v50, %v4901_v51  ;;  %v10829_v61 = vcombine.high %v4900_v52, %v4902_v54  ;;  %v4925_v50 = vld [vmem:[%s15988_s1 + $0x11e0] sm:$0xff]  ;;  %v4924_v51 = vld [vmem:[%s15988_s1 + $0x11a8] sm:$0xff] }
 0x2e0   :  { %6963 = vmatprep.subr.bf16.mxu1 %v10805_v62  ;;  %v4903_v62 = vld [vmem:[%s15988_s1 + $0xf20] sm:$0xff] }
 0x2e1   :  { %v10830_v14 = vcombine.low %v4903_v62, %v4905_v1 }
 0x2e2   :  { %6759 = vmatpush1.bf16.msra.mxu0 %v10802_v5  ;;  %v10828_v5 = vcombine.low %v4900_v52, %v4902_v54  ;;  %v4926_v52 = vld [vmem:[%s15988_s1 + $0x11e8] sm:$0xff] }
 0x2e3   :  { %6964 = vmatpush1.bf16.msra.mxu1 %v10804_v6  ;;  %6760 = vmatprep.subr.bf16.mxu0 %v10807_v7  ;;  %v10831_v6 = vcombine.high %v4903_v62, %v4905_v1  ;;  %v10833_v7 = vcombine.high %v4904_v2, %v4906_v28  ;;  %v4929_v62 = vld [vmem:[%s15988_s1 + $0x1260] sm:$0xff]  ;;  %v4928_v1 = vld [vmem:[%s15988_s1 + $0x1228] sm:$0xff] }
 0x2e4   :  { %6965 = vmatprep.subr.bf16.mxu1 %v10809_v8  ;;  %v4907_v8 = vld [vmem:[%s15988_s1 + $0xfa0] sm:$0xff] }
 0x2e5   :  { %v10834_v24 = vcombine.low %v4907_v8, %v4909_v11 }
 0x2e6   :  { %6761 = vmatpush1.bf16.msra.mxu0 %v10806_v15  ;;  %v10832_v15 = vcombine.low %v4904_v2, %v4906_v28  ;;  %v4930_v2 = vld [vmem:[%s15988_s1 + $0x1268] sm:$0xff] }
 0x2e7   :  { %6966 = vmatpush1.bf16.msra.mxu1 %v10808_v16  ;;  %6762 = vmatprep.subr.bf16.mxu0 %v10811_v17  ;;  %v10835_v16 = vcombine.high %v4907_v8, %v4909_v11  ;;  %v10837_v17 = vcombine.high %v4908_v12, %v4910_v13  ;;  %v4933_v8 = vld [vmem:[%s15988_s1 + $0x12e0] sm:$0xff]  ;;  %v4932_v11 = vld [vmem:[%s15988_s1 + $0x12a8] sm:$0xff] }
 0x2e8   :  { %6967 = vmatprep.subr.bf16.mxu1 %v10813_v19  ;;  %v4911_v19 = vld [vmem:[%s15988_s1 + $0x1020] sm:$0xff] }
 0x2e9   :  { %v10838_v32 = vcombine.low %v4911_v19, %v4913_v20 }
 0x2ea   :  { %6763 = vmatpush1.bf16.msra.mxu0 %v10810_v25  ;;  %v10836_v25 = vcombine.low %v4908_v12, %v4910_v13  ;;  %v4934_v12 = vld [vmem:[%s15988_s1 + $0x12e8] sm:$0xff] }
 0x2eb   :  { %6968 = vmatpush1.bf16.msra.mxu1 %v10812_v26  ;;  %6764 = vmatprep.subr.bf16.mxu0 %v10815_v59  ;;  %v10839_v26 = vcombine.high %v4911_v19, %v4913_v20  ;;  %v10841_v59 = vcombine.high %v4912_v21, %v4914_v22  ;;  %v4937_v19 = vld [vmem:[%s15988_s1 + $0x1360] sm:$0xff]  ;;  %v4936_v20 = vld [vmem:[%s15988_s1 + $0x1328] sm:$0xff] }
 0x2ec   :  { %6969 = vmatprep.subr.bf16.mxu1 %v10817_v29  ;;  %v4915_v29 = vld [vmem:[%s15988_s1 + $0x10a0] sm:$0xff] }
 0x2ed   :  { %v10842_v42 = vcombine.low %v4915_v29, %v4917_v63 }
 0x2ee   :  { %6765 = vmatpush1.bf16.msra.mxu0 %v10814_v34  ;;  %v10840_v34 = vcombine.low %v4912_v21, %v4914_v22  ;;  %v4938_v21 = vld [vmem:[%s15988_s1 + $0x1368] sm:$0xff] }
 0x2ef   :  { %6970 = vmatpush1.bf16.msra.mxu1 %v10816_v35  ;;  %6766 = vmatprep.subr.bf16.mxu0 %v10819_v36  ;;  %v10843_v35 = vcombine.high %v4915_v29, %v4917_v63  ;;  %v10845_v36 = vcombine.high %v4916_v30, %v4918_v31  ;;  %v4941_v29 = vld [vmem:[%s15988_s1 + $0x13e0] sm:$0xff]  ;;  %v4940_v63 = vld [vmem:[%s15988_s1 + $0x13a8] sm:$0xff] }
 0x2f0   :  { %6971 = vmatprep.subr.bf16.mxu1 %v10821_v37  ;;  %v4919_v37 = vld [vmem:[%s15988_s1 + $0x1120] sm:$0xff] }
 0x2f1   :  { %v10846_v54 = vcombine.low %v4919_v37, %v4921_v39 }
 0x2f2   :  { %6767 = vmatpush1.bf16.msra.mxu0 %v10818_v43  ;;  %v10844_v43 = vcombine.low %v4916_v30, %v4918_v31  ;;  %v4942_v30 = vld [vmem:[%s15988_s1 + $0x13e8] sm:$0xff] }
 0x2f3   :  { %6972 = vmatpush1.bf16.msra.mxu1 %v10820_v45  ;;  %6768 = vmatprep.subr.bf16.mxu0 %v10823_v46  ;;  %v10847_v45 = vcombine.high %v4919_v37, %v4921_v39  ;;  %v10849_v46 = vcombine.high %v4920_v40, %v4922_v41  ;;  %v4945_v37 = vld [vmem:[%s15988_s1 + $0x1460] sm:$0xff]  ;;  %v4944_v39 = vld [vmem:[%s15988_s1 + $0x1428] sm:$0xff] }
 0x2f4   :  { %6973 = vmatprep.subr.bf16.mxu1 %v10825_v49  ;;  %v4923_v49 = vld [vmem:[%s15988_s1 + $0x11a0] sm:$0xff] }
 0x2f5   :  { %v10850_v28 = vcombine.low %v4923_v49, %v4925_v50 }
 0x2f6   :  { %6769 = vmatpush1.bf16.msra.mxu0 %v10822_v53  ;;  %v10848_v53 = vcombine.low %v4920_v40, %v4922_v41  ;;  %v4946_v40 = vld [vmem:[%s15988_s1 + $0x1468] sm:$0xff] }
 0x2f7   :  { %6974 = vmatpush1.bf16.msra.mxu1 %v10824_v10  ;;  %6770 = vmatprep.subr.bf16.mxu0 %v10827_v56  ;;  %v10851_v10 = vcombine.high %v4923_v49, %v4925_v50  ;;  %v10853_v56 = vcombine.high %v4924_v51, %v4926_v52  ;;  %v4949_v49 = vld [vmem:[%s15988_s1 + $0x14e0] sm:$0xff]  ;;  %v4948_v50 = vld [vmem:[%s15988_s1 + $0x14a8] sm:$0xff] }
 0x2f8   :  { %6975 = vmatprep.subr.bf16.mxu1 %v10829_v61  ;;  %v4927_v61 = vld [vmem:[%s15988_s1 + $0x1220] sm:$0xff] }
 0x2f9   :  { %v10854_v13 = vcombine.low %v4927_v61, %v4929_v62 }
 0x2fa   :  { %6771 = vmatpush1.bf16.msra.mxu0 %v10826_v3  ;;  %v10852_v3 = vcombine.low %v4924_v51, %v4926_v52  ;;  %v4950_v51 = vld [vmem:[%s15988_s1 + $0x14e8] sm:$0xff] }
 0x2fb   :  { %6976 = vmatpush1.bf16.msra.mxu1 %v10828_v5  ;;  %6772 = vmatprep.subr.bf16.mxu0 %v10831_v6  ;;  %v10855_v5 = vcombine.high %v4927_v61, %v4929_v62  ;;  %v10857_v6 = vcombine.high %v4928_v1, %v4930_v2  ;;  %v4953_v61 = vld [vmem:[%s15988_s1 + $0x1560] sm:$0xff]  ;;  %v4952_v62 = vld [vmem:[%s15988_s1 + $0x1528] sm:$0xff] }
 0x2fc   :  { %6977 = vmatprep.subr.bf16.mxu1 %v10833_v7  ;;  %v4931_v7 = vld [vmem:[%s15988_s1 + $0x12a0] sm:$0xff] }
 0x2fd   :  { %v10858_v22 = vcombine.low %v4931_v7, %v4933_v8 }
 0x2fe   :  { %6773 = vmatpush1.bf16.msra.mxu0 %v10830_v14  ;;  %v10856_v14 = vcombine.low %v4928_v1, %v4930_v2  ;;  %v4954_v1 = vld [vmem:[%s15988_s1 + $0x1568] sm:$0xff] }
 0x2ff   :  { %6978 = vmatpush1.bf16.msra.mxu1 %v10832_v15  ;;  %6774 = vmatprep.subr.bf16.mxu0 %v10835_v16  ;;  %v10859_v15 = vcombine.high %v4931_v7, %v4933_v8  ;;  %v10861_v16 = vcombine.high %v4932_v11, %v4934_v12  ;;  %v4957_v7 = vld [vmem:[%s15988_s1 + $0x15e0] sm:$0xff]  ;;  %v4956_v8 = vld [vmem:[%s15988_s1 + $0x15a8] sm:$0xff] }
 0x300   :  { %6979 = vmatprep.subr.bf16.mxu1 %v10837_v17  ;;  %v4935_v17 = vld [vmem:[%s15988_s1 + $0x1320] sm:$0xff] }
 0x301   :  { %v10862_v31 = vcombine.low %v4935_v17, %v4937_v19 }
 0x302   :  { %6775 = vmatpush1.bf16.msra.mxu0 %v10834_v24  ;;  %v10860_v24 = vcombine.low %v4932_v11, %v4934_v12  ;;  %v4958_v11 = vld [vmem:[%s15988_s1 + $0x15e8] sm:$0xff] }
 0x303   :  { %6980 = vmatpush1.bf16.msra.mxu1 %v10836_v25  ;;  %6785 = vmatprep.subr.bf16.mxu0 %v10839_v26  ;;  %v10863_v25 = vcombine.high %v4935_v17, %v4937_v19  ;;  %v10865_v26 = vcombine.high %v4936_v20, %v4938_v21  ;;  %v4961_v17 = vld [vmem:[%s15988_s1 + $0x1660] sm:$0xff]  ;;  %v4960_v19 = vld [vmem:[%s15988_s1 + $0x1628] sm:$0xff] }
 0x304   :  { %6990 = vmatprep.subr.bf16.mxu1 %v10841_v59  ;;  %v4939_v59 = vld [vmem:[%s15988_s1 + $0x13a0] sm:$0xff] }
 0x305   :  { %6777 = vmatmul.mubr.bf16.vlgmr.msra.gmra.mrb[8].mxu0 %v12206_v38  ;;  %v10866_v41 = vcombine.low %v4939_v59, %v4941_v29 }
 0x306   :  { %6786 = vmatpush1.bf16.msra.mxu0 %v10838_v32  ;;  %6982 = vmatmul.mubr.bf16.vlgmr.msra.gmra.mrb[8].mxu1 %v12206_v38  ;;  %v10864_v32 = vcombine.low %v4936_v20, %v4938_v21  ;;  %v4962_v20 = vld [vmem:[%s15988_s1 + $0x1668] sm:$0xff] }
 0x307   :  { %6991 = vmatpush1.bf16.msra.mxu1 %v10840_v34  ;;  %6787 = vmatprep.subr.bf16.mxu0 %v10843_v35  ;;  %v10867_v34 = vcombine.high %v4939_v59, %v4941_v29  ;;  %v10869_v35 = vcombine.high %v4940_v63, %v4942_v30  ;;  %v4965_v59 = vld [vmem:[%s15988_s1 + $0x16e0] sm:$0xff]  ;;  %v4964_v29 = vld [vmem:[%s15988_s1 + $0x16a8] sm:$0xff] }
 0x308   :  { %6992 = vmatprep.subr.bf16.mxu1 %v10845_v36  ;;  %6817 = vmatprep.mubr.bf16.mxu0 %v12221_v48  ;;  %v4943_v36 = vld [vmem:[%s15988_s1 + $0x1420] sm:$0xff] }
 0x309   :  { %7022 = vmatprep.mubr.bf16.mxu1 %v12221_v48  ;;  %v10870_v52 = vcombine.low %v4943_v36, %v4945_v37 }
 0x30a   :  { %6788 = vmatpush1.bf16.msra.mxu0 %v10842_v42  ;;  %v10868_v42 = vcombine.low %v4940_v63, %v4942_v30  ;;  %v4966_v63 = vld [vmem:[%s15988_s1 + $0x16e8] sm:$0xff] }
 0x30b   :  { %6993 = vmatpush1.bf16.msra.mxu1 %v10844_v43  ;;  %6789 = vmatprep.subr.bf16.mxu0 %v10847_v45  ;;  %v10871_v43 = vcombine.high %v4943_v36, %v4945_v37  ;;  %v10873_v45 = vcombine.high %v4944_v39, %v4946_v40  ;;  %v4969_v36 = vld [vmem:[%s15988_s1 + $0x1760] sm:$0xff]  ;;  %v4968_v37 = vld [vmem:[%s15988_s1 + $0x1728] sm:$0xff] }
 0x30c   :  { %6994 = vmatprep.subr.bf16.mxu1 %v10849_v46  ;;  %v4947_v46 = vld [vmem:[%s15988_s1 + $0x14a0] sm:$0xff] }
 0x30d   :  { %v10874_v2 = vcombine.low %v4947_v46, %v4949_v49 }
 0x30e   :  { %6790 = vmatpush1.bf16.msra.mxu0 %v10846_v54  ;;  %v10872_v54 = vcombine.low %v4944_v39, %v4946_v40  ;;  %v4970_v39 = vld [vmem:[%s15988_s1 + $0x1768] sm:$0xff] }
 0x30f   :  { %6995 = vmatpush1.bf16.msra.mxu1 %v10848_v53  ;;  %6791 = vmatprep.subr.bf16.mxu0 %v10851_v10  ;;  %v10875_v53 = vcombine.high %v4947_v46, %v4949_v49  ;;  %v10877_v10 = vcombine.high %v4948_v50, %v4950_v51  ;;  %v4973_v46 = vld [vmem:[%s15988_s1 + $0x17e0] sm:$0xff]  ;;  %v4972_v49 = vld [vmem:[%s15988_s1 + $0x17a8] sm:$0xff] }
 0x310   :  { %6996 = vmatprep.subr.bf16.mxu1 %v10853_v56  ;;  %v4951_v56 = vld [vmem:[%s15988_s1 + $0x1520] sm:$0xff] }
 0x311   :  { %v10878_v12 = vcombine.low %v4951_v56, %v4953_v61 }
 0x312   :  { %6792 = vmatpush1.bf16.msra.mxu0 %v10850_v28  ;;  %v10876_v28 = vcombine.low %v4948_v50, %v4950_v51  ;;  %v4974_v50 = vld [vmem:[%s15988_s1 + $0x17e8] sm:$0xff] }
 0x313   :  { %6997 = vmatpush1.bf16.msra.mxu1 %v10852_v3  ;;  %6793 = vmatprep.subr.bf16.mxu0 %v10855_v5  ;;  %v10879_v3 = vcombine.high %v4951_v56, %v4953_v61  ;;  %v10881_v5 = vcombine.high %v4952_v62, %v4954_v1  ;;  %v4977_v56 = vld [vmem:[%s15988_s1 + $0x1860] sm:$0xff]  ;;  %v4976_v61 = vld [vmem:[%s15988_s1 + $0x1828] sm:$0xff] }
 0x314   :  { %6998 = vmatprep.subr.bf16.mxu1 %v10857_v6  ;;  %v4955_v6 = vld [vmem:[%s15988_s1 + $0x15a0] sm:$0xff] }
 0x315   :  { %v10882_v21 = vcombine.low %v4955_v6, %v4957_v7 }
 0x316   :  { %6794 = vmatpush1.bf16.msra.mxu0 %v10854_v13  ;;  %v10880_v13 = vcombine.low %v4952_v62, %v4954_v1  ;;  %v4978_v62 = vld [vmem:[%s15988_s1 + $0x1868] sm:$0xff] }
 0x317   :  { %6999 = vmatpush1.bf16.msra.mxu1 %v10856_v14  ;;  %6795 = vmatprep.subr.bf16.mxu0 %v10859_v15  ;;  %v10883_v14 = vcombine.high %v4955_v6, %v4957_v7  ;;  %v10885_v15 = vcombine.high %v4956_v8, %v4958_v11  ;;  %v4981_v6 = vld [vmem:[%s15988_s1 + $0x18e0] sm:$0xff]  ;;  %v4980_v7 = vld [vmem:[%s15988_s1 + $0x18a8] sm:$0xff] }
 0x318   :  { %7000 = vmatprep.subr.bf16.mxu1 %v10861_v16  ;;  %v4959_v16 = vld [vmem:[%s15988_s1 + $0x1620] sm:$0xff] }
 0x319   :  { %v10886_v30 = vcombine.low %v4959_v16, %v4961_v17 }
 0x31a   :  { %6796 = vmatpush1.bf16.msra.mxu0 %v10858_v22  ;;  %v10884_v22 = vcombine.low %v4956_v8, %v4958_v11  ;;  %v4982_v8 = vld [vmem:[%s15988_s1 + $0x18e8] sm:$0xff] }
 0x31b   :  { %7001 = vmatpush1.bf16.msra.mxu1 %v10860_v24  ;;  %6797 = vmatprep.subr.bf16.mxu0 %v10863_v25  ;;  %v10887_v24 = vcombine.high %v4959_v16, %v4961_v17  ;;  %v10889_v25 = vcombine.high %v4960_v19, %v4962_v20  ;;  %v4985_v16 = vld [vmem:[%s15988_s1 + $0x1960] sm:$0xff]  ;;  %v4984_v17 = vld [vmem:[%s15988_s1 + $0x1928] sm:$0xff] }
 0x31c   :  { %7002 = vmatprep.subr.bf16.mxu1 %v10865_v26  ;;  %v4963_v26 = vld [vmem:[%s15988_s1 + $0x16a0] sm:$0xff] }
 0x31d   :  { %v10890_v40 = vcombine.low %v4963_v26, %v4965_v59 }
 0x31e   :  { %6798 = vmatpush1.bf16.msra.mxu0 %v10862_v31  ;;  %v10888_v31 = vcombine.low %v4960_v19, %v4962_v20  ;;  %v4986_v19 = vld [vmem:[%s15988_s1 + $0x1968] sm:$0xff] }
 0x31f   :  { %7003 = vmatpush1.bf16.msra.mxu1 %v10864_v32  ;;  %6799 = vmatprep.subr.bf16.mxu0 %v10867_v34  ;;  %v10891_v32 = vcombine.high %v4963_v26, %v4965_v59  ;;  %v10893_v34 = vcombine.high %v4964_v29, %v4966_v63  ;;  %v4989_v26 = vld [vmem:[%s15988_s1 + $0x19e0] sm:$0xff]  ;;  %v4988_v59 = vld [vmem:[%s15988_s1 + $0x19a8] sm:$0xff] }
 0x320   :  { %7004 = vmatprep.subr.bf16.mxu1 %v10869_v35  ;;  %v4967_v35 = vld [vmem:[%s15988_s1 + $0x1720] sm:$0xff] }
 0x321   :  { %v10894_v51 = vcombine.low %v4967_v35, %v4969_v36 }
 0x322   :  { %6800 = vmatpush1.bf16.msra.mxu0 %v10866_v41  ;;  %v10892_v41 = vcombine.low %v4964_v29, %v4966_v63  ;;  %v4990_v29 = vld [vmem:[%s15988_s1 + $0x19e8] sm:$0xff] }
 0x323   :  { %7005 = vmatpush1.bf16.msra.mxu1 %v10868_v42  ;;  %6801 = vmatprep.subr.bf16.mxu0 %v10871_v43  ;;  %v10895_v42 = vcombine.high %v4967_v35, %v4969_v36  ;;  %v10897_v43 = vcombine.high %v4968_v37, %v4970_v39  ;;  %v4993_v35 = vld [vmem:[%s15988_s1 + $0x1a60] sm:$0xff]  ;;  %v4992_v36 = vld [vmem:[%s15988_s1 + $0x1a28] sm:$0xff] }
 0x324   :  { %7006 = vmatprep.subr.bf16.mxu1 %v10873_v45  ;;  %v4971_v45 = vld [vmem:[%s15988_s1 + $0x17a0] sm:$0xff] }
 0x325   :  { %v10898_v1 = vcombine.low %v4971_v45, %v4973_v46 }
 0x326   :  { %6802 = vmatpush1.bf16.msra.mxu0 %v10870_v52  ;;  %v10896_v52 = vcombine.low %v4968_v37, %v4970_v39  ;;  %v4994_v37 = vld [vmem:[%s15988_s1 + $0x1a68] sm:$0xff] }
 0x327   :  { %7007 = vmatpush1.bf16.msra.mxu1 %v10872_v54  ;;  %6803 = vmatprep.subr.bf16.mxu0 %v10875_v53  ;;  %v10899_v54 = vcombine.high %v4971_v45, %v4973_v46  ;;  %v10901_v53 = vcombine.high %v4972_v49, %v4974_v50  ;;  %v4997_v45 = vld [vmem:[%s15988_s1 + $0x1ae0] sm:$0xff]  ;;  %v4996_v46 = vld [vmem:[%s15988_s1 + $0x1aa8] sm:$0xff] }
 0x328   :  { %7008 = vmatprep.subr.bf16.mxu1 %v10877_v10  ;;  %v4975_v10 = vld [vmem:[%s15988_s1 + $0x1820] sm:$0xff] }
 0x329   :  { %v10902_v11 = vcombine.low %v4975_v10, %v4977_v56 }
 0x32a   :  { %6804 = vmatpush1.bf16.msra.mxu0 %v10874_v2  ;;  %v10900_v2 = vcombine.low %v4972_v49, %v4974_v50  ;;  %v4998_v49 = vld [vmem:[%s15988_s1 + $0x1ae8] sm:$0xff] }
 0x32b   :  { %7009 = vmatpush1.bf16.msra.mxu1 %v10876_v28  ;;  %6805 = vmatprep.subr.bf16.mxu0 %v10879_v3  ;;  %v10903_v28 = vcombine.high %v4975_v10, %v4977_v56  ;;  %v10905_v3 = vcombine.high %v4976_v61, %v4978_v62  ;;  %v5001_v10 = vld [vmem:[%s15988_s1 + $0x1b60] sm:$0xff]  ;;  %v5000_v56 = vld [vmem:[%s15988_s1 + $0x1b28] sm:$0xff] }
 0x32c   :  { %7010 = vmatprep.subr.bf16.mxu1 %v10881_v5  ;;  %v4979_v5 = vld [vmem:[%s15988_s1 + $0x18a0] sm:$0xff] }
 0x32d   :  { %v10906_v20 = vcombine.low %v4979_v5, %v4981_v6 }
 0x32e   :  { %6806 = vmatpush1.bf16.msra.mxu0 %v10878_v12  ;;  %v10904_v12 = vcombine.low %v4976_v61, %v4978_v62  ;;  %v5002_v61 = vld [vmem:[%s15988_s1 + $0x1b68] sm:$0xff] }
 0x32f   :  { %7011 = vmatpush1.bf16.msra.mxu1 %v10880_v13  ;;  %6807 = vmatprep.subr.bf16.mxu0 %v10883_v14  ;;  %v10907_v13 = vcombine.high %v4979_v5, %v4981_v6  ;;  %v10909_v14 = vcombine.high %v4980_v7, %v4982_v8  ;;  %v5003_v5 = vld [vmem:[%s15988_s1 + $0x1ba0] sm:$0xff] }
 0x330   :  { %7012 = vmatprep.subr.bf16.mxu1 %v10885_v15  ;;  %v4983_v15 = vld [vmem:[%s15988_s1 + $0x1920] sm:$0xff] }
 0x331   :  { %v10910_v63 = vcombine.low %v4983_v15, %v4985_v16  ;;  %v5005_v6 = vld [vmem:[%s15988_s1 + $0x1be0] sm:$0xff] }
 0x332   :  { %6808 = vmatpush1.bf16.msra.mxu0 %v10882_v21  ;;  %v10908_v21 = vcombine.low %v4980_v7, %v4982_v8 }
 0x333   :  { %7013 = vmatpush1.bf16.msra.mxu1 %v10884_v22  ;;  %6809 = vmatprep.subr.bf16.mxu0 %v10887_v24  ;;  %v10911_v22 = vcombine.high %v4983_v15, %v4985_v16  ;;  %v10913_v24 = vcombine.high %v4984_v17, %v4986_v19 }
 0x334   :  { %7014 = vmatprep.subr.bf16.mxu1 %v10889_v25  ;;  %v4987_v25 = vld [vmem:[%s15988_s1 + $0x19a0] sm:$0xff] }
 0x335   :  { %v10914_v39 = vcombine.low %v4987_v25, %v4989_v26 }
 0x336   :  { %6810 = vmatpush1.bf16.msra.mxu0 %v10886_v30  ;;  %v10912_v30 = vcombine.low %v4984_v17, %v4986_v19 }
 0x337   :  { %7015 = vmatpush1.bf16.msra.mxu1 %v10888_v31  ;;  %6811 = vmatprep.subr.bf16.mxu0 %v10891_v32  ;;  %v10915_v31 = vcombine.high %v4987_v25, %v4989_v26  ;;  %v10917_v32 = vcombine.high %v4988_v59, %v4990_v29  ;;  %v10931_v25 = vcombine.high %v5003_v5, %v5005_v6 }
 0x338   :  { %7016 = vmatprep.subr.bf16.mxu1 %v10893_v34  ;;  %v4991_v34 = vld [vmem:[%s15988_s1 + $0x1a20] sm:$0xff] }
 0x339   :  { %v10918_v50 = vcombine.low %v4991_v34, %v4993_v35 }
 0x33a   :  { %6812 = vmatpush1.bf16.msra.mxu0 %v10890_v40  ;;  %v10916_v40 = vcombine.low %v4988_v59, %v4990_v29  ;;  %v5007_v29 = vld [vmem:[%s15988_s1 + $0x1c20] sm:$0xff] }
 0x33b   :  { %7017 = vmatpush1.bf16.msra.mxu1 %v10892_v41  ;;  %6813 = vmatprep.subr.bf16.mxu0 %v10895_v42  ;;  %v10919_v41 = vcombine.high %v4991_v34, %v4993_v35  ;;  %v10921_v42 = vcombine.high %v4992_v36, %v4994_v37 }
 0x33c   :  { %7018 = vmatprep.subr.bf16.mxu1 %v10897_v43  ;;  %v4995_v43 = vld [vmem:[%s15988_s1 + $0x1aa0] sm:$0xff] }
 0x33d   :  { %v10922_v62 = vcombine.low %v4995_v43, %v4997_v45 }
 0x33e   :  { %6814 = vmatpush1.bf16.msra.mxu0 %v10894_v51  ;;  %v10920_v51 = vcombine.low %v4992_v36, %v4994_v37  ;;  %v5011_v37 = vld [vmem:[%s15988_s1 + $0x1ca0] sm:$0xff] }
 0x33f   :  { %7019 = vmatpush1.bf16.msra.mxu1 %v10896_v52  ;;  %6815 = vmatprep.subr.bf16.mxu0 %v10899_v54  ;;  %v10923_v52 = vcombine.high %v4995_v43, %v4997_v45  ;;  %v10925_v54 = vcombine.high %v4996_v46, %v4998_v49 }
 0x340   :  { %7020 = vmatprep.subr.bf16.mxu1 %v10901_v53  ;;  %v4999_v53 = vld [vmem:[%s15988_s1 + $0x1b20] sm:$0xff] }
 0x341   :  { %v10926_v19 = vcombine.low %v4999_v53, %v5001_v10 }
 0x342   :  { %6816 = vmatpush1.bf16.msra.mxu0 %v10898_v1  ;;  %v10924_v1 = vcombine.low %v4996_v46, %v4998_v49  ;;  %v5015_v49 = vld [vmem:[%s15988_s1 + $0x1d20] sm:$0xff] }
 0x343   :  { %7021 = vmatpush1.bf16.msra.mxu1 %v10900_v2  ;;  %6826 = vmatprep.subr.bf16.mxu0 %v10903_v28  ;;  %v10927_v2 = vcombine.high %v4999_v53, %v5001_v10 }
 0x344   :  { %7031 = vmatprep.subr.bf16.mxu1 %v10905_v3  ;;  %v10929_v3 = vcombine.high %v5000_v56, %v5002_v61 }
 0x345   :  { %6818 = vmatmul.mubr.bf16.vlgmr.msra.gmra.mrb[8].mxu0 %v12409_v58 }
 0x346   :  { %6827 = vmatpush1.bf16.msra.mxu0 %v10902_v11  ;;  %7023 = vmatmul.mubr.bf16.vlgmr.msra.gmra.mrb[8].mxu1 %v12409_v58 }
 0x347   :  { %7032 = vmatpush1.bf16.msra.mxu1 %v10904_v12  ;;  %6828 = vmatprep.subr.bf16.mxu0 %v10907_v13  ;;  %v5004_v12 = vld [vmem:[%s15988_s1 + $0x1ba8] sm:$0xff] }
 0x348   :  { %7033 = vmatprep.subr.bf16.mxu1 %v10909_v14  ;;  %6858 = vmatprep.mubr.bf16.mxu0 %v12425_v4  ;;  %v5006_v13 = vld [vmem:[%s15988_s1 + $0x1be8] sm:$0xff] }
 0x349   :  { %7063 = vmatprep.mubr.bf16.mxu1 %v12425_v4  ;;  %v10933_v59 = vcombine.high %v5004_v12, %v5006_v13  ;;  %v10932_v34 = vcombine.low %v5004_v12, %v5006_v13  ;;  %v5023_v13 = vld [vmem:[%s15988_s1 + $0x1e20] sm:$0xff] }
 0x34a   :  { %6829 = vmatpush1.bf16.msra.mxu0 %v10906_v20 }
 0x34b   :  { %7034 = vmatpush1.bf16.msra.mxu1 %v10908_v21  ;;  %6830 = vmatprep.subr.bf16.mxu0 %v10911_v22 }
 0x34c   :  { %7035 = vmatprep.subr.bf16.mxu1 %v10913_v24  ;;  %v10928_v24 = vcombine.low %v5000_v56, %v5002_v61  ;;  %v5019_v61 = vld [vmem:[%s15988_s1 + $0x1da0] sm:$0xff] }
 0x34e   :  { %6831 = vmatpush1.bf16.msra.mxu0 %v10910_v63  ;;  %v5009_v63 = vld [vmem:[%s15988_s1 + $0x1c60] sm:$0xff] }
 0x34f   :  { %7036 = vmatpush1.bf16.msra.mxu1 %v10912_v30  ;;  %6832 = vmatprep.subr.bf16.mxu0 %v10915_v31  ;;  %v5008_v30 = vld [vmem:[%s15988_s1 + $0x1c28] sm:$0xff]  ;;  %v10935_v35 = vcombine.high %v5007_v29, %v5009_v63 }
 0x350   :  { %7037 = vmatprep.subr.bf16.mxu1 %v10917_v32  ;;  %v5010_v31 = vld [vmem:[%s15988_s1 + $0x1c68] sm:$0xff]  ;;  %v10930_v32 = vcombine.low %v5003_v5, %v5005_v6 }
 0x351   :  { %v10937_v36 = vcombine.high %v5008_v30, %v5010_v31  ;;  %v10936_v43 = vcombine.low %v5008_v30, %v5010_v31  ;;  %v5030_v30 = vld [vmem:[%s15988_s1 + $0x1ee8] sm:$0xff] }
 0x352   :  { %6833 = vmatpush1.bf16.msra.mxu0 %v10914_v39  ;;  %v5013_v39 = vld [vmem:[%s15988_s1 + $0x1ce0] sm:$0xff] }
 0x353   :  { %7038 = vmatpush1.bf16.msra.mxu1 %v10916_v40  ;;  %6834 = vmatprep.subr.bf16.mxu0 %v10919_v41  ;;  %v5012_v40 = vld [vmem:[%s15988_s1 + $0x1ca8] sm:$0xff]  ;;  %v10939_v45 = vcombine.high %v5011_v37, %v5013_v39 }
 0x354   :  { %7039 = vmatprep.subr.bf16.mxu1 %v10921_v42  ;;  %v5014_v41 = vld [vmem:[%s15988_s1 + $0x1ce8] sm:$0xff]  ;;  %v10934_v42 = vcombine.low %v5007_v29, %v5009_v63  ;;  %v5029_v29 = vld [vmem:[%s15988_s1 + $0x1ee0] sm:$0xff] }
 0x355   :  { %v10941_v46 = vcombine.high %v5012_v40, %v5014_v41  ;;  %v10940_v53 = vcombine.low %v5012_v40, %v5014_v41  ;;  %v5028_v63 = vld [vmem:[%s15988_s1 + $0x1ea8] sm:$0xff] }
 0x356   :  { %6835 = vmatpush1.bf16.msra.mxu0 %v10918_v50  ;;  %v5017_v50 = vld [vmem:[%s15988_s1 + $0x1d60] sm:$0xff]  ;;  %v5034_v40 = vld [vmem:[%s15988_s1 + $0x1f68] sm:$0xff] }
 0x357   :  { %7040 = vmatpush1.bf16.msra.mxu1 %v10920_v51  ;;  %6836 = vmatprep.subr.bf16.mxu0 %v10923_v52  ;;  %v5016_v51 = vld [vmem:[%s15988_s1 + $0x1d28] sm:$0xff]  ;;  %v10943_v10 = vcombine.high %v5015_v49, %v5017_v50 }
 0x358   :  { %v14471_v28 = vpop.f32.mrb[4].mxu0  ;;  %7041 = vmatprep.subr.bf16.mxu1 %v10925_v54  ;;  %v5018_v52 = vld [vmem:[%s15988_s1 + $0x1d68] sm:$0xff]  ;;  %v10938_v54 = vcombine.low %v5011_v37, %v5013_v39  ;;  %v5033_v37 = vld [vmem:[%s15988_s1 + $0x1f60] sm:$0xff] }
 0x359   :  { %v4779_v7 = vmax.f32 %v13483_v55, %v14471_v28  ;;  %v14481_v8 = vpop.f32.mrb[4].mxu1  ;;  %v14483_v11 = vpop.f32.mrb[5].mxu0  ;;  %v10945_v56 = vcombine.high %v5016_v51, %v5018_v52  ;;  %v10944_v5 = vcombine.low %v5016_v51, %v5018_v52  ;;  %v5032_v39 = vld [vmem:[%s15988_s1 + $0x1f28] sm:$0xff] }
 0x35a   :  { %v4781_v14 = vmax.f32 %v13491_v57, %v14481_v8  ;;  %v4780_v15 = vmax.f32 %v13493_v60, %v14483_v11  ;;  %v14495_v16 = vpop.f32.mrb[5].mxu1  ;;  %v4571_v17 = vpop.f32.mrb[6].mxu0  ;;  %6837 = vmatpush1.bf16.msra.mxu0 %v10922_v62  ;;  %v5021_v62 = vld [vmem:[%s15988_s1 + $0x1de0] sm:$0xff]  ;;  %v5038_v51 = vld [vmem:[%s15988_s1 + $0x1fe8] sm:$0xff] }
 0x35b   :  { %v4782_v20 = vmax.f32 %v13501_v0, %v14495_v16  ;;  %v4776_v21 = vpop.f32.mrb[6].mxu1  ;;  %7042 = vmatpush1.bf16.msra.mxu1 %v10924_v1  ;;  %v4572_v22 = vpop.f32.mrb[7].mxu0  ;;  %6838 = vmatprep.subr.bf16.mxu0 %v10927_v2  ;;  %v5020_v1 = vld [vmem:[%s15988_s1 + $0x1da8] sm:$0xff]  ;;  %v10947_v6 = vcombine.high %v5019_v61, %v5021_v62  ;;  %v5025_v17 = vld [vmem:[%s15988_s1 + $0x1e60] sm:$0xff] }
 0x35c   :  { %v4777_v26 = vpop.f32.mrb[7].mxu1  ;;  %7043 = vmatprep.subr.bf16.mxu1 %v10929_v3  ;;  %v5022_v2 = vld [vmem:[%s15988_s1 + $0x1de8] sm:$0xff]  ;;  %v10942_v3 = vcombine.low %v5015_v49, %v5017_v50  ;;  %v10946_v22 = vcombine.low %v5019_v61, %v5021_v62  ;;  %v10950_v31 = vcombine.low %v5023_v13, %v5025_v17  ;;  %v5037_v49 = vld [vmem:[%s15988_s1 + $0x1fe0] sm:$0xff] }
 0x35d   :  { %v10949_v12 = vcombine.high %v5020_v1, %v5022_v2  ;;  %v5026_v21 = vld [vmem:[%s15988_s1 + $0x1e68] sm:$0xff]  ;;  %v5041_v61 = vld [vmem:[%s15988_s1 + $0x2060] sm:$0xff] }
 0x35e   :  { %6839 = vmatpush1.bf16.msra.mxu0 %v10926_v19  ;;  %v5024_v19 = vld [vmem:[%s15988_s1 + $0x1e28] sm:$0xff]  ;;  %v11668_v57 = vld [vmem:[%s15992_s5] sm:$0xff]  }
 0x35f   :  { %7044 = vmatpush1.bf16.msra.mxu1 %v10928_v24  ;;  %6840 = vmatprep.subr.bf16.mxu0 %v10931_v25  ;;  %v10948_v24 = vcombine.low %v5020_v1, %v5022_v2  ;;  %v10951_v25 = vcombine.high %v5023_v13, %v5025_v17  ;;  %v10953_v26 = vcombine.high %v5024_v19, %v5026_v21  ;;  %v5036_v50 = vld [vmem:[%s15988_s1 + $0x1fa8] sm:$0xff]  ;;  %v5045_v13 = vld [vmem:[%s15988_s1 + $0x20e0] sm:$0xff] }
 0x360   :  { %7045 = vmatprep.subr.bf16.mxu1 %v10933_v59  ;;  %v5027_v59 = vld [vmem:[%s15988_s1 + $0x1ea0] sm:$0xff]  ;;  %v5040_v62 = vld [vmem:[%s15988_s1 + $0x2028] sm:$0xff] }
 0x361   :  { %v10954_v41 = vcombine.low %v5027_v59, %v5029_v29  ;;  %v5042_v1 = vld [vmem:[%s15988_s1 + $0x2068] sm:$0xff]  ;;  %v11672_v16 = vld [vmem:[%s15992_s5 + $0x20] sm:$0xff]  }
 0x362   :  { %6841 = vmatpush1.bf16.msra.mxu0 %v10930_v32  ;;  %v10952_v32 = vcombine.low %v5024_v19, %v5026_v21  ;;  %v5044_v17 = vld [vmem:[%s15988_s1 + $0x20a8] sm:$0xff] }
 0x363   :  { %7046 = vmatpush1.bf16.msra.mxu1 %v10932_v34  ;;  %6842 = vmatprep.subr.bf16.mxu0 %v10935_v35  ;;  %v10955_v34 = vcombine.high %v5027_v59, %v5029_v29  ;;  %v10957_v35 = vcombine.high %v5028_v63, %v5030_v30  ;;  %v5046_v19 = vld [vmem:[%s15988_s1 + $0x20e8] sm:$0xff]  ;;  %v5049_v59 = vld [vmem:[%s15988_s1 + $0x2160] sm:$0xff] }
 0x364   :  { %7047 = vmatprep.subr.bf16.mxu1 %v10937_v36  ;;  %v5031_v36 = vld [vmem:[%s15988_s1 + $0x1f20] sm:$0xff]  ;;  %v5048_v29 = vld [vmem:[%s15988_s1 + $0x2128] sm:$0xff] }
 0x365   :  { %v10958_v52 = vcombine.low %v5031_v36, %v5033_v37  ;;  %v11669_v0 = vld [vmem:[%s15992_s5 + $0x8] sm:$0xff]  }
 0x366   :  { %6843 = vmatpush1.bf16.msra.mxu0 %v10934_v42  ;;  %v10956_v42 = vcombine.low %v5028_v63, %v5030_v30  ;;  %v5050_v63 = vld [vmem:[%s15988_s1 + $0x2168] sm:$0xff] }
 0x367   :  { %7048 = vmatpush1.bf16.msra.mxu1 %v10936_v43  ;;  %6844 = vmatprep.subr.bf16.mxu0 %v10939_v45  ;;  %v10959_v43 = vcombine.high %v5031_v36, %v5033_v37  ;;  %v10961_v45 = vcombine.high %v5032_v39, %v5034_v40  ;;  %v5053_v36 = vld [vmem:[%s15988_s1 + $0x21e0] sm:$0xff]  ;;  %v5052_v37 = vld [vmem:[%s15988_s1 + $0x21a8] sm:$0xff] }
 0x368   :  { %7049 = vmatprep.subr.bf16.mxu1 %v10941_v46  ;;  %v5035_v46 = vld [vmem:[%s15988_s1 + $0x1fa0] sm:$0xff] }
 0x369   :  { %v10962_v2 = vcombine.low %v5035_v46, %v5037_v49 }
 0x36a   :  { %6845 = vmatpush1.bf16.msra.mxu0 %v10938_v54  ;;  %v10960_v54 = vcombine.low %v5032_v39, %v5034_v40  ;;  %v5054_v39 = vld [vmem:[%s15988_s1 + $0x21e8] sm:$0xff] }
 0x36b   :  { %7050 = vmatpush1.bf16.msra.mxu1 %v10940_v53  ;;  %6846 = vmatprep.subr.bf16.mxu0 %v10943_v10  ;;  %v10963_v53 = vcombine.high %v5035_v46, %v5037_v49  ;;  %v10965_v10 = vcombine.high %v5036_v50, %v5038_v51  ;;  %v5057_v46 = vld [vmem:[%s15988_s1 + $0x2260] sm:$0xff]  ;;  %v5056_v49 = vld [vmem:[%s15988_s1 + $0x2228] sm:$0xff] }
 0x36c   :  { %7051 = vmatprep.subr.bf16.mxu1 %v10945_v56  ;;  %v5039_v56 = vld [vmem:[%s15988_s1 + $0x2020] sm:$0xff] }
 0x36d   :  { %v10966_v21 = vcombine.low %v5039_v56, %v5041_v61 }
 0x36e   :  { %6847 = vmatpush1.bf16.msra.mxu0 %v10942_v3  ;;  %v10964_v3 = vcombine.low %v5036_v50, %v5038_v51  ;;  %v5058_v50 = vld [vmem:[%s15988_s1 + $0x2268] sm:$0xff] }
 0x36f   :  { %7052 = vmatpush1.bf16.msra.mxu1 %v10944_v5  ;;  %6848 = vmatprep.subr.bf16.mxu0 %v10947_v6  ;;  %v10967_v5 = vcombine.high %v5039_v56, %v5041_v61  ;;  %v10969_v6 = vcombine.high %v5040_v62, %v5042_v1  ;;  %v5061_v56 = vld [vmem:[%s15988_s1 + $0x22e0] sm:$0xff]  ;;  %v5060_v61 = vld [vmem:[%s15988_s1 + $0x22a8] sm:$0xff] }
 0x370   :  { %7053 = vmatprep.subr.bf16.mxu1 %v10949_v12  ;;  %v5043_v12 = vld [vmem:[%s15988_s1 + $0x20a0] sm:$0xff] }
 0x371   :  { %v10970_v30 = vcombine.low %v5043_v12, %v5045_v13 }
 0x372   :  { %6849 = vmatpush1.bf16.msra.mxu0 %v10946_v22  ;;  %v10968_v22 = vcombine.low %v5040_v62, %v5042_v1  ;;  %v5062_v62 = vld [vmem:[%s15988_s1 + $0x22e8] sm:$0xff] }
 0x373   :  { %7054 = vmatpush1.bf16.msra.mxu1 %v10948_v24  ;;  %6850 = vmatprep.subr.bf16.mxu0 %v10951_v25  ;;  %v10971_v24 = vcombine.high %v5043_v12, %v5045_v13  ;;  %v10973_v25 = vcombine.high %v5044_v17, %v5046_v19  ;;  %v5065_v12 = vld [vmem:[%s15988_s1 + $0x2360] sm:$0xff]  ;;  %v5064_v13 = vld [vmem:[%s15988_s1 + $0x2328] sm:$0xff] }
 0x374   :  { %7055 = vmatprep.subr.bf16.mxu1 %v10953_v26  ;;  %v5047_v26 = vld [vmem:[%s15988_s1 + $0x2120] sm:$0xff] }
 0x375   :  { %v10974_v40 = vcombine.low %v5047_v26, %v5049_v59 }
 0x376   :  { %6851 = vmatpush1.bf16.msra.mxu0 %v10950_v31  ;;  %v10972_v31 = vcombine.low %v5044_v17, %v5046_v19  ;;  %v5066_v17 = vld [vmem:[%s15988_s1 + $0x2368] sm:$0xff] }
 0x377   :  { %7056 = vmatpush1.bf16.msra.mxu1 %v10952_v32  ;;  %6852 = vmatprep.subr.bf16.mxu0 %v10955_v34  ;;  %v10975_v32 = vcombine.high %v5047_v26, %v5049_v59  ;;  %v10977_v34 = vcombine.high %v5048_v29, %v5050_v63  ;;  %v5069_v26 = vld [vmem:[%s15988_s1 + $0x23e0] sm:$0xff]  ;;  %v5068_v59 = vld [vmem:[%s15988_s1 + $0x23a8] sm:$0xff] }
 0x378   :  { %7057 = vmatprep.subr.bf16.mxu1 %v10957_v35  ;;  %v5051_v35 = vld [vmem:[%s15988_s1 + $0x21a0] sm:$0xff] }
 0x379   :  { %v10978_v51 = vcombine.low %v5051_v35, %v5053_v36 }
 0x37a   :  { %6853 = vmatpush1.bf16.msra.mxu0 %v10954_v41  ;;  %v10976_v41 = vcombine.low %v5048_v29, %v5050_v63  ;;  %v5070_v29 = vld [vmem:[%s15988_s1 + $0x23e8] sm:$0xff] }
 0x37b   :  { %7058 = vmatpush1.bf16.msra.mxu1 %v10956_v42  ;;  %6854 = vmatprep.subr.bf16.mxu0 %v10959_v43  ;;  %v10979_v42 = vcombine.high %v5051_v35, %v5053_v36  ;;  %v10981_v43 = vcombine.high %v5052_v37, %v5054_v39  ;;  %v5073_v35 = vld [vmem:[%s15988_s1 + $0x2460] sm:$0xff]  ;;  %v5072_v36 = vld [vmem:[%s15988_s1 + $0x2428] sm:$0xff] }
 0x37c   :  { %7059 = vmatprep.subr.bf16.mxu1 %v10961_v45  ;;  %v5055_v45 = vld [vmem:[%s15988_s1 + $0x2220] sm:$0xff] }
 0x37d   :  { %v10982_v1 = vcombine.low %v5055_v45, %v5057_v46 }
 0x37e   :  { %6855 = vmatpush1.bf16.msra.mxu0 %v10958_v52  ;;  %v10980_v52 = vcombine.low %v5052_v37, %v5054_v39  ;;  %v5074_v37 = vld [vmem:[%s15988_s1 + $0x2468] sm:$0xff] }
 0x37f   :  { %7060 = vmatpush1.bf16.msra.mxu1 %v10960_v54  ;;  %6856 = vmatprep.subr.bf16.mxu0 %v10963_v53  ;;  %v10983_v54 = vcombine.high %v5055_v45, %v5057_v46  ;;  %v10985_v53 = vcombine.high %v5056_v49, %v5058_v50  ;;  %v5077_v45 = vld [vmem:[%s15988_s1 + $0x24e0] sm:$0xff]  ;;  %v5076_v46 = vld [vmem:[%s15988_s1 + $0x24a8] sm:$0xff] }
 0x380   :  { %7061 = vmatprep.subr.bf16.mxu1 %v10965_v10  ;;  %v5059_v10 = vld [vmem:[%s15988_s1 + $0x22a0] sm:$0xff] }
 0x381   :  { %v10986_v19 = vcombine.low %v5059_v10, %v5061_v56 }
 0x382   :  { %6857 = vmatpush1.bf16.msra.mxu0 %v10962_v2  ;;  %v10984_v2 = vcombine.low %v5056_v49, %v5058_v50  ;;  %v5078_v49 = vld [vmem:[%s15988_s1 + $0x24e8] sm:$0xff] }
 0x383   :  { %7062 = vmatpush1.bf16.msra.mxu1 %v10964_v3  ;;  %6867 = vmatprep.subr.bf16.mxu0 %v10967_v5  ;;  %v10987_v3 = vcombine.high %v5059_v10, %v5061_v56  ;;  %v10989_v5 = vcombine.high %v5060_v61, %v5062_v62  ;;  %v5081_v10 = vld [vmem:[%s15988_s1 + $0x2560] sm:$0xff]  ;;  %v5080_v56 = vld [vmem:[%s15988_s1 + $0x2528] sm:$0xff] }
 0x384   :  { %7072 = vmatprep.subr.bf16.mxu1 %v10969_v6  ;;  %v5063_v6 = vld [vmem:[%s15988_s1 + $0x2320] sm:$0xff] }
 0x385   :  { %6859 = vmatmul.mubr.bf16.vlgmr.msra.gmra.mrb[8].mxu0 %v12620_v18  ;;  %v10990_v63 = vcombine.low %v5063_v6, %v5065_v12 }
 0x386   :  { %6868 = vmatpush1.bf16.msra.mxu0 %v10966_v21  ;;  %7064 = vmatmul.mubr.bf16.vlgmr.msra.gmra.mrb[8].mxu1 %v12620_v18  ;;  %v10988_v21 = vcombine.low %v5060_v61, %v5062_v62  ;;  %v5082_v61 = vld [vmem:[%s15988_s1 + $0x2568] sm:$0xff] }
 0x387   :  { %7073 = vmatpush1.bf16.msra.mxu1 %v10968_v22  ;;  %6869 = vmatprep.subr.bf16.mxu0 %v10971_v24  ;;  %v10991_v22 = vcombine.high %v5063_v6, %v5065_v12  ;;  %v10993_v24 = vcombine.high %v5064_v13, %v5066_v17  ;;  %v5085_v6 = vld [vmem:[%s15988_s1 + $0x25e0] sm:$0xff]  ;;  %v5084_v12 = vld [vmem:[%s15988_s1 + $0x25a8] sm:$0xff] }
 0x388   :  { %7074 = vmatprep.subr.bf16.mxu1 %v10973_v25  ;;  %6899 = vmatprep.mubr.bf16.mxu0 %v12635_v27  ;;  %v5067_v25 = vld [vmem:[%s15988_s1 + $0x23a0] sm:$0xff] }
 0x389   :  { %7104 = vmatprep.mubr.bf16.mxu1 %v12635_v27  ;;  %v10994_v39 = vcombine.low %v5067_v25, %v5069_v26 }
 0x38a   :  { %6870 = vmatpush1.bf16.msra.mxu0 %v10970_v30  ;;  %v10992_v30 = vcombine.low %v5064_v13, %v5066_v17  ;;  %v5086_v13 = vld [vmem:[%s15988_s1 + $0x25e8] sm:$0xff] }
 0x38b   :  { %7075 = vmatpush1.bf16.msra.mxu1 %v10972_v31  ;;  %6871 = vmatprep.subr.bf16.mxu0 %v10975_v32  ;;  %v10995_v31 = vcombine.high %v5067_v25, %v5069_v26  ;;  %v10997_v32 = vcombine.high %v5068_v59, %v5070_v29  ;;  %v5089_v25 = vld [vmem:[%s15988_s1 + $0x2660] sm:$0xff]  ;;  %v5088_v26 = vld [vmem:[%s15988_s1 + $0x2628] sm:$0xff] }
 0x38c   :  { %7076 = vmatprep.subr.bf16.mxu1 %v10977_v34  ;;  %v5071_v34 = vld [vmem:[%s15988_s1 + $0x2420] sm:$0xff] }
 0x38d   :  { %v10998_v50 = vcombine.low %v5071_v34, %v5073_v35 }
 0x38e   :  { %6872 = vmatpush1.bf16.msra.mxu0 %v10974_v40  ;;  %v10996_v40 = vcombine.low %v5068_v59, %v5070_v29  ;;  %v5090_v59 = vld [vmem:[%s15988_s1 + $0x2668] sm:$0xff] }
 0x38f   :  { %7077 = vmatpush1.bf16.msra.mxu1 %v10976_v41  ;;  %6873 = vmatprep.subr.bf16.mxu0 %v10979_v42  ;;  %v10999_v41 = vcombine.high %v5071_v34, %v5073_v35  ;;  %v11001_v42 = vcombine.high %v5072_v36, %v5074_v37  ;;  %v5093_v34 = vld [vmem:[%s15988_s1 + $0x26e0] sm:$0xff]  ;;  %v5092_v35 = vld [vmem:[%s15988_s1 + $0x26a8] sm:$0xff] }
 0x390   :  { %7078 = vmatprep.subr.bf16.mxu1 %v10981_v43  ;;  %v5075_v43 = vld [vmem:[%s15988_s1 + $0x24a0] sm:$0xff] }
 0x391   :  { %v11002_v62 = vcombine.low %v5075_v43, %v5077_v45 }
 0x392   :  { %6874 = vmatpush1.bf16.msra.mxu0 %v10978_v51  ;;  %v11000_v51 = vcombine.low %v5072_v36, %v5074_v37  ;;  %v5094_v36 = vld [vmem:[%s15988_s1 + $0x26e8] sm:$0xff] }
 0x393   :  { %7079 = vmatpush1.bf16.msra.mxu1 %v10980_v52  ;;  %6875 = vmatprep.subr.bf16.mxu0 %v10983_v54  ;;  %v11003_v52 = vcombine.high %v5075_v43, %v5077_v45  ;;  %v11005_v54 = vcombine.high %v5076_v46, %v5078_v49  ;;  %v5097_v43 = vld [vmem:[%s15988_s1 + $0x2760] sm:$0xff]  ;;  %v5096_v45 = vld [vmem:[%s15988_s1 + $0x2728] sm:$0xff] }
 0x394   :  { %7080 = vmatprep.subr.bf16.mxu1 %v10985_v53  ;;  %v5079_v53 = vld [vmem:[%s15988_s1 + $0x2520] sm:$0xff] }
 0x395   :  { %v11006_v17 = vcombine.low %v5079_v53, %v5081_v10 }
 0x396   :  { %6876 = vmatpush1.bf16.msra.mxu0 %v10982_v1  ;;  %v11004_v1 = vcombine.low %v5076_v46, %v5078_v49  ;;  %v5098_v46 = vld [vmem:[%s15988_s1 + $0x2768] sm:$0xff] }
 0x397   :  { %7081 = vmatpush1.bf16.msra.mxu1 %v10984_v2  ;;  %6877 = vmatprep.subr.bf16.mxu0 %v10987_v3  ;;  %v11007_v2 = vcombine.high %v5079_v53, %v5081_v10  ;;  %v11009_v3 = vcombine.high %v5080_v56, %v5082_v61  ;;  %v5101_v53 = vld [vmem:[%s15988_s1 + $0x27e0] sm:$0xff]  ;;  %v5100_v10 = vld [vmem:[%s15988_s1 + $0x27a8] sm:$0xff] }
 0x398   :  { %7082 = vmatprep.subr.bf16.mxu1 %v10989_v5  ;;  %v5083_v5 = vld [vmem:[%s15988_s1 + $0x25a0] sm:$0xff] }
 0x399   :  { %v11010_v29 = vcombine.low %v5083_v5, %v5085_v6 }
 0x39a   :  { %6878 = vmatpush1.bf16.msra.mxu0 %v10986_v19  ;;  %v11008_v19 = vcombine.low %v5080_v56, %v5082_v61  ;;  %v5102_v56 = vld [vmem:[%s15988_s1 + $0x27e8] sm:$0xff] }
 0x39b   :  { %7083 = vmatpush1.bf16.msra.mxu1 %v10988_v21  ;;  %6879 = vmatprep.subr.bf16.mxu0 %v10991_v22  ;;  %v11011_v21 = vcombine.high %v5083_v5, %v5085_v6  ;;  %v11013_v22 = vcombine.high %v5084_v12, %v5086_v13  ;;  %v7115_v5 = vld [vmem:[%s15988_s1 + $0x70] sm:$0xff]  ;;  %v7114_v6 = vld [vmem:[%s15988_s1 + $0x38] sm:$0xff] }
 0x39c   :  { %7084 = vmatprep.subr.bf16.mxu1 %v10993_v24  ;;  %v5087_v24 = vld [vmem:[%s15988_s1 + $0x2620] sm:$0xff] }
 0x39d   :  { %v11014_v37 = vcombine.low %v5087_v24, %v5089_v25 }
 0x39e   :  { %6880 = vmatpush1.bf16.msra.mxu0 %v10990_v63  ;;  %v11012_v63 = vcombine.low %v5084_v12, %v5086_v13  ;;  %v7116_v12 = vld [vmem:[%s15988_s1 + $0x78] sm:$0xff] }
 0x39f   :  { %7085 = vmatpush1.bf16.msra.mxu1 %v10992_v30  ;;  %6881 = vmatprep.subr.bf16.mxu0 %v10995_v31  ;;  %v11015_v30 = vcombine.high %v5087_v24, %v5089_v25  ;;  %v11017_v31 = vcombine.high %v5088_v26, %v5090_v59  ;;  %v7119_v24 = vld [vmem:[%s15988_s1 + $0xf0] sm:$0xff]  ;;  %v7118_v25 = vld [vmem:[%s15988_s1 + $0xb8] sm:$0xff] }
 0x3a0   :  { %7086 = vmatprep.subr.bf16.mxu1 %v10997_v32  ;;  %v5091_v32 = vld [vmem:[%s15988_s1 + $0x26a0] sm:$0xff] }
 0x3a1   :  { %v11018_v49 = vcombine.low %v5091_v32, %v5093_v34 }
 0x3a2   :  { %6882 = vmatpush1.bf16.msra.mxu0 %v10994_v39  ;;  %v11016_v39 = vcombine.low %v5088_v26, %v5090_v59  ;;  %v7120_v26 = vld [vmem:[%s15988_s1 + $0xf8] sm:$0xff] }
 0x3a3   :  { %7087 = vmatpush1.bf16.msra.mxu1 %v10996_v40  ;;  %6883 = vmatprep.subr.bf16.mxu0 %v10999_v41  ;;  %v11019_v40 = vcombine.high %v5091_v32, %v5093_v34  ;;  %v11021_v41 = vcombine.high %v5092_v35, %v5094_v36  ;;  %v7123_v32 = vld [vmem:[%s15988_s1 + $0x170] sm:$0xff]  ;;  %v7122_v34 = vld [vmem:[%s15988_s1 + $0x138] sm:$0xff] }
 0x3a4   :  { %7088 = vmatprep.subr.bf16.mxu1 %v11001_v42  ;;  %v5095_v42 = vld [vmem:[%s15988_s1 + $0x2720] sm:$0xff] }
 0x3a5   :  { %v11022_v61 = vcombine.low %v5095_v42, %v5097_v43 }
 0x3a6   :  { %6884 = vmatpush1.bf16.msra.mxu0 %v10998_v50  ;;  %v11020_v50 = vcombine.low %v5092_v35, %v5094_v36  ;;  %v7124_v35 = vld [vmem:[%s15988_s1 + $0x178] sm:$0xff] }
 0x3a7   :  { %7089 = vmatpush1.bf16.msra.mxu1 %v11000_v51  ;;  %6885 = vmatprep.subr.bf16.mxu0 %v11003_v52  ;;  %v11023_v51 = vcombine.high %v5095_v42, %v5097_v43  ;;  %v11025_v52 = vcombine.high %v5096_v45, %v5098_v46  ;;  %v7127_v42 = vld [vmem:[%s15988_s1 + $0x1f0] sm:$0xff]  ;;  %v7126_v43 = vld [vmem:[%s15988_s1 + $0x1b8] sm:$0xff] }
 0x3a8   :  { %7090 = vmatprep.subr.bf16.mxu1 %v11005_v54  ;;  %v5099_v54 = vld [vmem:[%s15988_s1 + $0x27a0] sm:$0xff] }
 0x3a9   :  { %v11026_v13 = vcombine.low %v5099_v54, %v5101_v53 }
 0x3aa   :  { %6886 = vmatpush1.bf16.msra.mxu0 %v11002_v62  ;;  %v11024_v62 = vcombine.low %v5096_v45, %v5098_v46  ;;  %v7128_v45 = vld [vmem:[%s15988_s1 + $0x1f8] sm:$0xff] }
 0x3ab   :  { %7091 = vmatpush1.bf16.msra.mxu1 %v11004_v1  ;;  %6887 = vmatprep.subr.bf16.mxu0 %v11007_v2  ;;  %v11027_v1 = vcombine.high %v5099_v54, %v5101_v53  ;;  %v11029_v2 = vcombine.high %v5100_v10, %v5102_v56  ;;  %v7131_v54 = vld [vmem:[%s15988_s1 + $0x270] sm:$0xff]  ;;  %v7132_v53 = vld [vmem:[%s15988_s1 + $0x278] sm:$0xff] }
 0x3ac   :  { %7092 = vmatprep.subr.bf16.mxu1 %v11009_v3  ;;  %v7113_v3 = vld [vmem:[%s15988_s1 + $0x30] sm:$0xff] }
 0x3ad   :  { %v11030_v59 = vcombine.low %v7113_v3, %v7115_v5 }
 0x3ae   :  { %6888 = vmatpush1.bf16.msra.mxu0 %v11006_v17  ;;  %v11028_v17 = vcombine.low %v5100_v10, %v5102_v56  ;;  %v11044_v56 = vcombine.low %v7126_v43, %v7128_v45 }
 0x3af   :  { %7093 = vmatpush1.bf16.msra.mxu1 %v11008_v19  ;;  %6889 = vmatprep.subr.bf16.mxu0 %v11011_v21  ;;  %v11031_v19 = vcombine.high %v7113_v3, %v7115_v5  ;;  %v11033_v21 = vcombine.high %v7114_v6, %v7116_v12  ;;  %v7134_v3 = vld [vmem:[%s15988_s1 + $0x2b8] sm:$0xff] }
 0x3b0   :  { %7094 = vmatprep.subr.bf16.mxu1 %v11013_v22  ;;  %v7117_v22 = vld [vmem:[%s15988_s1 + $0xb0] sm:$0xff]  ;;  %v7136_v5 = vld [vmem:[%s15988_s1 + $0x2f8] sm:$0xff] }
 0x3b1   :  { %v11034_v36 = vcombine.low %v7117_v22, %v7119_v24 }
 0x3b2   :  { %6890 = vmatpush1.bf16.msra.mxu0 %v11010_v29  ;;  %v11032_v29 = vcombine.low %v7114_v6, %v7116_v12 }
 0x3b3   :  { %7095 = vmatpush1.bf16.msra.mxu1 %v11012_v63  ;;  %6891 = vmatprep.subr.bf16.mxu0 %v11015_v30  ;;  %v11035_v63 = vcombine.high %v7117_v22, %v7119_v24  ;;  %v11037_v30 = vcombine.high %v7118_v25, %v7120_v26  ;;  %v7138_v22 = vld [vmem:[%s15988_s1 + $0x338] sm:$0xff] }
 0x3b4   :  { %7096 = vmatprep.subr.bf16.mxu1 %v11017_v31  ;;  %v7121_v31 = vld [vmem:[%s15988_s1 + $0x130] sm:$0xff]  ;;  %v7140_v24 = vld [vmem:[%s15988_s1 + $0x378] sm:$0xff] }
 0x3b5   :  { %v11038_v46 = vcombine.low %v7121_v31, %v7123_v32 }
 0x3b6   :  { %6892 = vmatpush1.bf16.msra.mxu0 %v11014_v37  ;;  %v11036_v37 = vcombine.low %v7118_v25, %v7120_v26  ;;  %v11052_v26 = vcombine.low %v7134_v3, %v7136_v5 }
 0x3b7   :  { %7097 = vmatpush1.bf16.msra.mxu1 %v11016_v39  ;;  %6893 = vmatprep.subr.bf16.mxu0 %v11019_v40  ;;  %v11039_v39 = vcombine.high %v7121_v31, %v7123_v32  ;;  %v11041_v40 = vcombine.high %v7122_v34, %v7124_v35  ;;  %v7142_v31 = vld [vmem:[%s15988_s1 + $0x3b8] sm:$0xff] }
 0x3b8   :  { %7098 = vmatprep.subr.bf16.mxu1 %v11021_v41  ;;  %v7125_v41 = vld [vmem:[%s15988_s1 + $0x1b0] sm:$0xff]  ;;  %v7144_v32 = vld [vmem:[%s15988_s1 + $0x3f8] sm:$0xff] }
 0x3b9   :  { %v11042_v10 = vcombine.low %v7125_v41, %v7127_v42 }
 0x3ba   :  { %6894 = vmatpush1.bf16.msra.mxu0 %v11018_v49  ;;  %v11040_v49 = vcombine.low %v7122_v34, %v7124_v35  ;;  %v11056_v35 = vcombine.low %v7138_v22, %v7140_v24 }
 0x3bb   :  { %7099 = vmatpush1.bf16.msra.mxu1 %v11020_v50  ;;  %6895 = vmatprep.subr.bf16.mxu0 %v11023_v51  ;;  %v11043_v50 = vcombine.high %v7125_v41, %v7127_v42  ;;  %v11045_v51 = vcombine.high %v7126_v43, %v7128_v45  ;;  %v7146_v41 = vld [vmem:[%s15988_s1 + $0x438] sm:$0xff]  ;;  %v11060_v45 = vcombine.low %v7142_v31, %v7144_v32 }
 0x3bc   :  { %7100 = vmatprep.subr.bf16.mxu1 %v11025_v52  ;;  %v7129_v52 = vld [vmem:[%s15988_s1 + $0x230] sm:$0xff]  ;;  %v7148_v42 = vld [vmem:[%s15988_s1 + $0x478] sm:$0xff] }
 0x3bd   :  { %v11046_v6 = vcombine.low %v7129_v52, %v7131_v54 }
 0x3be   :  { %6896 = vmatpush1.bf16.msra.mxu0 %v11022_v61  ;;  %v11047_v61 = vcombine.high %v7129_v52, %v7131_v54  ;;  %v7150_v52 = vld [vmem:[%s15988_s1 + $0x4b8] sm:$0xff] }
 0x3bf   :  { %7101 = vmatpush1.bf16.msra.mxu1 %v11024_v62  ;;  %6897 = vmatprep.subr.bf16.mxu0 %v11027_v1  ;;  %v7133_v1 = vld [vmem:[%s15988_s1 + $0x2b0] sm:$0xff]  ;;  %v7152_v54 = vld [vmem:[%s15988_s1 + $0x4f8] sm:$0xff] }
 0x3c0   :  { %7102 = vmatprep.subr.bf16.mxu1 %v11029_v2  ;;  %v7135_v2 = vld [vmem:[%s15988_s1 + $0x2f0] sm:$0xff] }
 0x3c1   :  { %v11050_v25 = vcombine.low %v7133_v1, %v7135_v2 }
 0x3c2   :  { %6898 = vmatpush1.bf16.msra.mxu0 %v11026_v13  ;;  %v11051_v13 = vcombine.high %v7133_v1, %v7135_v2  ;;  %v7154_v1 = vld [vmem:[%s15988_s1 + $0x538] sm:$0xff] }
 0x3c3   :  { %7103 = vmatpush1.bf16.msra.mxu1 %v11028_v17  ;;  %9033 = vmatprep.subr.bf16.mxu0 %v11031_v19  ;;  %v11053_v17 = vcombine.high %v7134_v3, %v7136_v5  ;;  %v7137_v19 = vld [vmem:[%s15988_s1 + $0x330] sm:$0xff]  ;;  %v7156_v2 = vld [vmem:[%s15988_s1 + $0x578] sm:$0xff]  ;;  %v11068_v5 = vcombine.low %v7150_v52, %v7152_v54 }
 0x3c4   :  { %9238 = vmatprep.subr.bf16.mxu1 %v11033_v21  ;;  %v7139_v21 = vld [vmem:[%s15988_s1 + $0x370] sm:$0xff] }
 0x3c5   :  { %6900 = vmatmul.mubr.bf16.vlgmr.msra.gmra.mrb[8].mxu0 %v12823_v47  ;;  %v11054_v34 = vcombine.low %v7137_v19, %v7139_v21 }
 0x3c6   :  { %7105 = vmatmul.mubr.bf16.vlgmr.msra.gmra.mrb[8].mxu1 %v12823_v47  ;;  %9034 = vmatpush1.bf16.msra.mxu0 %v11030_v59  ;;  %v11055_v59 = vcombine.high %v7137_v19, %v7139_v21  ;;  %v7158_v19 = vld [vmem:[%s15988_s1 + $0x5b8] sm:$0xff] }
 0x3c7   :  { %9239 = vmatpush1.bf16.msra.mxu1 %v11032_v29  ;;  %9035 = vmatprep.subr.bf16.mxu0 %v11035_v63  ;;  %v11057_v29 = vcombine.high %v7138_v22, %v7140_v24  ;;  %v7141_v63 = vld [vmem:[%s15988_s1 + $0x3b0] sm:$0xff]  ;;  %v7160_v21 = vld [vmem:[%s15988_s1 + $0x5f8] sm:$0xff]  ;;  %v11072_v24 = vcombine.low %v7154_v1, %v7156_v2 }
 0x3c8   :  { %9240 = vmatprep.subr.bf16.mxu1 %v11037_v30  ;;  %9065 = vmatprep.mubr.bf16.mxu0 %v11881_v9  ;;  %v7143_v30 = vld [vmem:[%s15988_s1 + $0x3f0] sm:$0xff] }
 0x3c9   :  { %9270 = vmatprep.mubr.bf16.mxu1 %v11881_v9  ;;  %v7130_v9 = vld [vmem:[%s15988_s1 + $0x238] sm:$0xff]  ;;  %v11058_v43 = vcombine.low %v7141_v63, %v7143_v30 }
 0x3ca   :  { %9036 = vmatpush1.bf16.msra.mxu0 %v11034_v36  ;;  %v11049_v62 = vcombine.high %v7130_v9, %v7132_v53  ;;  %v11048_v12 = vcombine.low %v7130_v9, %v7132_v53  ;;  %v11059_v36 = vcombine.high %v7141_v63, %v7143_v30  ;;  %v11064_v53 = vcombine.low %v7146_v41, %v7148_v42  ;;  %v7162_v63 = vld [vmem:[%s15988_s1 + $0x638] sm:$0xff] }
 0x3cb   :  { %9241 = vmatpush1.bf16.msra.mxu1 %v11036_v37  ;;  %9037 = vmatprep.subr.bf16.mxu0 %v11039_v39  ;;  %v11061_v37 = vcombine.high %v7142_v31, %v7144_v32  ;;  %v7145_v39 = vld [vmem:[%s15988_s1 + $0x430] sm:$0xff]  ;;  %v7164_v30 = vld [vmem:[%s15988_s1 + $0x678] sm:$0xff]  ;;  %v11076_v32 = vcombine.low %v7158_v19, %v7160_v21 }
 0x3cc   :  { %9242 = vmatprep.subr.bf16.mxu1 %v11041_v40  ;;  %v7147_v40 = vld [vmem:[%s15988_s1 + $0x470] sm:$0xff] }
 0x3cd   :  { %v11062_v9 = vcombine.low %v7145_v39, %v7147_v40 }
 0x3ce   :  { %9038 = vmatpush1.bf16.msra.mxu0 %v11038_v46  ;;  %v11063_v46 = vcombine.high %v7145_v39, %v7147_v40  ;;  %v7166_v39 = vld [vmem:[%s15988_s1 + $0x6b8] sm:$0xff] }
 0x3cf   :  { %9243 = vmatpush1.bf16.msra.mxu1 %v11040_v49  ;;  %9039 = vmatprep.subr.bf16.mxu0 %v11043_v50  ;;  %v11065_v49 = vcombine.high %v7146_v41, %v7148_v42  ;;  %v7149_v50 = vld [vmem:[%s15988_s1 + $0x4b0] sm:$0xff]  ;;  %v7168_v40 = vld [vmem:[%s15988_s1 + $0x6f8] sm:$0xff]  ;;  %v11080_v42 = vcombine.low %v7162_v63, %v7164_v30 }
 0x3d0   :  { %9244 = vmatprep.subr.bf16.mxu1 %v11045_v51  ;;  %v7151_v51 = vld [vmem:[%s15988_s1 + $0x4f0] sm:$0xff] }
 0x3d1   :  { %v11066_v3 = vcombine.low %v7149_v50, %v7151_v51 }
 0x3d2   :  { %9040 = vmatpush1.bf16.msra.mxu0 %v11042_v10  ;;  %v11067_v10 = vcombine.high %v7149_v50, %v7151_v51  ;;  %v7170_v50 = vld [vmem:[%s15988_s1 + $0x738] sm:$0xff] }
 0x3d3   :  { %9245 = vmatpush1.bf16.msra.mxu1 %v11044_v56  ;;  %9041 = vmatprep.subr.bf16.mxu0 %v11047_v61  ;;  %v11069_v56 = vcombine.high %v7150_v52, %v7152_v54  ;;  %v7153_v61 = vld [vmem:[%s15988_s1 + $0x530] sm:$0xff]  ;;  %v7172_v51 = vld [vmem:[%s15988_s1 + $0x778] sm:$0xff]  ;;  %v11084_v54 = vcombine.low %v7166_v39, %v7168_v40 }
 0x3d4   :  { %9246 = vmatprep.subr.bf16.mxu1 %v11049_v62  ;;  %v7155_v62 = vld [vmem:[%s15988_s1 + $0x570] sm:$0xff] }
 0x3d5   :  { %v11070_v22 = vcombine.low %v7153_v61, %v7155_v62 }
 0x3d6   :  { %9042 = vmatpush1.bf16.msra.mxu0 %v11046_v6  ;;  %v11071_v6 = vcombine.high %v7153_v61, %v7155_v62  ;;  %v7174_v61 = vld [vmem:[%s15988_s1 + $0x7b8] sm:$0xff] }
 0x3d7   :  { %9247 = vmatpush1.bf16.msra.mxu1 %v11048_v12  ;;  %9043 = vmatprep.subr.bf16.mxu0 %v11051_v13  ;;  %v11073_v12 = vcombine.high %v7154_v1, %v7156_v2  ;;  %v7157_v13 = vld [vmem:[%s15988_s1 + $0x5b0] sm:$0xff]  ;;  %v7176_v62 = vld [vmem:[%s15988_s1 + $0x7f8] sm:$0xff]  ;;  %v11088_v2 = vcombine.low %v7170_v50, %v7172_v51 }
 0x3d8   :  { %9248 = vmatprep.subr.bf16.mxu1 %v11053_v17  ;;  %v7159_v17 = vld [vmem:[%s15988_s1 + $0x5f0] sm:$0xff] }
 0x3d9   :  { %v11074_v31 = vcombine.low %v7157_v13, %v7159_v17 }
 0x3da   :  { %9044 = vmatpush1.bf16.msra.mxu0 %v11050_v25  ;;  %v11075_v25 = vcombine.high %v7157_v13, %v7159_v17  ;;  %v7178_v13 = vld [vmem:[%s15988_s1 + $0x838] sm:$0xff] }
 0x3db   :  { %9249 = vmatpush1.bf16.msra.mxu1 %v11052_v26  ;;  %9045 = vmatprep.subr.bf16.mxu0 %v11055_v59  ;;  %v11077_v26 = vcombine.high %v7158_v19, %v7160_v21  ;;  %v7161_v59 = vld [vmem:[%s15988_s1 + $0x630] sm:$0xff]  ;;  %v7180_v17 = vld [vmem:[%s15988_s1 + $0x878] sm:$0xff]  ;;  %v11092_v21 = vcombine.low %v7174_v61, %v7176_v62 }
 0x3dc   :  { %9250 = vmatprep.subr.bf16.mxu1 %v11057_v29  ;;  %v7163_v29 = vld [vmem:[%s15988_s1 + $0x670] sm:$0xff] }
 0x3dd   :  { %v11078_v41 = vcombine.low %v7161_v59, %v7163_v29 }
 0x3de   :  { %9046 = vmatpush1.bf16.msra.mxu0 %v11054_v34  ;;  %v11079_v34 = vcombine.high %v7161_v59, %v7163_v29  ;;  %v7182_v59 = vld [vmem:[%s15988_s1 + $0x8b8] sm:$0xff] }
 0x3df   :  { %9251 = vmatpush1.bf16.msra.mxu1 %v11056_v35  ;;  %9047 = vmatprep.subr.bf16.mxu0 %v11059_v36  ;;  %v11081_v35 = vcombine.high %v7162_v63, %v7164_v30  ;;  %v7165_v36 = vld [vmem:[%s15988_s1 + $0x6b0] sm:$0xff]  ;;  %v7184_v29 = vld [vmem:[%s15988_s1 + $0x8f8] sm:$0xff]  ;;  %v11096_v30 = vcombine.low %v7178_v13, %v7180_v17 }
 0x3e0   :  { %9252 = vmatprep.subr.bf16.mxu1 %v11061_v37  ;;  %v7167_v37 = vld [vmem:[%s15988_s1 + $0x6f0] sm:$0xff] }
 0x3e1   :  { %v11082_v52 = vcombine.low %v7165_v36, %v7167_v37 }
 0x3e2   :  { %9048 = vmatpush1.bf16.msra.mxu0 %v11058_v43  ;;  %v11083_v43 = vcombine.high %v7165_v36, %v7167_v37  ;;  %v7186_v36 = vld [vmem:[%s15988_s1 + $0x938] sm:$0xff] }
 0x3e3   :  { %9253 = vmatpush1.bf16.msra.mxu1 %v11060_v45  ;;  %9049 = vmatprep.subr.bf16.mxu0 %v11063_v46  ;;  %v11085_v45 = vcombine.high %v7166_v39, %v7168_v40  ;;  %v7169_v46 = vld [vmem:[%s15988_s1 + $0x730] sm:$0xff]  ;;  %v7188_v37 = vld [vmem:[%s15988_s1 + $0x978] sm:$0xff]  ;;  %v11100_v40 = vcombine.low %v7182_v59, %v7184_v29 }
 0x3e4   :  { %9254 = vmatprep.subr.bf16.mxu1 %v11065_v49  ;;  %v7171_v49 = vld [vmem:[%s15988_s1 + $0x770] sm:$0xff] }
 0x3e5   :  { %v11086_v1 = vcombine.low %v7169_v46, %v7171_v49 }
 0x3e6   :  { %9050 = vmatpush1.bf16.msra.mxu0 %v11062_v9  ;;  %v11087_v9 = vcombine.high %v7169_v46, %v7171_v49  ;;  %v7192_v46 = vld [vmem:[%s15988_s1 + $0x9f8] sm:$0xff] }
 0x3e7   :  { %9255 = vmatpush1.bf16.msra.mxu1 %v11064_v53  ;;  %9051 = vmatprep.subr.bf16.mxu0 %v11067_v10  ;;  %v11089_v53 = vcombine.high %v7170_v50, %v7172_v51  ;;  %v7173_v10 = vld [vmem:[%s15988_s1 + $0x7b0] sm:$0xff]  ;;  %v11104_v50 = vcombine.low %v7186_v36, %v7188_v37 }
 0x3e8   :  { %9256 = vmatprep.subr.bf16.mxu1 %v11069_v56  ;;  %v7175_v56 = vld [vmem:[%s15988_s1 + $0x7f0] sm:$0xff] }
 0x3e9   :  { %v11090_v19 = vcombine.low %v7173_v10, %v7175_v56 }
 0x3ea   :  { %9052 = vmatpush1.bf16.msra.mxu0 %v11066_v3  ;;  %v11091_v3 = vcombine.high %v7173_v10, %v7175_v56 }
 0x3eb   :  { %9257 = vmatpush1.bf16.msra.mxu1 %v11068_v5  ;;  %9053 = vmatprep.subr.bf16.mxu0 %v11071_v6  ;;  %v11093_v5 = vcombine.high %v7174_v61, %v7176_v62  ;;  %v7177_v6 = vld [vmem:[%s15988_s1 + $0x830] sm:$0xff] }
 0x3ec   :  { %9258 = vmatprep.subr.bf16.mxu1 %v11073_v12  ;;  %v7179_v12 = vld [vmem:[%s15988_s1 + $0x870] sm:$0xff] }
 0x3ed   :  { %v11094_v63 = vcombine.low %v7177_v6, %v7179_v12 }
 0x3ee   :  { %9054 = vmatpush1.bf16.msra.mxu0 %v11070_v22  ;;  %v11095_v22 = vcombine.high %v7177_v6, %v7179_v12 }
 0x3ef   :  { %9259 = vmatpush1.bf16.msra.mxu1 %v11072_v24  ;;  %9055 = vmatprep.subr.bf16.mxu0 %v11075_v25  ;;  %v11097_v24 = vcombine.high %v7178_v13, %v7180_v17  ;;  %v7181_v25 = vld [vmem:[%s15988_s1 + $0x8b0] sm:$0xff] }
 0x3f0   :  { %9260 = vmatprep.subr.bf16.mxu1 %v11077_v26  ;;  %v7183_v26 = vld [vmem:[%s15988_s1 + $0x8f0] sm:$0xff] }
 0x3f1   :  { %v11098_v39 = vcombine.low %v7181_v25, %v7183_v26 }
 0x3f2   :  { %9056 = vmatpush1.bf16.msra.mxu0 %v11074_v31  ;;  %v11099_v31 = vcombine.high %v7181_v25, %v7183_v26 }
 0x3f3   :  { %9261 = vmatpush1.bf16.msra.mxu1 %v11076_v32  ;;  %9057 = vmatprep.subr.bf16.mxu0 %v11079_v34  ;;  %v11101_v32 = vcombine.high %v7182_v59, %v7184_v29  ;;  %v7185_v34 = vld [vmem:[%s15988_s1 + $0x930] sm:$0xff] }
 0x3f4   :  { %9262 = vmatprep.subr.bf16.mxu1 %v11081_v35  ;;  %v7187_v35 = vld [vmem:[%s15988_s1 + $0x970] sm:$0xff] }
 0x3f5   :  { %v11102_v49 = vcombine.low %v7185_v34, %v7187_v35 }
 0x3f6   :  { %9058 = vmatpush1.bf16.msra.mxu0 %v11078_v41  ;;  %v11103_v41 = vcombine.high %v7185_v34, %v7187_v35 }
 0x3f7   :  { %9263 = vmatpush1.bf16.msra.mxu1 %v11080_v42  ;;  %9059 = vmatprep.subr.bf16.mxu0 %v11083_v43  ;;  %v11105_v42 = vcombine.high %v7186_v36, %v7188_v37  ;;  %v7189_v43 = vld [vmem:[%s15988_s1 + $0x9b0] sm:$0xff] }
 0x3f8   :  { %9264 = vmatprep.subr.bf16.mxu1 %v11085_v45  ;;  %v7191_v45 = vld [vmem:[%s15988_s1 + $0x9f0] sm:$0xff] }
 0x3f9   :  { %v11107_v51 = vcombine.high %v7189_v43, %v7191_v45  ;;  %v11106_v10 = vcombine.low %v7189_v43, %v7191_v45 }
 0x3fa   :  { %9060 = vmatpush1.bf16.msra.mxu0 %v11082_v52 }
 0x3fb   :  { %9265 = vmatpush1.bf16.msra.mxu1 %v11084_v54  ;;  %9061 = vmatprep.subr.bf16.mxu0 %v11087_v9  ;;  %v7193_v54 = vld [vmem:[%s15988_s1 + $0xa30] sm:$0xff] }
 0x3fc   :  { %9266 = vmatprep.subr.bf16.mxu1 %v11089_v53  ;;  %v7195_v9 = vld [vmem:[%s15988_s1 + $0xa70] sm:$0xff]  ;;  %v7196_v53 = vld [vmem:[%s15988_s1 + $0xa78] sm:$0xff] }
 0x3fd   :  { %v11111_v61 = vcombine.high %v7193_v54, %v7195_v9  ;;  %v11110_v6 = vcombine.low %v7193_v54, %v7195_v9 }
 0x3fe   :  { %9062 = vmatpush1.bf16.msra.mxu0 %v11086_v1  ;;  %v7197_v1 = vld [vmem:[%s15988_s1 + $0xab0] sm:$0xff] }
 0x3ff   :  { %9267 = vmatpush1.bf16.msra.mxu1 %v11088_v2  ;;  %9063 = vmatprep.subr.bf16.mxu0 %v11091_v3  ;;  %v7199_v2 = vld [vmem:[%s15988_s1 + $0xaf0] sm:$0xff]  ;;  %v7198_v3 = vld [vmem:[%s15988_s1 + $0xab8] sm:$0xff] }
 0x400   :  { %9268 = vmatprep.subr.bf16.mxu1 %v11093_v5  ;;  %v7200_v5 = vld [vmem:[%s15988_s1 + $0xaf8] sm:$0xff]  ;;  %v11115_v13 = vcombine.high %v7197_v1, %v7199_v2  ;;  %v11114_v25 = vcombine.low %v7197_v1, %v7199_v2 }
 0x401   :  { %v11117_v17 = vcombine.high %v7198_v3, %v7200_v5  ;;  %v11116_v26 = vcombine.low %v7198_v3, %v7200_v5 }
 0x402   :  { %9064 = vmatpush1.bf16.msra.mxu0 %v11090_v19  ;;  %v7201_v19 = vld [vmem:[%s15988_s1 + $0xb30] sm:$0xff] }
 0x403   :  { %9269 = vmatpush1.bf16.msra.mxu1 %v11092_v21  ;;  %9074 = vmatprep.subr.bf16.mxu0 %v11095_v22  ;;  %v7203_v21 = vld [vmem:[%s15988_s1 + $0xb70] sm:$0xff]  ;;  %v7202_v22 = vld [vmem:[%s15988_s1 + $0xb38] sm:$0xff] }
 0x404   :  { %9279 = vmatprep.subr.bf16.mxu1 %v11097_v24  ;;  %v7204_v24 = vld [vmem:[%s15988_s1 + $0xb78] sm:$0xff]  ;;  %v11119_v59 = vcombine.high %v7201_v19, %v7203_v21  ;;  %v11118_v34 = vcombine.low %v7201_v19, %v7203_v21 }
 0x405   :  { %9066 = vmatmul.mubr.bf16.vlgmr.msra.gmra.mrb[12].mxu0 %v11995_v23  ;;  %v11121_v29 = vcombine.high %v7202_v22, %v7204_v24  ;;  %v11120_v35 = vcombine.low %v7202_v22, %v7204_v24 }
 0x406   :  { %9075 = vmatpush1.bf16.msra.mxu0 %v11094_v63  ;;  %9271 = vmatmul.mubr.bf16.vlgmr.msra.gmra.mrb[12].mxu1 %v11995_v23  ;;  %v7190_v23 = vld [vmem:[%s15988_s1 + $0x9b8] sm:$0xff]  ;;  %v7205_v63 = vld [vmem:[%s15988_s1 + $0xbb0] sm:$0xff] }
 0x407   :  { %9280 = vmatpush1.bf16.msra.mxu1 %v11096_v30  ;;  %9076 = vmatprep.subr.bf16.mxu0 %v11099_v31  ;;  %v11109_v52 = vcombine.high %v7190_v23, %v7192_v46  ;;  %v11108_v56 = vcombine.low %v7190_v23, %v7192_v46  ;;  %v7207_v30 = vld [vmem:[%s15988_s1 + $0xbf0] sm:$0xff]  ;;  %v7206_v31 = vld [vmem:[%s15988_s1 + $0xbb8] sm:$0xff] }
 0x408   :  { %9281 = vmatprep.subr.bf16.mxu1 %v11101_v32  ;;  %9106 = vmatprep.mubr.bf16.mxu0 %v12017_v33  ;;  %v7208_v32 = vld [vmem:[%s15988_s1 + $0xbf8] sm:$0xff]  ;;  %v11123_v36 = vcombine.high %v7205_v63, %v7207_v30  ;;  %v11122_v43 = vcombine.low %v7205_v63, %v7207_v30 }
 0x409   :  { %9311 = vmatprep.mubr.bf16.mxu1 %v12017_v33  ;;  %v7194_v33 = vld [vmem:[%s15988_s1 + $0xa38] sm:$0xff]  ;;  %v11125_v37 = vcombine.high %v7206_v31, %v7208_v32  ;;  %v11124_v45 = vcombine.low %v7206_v31, %v7208_v32 }
 0x40a   :  { %9077 = vmatpush1.bf16.msra.mxu0 %v11098_v39  ;;  %v11113_v62 = vcombine.high %v7194_v33, %v7196_v53  ;;  %v11112_v12 = vcombine.low %v7194_v33, %v7196_v53  ;;  %v7209_v39 = vld [vmem:[%s15988_s1 + $0xc30] sm:$0xff] }
 0x40b   :  { %9282 = vmatpush1.bf16.msra.mxu1 %v11100_v40  ;;  %9078 = vmatprep.subr.bf16.mxu0 %v11103_v41  ;;  %v7211_v40 = vld [vmem:[%s15988_s1 + $0xc70] sm:$0xff]  ;;  %v7210_v41 = vld [vmem:[%s15988_s1 + $0xc38] sm:$0xff] }
 0x40c   :  { %9283 = vmatprep.subr.bf16.mxu1 %v11105_v42  ;;  %v7212_v42 = vld [vmem:[%s15988_s1 + $0xc78] sm:$0xff]  ;;  %v11127_v23 = vcombine.high %v7209_v39, %v7211_v40  ;;  %v11126_v54 = vcombine.low %v7209_v39, %v7211_v40 }
 0x40d   :  { %v11129_v46 = vcombine.high %v7210_v41, %v7212_v42  ;;  %v11128_v9 = vcombine.low %v7210_v41, %v7212_v42 }
 0x40e   :  { %9079 = vmatpush1.bf16.msra.mxu0 %v11102_v49  ;;  %v7213_v49 = vld [vmem:[%s15988_s1 + $0xcb0] sm:$0xff] }
 0x40f   :  { %9284 = vmatpush1.bf16.msra.mxu1 %v11104_v50  ;;  %9080 = vmatprep.subr.bf16.mxu0 %v11107_v51  ;;  %v7215_v50 = vld [vmem:[%s15988_s1 + $0xcf0] sm:$0xff]  ;;  %v7214_v51 = vld [vmem:[%s15988_s1 + $0xcb8] sm:$0xff] }
 0x410   :  { %9285 = vmatprep.subr.bf16.mxu1 %v11109_v52  ;;  %v7216_v52 = vld [vmem:[%s15988_s1 + $0xcf8] sm:$0xff]  ;;  %v11131_v33 = vcombine.high %v7213_v49, %v7215_v50  ;;  %v11130_v1 = vcombine.low %v7213_v49, %v7215_v50 }
 0x411   :  { %v11133_v53 = vcombine.high %v7214_v51, %v7216_v52  ;;  %v11132_v2 = vcombine.low %v7214_v51, %v7216_v52 }
 0x412   :  { %9081 = vmatpush1.bf16.msra.mxu0 %v11106_v10  ;;  %v7217_v10 = vld [vmem:[%s15988_s1 + $0xd30] sm:$0xff] }
 0x413   :  { %9286 = vmatpush1.bf16.msra.mxu1 %v11108_v56  ;;  %9082 = vmatprep.subr.bf16.mxu0 %v11111_v61  ;;  %v7219_v56 = vld [vmem:[%s15988_s1 + $0xd70] sm:$0xff]  ;;  %v7218_v61 = vld [vmem:[%s15988_s1 + $0xd38] sm:$0xff] }
 0x414   :  { %9287 = vmatprep.subr.bf16.mxu1 %v11113_v62  ;;  %v7220_v62 = vld [vmem:[%s15988_s1 + $0xd78] sm:$0xff]  ;;  %v11135_v3 = vcombine.high %v7217_v10, %v7219_v56  ;;  %v11134_v19 = vcombine.low %v7217_v10, %v7219_v56 }
 0x415   :  { %v11137_v5 = vcombine.high %v7218_v61, %v7220_v62  ;;  %v11136_v21 = vcombine.low %v7218_v61, %v7220_v62 }
 0x416   :  { %9083 = vmatpush1.bf16.msra.mxu0 %v11110_v6  ;;  %v7221_v6 = vld [vmem:[%s15988_s1 + $0xdb0] sm:$0xff] }
 0x417   :  { %9288 = vmatpush1.bf16.msra.mxu1 %v11112_v12  ;;  %9084 = vmatprep.subr.bf16.mxu0 %v11115_v13  ;;  %v7223_v12 = vld [vmem:[%s15988_s1 + $0xdf0] sm:$0xff]  ;;  %v7222_v13 = vld [vmem:[%s15988_s1 + $0xdb8] sm:$0xff] }
 0x418   :  { %9289 = vmatprep.subr.bf16.mxu1 %v11117_v17  ;;  %v7224_v17 = vld [vmem:[%s15988_s1 + $0xdf8] sm:$0xff]  ;;  %v11139_v22 = vcombine.high %v7221_v6, %v7223_v12  ;;  %v11138_v63 = vcombine.low %v7221_v6, %v7223_v12 }
 0x419   :  { %v11141_v24 = vcombine.high %v7222_v13, %v7224_v17  ;;  %v11140_v30 = vcombine.low %v7222_v13, %v7224_v17 }
 0x41a   :  { %9085 = vmatpush1.bf16.msra.mxu0 %v11114_v25  ;;  %v7225_v25 = vld [vmem:[%s15988_s1 + $0xe30] sm:$0xff] }
 0x41b   :  { %9290 = vmatpush1.bf16.msra.mxu1 %v11116_v26  ;;  %9086 = vmatprep.subr.bf16.mxu0 %v11119_v59  ;;  %v7227_v26 = vld [vmem:[%s15988_s1 + $0xe70] sm:$0xff]  ;;  %v7226_v59 = vld [vmem:[%s15988_s1 + $0xe38] sm:$0xff] }
 0x41c   :  { %9291 = vmatprep.subr.bf16.mxu1 %v11121_v29  ;;  %v7228_v29 = vld [vmem:[%s15988_s1 + $0xe78] sm:$0xff]  ;;  %v11143_v31 = vcombine.high %v7225_v25, %v7227_v26  ;;  %v11142_v39 = vcombine.low %v7225_v25, %v7227_v26 }
 0x41d   :  { %v11145_v32 = vcombine.high %v7226_v59, %v7228_v29  ;;  %v11144_v40 = vcombine.low %v7226_v59, %v7228_v29 }
 0x41e   :  { %9087 = vmatpush1.bf16.msra.mxu0 %v11118_v34  ;;  %v7229_v34 = vld [vmem:[%s15988_s1 + $0xeb0] sm:$0xff] }
 0x41f   :  { %9292 = vmatpush1.bf16.msra.mxu1 %v11120_v35  ;;  %9088 = vmatprep.subr.bf16.mxu0 %v11123_v36  ;;  %v7231_v35 = vld [vmem:[%s15988_s1 + $0xef0] sm:$0xff]  ;;  %v7230_v36 = vld [vmem:[%s15988_s1 + $0xeb8] sm:$0xff] }
 0x420   :  { %9293 = vmatprep.subr.bf16.mxu1 %v11125_v37  ;;  %v7232_v37 = vld [vmem:[%s15988_s1 + $0xef8] sm:$0xff]  ;;  %v11147_v41 = vcombine.high %v7229_v34, %v7231_v35  ;;  %v11146_v49 = vcombine.low %v7229_v34, %v7231_v35 }
 0x421   :  { %v11149_v42 = vcombine.high %v7230_v36, %v7232_v37  ;;  %v11148_v50 = vcombine.low %v7230_v36, %v7232_v37 }
 0x422   :  { %9089 = vmatpush1.bf16.msra.mxu0 %v11122_v43  ;;  %v7233_v43 = vld [vmem:[%s15988_s1 + $0xf30] sm:$0xff] }
 0x423   :  { %9294 = vmatpush1.bf16.msra.mxu1 %v11124_v45  ;;  %9090 = vmatprep.subr.bf16.mxu0 %v11127_v23  ;;  %v7235_v45 = vld [vmem:[%s15988_s1 + $0xf70] sm:$0xff]  ;;  %v7234_v23 = vld [vmem:[%s15988_s1 + $0xf38] sm:$0xff] }
 0x424   :  { %9295 = vmatprep.subr.bf16.mxu1 %v11129_v46  ;;  %v7236_v46 = vld [vmem:[%s15988_s1 + $0xf78] sm:$0xff]  ;;  %v11151_v51 = vcombine.high %v7233_v43, %v7235_v45  ;;  %v11150_v10 = vcombine.low %v7233_v43, %v7235_v45 }
 0x425   :  { %v11153_v52 = vcombine.high %v7234_v23, %v7236_v46  ;;  %v11152_v56 = vcombine.low %v7234_v23, %v7236_v46  ;;  %v7257_v46 = vld [vmem:[%s15988_s1 + $0x1230] sm:$0xff] }
 0x426   :  { %9091 = vmatpush1.bf16.msra.mxu0 %v11126_v54  ;;  %v7237_v54 = vld [vmem:[%s15988_s1 + $0xfb0] sm:$0xff] }
 0x427   :  { %9296 = vmatpush1.bf16.msra.mxu1 %v11128_v9  ;;  %9092 = vmatprep.subr.bf16.mxu0 %v11131_v33  ;;  %v7239_v9 = vld [vmem:[%s15988_s1 + $0xff0] sm:$0xff]  ;;  %v7238_v33 = vld [vmem:[%s15988_s1 + $0xfb8] sm:$0xff] }
 0x428   :  { %9297 = vmatprep.subr.bf16.mxu1 %v11133_v53  ;;  %v7240_v53 = vld [vmem:[%s15988_s1 + $0xff8] sm:$0xff]  ;;  %v11155_v61 = vcombine.high %v7237_v54, %v7239_v9  ;;  %v11154_v6 = vcombine.low %v7237_v54, %v7239_v9 }
 0x429   :  { %v11157_v62 = vcombine.high %v7238_v33, %v7240_v53  ;;  %v11156_v12 = vcombine.low %v7238_v33, %v7240_v53  ;;  %v7261_v33 = vld [vmem:[%s15988_s1 + $0x12b0] sm:$0xff] }
 0x42a   :  { %9093 = vmatpush1.bf16.msra.mxu0 %v11130_v1  ;;  %v7241_v1 = vld [vmem:[%s15988_s1 + $0x1030] sm:$0xff] }
 0x42b   :  { %9298 = vmatpush1.bf16.msra.mxu1 %v11132_v2  ;;  %9094 = vmatprep.subr.bf16.mxu0 %v11135_v3  ;;  %v7243_v2 = vld [vmem:[%s15988_s1 + $0x1070] sm:$0xff]  ;;  %v7242_v3 = vld [vmem:[%s15988_s1 + $0x1038] sm:$0xff] }
 0x42c   :  { %9299 = vmatprep.subr.bf16.mxu1 %v11137_v5  ;;  %v7244_v5 = vld [vmem:[%s15988_s1 + $0x1078] sm:$0xff]  ;;  %v11159_v13 = vcombine.high %v7241_v1, %v7243_v2  ;;  %v11158_v25 = vcombine.low %v7241_v1, %v7243_v2  ;;  %v7263_v53 = vld [vmem:[%s15988_s1 + $0x12f0] sm:$0xff] }
 0x42d   :  { %v11161_v17 = vcombine.high %v7242_v3, %v7244_v5  ;;  %v11160_v26 = vcombine.low %v7242_v3, %v7244_v5  ;;  %v11179_v1 = vcombine.high %v7261_v33, %v7263_v53  ;;  %v7265_v3 = vld [vmem:[%s15988_s1 + $0x1330] sm:$0xff] }
 0x42e   :  { %9095 = vmatpush1.bf16.msra.mxu0 %v11134_v19  ;;  %v7245_v19 = vld [vmem:[%s15988_s1 + $0x10b0] sm:$0xff] }
 0x42f   :  { %9300 = vmatpush1.bf16.msra.mxu1 %v11136_v21  ;;  %9096 = vmatprep.subr.bf16.mxu0 %v11139_v22  ;;  %v7247_v21 = vld [vmem:[%s15988_s1 + $0x10f0] sm:$0xff]  ;;  %v7246_v22 = vld [vmem:[%s15988_s1 + $0x10b8] sm:$0xff] }
 0x430   :  { %9301 = vmatprep.subr.bf16.mxu1 %v11141_v24  ;;  %v7248_v24 = vld [vmem:[%s15988_s1 + $0x10f8] sm:$0xff]  ;;  %v11163_v59 = vcombine.high %v7245_v19, %v7247_v21  ;;  %v11162_v34 = vcombine.low %v7245_v19, %v7247_v21  ;;  %v7267_v5 = vld [vmem:[%s15988_s1 + $0x1370] sm:$0xff] }
 0x431   :  { %v11165_v29 = vcombine.high %v7246_v22, %v7248_v24  ;;  %v11164_v35 = vcombine.low %v7246_v22, %v7248_v24  ;;  %v11183_v19 = vcombine.high %v7265_v3, %v7267_v5  ;;  %v7269_v22 = vld [vmem:[%s15988_s1 + $0x13b0] sm:$0xff] }
 0x432   :  { %9097 = vmatpush1.bf16.msra.mxu0 %v11138_v63  ;;  %v7249_v63 = vld [vmem:[%s15988_s1 + $0x1130] sm:$0xff] }
 0x433   :  { %9302 = vmatpush1.bf16.msra.mxu1 %v11140_v30  ;;  %9098 = vmatprep.subr.bf16.mxu0 %v11143_v31  ;;  %v7251_v30 = vld [vmem:[%s15988_s1 + $0x1170] sm:$0xff]  ;;  %v7250_v31 = vld [vmem:[%s15988_s1 + $0x1138] sm:$0xff] }
 0x434   :  { %9303 = vmatprep.subr.bf16.mxu1 %v11145_v32  ;;  %v7252_v32 = vld [vmem:[%s15988_s1 + $0x1178] sm:$0xff]  ;;  %v11167_v36 = vcombine.high %v7249_v63, %v7251_v30  ;;  %v7271_v24 = vld [vmem:[%s15988_s1 + $0x13f0] sm:$0xff] }
 0x435   :  { %v11169_v37 = vcombine.high %v7250_v31, %v7252_v32  ;;  %v11168_v43 = vcombine.low %v7250_v31, %v7252_v32  ;;  %v7273_v31 = vld [vmem:[%s15988_s1 + $0x1430] sm:$0xff] }
 0x436   :  { %9099 = vmatpush1.bf16.msra.mxu0 %v11142_v39  ;;  %v7253_v39 = vld [vmem:[%s15988_s1 + $0x11b0] sm:$0xff] }
 0x437   :  { %9304 = vmatpush1.bf16.msra.mxu1 %v11144_v40  ;;  %9100 = vmatprep.subr.bf16.mxu0 %v11147_v41  ;;  %v7255_v40 = vld [vmem:[%s15988_s1 + $0x11f0] sm:$0xff]  ;;  %v7256_v41 = vld [vmem:[%s15988_s1 + $0x11f8] sm:$0xff] }
 0x438   :  { %9305 = vmatprep.subr.bf16.mxu1 %v11149_v42  ;;  %v11166_v42 = vcombine.low %v7249_v63, %v7251_v30  ;;  %v11171_v45 = vcombine.high %v7253_v39, %v7255_v40  ;;  %v11187_v63 = vcombine.high %v7269_v22, %v7271_v24  ;;  %v7275_v32 = vld [vmem:[%s15988_s1 + $0x1470] sm:$0xff] }
 0x43a   :  { %9101 = vmatpush1.bf16.msra.mxu0 %v11146_v49  ;;  %v7259_v49 = vld [vmem:[%s15988_s1 + $0x1270] sm:$0xff] }
 0x43b   :  { %9306 = vmatpush1.bf16.msra.mxu1 %v11148_v50  ;;  %9102 = vmatprep.subr.bf16.mxu0 %v11151_v51  ;;  %v7260_v50 = vld [vmem:[%s15988_s1 + $0x1278] sm:$0xff]  ;;  %v11170_v51 = vcombine.low %v7253_v39, %v7255_v40  ;;  %v11175_v54 = vcombine.high %v7257_v46, %v7259_v49  ;;  %v11191_v39 = vcombine.high %v7273_v31, %v7275_v32 }
 0x43c   :  { %9307 = vmatprep.subr.bf16.mxu1 %v11153_v52 }
 0x43e   :  { %9103 = vmatpush1.bf16.msra.mxu0 %v11150_v10  ;;  %v7262_v10 = vld [vmem:[%s15988_s1 + $0x12b8] sm:$0xff] }
 0x43f   :  { %9308 = vmatpush1.bf16.msra.mxu1 %v11152_v56  ;;  %9104 = vmatprep.subr.bf16.mxu0 %v11155_v61  ;;  %v7264_v56 = vld [vmem:[%s15988_s1 + $0x12f8] sm:$0xff]  ;;  %v11174_v61 = vcombine.low %v7257_v46, %v7259_v49 }
 0x440   :  { %9309 = vmatprep.subr.bf16.mxu1 %v11157_v62  ;;  %v11181_v2 = vcombine.high %v7262_v10, %v7264_v56 }
 0x442   :  { %9105 = vmatpush1.bf16.msra.mxu0 %v11154_v6  ;;  %v7266_v6 = vld [vmem:[%s15988_s1 + $0x1338] sm:$0xff] }
 0x443   :  { %9310 = vmatpush1.bf16.msra.mxu1 %v11156_v12  ;;  %9115 = vmatprep.subr.bf16.mxu0 %v11159_v13  ;;  %v7268_v12 = vld [vmem:[%s15988_s1 + $0x1378] sm:$0xff]  ;;  %v11178_v13 = vcombine.low %v7261_v33, %v7263_v53 }
 0x444   :  { %9320 = vmatprep.subr.bf16.mxu1 %v11161_v17  ;;  %v11180_v17 = vcombine.low %v7262_v10, %v7264_v56  ;;  %v11185_v21 = vcombine.high %v7266_v6, %v7268_v12  ;;  %v7285_v10 = vld [vmem:[%s15988_s1 + $0x15b0] sm:$0xff] }
 0x445   :  { %9107 = vmatmul.mubr.bf16.vlgmr.msra.gmra.mrb[12].mxu0 %v12206_v38  ;;  %v7287_v56 = vld [vmem:[%s15988_s1 + $0x15f0] sm:$0xff] }
 0x446   :  { %9116 = vmatpush1.bf16.msra.mxu0 %v11158_v25  ;;  %9312 = vmatmul.mubr.bf16.vlgmr.msra.gmra.mrb[12].mxu1 %v12206_v38  ;;  %v7254_v38 = vld [vmem:[%s15988_s1 + $0x11b8] sm:$0xff] }
 0x447   :  { %9321 = vmatpush1.bf16.msra.mxu1 %v11160_v26  ;;  %9117 = vmatprep.subr.bf16.mxu0 %v11163_v59  ;;  %v11173_v23 = vcombine.high %v7254_v38, %v7256_v41  ;;  %v11172_v52 = vcombine.low %v7254_v38, %v7256_v41  ;;  %v7270_v25 = vld [vmem:[%s15988_s1 + $0x13b8] sm:$0xff]  ;;  %v11182_v59 = vcombine.low %v7265_v3, %v7267_v5  ;;  %v7277_v38 = vld [vmem:[%s15988_s1 + $0x14b0] sm:$0xff] }
 0x448   :  { %9322 = vmatprep.subr.bf16.mxu1 %v11165_v29  ;;  %9147 = vmatprep.mubr.bf16.mxu0 %v12221_v48  ;;  %v7272_v26 = vld [vmem:[%s15988_s1 + $0x13f8] sm:$0xff]  ;;  %v11184_v29 = vcombine.low %v7266_v6, %v7268_v12  ;;  %v7279_v41 = vld [vmem:[%s15988_s1 + $0x14f0] sm:$0xff]  ;;  %v11203_v3 = vcombine.high %v7285_v10, %v7287_v56 }
 0x449   :  { %9352 = vmatprep.mubr.bf16.mxu1 %v12221_v48  ;;  %v7258_v48 = vld [vmem:[%s15988_s1 + $0x1238] sm:$0xff]  ;;  %v11189_v30 = vcombine.high %v7270_v25, %v7272_v26  ;;  %v11195_v46 = vcombine.high %v7277_v38, %v7279_v41  ;;  %v7289_v6 = vld [vmem:[%s15988_s1 + $0x1630] sm:$0xff] }
 0x44a   :  { %9118 = vmatpush1.bf16.msra.mxu0 %v11162_v34  ;;  %v11177_v9 = vcombine.high %v7258_v48, %v7260_v50  ;;  %v11176_v62 = vcombine.low %v7258_v48, %v7260_v50  ;;  %v7274_v34 = vld [vmem:[%s15988_s1 + $0x1438] sm:$0xff]  ;;  %v7281_v48 = vld [vmem:[%s15988_s1 + $0x1530] sm:$0xff] }
 0x44b   :  { %9323 = vmatpush1.bf16.msra.mxu1 %v11164_v35  ;;  %9119 = vmatprep.subr.bf16.mxu0 %v11167_v36  ;;  %v7276_v35 = vld [vmem:[%s15988_s1 + $0x1478] sm:$0xff]  ;;  %v11186_v36 = vcombine.low %v7269_v22, %v7271_v24  ;;  %v7283_v50 = vld [vmem:[%s15988_s1 + $0x1570] sm:$0xff] }
 0x44c   :  { %9324 = vmatprep.subr.bf16.mxu1 %v11169_v37  ;;  %v11188_v37 = vcombine.low %v7270_v25, %v7272_v26  ;;  %v11193_v40 = vcombine.high %v7274_v34, %v7276_v35  ;;  %v11199_v33 = vcombine.high %v7281_v48, %v7283_v50  ;;  %v7291_v12 = vld [vmem:[%s15988_s1 + $0x1670] sm:$0xff] }
 0x44d   :  { %v11207_v22 = vcombine.high %v7289_v6, %v7291_v12  ;;  %v7293_v25 = vld [vmem:[%s15988_s1 + $0x16b0] sm:$0xff] }
 0x44e   :  { %9120 = vmatpush1.bf16.msra.mxu0 %v11166_v42  ;;  %v7278_v42 = vld [vmem:[%s15988_s1 + $0x14b8] sm:$0xff]  ;;  %v7295_v26 = vld [vmem:[%s15988_s1 + $0x16f0] sm:$0xff] }
 0x44f   :  { %9325 = vmatpush1.bf16.msra.mxu1 %v11168_v43  ;;  %9121 = vmatprep.subr.bf16.mxu0 %v11171_v45  ;;  %v7280_v43 = vld [vmem:[%s15988_s1 + $0x14f8] sm:$0xff]  ;;  %v11190_v45 = vcombine.low %v7273_v31, %v7275_v32  ;;  %v11211_v31 = vcombine.high %v7293_v25, %v7295_v26 }
 0x450   :  { %9326 = vmatprep.subr.bf16.mxu1 %v11173_v23  ;;  %v11192_v23 = vcombine.low %v7274_v34, %v7276_v35  ;;  %v11197_v49 = vcombine.high %v7278_v42, %v7280_v43  ;;  %v7297_v34 = vld [vmem:[%s15988_s1 + $0x1730] sm:$0xff] }
 0x451   :  { %v7299_v35 = vld [vmem:[%s15988_s1 + $0x1770] sm:$0xff] }
 0x452   :  { %9122 = vmatpush1.bf16.msra.mxu0 %v11170_v51  ;;  %v7282_v51 = vld [vmem:[%s15988_s1 + $0x1538] sm:$0xff] }
 0x453   :  { %9327 = vmatpush1.bf16.msra.mxu1 %v11172_v52  ;;  %9123 = vmatprep.subr.bf16.mxu0 %v11175_v54  ;;  %v7284_v52 = vld [vmem:[%s15988_s1 + $0x1578] sm:$0xff]  ;;  %v11194_v54 = vcombine.low %v7277_v38, %v7279_v41  ;;  %v11215_v38 = vcombine.high %v7297_v34, %v7299_v35 }
 0x454   :  { %9328 = vmatprep.subr.bf16.mxu1 %v11177_v9  ;;  %v11196_v9 = vcombine.low %v7278_v42, %v7280_v43  ;;  %v11201_v53 = vcombine.high %v7282_v51, %v7284_v52  ;;  %v7301_v42 = vld [vmem:[%s15988_s1 + $0x17b0] sm:$0xff] }
 0x455   :  { %v7303_v43 = vld [vmem:[%s15988_s1 + $0x17f0] sm:$0xff] }
 0x456   :  { %9124 = vmatpush1.bf16.msra.mxu0 %v11174_v61  ;;  %v7286_v61 = vld [vmem:[%s15988_s1 + $0x15b8] sm:$0xff] }
 0x457   :  { %9329 = vmatpush1.bf16.msra.mxu1 %v11176_v62  ;;  %9125 = vmatprep.subr.bf16.mxu0 %v11179_v1  ;;  %v7288_v62 = vld [vmem:[%s15988_s1 + $0x15f8] sm:$0xff]  ;;  %v11198_v1 = vcombine.low %v7281_v48, %v7283_v50  ;;  %v11219_v48 = vcombine.high %v7301_v42, %v7303_v43 }
 0x458   :  { %9330 = vmatprep.subr.bf16.mxu1 %v11181_v2  ;;  %v11200_v2 = vcombine.low %v7282_v51, %v7284_v52  ;;  %v11205_v5 = vcombine.high %v7286_v61, %v7288_v62  ;;  %v7305_v51 = vld [vmem:[%s15988_s1 + $0x1830] sm:$0xff] }
 0x459   :  { %v7307_v52 = vld [vmem:[%s15988_s1 + $0x1870] sm:$0xff] }
 0x45a   :  { %9126 = vmatpush1.bf16.msra.mxu0 %v11178_v13  ;;  %v7290_v13 = vld [vmem:[%s15988_s1 + $0x1638] sm:$0xff] }
 0x45b   :  { %9331 = vmatpush1.bf16.msra.mxu1 %v11180_v17  ;;  %9127 = vmatprep.subr.bf16.mxu0 %v11183_v19  ;;  %v7292_v17 = vld [vmem:[%s15988_s1 + $0x1678] sm:$0xff]  ;;  %v11202_v19 = vcombine.low %v7285_v10, %v7287_v56  ;;  %v11223_v10 = vcombine.high %v7305_v51, %v7307_v52 }
 0x45c   :  { %9332 = vmatprep.subr.bf16.mxu1 %v11185_v21  ;;  %v11204_v21 = vcombine.low %v7286_v61, %v7288_v62  ;;  %v11209_v24 = vcombine.high %v7290_v13, %v7292_v17  ;;  %v7309_v61 = vld [vmem:[%s15988_s1 + $0x18b0] sm:$0xff] }
 0x45d   :  { %v7311_v62 = vld [vmem:[%s15988_s1 + $0x18f0] sm:$0xff] }
 0x45e   :  { %9128 = vmatpush1.bf16.msra.mxu0 %v11182_v59  ;;  %v7294_v59 = vld [vmem:[%s15988_s1 + $0x16b8] sm:$0xff] }
 0x45f   :  { %9333 = vmatpush1.bf16.msra.mxu1 %v11184_v29  ;;  %9129 = vmatprep.subr.bf16.mxu0 %v11187_v63  ;;  %v7296_v29 = vld [vmem:[%s15988_s1 + $0x16f8] sm:$0xff]  ;;  %v11206_v63 = vcombine.low %v7289_v6, %v7291_v12  ;;  %v11227_v6 = vcombine.high %v7309_v61, %v7311_v62 }
 0x460   :  { %9334 = vmatprep.subr.bf16.mxu1 %v11189_v30  ;;  %v11208_v30 = vcombine.low %v7290_v13, %v7292_v17  ;;  %v11213_v32 = vcombine.high %v7294_v59, %v7296_v29  ;;  %v7313_v13 = vld [vmem:[%s15988_s1 + $0x1930] sm:$0xff] }
 0x461   :  { %v7315_v17 = vld [vmem:[%s15988_s1 + $0x1970] sm:$0xff] }
 0x462   :  { %9130 = vmatpush1.bf16.msra.mxu0 %v11186_v36  ;;  %v7298_v36 = vld [vmem:[%s15988_s1 + $0x1738] sm:$0xff] }
 0x463   :  { %9335 = vmatpush1.bf16.msra.mxu1 %v11188_v37  ;;  %9131 = vmatprep.subr.bf16.mxu0 %v11191_v39  ;;  %v7300_v37 = vld [vmem:[%s15988_s1 + $0x1778] sm:$0xff]  ;;  %v11210_v39 = vcombine.low %v7293_v25, %v7295_v26  ;;  %v11231_v25 = vcombine.high %v7313_v13, %v7315_v17 }
 0x464   :  { %9336 = vmatprep.subr.bf16.mxu1 %v11193_v40  ;;  %v11212_v40 = vcombine.low %v7294_v59, %v7296_v29  ;;  %v11217_v41 = vcombine.high %v7298_v36, %v7300_v37  ;;  %v7317_v59 = vld [vmem:[%s15988_s1 + $0x19b0] sm:$0xff] }
 0x465   :  { %v7319_v29 = vld [vmem:[%s15988_s1 + $0x19f0] sm:$0xff] }
 0x466   :  { %9132 = vmatpush1.bf16.msra.mxu0 %v11190_v45  ;;  %v7302_v45 = vld [vmem:[%s15988_s1 + $0x17b8] sm:$0xff] }
 0x467   :  { %9337 = vmatpush1.bf16.msra.mxu1 %v11192_v23  ;;  %9133 = vmatprep.subr.bf16.mxu0 %v11195_v46  ;;  %v7304_v23 = vld [vmem:[%s15988_s1 + $0x17f8] sm:$0xff]  ;;  %v11214_v46 = vcombine.low %v7297_v34, %v7299_v35  ;;  %v7321_v35 = vld [vmem:[%s15988_s1 + $0x1a30] sm:$0xff] }
 0x468   :  { %9338 = vmatprep.subr.bf16.mxu1 %v11197_v49  ;;  %v11216_v49 = vcombine.low %v7298_v36, %v7300_v37  ;;  %v11221_v50 = vcombine.high %v7302_v45, %v7304_v23  ;;  %v7323_v36 = vld [vmem:[%s15988_s1 + $0x1a70] sm:$0xff]  ;;  %v7324_v37 = vld [vmem:[%s15988_s1 + $0x1a78] sm:$0xff] }
 0x46a   :  { %9134 = vmatpush1.bf16.msra.mxu0 %v11194_v54  ;;  %v7306_v54 = vld [vmem:[%s15988_s1 + $0x1838] sm:$0xff] }
 0x46b   :  { %9339 = vmatpush1.bf16.msra.mxu1 %v11196_v9  ;;  %9135 = vmatprep.subr.bf16.mxu0 %v11199_v33  ;;  %v7308_v9 = vld [vmem:[%s15988_s1 + $0x1878] sm:$0xff]  ;;  %v11218_v33 = vcombine.low %v7301_v42, %v7303_v43  ;;  %v7325_v42 = vld [vmem:[%s15988_s1 + $0x1ab0] sm:$0xff] }
 0x46c   :  { %9340 = vmatprep.subr.bf16.mxu1 %v11201_v53  ;;  %v11220_v53 = vcombine.low %v7302_v45, %v7304_v23  ;;  %v11225_v56 = vcombine.high %v7306_v54, %v7308_v9  ;;  %v7327_v43 = vld [vmem:[%s15988_s1 + $0x1af0] sm:$0xff]  ;;  %v7326_v45 = vld [vmem:[%s15988_s1 + $0x1ab8] sm:$0xff] }
 0x46d   :  { %v7328_v23 = vld [vmem:[%s15988_s1 + $0x1af8] sm:$0xff] }
 0x46e   :  { %9136 = vmatpush1.bf16.msra.mxu0 %v11198_v1  ;;  %v7310_v1 = vld [vmem:[%s15988_s1 + $0x18b8] sm:$0xff] }
 0x46f   :  { %9341 = vmatpush1.bf16.msra.mxu1 %v11200_v2  ;;  %9137 = vmatprep.subr.bf16.mxu0 %v11203_v3  ;;  %v7312_v2 = vld [vmem:[%s15988_s1 + $0x18f8] sm:$0xff]  ;;  %v11222_v3 = vcombine.low %v7305_v51, %v7307_v52  ;;  %v7329_v51 = vld [vmem:[%s15988_s1 + $0x1b30] sm:$0xff] }
 0x470   :  { %9342 = vmatprep.subr.bf16.mxu1 %v11205_v5  ;;  %v11224_v5 = vcombine.low %v7306_v54, %v7308_v9  ;;  %v11229_v12 = vcombine.high %v7310_v1, %v7312_v2  ;;  %v7331_v52 = vld [vmem:[%s15988_s1 + $0x1b70] sm:$0xff]  ;;  %v7330_v54 = vld [vmem:[%s15988_s1 + $0x1b38] sm:$0xff] }
 0x471   :  { %v7332_v9 = vld [vmem:[%s15988_s1 + $0x1b78] sm:$0xff] }
 0x472   :  { %9138 = vmatpush1.bf16.msra.mxu0 %v11202_v19  ;;  %v7314_v19 = vld [vmem:[%s15988_s1 + $0x1938] sm:$0xff] }
 0x473   :  { %9343 = vmatpush1.bf16.msra.mxu1 %v11204_v21  ;;  %9139 = vmatprep.subr.bf16.mxu0 %v11207_v22  ;;  %v7316_v21 = vld [vmem:[%s15988_s1 + $0x1978] sm:$0xff]  ;;  %v11226_v22 = vcombine.low %v7309_v61, %v7311_v62  ;;  %v11249_v61 = vcombine.high %v7330_v54, %v7332_v9  ;;  %v7333_v62 = vld [vmem:[%s15988_s1 + $0x1bb0] sm:$0xff] }
 0x474   :  { %9344 = vmatprep.subr.bf16.mxu1 %v11209_v24  ;;  %v11228_v24 = vcombine.low %v7310_v1, %v7312_v2  ;;  %v11233_v26 = vcombine.high %v7314_v19, %v7316_v21  ;;  %v7335_v1 = vld [vmem:[%s15988_s1 + $0x1bf0] sm:$0xff] }
 0x476   :  { %9140 = vmatpush1.bf16.msra.mxu0 %v11206_v63  ;;  %v7320_v63 = vld [vmem:[%s15988_s1 + $0x19f8] sm:$0xff] }
 0x477   :  { %9345 = vmatpush1.bf16.msra.mxu1 %v11208_v30  ;;  %9141 = vmatprep.subr.bf16.mxu0 %v11211_v31  ;;  %v11230_v30 = vcombine.low %v7313_v13, %v7315_v17  ;;  %v11232_v31 = vcombine.low %v7314_v19, %v7316_v21  ;;  %v11246_v17 = vcombine.low %v7329_v51, %v7331_v52 }
 0x478   :  { %9346 = vmatprep.subr.bf16.mxu1 %v11213_v32  ;;  %v11235_v32 = vcombine.high %v7317_v59, %v7319_v29 }
 0x47a   :  { %9142 = vmatpush1.bf16.msra.mxu0 %v11210_v39  ;;  %v11234_v39 = vcombine.low %v7317_v59, %v7319_v29  ;;  %v7337_v59 = vld [vmem:[%s15988_s1 + $0x1c30] sm:$0xff] }
 0x47b   :  { %9347 = vmatpush1.bf16.msra.mxu1 %v11212_v40  ;;  %9143 = vmatprep.subr.bf16.mxu0 %v11215_v38  ;;  %v11239_v38 = vcombine.high %v7321_v35, %v7323_v36  ;;  %v7339_v29 = vld [vmem:[%s15988_s1 + $0x1c70] sm:$0xff] }
 0x47c   :  { %9348 = vmatprep.subr.bf16.mxu1 %v11217_v41 }
 0x47e   :  { %9144 = vmatpush1.bf16.msra.mxu0 %v11214_v46  ;;  %v11238_v46 = vcombine.low %v7321_v35, %v7323_v36  ;;  %v7341_v35 = vld [vmem:[%s15988_s1 + $0x1cb0] sm:$0xff] }
 0x47f   :  { %9349 = vmatpush1.bf16.msra.mxu1 %v11216_v49  ;;  %9145 = vmatprep.subr.bf16.mxu0 %v11219_v48  ;;  %v11243_v48 = vcombine.high %v7325_v42, %v7327_v43  ;;  %v7343_v36 = vld [vmem:[%s15988_s1 + $0x1cf0] sm:$0xff] }
 0x480   :  { %9350 = vmatprep.subr.bf16.mxu1 %v11221_v50  ;;  %v11245_v50 = vcombine.high %v7326_v45, %v7328_v23 }
 0x482   :  { %9146 = vmatpush1.bf16.msra.mxu0 %v11218_v33  ;;  %v11242_v33 = vcombine.low %v7325_v42, %v7327_v43  ;;  %v7345_v42 = vld [vmem:[%s15988_s1 + $0x1d30] sm:$0xff] }
 0x483   :  { %9351 = vmatpush1.bf16.msra.mxu1 %v11220_v53  ;;  %9156 = vmatprep.subr.bf16.mxu0 %v11223_v10  ;;  %v11244_v53 = vcombine.low %v7326_v45, %v7328_v23  ;;  %v11247_v10 = vcombine.high %v7329_v51, %v7331_v52  ;;  %v7347_v43 = vld [vmem:[%s15988_s1 + $0x1d70] sm:$0xff]  ;;  %v7346_v45 = vld [vmem:[%s15988_s1 + $0x1d38] sm:$0xff] }
 0x484   :  { %9361 = vmatprep.subr.bf16.mxu1 %v11225_v56  ;;  %v7348_v23 = vld [vmem:[%s15988_s1 + $0x1d78] sm:$0xff]  ;;  %v7349_v51 = vld [vmem:[%s15988_s1 + $0x1db0] sm:$0xff] }
 0x485   :  { %9148 = vmatmul.mubr.bf16.vlgmr.msra.gmra.mrb[12].mxu0 %v12409_v58  ;;  %v7351_v52 = vld [vmem:[%s15988_s1 + $0x1df0] sm:$0xff] }
 0x486   :  { %9157 = vmatpush1.bf16.msra.mxu0 %v11222_v3  ;;  %9353 = vmatmul.mubr.bf16.vlgmr.msra.gmra.mrb[12].mxu1 %v12409_v58  ;;  %v7318_v58 = vld [vmem:[%s15988_s1 + $0x19b8] sm:$0xff] }
 0x487   :  { %9362 = vmatpush1.bf16.msra.mxu1 %v11224_v5  ;;  %9158 = vmatprep.subr.bf16.mxu0 %v11227_v6  ;;  %v11237_v34 = vcombine.high %v7318_v58, %v7320_v63  ;;  %v11236_v40 = vcombine.low %v7318_v58, %v7320_v63  ;;  %v7334_v5 = vld [vmem:[%s15988_s1 + $0x1bb8] sm:$0xff] }
 0x488   :  { %9363 = vmatprep.subr.bf16.mxu1 %v11229_v12  ;;  %9188 = vmatprep.mubr.bf16.mxu0 %v12425_v4  ;;  %v7336_v6 = vld [vmem:[%s15988_s1 + $0x1bf8] sm:$0xff] }
 0x489   :  { %9393 = vmatprep.mubr.bf16.mxu1 %v12425_v4  ;;  %v7322_v4 = vld [vmem:[%s15988_s1 + $0x1a38] sm:$0xff] }
 0x48a   :  { %9159 = vmatpush1.bf16.msra.mxu0 %v11226_v22  ;;  %v11241_v41 = vcombine.high %v7322_v4, %v7324_v37  ;;  %v11240_v49 = vcombine.low %v7322_v4, %v7324_v37  ;;  %v11248_v22 = vcombine.low %v7330_v54, %v7332_v9  ;;  %v7338_v58 = vld [vmem:[%s15988_s1 + $0x1c38] sm:$0xff] }
 0x48b   :  { %9364 = vmatpush1.bf16.msra.mxu1 %v11228_v24  ;;  %9160 = vmatprep.subr.bf16.mxu0 %v11231_v25  ;;  %v11251_v24 = vcombine.high %v7333_v62, %v7335_v1  ;;  %v7340_v63 = vld [vmem:[%s15988_s1 + $0x1c78] sm:$0xff] }
 0x48c   :  { %9365 = vmatprep.subr.bf16.mxu1 %v11233_v26  ;;  %v11253_v26 = vcombine.high %v7334_v5, %v7336_v6  ;;  %v7342_v4 = vld [vmem:[%s15988_s1 + $0x1cb8] sm:$0xff] }
 0x48d   :  { %v7344_v37 = vld [vmem:[%s15988_s1 + $0x1cf8] sm:$0xff] }
 0x48e   :  { %9161 = vmatpush1.bf16.msra.mxu0 %v11230_v30  ;;  %v11250_v30 = vcombine.low %v7333_v62, %v7335_v1  ;;  %v7350_v54 = vld [vmem:[%s15988_s1 + $0x1db8] sm:$0xff]  ;;  %v7353_v62 = vld [vmem:[%s15988_s1 + $0x1e30] sm:$0xff] }
 0x48f   :  { %9366 = vmatpush1.bf16.msra.mxu1 %v11232_v31  ;;  %9162 = vmatprep.subr.bf16.mxu0 %v11235_v32  ;;  %v11252_v31 = vcombine.low %v7334_v5, %v7336_v6  ;;  %v11255_v32 = vcombine.high %v7337_v59, %v7339_v29  ;;  %v7352_v9 = vld [vmem:[%s15988_s1 + $0x1df8] sm:$0xff]  ;;  %v7355_v1 = vld [vmem:[%s15988_s1 + $0x1e70] sm:$0xff] }
 0x490   :  { %9367 = vmatprep.subr.bf16.mxu1 %v11237_v34  ;;  %v11257_v34 = vcombine.high %v7338_v58, %v7340_v63  ;;  %v7354_v5 = vld [vmem:[%s15988_s1 + $0x1e38] sm:$0xff] }
 0x491   :  { %v7356_v6 = vld [vmem:[%s15988_s1 + $0x1e78] sm:$0xff] }
 0x492   :  { %9163 = vmatpush1.bf16.msra.mxu0 %v11234_v39  ;;  %v11254_v39 = vcombine.low %v7337_v59, %v7339_v29  ;;  %v11270_v59 = vcombine.low %v7353_v62, %v7355_v1  ;;  %v11272_v29 = vcombine.low %v7354_v5, %v7356_v6 }
 0x493   :  { %9368 = vmatpush1.bf16.msra.mxu1 %v11236_v40  ;;  %9164 = vmatprep.subr.bf16.mxu0 %v11239_v38  ;;  %v11256_v40 = vcombine.low %v7338_v58, %v7340_v63  ;;  %v11259_v38 = vcombine.high %v7341_v35, %v7343_v36 }
 0x494   :  { %9369 = vmatprep.subr.bf16.mxu1 %v11241_v41  ;;  %v11261_v41 = vcombine.high %v7342_v4, %v7344_v37 }
 0x496   :  { %9165 = vmatpush1.bf16.msra.mxu0 %v11238_v46  ;;  %v11258_v46 = vcombine.low %v7341_v35, %v7343_v36 }
 0x497   :  { %9370 = vmatpush1.bf16.msra.mxu1 %v11240_v49  ;;  %9166 = vmatprep.subr.bf16.mxu0 %v11243_v48  ;;  %v11260_v49 = vcombine.low %v7342_v4, %v7344_v37  ;;  %v11263_v48 = vcombine.high %v7345_v42, %v7347_v43 }
 0x498   :  { %v15467_v56 = vpop.f32.mrb[8].mxu0  ;;  %9371 = vmatprep.subr.bf16.mxu1 %v11245_v50  ;;  %v11265_v50 = vcombine.high %v7346_v45, %v7348_v23 }
 0x499   :  { %v15475_v2 = vpop.f32.mrb[8].mxu1  ;;  %v15477_v3 = vpop.f32.mrb[9].mxu0 }
 0x49a   :  { %v15485_v12 = vpop.f32.mrb[9].mxu1  ;;  %v6905_v13 = vpop.f32.mrb[10].mxu0  ;;  %9167 = vmatpush1.bf16.msra.mxu0 %v11242_v33  ;;  %v11262_v33 = vcombine.low %v7345_v42, %v7347_v43 }
 0x49b   :  { %v7110_v19 = vpop.f32.mrb[10].mxu1  ;;  %9372 = vmatpush1.bf16.msra.mxu1 %v11244_v53  ;;  %v6906_v21 = vpop.f32.mrb[11].mxu0  ;;  %9168 = vmatprep.subr.bf16.mxu0 %v11247_v10  ;;  %v11264_v53 = vcombine.low %v7346_v45, %v7348_v23  ;;  %v11267_v10 = vcombine.high %v7349_v51, %v7351_v52  ;;  %v11266_v13 = vcombine.low %v7349_v51, %v7351_v52 }
 0x49c   :  { %v7111_v25 = vpop.f32.mrb[11].mxu1  ;;  %9373 = vmatprep.subr.bf16.mxu1 %v11249_v61  ;;  %v11269_v61 = vcombine.high %v7350_v54, %v7352_v9  ;;  %v11271_v19 = vcombine.high %v7353_v62, %v7355_v1  ;;  %v11273_v21 = vcombine.high %v7354_v5, %v7356_v6 }
 0x49d   :  { %v7358_v25 = vld [vmem:[%s15988_s1 + $0x1eb8] sm:$0xff] }
 0x49e   :  { %9169 = vmatpush1.bf16.msra.mxu0 %v11246_v17  ;;  %v11268_v17 = vcombine.low %v7350_v54, %v7352_v9 }
 0x49f   :  { %9374 = vmatpush1.bf16.msra.mxu1 %v11248_v22  ;;  %9170 = vmatprep.subr.bf16.mxu0 %v11251_v24  ;;  %v7357_v22 = vld [vmem:[%s15988_s1 + $0x1eb0] sm:$0xff] }
 0x4a0   :  { %9375 = vmatprep.subr.bf16.mxu1 %v11253_v26  ;;  %v7359_v24 = vld [vmem:[%s15988_s1 + $0x1ef0] sm:$0xff]  ;;  %v7360_v26 = vld [vmem:[%s15988_s1 + $0x1ef8] sm:$0xff] }
 0x4a1   :  { %v11275_v58 = vcombine.high %v7357_v22, %v7359_v24  ;;  %v11277_v63 = vcombine.high %v7358_v25, %v7360_v26  ;;  %v11274_v35 = vcombine.low %v7357_v22, %v7359_v24  ;;  %v11276_v36 = vcombine.low %v7358_v25, %v7360_v26 }
 0x4a2   :  { %9171 = vmatpush1.bf16.msra.mxu0 %v11250_v30  ;;  %v7361_v30 = vld [vmem:[%s15988_s1 + $0x1f30] sm:$0xff] }
 0x4a3   :  { %9376 = vmatpush1.bf16.msra.mxu1 %v11252_v31  ;;  %9172 = vmatprep.subr.bf16.mxu0 %v11255_v32  ;;  %v7363_v31 = vld [vmem:[%s15988_s1 + $0x1f70] sm:$0xff]  ;;  %v7362_v32 = vld [vmem:[%s15988_s1 + $0x1f38] sm:$0xff] }
 0x4a4   :  { %9377 = vmatprep.subr.bf16.mxu1 %v11257_v34  ;;  %v7364_v34 = vld [vmem:[%s15988_s1 + $0x1f78] sm:$0xff]  ;;  %v11279_v4 = vcombine.high %v7361_v30, %v7363_v31  ;;  %v11278_v42 = vcombine.low %v7361_v30, %v7363_v31 }
 0x4a5   :  { %v11281_v37 = vcombine.high %v7362_v32, %v7364_v34  ;;  %v11280_v43 = vcombine.low %v7362_v32, %v7364_v34  ;;  %v7385_v34 = vld [vmem:[%s15988_s1 + $0x2230] sm:$0xff] }
 0x4a6   :  { %9173 = vmatpush1.bf16.msra.mxu0 %v11254_v39  ;;  %v7365_v39 = vld [vmem:[%s15988_s1 + $0x1fb0] sm:$0xff] }
 0x4a7   :  { %9378 = vmatpush1.bf16.msra.mxu1 %v11256_v40  ;;  %9174 = vmatprep.subr.bf16.mxu0 %v11259_v38  ;;  %v7367_v40 = vld [vmem:[%s15988_s1 + $0x1ff0] sm:$0xff]  ;;  %v7366_v38 = vld [vmem:[%s15988_s1 + $0x1fb8] sm:$0xff] }
 0x4a8   :  { %9379 = vmatprep.subr.bf16.mxu1 %v11261_v41  ;;  %v7368_v41 = vld [vmem:[%s15988_s1 + $0x1ff8] sm:$0xff]  ;;  %v11283_v45 = vcombine.high %v7365_v39, %v7367_v40  ;;  %v11282_v51 = vcombine.low %v7365_v39, %v7367_v40 }
 0x4a9   :  { %v11285_v23 = vcombine.high %v7366_v38, %v7368_v41  ;;  %v11284_v52 = vcombine.low %v7366_v38, %v7368_v41  ;;  %v7389_v38 = vld [vmem:[%s15988_s1 + $0x22b0] sm:$0xff] }
 0x4aa   :  { %9175 = vmatpush1.bf16.msra.mxu0 %v11258_v46  ;;  %v7369_v46 = vld [vmem:[%s15988_s1 + $0x2030] sm:$0xff] }
 0x4ab   :  { %9380 = vmatpush1.bf16.msra.mxu1 %v11260_v49  ;;  %9176 = vmatprep.subr.bf16.mxu0 %v11263_v48  ;;  %v7371_v49 = vld [vmem:[%s15988_s1 + $0x2070] sm:$0xff]  ;;  %v7370_v48 = vld [vmem:[%s15988_s1 + $0x2038] sm:$0xff] }
 0x4ac   :  { %9381 = vmatprep.subr.bf16.mxu1 %v11265_v50  ;;  %v7372_v50 = vld [vmem:[%s15988_s1 + $0x2078] sm:$0xff]  ;;  %v11287_v54 = vcombine.high %v7369_v46, %v7371_v49  ;;  %v11286_v62 = vcombine.low %v7369_v46, %v7371_v49  ;;  %v7391_v41 = vld [vmem:[%s15988_s1 + $0x22f0] sm:$0xff] }
 0x4ad   :  { %v11289_v9 = vcombine.high %v7370_v48, %v7372_v50  ;;  %v11288_v1 = vcombine.low %v7370_v48, %v7372_v50  ;;  %v11307_v46 = vcombine.high %v7389_v38, %v7391_v41  ;;  %v7393_v48 = vld [vmem:[%s15988_s1 + $0x2330] sm:$0xff] }
 0x4ae   :  { %9177 = vmatpush1.bf16.msra.mxu0 %v11262_v33  ;;  %v7373_v33 = vld [vmem:[%s15988_s1 + $0x20b0] sm:$0xff] }
 0x4af   :  { %9382 = vmatpush1.bf16.msra.mxu1 %v11264_v53  ;;  %9178 = vmatprep.subr.bf16.mxu0 %v11267_v10  ;;  %v7375_v53 = vld [vmem:[%s15988_s1 + $0x20f0] sm:$0xff]  ;;  %v7374_v10 = vld [vmem:[%s15988_s1 + $0x20b8] sm:$0xff] }
 0x4b0   :  { %9383 = vmatprep.subr.bf16.mxu1 %v11269_v61  ;;  %v7376_v61 = vld [vmem:[%s15988_s1 + $0x20f8] sm:$0xff]  ;;  %v11291_v5 = vcombine.high %v7373_v33, %v7375_v53  ;;  %v11290_v22 = vcombine.low %v7373_v33, %v7375_v53  ;;  %v7395_v50 = vld [vmem:[%s15988_s1 + $0x2370] sm:$0xff] }
 0x4b1   :  { %v11293_v6 = vcombine.high %v7374_v10, %v7376_v61  ;;  %v11292_v24 = vcombine.low %v7374_v10, %v7376_v61  ;;  %v11311_v33 = vcombine.high %v7393_v48, %v7395_v50  ;;  %v7397_v10 = vld [vmem:[%s15988_s1 + $0x23b0] sm:$0xff] }
 0x4b2   :  { %9179 = vmatpush1.bf16.msra.mxu0 %v11266_v13  ;;  %v7377_v13 = vld [vmem:[%s15988_s1 + $0x2130] sm:$0xff] }
 0x4b3   :  { %9384 = vmatpush1.bf16.msra.mxu1 %v11268_v17  ;;  %9180 = vmatprep.subr.bf16.mxu0 %v11271_v19  ;;  %v7379_v17 = vld [vmem:[%s15988_s1 + $0x2170] sm:$0xff]  ;;  %v7378_v19 = vld [vmem:[%s15988_s1 + $0x2138] sm:$0xff] }
 0x4b4   :  { %9385 = vmatprep.subr.bf16.mxu1 %v11273_v21  ;;  %v7380_v21 = vld [vmem:[%s15988_s1 + $0x2178] sm:$0xff]  ;;  %v11295_v25 = vcombine.high %v7377_v13, %v7379_v17  ;;  %v7399_v61 = vld [vmem:[%s15988_s1 + $0x23f0] sm:$0xff] }
 0x4b5   :  { %v11297_v26 = vcombine.high %v7378_v19, %v7380_v21  ;;  %v11296_v30 = vcombine.low %v7378_v19, %v7380_v21  ;;  %v7401_v19 = vld [vmem:[%s15988_s1 + $0x2430] sm:$0xff] }
 0x4b6   :  { %9181 = vmatpush1.bf16.msra.mxu0 %v11270_v59  ;;  %v7381_v59 = vld [vmem:[%s15988_s1 + $0x21b0] sm:$0xff] }
 0x4b7   :  { %9386 = vmatpush1.bf16.msra.mxu1 %v11272_v29  ;;  %9182 = vmatprep.subr.bf16.mxu0 %v11275_v58  ;;  %v7383_v29 = vld [vmem:[%s15988_s1 + $0x21f0] sm:$0xff]  ;;  %v7384_v58 = vld [vmem:[%s15988_s1 + $0x21f8] sm:$0xff] }
 0x4b8   :  { %9387 = vmatprep.subr.bf16.mxu1 %v11277_v63  ;;  %v11294_v63 = vcombine.low %v7377_v13, %v7379_v17  ;;  %v11299_v31 = vcombine.high %v7381_v59, %v7383_v29  ;;  %v11315_v13 = vcombine.high %v7397_v10, %v7399_v61  ;;  %v7403_v21 = vld [vmem:[%s15988_s1 + $0x2470] sm:$0xff] }
 0x4ba   :  { %9183 = vmatpush1.bf16.msra.mxu0 %v11274_v35  ;;  %v7387_v35 = vld [vmem:[%s15988_s1 + $0x2270] sm:$0xff] }
 0x4bb   :  { %9388 = vmatpush1.bf16.msra.mxu1 %v11276_v36  ;;  %9184 = vmatprep.subr.bf16.mxu0 %v11279_v4  ;;  %v7388_v36 = vld [vmem:[%s15988_s1 + $0x2278] sm:$0xff]  ;;  %v11298_v4 = vcombine.low %v7381_v59, %v7383_v29  ;;  %v11303_v39 = vcombine.high %v7385_v34, %v7387_v35  ;;  %v11319_v59 = vcombine.high %v7401_v19, %v7403_v21 }
 0x4bc   :  { %9389 = vmatprep.subr.bf16.mxu1 %v11281_v37 }
 0x4be   :  { %9185 = vmatpush1.bf16.msra.mxu0 %v11278_v42  ;;  %v7390_v42 = vld [vmem:[%s15988_s1 + $0x22b8] sm:$0xff] }
 0x4bf   :  { %9390 = vmatpush1.bf16.msra.mxu1 %v11280_v43  ;;  %9186 = vmatprep.subr.bf16.mxu0 %v11283_v45  ;;  %v7392_v43 = vld [vmem:[%s15988_s1 + $0x22f8] sm:$0xff]  ;;  %v11302_v45 = vcombine.low %v7385_v34, %v7387_v35 }
 0x4c0   :  { %9391 = vmatprep.subr.bf16.mxu1 %v11285_v23  ;;  %v11309_v49 = vcombine.high %v7390_v42, %v7392_v43 }
 0x4c2   :  { %9187 = vmatpush1.bf16.msra.mxu0 %v11282_v51  ;;  %v7394_v51 = vld [vmem:[%s15988_s1 + $0x2338] sm:$0xff] }
 0x4c3   :  { %9392 = vmatpush1.bf16.msra.mxu1 %v11284_v52  ;;  %9197 = vmatprep.subr.bf16.mxu0 %v11287_v54  ;;  %v7396_v52 = vld [vmem:[%s15988_s1 + $0x2378] sm:$0xff]  ;;  %v11306_v54 = vcombine.low %v7389_v38, %v7391_v41 }
 0x4c4   :  { %9402 = vmatprep.subr.bf16.mxu1 %v11289_v9  ;;  %v11308_v9 = vcombine.low %v7390_v42, %v7392_v43  ;;  %v11313_v53 = vcombine.high %v7394_v51, %v7396_v52  ;;  %v7413_v42 = vld [vmem:[%s15988_s1 + $0x25b0] sm:$0xff] }
 0x4c5   :  { %9189 = vmatmul.mubr.bf16.vlgmr.msra.gmra.mrb[12].mxu0 %v12620_v18  ;;  %v7415_v43 = vld [vmem:[%s15988_s1 + $0x25f0] sm:$0xff] }
 0x4c6   :  { %9198 = vmatpush1.bf16.msra.mxu0 %v11286_v62  ;;  %9394 = vmatmul.mubr.bf16.vlgmr.msra.gmra.mrb[12].mxu1 %v12620_v18  ;;  %v7382_v18 = vld [vmem:[%s15988_s1 + $0x21b8] sm:$0xff] }
 0x4c7   :  { %9403 = vmatpush1.bf16.msra.mxu1 %v11288_v1  ;;  %9199 = vmatprep.subr.bf16.mxu0 %v11291_v5  ;;  %v11301_v32 = vcombine.high %v7382_v18, %v7384_v58  ;;  %v11300_v37 = vcombine.low %v7382_v18, %v7384_v58  ;;  %v7398_v62 = vld [vmem:[%s15988_s1 + $0x23b8] sm:$0xff]  ;;  %v11310_v5 = vcombine.low %v7393_v48, %v7395_v50  ;;  %v7405_v18 = vld [vmem:[%s15988_s1 + $0x24b0] sm:$0xff] }
 0x4c8   :  { %9404 = vmatprep.subr.bf16.mxu1 %v11293_v6  ;;  %9229 = vmatprep.mubr.bf16.mxu0 %v12635_v27  ;;  %v7400_v1 = vld [vmem:[%s15988_s1 + $0x23f8] sm:$0xff]  ;;  %v11312_v6 = vcombine.low %v7394_v51, %v7396_v52  ;;  %v7407_v58 = vld [vmem:[%s15988_s1 + $0x24f0] sm:$0xff]  ;;  %v11331_v48 = vcombine.high %v7413_v42, %v7415_v43 }
 0x4c9   :  { %9434 = vmatprep.mubr.bf16.mxu1 %v12635_v27  ;;  %v7386_v27 = vld [vmem:[%s15988_s1 + $0x2238] sm:$0xff]  ;;  %v11317_v17 = vcombine.high %v7398_v62, %v7400_v1  ;;  %v11323_v34 = vcombine.high %v7405_v18, %v7407_v58  ;;  %v7417_v51 = vld [vmem:[%s15988_s1 + $0x2630] sm:$0xff] }
 0x4ca   :  { %9200 = vmatpush1.bf16.msra.mxu0 %v11290_v22  ;;  %v11305_v40 = vcombine.high %v7386_v27, %v7388_v36  ;;  %v11304_v23 = vcombine.low %v7386_v27, %v7388_v36  ;;  %v7402_v22 = vld [vmem:[%s15988_s1 + $0x2438] sm:$0xff]  ;;  %v7409_v27 = vld [vmem:[%s15988_s1 + $0x2530] sm:$0xff] }
 0x4cb   :  { %9405 = vmatpush1.bf16.msra.mxu1 %v11292_v24  ;;  %9201 = vmatprep.subr.bf16.mxu0 %v11295_v25  ;;  %v7404_v24 = vld [vmem:[%s15988_s1 + $0x2478] sm:$0xff]  ;;  %v11314_v25 = vcombine.low %v7397_v10, %v7399_v61  ;;  %v7411_v36 = vld [vmem:[%s15988_s1 + $0x2570] sm:$0xff] }
 0x4cc   :  { %9406 = vmatprep.subr.bf16.mxu1 %v11297_v26  ;;  %v11316_v26 = vcombine.low %v7398_v62, %v7400_v1  ;;  %v11321_v29 = vcombine.high %v7402_v22, %v7404_v24  ;;  %v11327_v38 = vcombine.high %v7409_v27, %v7411_v36  ;;  %v7419_v52 = vld [vmem:[%s15988_s1 + $0x2670] sm:$0xff] }
 0x4cd   :  { %v11335_v10 = vcombine.high %v7417_v51, %v7419_v52  ;;  %v7421_v62 = vld [vmem:[%s15988_s1 + $0x26b0] sm:$0xff] }
 0x4ce   :  { %9202 = vmatpush1.bf16.msra.mxu0 %v11294_v63  ;;  %v7406_v63 = vld [vmem:[%s15988_s1 + $0x24b8] sm:$0xff]  ;;  %v7423_v1 = vld [vmem:[%s15988_s1 + $0x26f0] sm:$0xff] }
 0x4cf   :  { %9407 = vmatpush1.bf16.msra.mxu1 %v11296_v30  ;;  %9203 = vmatprep.subr.bf16.mxu0 %v11299_v31  ;;  %v7408_v30 = vld [vmem:[%s15988_s1 + $0x24f8] sm:$0xff]  ;;  %v11318_v31 = vcombine.low %v7401_v19, %v7403_v21  ;;  %v11339_v19 = vcombine.high %v7421_v62, %v7423_v1 }
 0x4d0   :  { %9408 = vmatprep.subr.bf16.mxu1 %v11301_v32  ;;  %v11320_v32 = vcombine.low %v7402_v22, %v7404_v24  ;;  %v11325_v35 = vcombine.high %v7406_v63, %v7408_v30  ;;  %v7425_v22 = vld [vmem:[%s15988_s1 + $0x2730] sm:$0xff] }
 0x4d1   :  { %v7427_v24 = vld [vmem:[%s15988_s1 + $0x2770] sm:$0xff] }
 0x4d2   :  { %9204 = vmatpush1.bf16.msra.mxu0 %v11298_v4  ;;  %v7410_v4 = vld [vmem:[%s15988_s1 + $0x2538] sm:$0xff] }
 0x4d3   :  { %9409 = vmatpush1.bf16.msra.mxu1 %v11300_v37  ;;  %9205 = vmatprep.subr.bf16.mxu0 %v11303_v39  ;;  %v7412_v37 = vld [vmem:[%s15988_s1 + $0x2578] sm:$0xff]  ;;  %v11322_v39 = vcombine.low %v7405_v18, %v7407_v58  ;;  %v11343_v18 = vcombine.high %v7425_v22, %v7427_v24 }
 0x4d4   :  { %9410 = vmatprep.subr.bf16.mxu1 %v11305_v40  ;;  %v11324_v40 = vcombine.low %v7406_v63, %v7408_v30  ;;  %v11329_v41 = vcombine.high %v7410_v4, %v7412_v37  ;;  %v7429_v63 = vld [vmem:[%s15988_s1 + $0x27b0] sm:$0xff] }
 0x4d5   :  { %v7431_v30 = vld [vmem:[%s15988_s1 + $0x27f0] sm:$0xff] }
 0x4d6   :  { %9206 = vmatpush1.bf16.msra.mxu0 %v11302_v45  ;;  %v7414_v45 = vld [vmem:[%s15988_s1 + $0x25b8] sm:$0xff] }
 0x4d7   :  { %9411 = vmatpush1.bf16.msra.mxu1 %v11304_v23  ;;  %9207 = vmatprep.subr.bf16.mxu0 %v11307_v46  ;;  %v7416_v23 = vld [vmem:[%s15988_s1 + $0x25f8] sm:$0xff]  ;;  %v11326_v46 = vcombine.low %v7409_v27, %v7411_v36  ;;  %v11347_v27 = vcombine.high %v7429_v63, %v7431_v30 }
 0x4d8   :  { %9412 = vmatprep.subr.bf16.mxu1 %v11309_v49  ;;  %v11328_v49 = vcombine.low %v7410_v4, %v7412_v37  ;;  %v11333_v50 = vcombine.high %v7414_v45, %v7416_v23  ;;  %v11346_v4 = vcombine.low %v7429_v63, %v7431_v30  ;;  %v9467_v63 = vsub.s32 3, %v11828_v44 }
 0x4da   :  { %9208 = vmatpush1.bf16.msra.mxu0 %v11306_v54  ;;  %v7418_v54 = vld [vmem:[%s15988_s1 + $0x2638] sm:$0xff] }
 0x4db   :  { %9413 = vmatpush1.bf16.msra.mxu1 %v11308_v9  ;;  %9209 = vmatprep.subr.bf16.mxu0 %v11311_v33  ;;  %v7420_v9 = vld [vmem:[%s15988_s1 + $0x2678] sm:$0xff]  ;;  %v11330_v33 = vcombine.low %v7413_v42, %v7415_v43  ;;  %v11640_v42 = vld [vmem:[%s15990_s3 + $0x48] sm:$0xff]  }
 0x4dc   :  { %9414 = vmatprep.subr.bf16.mxu1 %v11313_v53  ;;  %v11332_v53 = vcombine.low %v7414_v45, %v7416_v23  ;;  %v11337_v61 = vcombine.high %v7418_v54, %v7420_v9  ;;  %v11641_v43 = vld [vmem:[%s15990_s3 + $0xc8] sm:$0xff]  }
 0x4dd   :  { %v11642_v45 = vld [vmem:[%s15990_s3 + $0x8] sm:$0xff]  }
 0x4de   :  { %9210 = vmatpush1.bf16.msra.mxu0 %v11310_v5  ;;  %v7422_v5 = vld [vmem:[%s15988_s1 + $0x26b8] sm:$0xff]  ;;  %v11643_v23 = vld [vmem:[%s15990_s3 + $0x88] sm:$0xff]  }
 0x4df   :  { %9415 = vmatpush1.bf16.msra.mxu1 %v11312_v6  ;;  %9211 = vmatprep.subr.bf16.mxu0 %v11315_v13  ;;  %v7424_v6 = vld [vmem:[%s15988_s1 + $0x26f8] sm:$0xff]  ;;  %v11334_v13 = vcombine.low %v7417_v51, %v7419_v52 }
 0x4e0   :  { %9416 = vmatprep.subr.bf16.mxu1 %v11317_v17  ;;  %v11336_v17 = vcombine.low %v7418_v54, %v7420_v9  ;;  %v11341_v21 = vcombine.high %v7422_v5, %v7424_v6  ;;  %v11649_v51 = vld [vmem:[%s15990_s3 + $0xd8] sm:$0xff]   ;;  %v11652_v9 = vld [vmem:[%s15990_s3 + $0x60] sm:$0xff]  }
 0x4e1   :  { %v11650_v52 = vld [vmem:[%s15990_s3 + $0x18] sm:$0xff]  }
 0x4e2   :  { %9212 = vmatpush1.bf16.msra.mxu0 %v11314_v25  ;;  %v7426_v25 = vld [vmem:[%s15988_s1 + $0x2738] sm:$0xff] }
 0x4e3   :  { %9417 = vmatpush1.bf16.msra.mxu1 %v11316_v26  ;;  %9213 = vmatprep.subr.bf16.mxu0 %v11319_v59  ;;  %v7428_v26 = vld [vmem:[%s15988_s1 + $0x2778] sm:$0xff]  ;;  %v11338_v59 = vcombine.low %v7421_v62, %v7423_v1  ;;  %v11657_v62 = vld [vmem:[%s15990_s3 + $0xe8] sm:$0xff]  }
 0x4e4   :  { %9418 = vmatprep.subr.bf16.mxu1 %v11321_v29  ;;  %v11340_v29 = vcombine.low %v7422_v5, %v7424_v6  ;;  %v11345_v58 = vcombine.high %v7426_v25, %v7428_v26  ;;  %v11651_v54 = vld [vmem:[%s15990_s3 + $0x98] sm:$0xff]   ;;  %v11658_v1 = vld [vmem:[%s15990_s3 + $0x28] sm:$0xff]   ;;  %v11660_v6 = vld [vmem:[%s15990_s3 + $0x70] sm:$0xff]  }
 0x4e5   :  { %v11659_v5 = vld [vmem:[%s15990_s3 + $0xa8] sm:$0xff]  }
 0x4e6   :  { %9214 = vmatpush1.bf16.msra.mxu0 %v11318_v31  ;;  %v7430_v31 = vld [vmem:[%s15988_s1 + $0x27b8] sm:$0xff] }
 0x4e7   :  { %9419 = vmatpush1.bf16.msra.mxu1 %v11320_v32  ;;  %9215 = vmatprep.subr.bf16.mxu0 %v11323_v34  ;;  %v7432_v32 = vld [vmem:[%s15988_s1 + $0x27f8] sm:$0xff]  ;;  %v11342_v34 = vcombine.low %v7425_v22, %v7427_v24 }
 0x4e8   :  { %9420 = vmatprep.subr.bf16.mxu1 %v11325_v35  ;;  %v11344_v35 = vcombine.low %v7426_v25, %v7428_v26  ;;  %v11349_v36 = vcombine.high %v7430_v31, %v7432_v32  ;;  %v11348_v37 = vcombine.low %v7430_v31, %v7432_v32  ;;  %v11665_v22 = vld [vmem:[%s15990_s3 + $0xf8] sm:$0xff]   ;;  %v11709_v26 = vmov 0.0  }
 0x4e9   :  { %v11666_v24 = vld [vmem:[%s15990_s3 + $0x38] sm:$0xff]  }
 0x4ea   :  { %9216 = vmatpush1.bf16.msra.mxu0 %v11322_v39  ;;  %v11636_v39 = vld [vmem:[%s15990_s3 + $0x40] sm:$0xff]   ;;  %v11667_v25 = vld [vmem:[%s15990_s3 + $0xb8] sm:$0xff]  }
 0x4eb   :  { %9421 = vmatpush1.bf16.msra.mxu1 %v11324_v40  ;;  %9217 = vmatprep.subr.bf16.mxu0 %v11327_v38  ;;  %v11637_v40 = vld [vmem:[%s15990_s3 + $0xc0] sm:$0xff]  }
 0x4ec   :  { %9422 = vmatprep.subr.bf16.mxu1 %v11329_v41  ;;  %v11638_v38 = vld [vmem:[%s15990_s3] sm:$0xff]  }
 0x4ed   :  { %v11639_v41 = vld [vmem:[%s15990_s3 + $0x80] sm:$0xff]  }
 0x4ee   :  { %9218 = vmatpush1.bf16.msra.mxu0 %v11326_v46  ;;  %v11644_v46 = vld [vmem:[%s15990_s3 + $0x50] sm:$0xff]  }
 0x4ef   :  { %9423 = vmatpush1.bf16.msra.mxu1 %v11328_v49  ;;  %9219 = vmatprep.subr.bf16.mxu0 %v11331_v48  ;;  %v11646_v49 = vld [vmem:[%s15990_s3 + $0x10] sm:$0xff]  }
 0x4f0   :  { %9424 = vmatprep.subr.bf16.mxu1 %v11333_v50  ;;  %v11647_v48 = vld [vmem:[%s15990_s3 + $0x90] sm:$0xff]   ;;  %v11648_v50 = vld [vmem:[%s15990_s3 + $0x58] sm:$0xff]  }
 0x4f2   :  { %9220 = vmatpush1.bf16.msra.mxu0 %v11330_v33  ;;  %v11653_v33 = vld [vmem:[%s15990_s3 + $0xe0] sm:$0xff]  }
 0x4f3   :  { %9425 = vmatpush1.bf16.msra.mxu1 %v11332_v53  ;;  %9221 = vmatprep.subr.bf16.mxu0 %v11335_v10  ;;  %v11654_v53 = vld [vmem:[%s15990_s3 + $0x20] sm:$0xff]  }
 0x4f4   :  { %9426 = vmatprep.subr.bf16.mxu1 %v11337_v61  ;;  %v11655_v10 = vld [vmem:[%s15990_s3 + $0xa0] sm:$0xff]   ;;  %v11656_v61 = vld [vmem:[%s15990_s3 + $0x68] sm:$0xff]  }
 0x4f6   :  { %9222 = vmatpush1.bf16.msra.mxu0 %v11334_v13  ;;  %v11661_v13 = vld [vmem:[%s15990_s3 + $0xf0] sm:$0xff]  }
 0x4f7   :  { %9427 = vmatpush1.bf16.msra.mxu1 %v11336_v17  ;;  %9223 = vmatprep.subr.bf16.mxu0 %v11339_v19  ;;  %v11662_v17 = vld [vmem:[%s15990_s3 + $0x30] sm:$0xff]  }
 0x4f8   :  { %9428 = vmatprep.subr.bf16.mxu1 %v11341_v21  ;;  %v11663_v19 = vld [vmem:[%s15990_s3 + $0xb0] sm:$0xff]   ;;  %v11664_v21 = vld [vmem:[%s15990_s3 + $0x78] sm:$0xff]  }
 0x4fa   :  { %9224 = vmatpush1.bf16.msra.mxu0 %v11338_v59  ;;  %v9455_v59 = vsub.s32 0, %v11828_v44 }
 0x4fb   :  { %9429 = vmatpush1.bf16.msra.mxu1 %v11340_v29  ;;  %9225 = vmatprep.subr.bf16.mxu0 %v11343_v18  ;;  %v9451_v29 = vld [vmem:[%s15989_s2] sm:$0xf]  ;;  %v9463_v18 = vsub.s32 2, %v11828_v44 }
 0x4fc   :  { %9430 = vmatprep.subr.bf16.mxu1 %v11345_v58  ;;  %v9459_v58 = vsub.s32 1, %v11828_v44  ;;  %v9456_v32 = vrot.slane %v9451_v29, %v9455_v59 }
 0x4fe   :  { %9226 = vmatpush1.bf16.msra.mxu0 %v11342_v34 }
 0x4ff   :  { %9431 = vmatpush1.bf16.msra.mxu1 %v11344_v35  ;;  %9227 = vmatprep.subr.bf16.mxu0 %v11347_v27 }
 0x500   :  { %9432 = vmatprep.subr.bf16.mxu1 %v11349_v36  ;;  %v9464_v36 = vrot.slane %v9451_v29, %v9463_v18 }
 0x502   :  { %9228 = vmatpush1.bf16.msra.mxu0 %v11346_v4 }
 0x503   :  { %9433 = vmatpush1.bf16.msra.mxu1 %v11348_v37  ;;  %11401 = vmatprep.subr.bf16.mxu0 %v11636_v39  ;;  %v9460_v37 = vrot.slane %v9451_v29, %v9459_v58  ;;  %v11682_v58 = vld [vmem:[%s15994_s7 + $0x30] sm:$0xff]  }
 0x504   :  { %11423 = vmatprep.subr.bf16.mxu1 %v11637_v40 }
 0x505   :  { %9230 = vmatmul.mubr.bf16.vlgmr.msra.gmra.mrb[12].mxu0 %v12823_v47 }
 0x506   :  { %9435 = vmatmul.mubr.bf16.vlgmr.msra.gmra.mrb[12].mxu1 %v12823_v47  ;;  %11402 = vmatpush3.bf16.msra.mxu0 %v11638_v38  ;;  %v11645_v47 = vld [vmem:[%s15990_s3 + $0xd0] sm:$0xff]  }
 0x507   :  { %11424 = vmatpush3.bf16.msra.mxu1 %v11639_v41  ;;  %11403 = vmatprep.subr.bf16.mxu0 %v11640_v42  ;;  %v9468_v41 = vrot.slane %v9451_v29, %v9467_v63  ;;  %v11683_v63 = vld [vmem:[%s15994_s7 + $0x38] sm:$0xff]  }
 0x508   :  { %11425 = vmatprep.subr.bf16.mxu1 %v11641_v43 }
 0x50a   :  { %11404 = vmatpush3.bf16.msra.mxu0 %v11642_v45 }
 0x50b   :  { %11426 = vmatpush3.bf16.msra.mxu1 %v11643_v23  ;;  %11405 = vmatprep.subr.bf16.mxu0 %v11644_v46 }
 0x50c   :  { %11427 = vmatprep.subr.bf16.mxu1 %v11645_v47 }
 0x50e   :  { %11406 = vmatpush3.bf16.msra.mxu0 %v11646_v49 }
 0x50f   :  { %11428 = vmatpush3.bf16.msra.mxu1 %v11647_v48  ;;  %11407 = vmatprep.subr.bf16.mxu0 %v11648_v50  ;;  %v11674_v50 = vld [vmem:[%s15992_s5 + $0x30] sm:$0xff]  }
 0x510   :  { %11429 = vmatprep.subr.bf16.mxu1 %v11649_v51  ;;  %v11675_v51 = vld [vmem:[%s15992_s5 + $0x38] sm:$0xff]  }
 0x512   :  { %11408 = vmatpush3.bf16.msra.mxu0 %v11650_v52  ;;  %v11676_v52 = vld [vmem:[%s15994_s7] sm:$0xff]  }
 0x513   :  { %11430 = vmatpush3.bf16.msra.mxu1 %v11651_v54  ;;  %11409 = vmatprep.subr.bf16.mxu0 %v11652_v9  ;;  %v11677_v54 = vld [vmem:[%s15994_s7 + $0x8] sm:$0xff]   ;;  %v11678_v9 = vld [vmem:[%s15994_s7 + $0x10] sm:$0xff]  }
 0x514   :  { %11431 = vmatprep.subr.bf16.mxu1 %v11653_v33  ;;  %v11679_v33 = vld [vmem:[%s15994_s7 + $0x18] sm:$0xff]  }
 0x516   :  { %11410 = vmatpush3.bf16.msra.mxu0 %v11654_v53  ;;  %v11680_v53 = vld [vmem:[%s15994_s7 + $0x20] sm:$0xff]  }
 0x517   :  { %11432 = vmatpush3.bf16.msra.mxu1 %v11655_v10  ;;  %11411 = vmatprep.subr.bf16.mxu0 %v11656_v61  ;;  %v11681_v10 = vld [vmem:[%s15994_s7 + $0x28] sm:$0xff]  }
 0x518   :  { %11433 = vmatprep.subr.bf16.mxu1 %v11657_v62 }
 0x51a   :  { %11412 = vmatpush3.bf16.msra.mxu0 %v11658_v1  ;;  %v11350_v1 = vld [vmem:[%s15991_s4] ss:$0 sm:$0xff] }
 0x51b   :  { %11434 = vmatpush3.bf16.msra.mxu1 %v11659_v5  ;;  %11413 = vmatprep.subr.bf16.mxu0 %v11660_v6 }
 0x51c   :  { %11435 = vmatprep.subr.bf16.mxu1 %v11661_v13 }
 0x51e   :  { %11414 = vmatpush3.bf16.msra.mxu0 %v11662_v17 }
 0x51f   :  { %11436 = vmatpush3.bf16.msra.mxu1 %v11663_v19  ;;  %11415 = vmatprep.subr.bf16.mxu0 %v11664_v21 }
 0x520   :  { %11437 = vmatprep.subr.bf16.mxu1 %v11665_v22 }
 0x522   :  { %11416 = vmatpush3.bf16.msra.mxu0 %v11666_v24 }
 0x523   :  { %11438 = vmatpush3.bf16.msra.mxu1 %v11667_v25  ;;  %11463 = vmatprep.subr.bf16.mxu0 %v11709_v26 }
 0x524   :  { %11483 = vmatprep.subr.bf16.mxu1 %v11709_v26 }
 0x5d8   :  { %v9231_v30 = vpop.f32.mrb[12].mxu0 }
 0x5d9   :  { %v9443_v31 = vmax.f32 %v15467_v56, %v9231_v30  ;;  %v9436_v34 = vpop.f32.mrb[12].mxu1  ;;  %v9233_v35 = vpop.f32.mrb[13].mxu0  ;;  %v11383_v30 = vld [vmem:[%s15993_s6] ss:$0 sm:$0xff]  ;;  %s11684_s6 = scalar_lea.vmem %s10062_s29, 32 }
 0x5da   :  { %v9445_v27 = vmax.f32 %v15475_v2, %v9436_v34  ;;  %v9444_v4 = vmax.f32 %v15477_v3, %v9233_v35  ;;  %v9438_v39 = vpop.f32.mrb[13].mxu1  ;;  %v9235_v40 = vpop.f32.mrb[14].mxu0  ;;  %p11685_p0 = scmp.ne.s32.totalorder %s10062_s29, %s11684_s6  ;;  %p11690_p2 = scmp.lt.s32.totalorder %s11684_s6, %s11684_s6 }
 0x5db   :  { %v9447_v38 = vmax.f32 %v4779_v7, %v9443_v31  ;;  %v9446_v44 = vmax.f32 %v15485_v12, %v9438_v39  ;;  %v9440_v42 = vpop.f32.mrb[14].mxu1  ;;  %v9236_v56 = vpop.f32.mrb[15].mxu0 }
 0x5dc   :  { %v9449_v43 = vmax.f32 %v4781_v14, %v9445_v27  ;;  %v9448_v2 = vmax.f32 %v4780_v15, %v9444_v4  ;;  %v9441_v3 = vpop.f32.mrb[15].mxu1  ;;  %v11670_v14 = vld [vmem:[%s15992_s5 + $0x10] sm:$0xff]   ;;  %v11671_v15 = vld [vmem:[%s15992_s5 + $0x18] sm:$0xff]   ;;  %p11691_p3 = por %p11690_p2, %p11689_p1 }
 0x5dd   :  { %v9473_v45 = vadd.f32 %v9456_v32, %v9447_v38  ;;  %v9450_v55 = vmax.f32 %v4782_v20, %v9446_v44  ;;  %v11673_v20 = vld [vmem:[%s15992_s5 + $0x28] sm:$0xff]  }
 0x5de   :  { %v9475_v28 = vadd.f32 %v9464_v36, %v9449_v43  ;;  %v9474_v7 = vadd.f32 %v9460_v37, %v9448_v2  ;;  %p11692_p4 = pnand %p11691_p3, %p11685_p0 }
 0x5df   :  { %v9477_v12 = vmax.f32 %v9473_v45, 0.0  ;;  %v9476_v23 = vadd.f32 %v9468_v41, %v9450_v55 }
 0x5e0   :  { %v9479_v46 = vmax.f32 %v9475_v28, 0.0  ;;  %v9478_v47 = vmax.f32 %v9474_v7, 0.0 }
 0x5e1   :  { %v9480_v49 = vmax.f32 %v9476_v23, 0.0  ;;  %v9481_v60 = vpack.c.bf16 %v9477_v12, %v9477_v12 }
 0x5e2   :  { %v9482_v48 = vpack.c.bf16 %v9478_v47, %v9478_v47  ;;  %v9483_v11 = vpack.c.bf16 %v9479_v46, %v9479_v46 }
 0x5e3   :  { %v9484_v8 = vpack.c.bf16 %v9480_v49, %v9480_v49 }
 0x5e4   :  { %9780 = vmatprep.mubr.bf16.mxu0 %v9482_v48 }
 0x5e5   :  { %9820 = vmatprep.mubr.bf16.mxu1 %v9484_v8  ;;  %9781 = vmatmul.mubr.bf16.vlgmr.msra.gmra.mrb[16].mxu0 %v9481_v60 }
 0x5e6   :  { %9821 = vmatmul.mubr.bf16.vlgmr.msra.gmra.mrb[16].mxu1 %v9483_v11  ;;  %11464 = vmatpush3.bf16.msra.mxu0 %v11668_v57 }
 0x5e7   :  { %11465 = vmatprep.subr.bf16.mxu0 %v11709_v26  ;;  %11479 = vmatprep.mubr.msk.bf16.mxu0 %vm11710_vm0, %v11709_v26 }
 0x5e8   :  { %11499 = vmatprep.mubr.msk.bf16.mxu1 %vm11710_vm0, %v11709_v26  ;;  %11484 = vmatpush3.bf16.msra.mxu1 %v11676_v52 }
 0x5e9   :  { %11485 = vmatprep.subr.bf16.mxu1 %v11709_v26 }
 0x5ea   :  { %11466 = vmatpush3.bf16.msra.mxu0 %v11669_v0 }
 0x5eb   :  { %11467 = vmatprep.subr.bf16.mxu0 %v11709_v26 }
 0x5ec   :  { %11486 = vmatpush3.bf16.msra.mxu1 %v11677_v54 }
 0x5ed   :  { %11487 = vmatprep.subr.bf16.mxu1 %v11709_v26 }
 0x5ee   :  { %11468 = vmatpush3.bf16.msra.mxu0 %v11670_v14 }
 0x5ef   :  { %11469 = vmatprep.subr.bf16.mxu0 %v11709_v26 }
 0x5f0   :  { %11488 = vmatpush3.bf16.msra.mxu1 %v11678_v9 }
 0x5f1   :  { %11489 = vmatprep.subr.bf16.mxu1 %v11709_v26 }
 0x5f2   :  { %11470 = vmatpush3.bf16.msra.mxu0 %v11671_v15 }
 0x5f3   :  { %11471 = vmatprep.subr.bf16.mxu0 %v11709_v26 }
 0x5f4   :  { %11490 = vmatpush3.bf16.msra.mxu1 %v11679_v33 }
 0x5f5   :  { %11491 = vmatprep.subr.bf16.mxu1 %v11709_v26 }
 0x5f6   :  { %11472 = vmatpush3.bf16.msra.mxu0 %v11672_v16 }
 0x5f7   :  { %11473 = vmatprep.subr.bf16.mxu0 %v11709_v26 }
 0x5f8   :  { %11492 = vmatpush3.bf16.msra.mxu1 %v11680_v53 }
 0x5f9   :  { %11493 = vmatprep.subr.bf16.mxu1 %v11709_v26 }
 0x5fa   :  { %11474 = vmatpush3.bf16.msra.mxu0 %v11673_v20 }
 0x5fb   :  { %11475 = vmatprep.subr.bf16.mxu0 %v11709_v26 }
 0x5fc   :  { %11494 = vmatpush3.bf16.msra.mxu1 %v11681_v10 }
 0x5fd   :  { %11495 = vmatprep.subr.bf16.mxu1 %v11709_v26 }
 0x5fe   :  { %11476 = vmatpush3.bf16.msra.mxu0 %v11674_v50 }
 0x5ff   :  { %11477 = vmatprep.subr.bf16.mxu0 %v11709_v26 }
 0x600   :  { %11496 = vmatpush3.bf16.msra.mxu1 %v11682_v58 }
 0x601   :  { %11497 = vmatprep.subr.bf16.mxu1 %v11709_v26  ;;  %v11392_v26 = vld [vmem:[%s15995_s8] ss:$0 sm:$0xff] }
 0x602   :  { %11478 = vmatpush3.bf16.msra.mxu0 %v11675_v51 }
 0x604   :  { %11498 = vmatpush3.bf16.msra.mxu1 %v11683_v63 }
 0x6b8   :  { %v11417_v61 = vpop.f32.mrb[16].mxu0 }
 0x6b9   :  { %v11439_v62 = vpop.f32.mrb[16].mxu1  ;;  %v11418_v5 = vpop.f32.mrb[17].mxu0 }
 0x6ba   :  { %v11419_v6 = vadd.f32 %v11418_v5, %v11417_v61  ;;  %v11440_v13 = vpop.f32.mrb[17].mxu1  ;;  %v11420_v17 = vpop.f32.mrb[18].mxu0 }
 0x6bb   :  { %v11441_v19 = vadd.f32 %v11440_v13, %v11439_v62  ;;  %v11442_v21 = vpop.f32.mrb[18].mxu1  ;;  %v11421_v22 = vpop.f32.mrb[19].mxu0 }
 0x6bc   :  { %v9783_v24 = vadd.f32 %v11419_v6, %v11350_v1  ;;  %v11443_v25 = vpop.f32.mrb[19].mxu1 }
 0x6be   :  { %v9823_v59 = vadd.f32 %v11441_v19, %v9783_v24 }
 0x6c0   :  { %v9828_v29 = vmax.f32 %v9823_v59, 0.0 }
 0x6c2   :  { %v9829_v18 = vpack.c.bf16 %v9828_v29, %v9828_v29 }
 0x6c4   :  { %11480 = vmatmul.mubr.bf16.vlgmr.msra.gmra.mrb[20].mxu0 %v9829_v18 }
 0x797   :  { %v9935_v31 = vpop.f32.mrb[20].mxu0 }
 0x798   :  { %v9936_v32 = vadd.f32 %v11383_v30, %v9935_v31  ;;  %v11481_v34 = vpop.f32.mrb[21].mxu0 }
 0x799   :  { %v9938_v35 = vpop.f32.mrb[22].mxu0 }
 0x79a   :  { %v9941_v27 = vmax.f32 %v9936_v32, 0.0  ;;  %v11482_v36 = vpop.f32.mrb[23].mxu0 }
 0x79c   :  { %v9942_v4 = vpack.c.bf16 %v9941_v27, %v9941_v27 }
 0x79e   :  { %11500 = vmatmul.mubr.bf16.vlgmr.msra.gmra.mrb[20].mxu1 %v9942_v4 }
 0x871   :  { %v10048_v37 = vpop.f32.mrb[20].mxu1 }
 0x872   :  { %v10049_v39 = vadd.f32 %v11392_v26, %v10048_v37  ;;  %v11501_v40 = vpop.f32.mrb[21].mxu1 }
 0x873   :  { %v10051_v38 = vpop.f32.mrb[22].mxu1 }
 0x874   :  { %10054 = vst [vmem:[#allocation2] sm:$0x3] %v10049_v39  ;;  %v11502_v44 = vpop.f32.mrb[23].mxu1 }
 0x875   :  { %11695 = shalt.err (!%p11692_p4)
}
 0x876   :  { %s11696_s8 = scalar_lea.hbm %s15996_s9, 32 }
 0x877   :  { %p11697_p5 = scmp.ne.s32.totalorder %s15996_s9, %s11696_s8  ;;  %p11700_p6 = scmp.lt.u32.totalorder %s11696_s8, %s15996_s9 }
 0x879   :  { %p11702_p7 = pnand %p11700_p6, %p11697_p5 }
 0x87b   :  { %11705 = shalt.err (!%p11702_p7)
}
 0x87c   :  { %10064 = dma.vmem_to_hbm [thread:$0]  %s10062_s29, 32, %s15996_s9, [#allocation3]  }
 0x87d   :  { %11706 = dma.done.wait [#allocation3], 32  }
 0x87e   :  { %11707 = vsyncadd [#allocation3], 4294967264 }
 0x87f   :  { %10068 = vsyncpa [#allocation3], 1 }

</bundles_post_ra>
